<compile_context>
chip_gen: v5e
topology: v5e:2x2
jax: 0.10.0
libtpu: 0.0.40
codegen_flags: <defaults>
</compile_context>

<pallas_src>
import math
import re

import jax
import jax.numpy as jnp
from jax.experimental import pallas as pl
from jax.experimental.pallas import tpu as pltpu

ENC_DIMS = [714, 357, 178, 89, 45]
DEC_DIMS = [89, 178, 357, 714]
LATENT = ENC_DIMS[-1]  # 45


def _round_up(n, m):
    return ((n + m - 1) // m) * m


def _layer_dims(brain_size):
    """(in, out) for all 10 Linear layers in forward order."""
    dims = []
    prev = brain_size
    for d in ENC_DIMS + DEC_DIMS + [brain_size]:
        dims.append((prev, d))
        prev = d
    return dims


def _chip_config():
    """Returns (use_bf16_activations, vmem_cap_bytes) per TPU generation."""
    kind = ""
    try:
        kind = jax.devices()[0].device_kind.lower()
    except Exception:
        pass
    m = re.search(r"(\d+)", kind)
    gen = int(m.group(1)) if m else 0
    # v6e/v7x VPU+EUP run bf16 (~2x the f32 rate); v5e and older do not.
    use_bf16_act = gen >= 6
    if gen >= 7:
        vmem_cap = 48 << 20      # v7x: 64 MiB physical per TensorCore
    elif 2 <= gen <= 6:
        vmem_cap = 100 << 20     # v5e/v6e: 128 MiB physical
    else:
        vmem_cap = 48 << 20      # unknown chip: stay conservative
    return use_bf16_act, vmem_cap


def _pick_batch_tiling(B):
    """Pick (batch_tile, padded_batch).

    Guarantees an even number (>=2) of grid tiles so the "parallel" batch
    axis actually shards across both v7x TensorCores, while deriving the tile
    from cdiv(B, n_tiles) (instead of a fixed 256) to minimize fully-padded
    rows.  Tiles are sublane-aligned (multiple of 8) and capped at 512 rows
    (~1.5 MiB of f32 activations at the 768-wide layers).
    """
    n_tiles = max(2, pl.cdiv(B, 512))
    if n_tiles % 2:
        n_tiles += 1
    tb = _round_up(pl.cdiv(B, n_tiles), 8)
    return tb, n_tiles * tb


def _make_kernel(use_bf16_act):
    act_dtype = jnp.bfloat16 if use_bf16_act else jnp.float32

    def kernel(*refs):
        # refs = [x, w0, b0, w1, b1, ..., w9, b9, enc_out, dec_out]
        # x & weights bf16, biases f32; all feature dims padded to 128.
        x_ref = refs[0]
        param_refs = refs[1:21]
        ws = param_refs[0::2]
        bs = param_refs[1::2]
        enc_ref, dec_ref = refs[21], refs[22]

        h = x_ref[...]                     # bf16, feeds the MXU directly

        # ----- encoder: 4 x (Linear + Tanh), then Linear (no activation) -----
        for li in range(4):
            acc = jnp.dot(h.astype(jnp.bfloat16), ws[li][...],
                          preferred_element_type=jnp.float32)
            # bias-add in f32; tanh in bf16 on v6e/v7x (2x EUP), f32 on v5e.
            h = jnp.tanh((acc + bs[li][...]).astype(act_dtype))
        enc = jnp.dot(h.astype(jnp.bfloat16), ws[4][...],
                      preferred_element_type=jnp.float32) + bs[4][...]
        enc_ref[...] = enc.astype(enc_ref.dtype)   # lane-dense (128-padded)

        # ----- decoder: 4 x (Linear + Tanh), then Linear + Sigmoid -----
        d = enc
        for li in range(5, 9):
            acc = jnp.dot(d.astype(jnp.bfloat16), ws[li][...],
                          preferred_element_type=jnp.float32)
            d = jnp.tanh((acc + bs[li][...]).astype(act_dtype))
        d = jnp.dot(d.astype(jnp.bfloat16), ws[9][...],
                    preferred_element_type=jnp.float32) + bs[9][...]
        dec_ref[...] = jax.nn.sigmoid(d.astype(act_dtype)).astype(dec_ref.dtype)

    return kernel


def prepare_params(params, brain_size):
    """One-time pad-to-128 + bf16 cast of the 10 (W, b) pairs.

    Hoisted out of the per-call path so each forward does not pay 20 XLA
    pad/convert ops (and extra HBM round-trips) before the kernel starts.
    """
    dims = _layer_dims(brain_size)
    assert len(params) == len(dims) == 10
    flat = []
    for (din, dout), (w, b) in zip(dims, params):
        dip, dop = _round_up(din, 128), _round_up(dout, 128)
        # Weights zero-padded and stored bf16 (halves VMEM footprint + DMA).
        w_p = jnp.zeros((dip, dop), jnp.bfloat16).at[:din, :dout].set(
            w.astype(jnp.bfloat16))
        # Biases zero-padded, kept f32 (bias-add runs in f32).
        b_p = jnp.zeros((1, dop), jnp.float32).at[:, :dout].set(b)
        flat += [w_p, b_p]
    return tuple(flat)


def autoencoder_forward(x, prepared_params):
    """x: (B, brain_size) float.  prepared_params: output of prepare_params().
    Returns (encoder (B, 45) f32, decoder (B, brain_size) f32)."""
    B, brain_size = x.shape
    dims = _layer_dims(brain_size)
    pad_in = [_round_up(din, 128) for (din, _) in dims]
    pad_out = [_round_up(dout, 128) for (_, dout) in dims]
    bs_pad = pad_in[0]
    enc_pad = pad_out[4]

    use_bf16_act, vmem_cap = _chip_config()

    TB, B_pad = _pick_batch_tiling(B)
    n_tiles = B_pad // TB

    # x stored/DMA'd as bf16: numerically identical (the layer-0 matmul casts
    # to bf16 anyway) and halves the largest per-tile input DMA.
    x_p = (jnp.zeros((B_pad, bs_pad), jnp.bfloat16)
           .at[:B, :brain_size].set(x.astype(jnp.bfloat16)))

    flat_inputs = [x_p] + list(prepared_params)

    out_shape = (
        jax.ShapeDtypeStruct((B_pad, enc_pad), jnp.float32),  # padded encoder
        jax.ShapeDtypeStruct((B_pad, bs_pad), jnp.float32),   # padded decoder
    )
    out_specs = (
        pl.BlockSpec((TB, enc_pad), lambda i: (i, 0)),
        pl.BlockSpec((TB, bs_pad), lambda i: (i, 0)),
    )

    # Advisory cost estimate so XLA schedules/overlaps around the call.
    flops = 2 * B_pad * sum(dip * dop for dip, dop in zip(pad_in, pad_out))
    transcendentals = B_pad * (
        sum(pad_out[li] for li in (0, 1, 2, 3, 5, 6, 7, 8)) + pad_out[9])
    bytes_accessed = (
        x_p.size * 2
        + sum(a.size * a.dtype.itemsize for a in prepared_params)
        + B_pad * enc_pad * 4 + B_pad * bs_pad * 4)
    cost = pl.CostEstimate(flops=flops, transcendentals=transcendentals,
                           bytes_accessed=bytes_accessed)

    param_bytes = sum(a.size * a.dtype.itemsize for a in prepared_params)

    def run(single_buffer_params):
        in_specs = [pl.BlockSpec((TB, bs_pad), lambda i: (i, 0))]
        for li in range(10):
            dip, dop = pad_in[li], pad_out[li]
            if single_buffer_params:
                # Constant index_map -> fetched once, VMEM-resident across
                # tiles; Buffered(1) drops the pointless second buffer
                # (halves the weight VMEM term -- matters most on v7x).
                w_spec = pl.BlockSpec((dip, dop), lambda i: (0, 0),
                                      pipeline_mode=pl.Buffered(1))
                b_spec = pl.BlockSpec((1, dop), lambda i: (0, 0),
                                      pipeline_mode=pl.Buffered(1))
            else:
                w_spec = pl.BlockSpec((dip, dop), lambda i: (0, 0))
                b_spec = pl.BlockSpec((1, dop), lambda i: (0, 0))
            in_specs += [w_spec, b_spec]

        # VMEM budget from the actual footprint (params x buffer count,
        # double-buffered activation tiles, widest live f32 temporaries),
        # capped per chip generation.
        # TODO(synk): for very large brain_size, K-tile W0 and N-tile W9
        # (extra grid axis / pltpu.emit_pipeline) instead of holding both
        # boundary weights VMEM-resident.
        buf_count = 1 if single_buffer_params else 2
        act_bytes = (2 * TB * bs_pad * 2                  # x tiles (bf16)
                     + 2 * 4 * TB * (enc_pad + bs_pad)    # output tiles (f32)
                     + 6 * TB * max(pad_out) * 4)         # live f32 temps
        vmem_limit = int(min(max(buf_count * param_bytes + act_bytes
                                 + (4 << 20), 16 << 20), vmem_cap))

        return pl.pallas_call(
            _make_kernel(use_bf16_act),
            out_shape=out_shape,
            grid=(n_tiles,),
            in_specs=in_specs,
            out_specs=out_specs,
            cost_estimate=cost,
            compiler_params=pltpu.CompilerParams(
                dimension_semantics=("parallel",),  # megacore-shard the batch
                vmem_limit_bytes=vmem_limit,
            ),
        )(*flat_inputs)

    try:
        enc_p, dec_p = run(True)
    except Exception:
        # Fallback for jax builds without single-buffered pipeline_mode
        # support on constant-index BlockSpecs.
        enc_p, dec_p = run(False)

    return enc_p[:B, :LATENT], dec_p[:B, :brain_size]


def init_params(key, brain_size):
    """PyTorch nn.Linear default init: U(-1/sqrt(fan_in), 1/sqrt(fan_in))."""
    params = []
    for (fan_in, fan_out) in _layer_dims(brain_size):
        key, kw, kb = jax.random.split(key, 3)
        bound = 1.0 / math.sqrt(fan_in)
        # Stored as (in, out) == transpose of PyTorch's (out, in).
        w = jax.random.uniform(
            kw, (fan_in, fan_out), jnp.float32, minval=-bound, maxval=bound)
        b = jax.random.uniform(
            kb, (1, fan_out), jnp.float32, minval=-bound, maxval=bound)
        params.append((w, b))
    return params


def reference_forward(x, params, use_bf16_act):
    """Pure-JAX reference modelling the kernel numerics (bf16 matmul inputs,
    f32 accumulation; activations in bf16 on v6e/v7x, f32 otherwise)."""
    act_dtype = jnp.bfloat16 if use_bf16_act else jnp.float32

    def mm(h, w):
        return jnp.dot(h.astype(jnp.bfloat16), w.astype(jnp.bfloat16),
                       preferred_element_type=jnp.float32)

    h = x.astype(jnp.float32)
    for li in range(4):
        w, b = params[li]
        h = jnp.tanh((mm(h, w) + b).astype(act_dtype))
    w, b = params[4]
    enc = mm(h, w) + b
    d = enc
    for li in range(5, 9):
        w, b = params[li]
        d = jnp.tanh((mm(d, w) + b).astype(act_dtype))
    w, b = params[9]
    dec = jax.nn.sigmoid((mm(d, w) + b).astype(act_dtype)).astype(jnp.float32)
    return enc, dec


if __name__ == "__main__":
    # Small brain volume: brain_x = brain_y = brain_z = 4 -> brain_size = 64.
    brain_x = brain_y = brain_z = 4
    brain_size = brain_x * brain_y * brain_z
    batch = 2

    key = jax.random.PRNGKey(0)
    key, kx = jax.random.split(key)
    x = jax.random.uniform(kx, (batch, brain_size), jnp.float32)

    params = init_params(key, brain_size)
    prepared = prepare_params(params, brain_size)   # one-time pad + bf16 cast

    enc, dec = autoencoder_forward(x, prepared)
    enc = jax.block_until_ready(enc)
    dec = jax.block_until_ready(dec)

    use_bf16_act, _ = _chip_config()
    enc_ref, dec_ref = reference_forward(x, params, use_bf16_act)
    assert enc.shape == (batch, LATENT)
    assert dec.shape == (batch, brain_size)
    # bf16 matmul inputs (+ bf16 activations on v6e/v7x) -> bf16-level tol.
    assert jnp.allclose(enc, enc_ref, atol=1e-2, rtol=1e-2)
    assert jnp.allclose(dec, dec_ref, atol=1e-2, rtol=1e-2)

    print("KERNEL_OK")
</pallas_src>

<mosaic_0001>
module attributes {stable_mosaic.version = 11 : i64} {
  func.func @kernel(%arg0: i32, %arg1: memref<8x128xbf16, #tpu.memory_space<vmem>>, %arg2: memref<128x768xbf16, #tpu.memory_space<vmem>>, %arg3: memref<1x768xf32, #tpu.memory_space<vmem>>, %arg4: memref<768x384xbf16, #tpu.memory_space<vmem>>, %arg5: memref<1x384xf32, #tpu.memory_space<vmem>>, %arg6: memref<384x256xbf16, #tpu.memory_space<vmem>>, %arg7: memref<1x256xf32, #tpu.memory_space<vmem>>, %arg8: memref<256x128xbf16, #tpu.memory_space<vmem>>, %arg9: memref<1x128xf32, #tpu.memory_space<vmem>>, %arg10: memref<128x128xbf16, #tpu.memory_space<vmem>>, %arg11: memref<1x128xf32, #tpu.memory_space<vmem>>, %arg12: memref<128x128xbf16, #tpu.memory_space<vmem>>, %arg13: memref<1x128xf32, #tpu.memory_space<vmem>>, %arg14: memref<128x256xbf16, #tpu.memory_space<vmem>>, %arg15: memref<1x256xf32, #tpu.memory_space<vmem>>, %arg16: memref<256x384xbf16, #tpu.memory_space<vmem>>, %arg17: memref<1x384xf32, #tpu.memory_space<vmem>>, %arg18: memref<384x768xbf16, #tpu.memory_space<vmem>>, %arg19: memref<1x768xf32, #tpu.memory_space<vmem>>, %arg20: memref<768x128xbf16, #tpu.memory_space<vmem>>, %arg21: memref<1x128xf32, #tpu.memory_space<vmem>>, %arg22: memref<8x128xf32, #tpu.memory_space<vmem>>, %arg23: memref<8x128xf32, #tpu.memory_space<vmem>>) attributes {dimension_semantics = [#tpu.dimension_semantics<parallel>], iteration_bounds = array<i64: 2>, scalar_prefetch = 0 : i64, scratch_operands = 0 : i64, tpu.core_type = #tpu.core_type<tc>, window_params = [{transform_indices = @transform_0, window_bounds = array<i64: 8, 128>}, {pipeline_mode = #tpu.pipeline_mode<synchronous>, transform_indices = @transform_1, window_bounds = array<i64: 128, 768>}, {pipeline_mode = #tpu.pipeline_mode<synchronous>, transform_indices = @transform_2, window_bounds = array<i64: 1, 768>}, {pipeline_mode = #tpu.pipeline_mode<synchronous>, transform_indices = @transform_3, window_bounds = array<i64: 768, 384>}, {pipeline_mode = #tpu.pipeline_mode<synchronous>, transform_indices = @transform_4, window_bounds = array<i64: 1, 384>}, {pipeline_mode = #tpu.pipeline_mode<synchronous>, transform_indices = @transform_5, window_bounds = array<i64: 384, 256>}, {pipeline_mode = #tpu.pipeline_mode<synchronous>, transform_indices = @transform_6, window_bounds = array<i64: 1, 256>}, {pipeline_mode = #tpu.pipeline_mode<synchronous>, transform_indices = @transform_7, window_bounds = array<i64: 256, 128>}, {pipeline_mode = #tpu.pipeline_mode<synchronous>, transform_indices = @transform_8, window_bounds = array<i64: 1, 128>}, {pipeline_mode = #tpu.pipeline_mode<synchronous>, transform_indices = @transform_9, window_bounds = array<i64: 128, 128>}, {pipeline_mode = #tpu.pipeline_mode<synchronous>, transform_indices = @transform_10, window_bounds = array<i64: 1, 128>}, {pipeline_mode = #tpu.pipeline_mode<synchronous>, transform_indices = @transform_11, window_bounds = array<i64: 128, 128>}, {pipeline_mode = #tpu.pipeline_mode<synchronous>, transform_indices = @transform_12, window_bounds = array<i64: 1, 128>}, {pipeline_mode = #tpu.pipeline_mode<synchronous>, transform_indices = @transform_13, window_bounds = array<i64: 128, 256>}, {pipeline_mode = #tpu.pipeline_mode<synchronous>, transform_indices = @transform_14, window_bounds = array<i64: 1, 256>}, {pipeline_mode = #tpu.pipeline_mode<synchronous>, transform_indices = @transform_15, window_bounds = array<i64: 256, 384>}, {pipeline_mode = #tpu.pipeline_mode<synchronous>, transform_indices = @transform_16, window_bounds = array<i64: 1, 384>}, {pipeline_mode = #tpu.pipeline_mode<synchronous>, transform_indices = @transform_17, window_bounds = array<i64: 384, 768>}, {pipeline_mode = #tpu.pipeline_mode<synchronous>, transform_indices = @transform_18, window_bounds = array<i64: 1, 768>}, {pipeline_mode = #tpu.pipeline_mode<synchronous>, transform_indices = @transform_19, window_bounds = array<i64: 768, 128>}, {pipeline_mode = #tpu.pipeline_mode<synchronous>, transform_indices = @transform_20, window_bounds = array<i64: 1, 128>}, {transform_indices = @transform_21, window_bounds = array<i64: 8, 128>}, {transform_indices = @transform_22, window_bounds = array<i64: 8, 128>}]} {
    %c0 = arith.constant 0 : index
    %c0_0 = arith.constant 0 : index
    %0 = vector.load %arg1[%c0, %c0_0] : memref<8x128xbf16, #tpu.memory_space<vmem>>, vector<8x128xbf16>
    %c0_1 = arith.constant 0 : index
    %c0_2 = arith.constant 0 : index
    %1 = vector.load %arg2[%c0_1, %c0_2] : memref<128x768xbf16, #tpu.memory_space<vmem>>, vector<128x768xbf16>
    %cst = arith.constant dense<0.000000e+00> : vector<8x768xf32>
    %2 = tpu.matmul %0, %1, %cst {dimension_numbers = #tpu.dot_dimension_numbers<[1], [0], [0], [1], [0, 0, 1, 1], [], []>} : vector<8x128xbf16>, vector<128x768xbf16>, vector<8x768xf32> -> vector<8x768xf32>
    %c0_3 = arith.constant 0 : index
    %c0_4 = arith.constant 0 : index
    %3 = vector.load %arg3[%c0_3, %c0_4] : memref<1x768xf32, #tpu.memory_space<vmem>>, vector<1x768xf32>
    %4 = vector.broadcast %3 : vector<1x768xf32> to vector<8x768xf32>
    %5 = arith.addf %2, %4 : vector<8x768xf32>
    %6 = math.tanh %5 : vector<8x768xf32>
    %7 = arith.truncf %6 : vector<8x768xf32> to vector<8x768xbf16>
    %c0_5 = arith.constant 0 : index
    %c0_6 = arith.constant 0 : index
    %8 = vector.load %arg4[%c0_5, %c0_6] : memref<768x384xbf16, #tpu.memory_space<vmem>>, vector<768x384xbf16>
    %cst_7 = arith.constant dense<0.000000e+00> : vector<8x384xf32>
    %9 = tpu.matmul %7, %8, %cst_7 {dimension_numbers = #tpu.dot_dimension_numbers<[1], [0], [0], [1], [0, 0, 1, 1], [], []>} : vector<8x768xbf16>, vector<768x384xbf16>, vector<8x384xf32> -> vector<8x384xf32>
    %c0_8 = arith.constant 0 : index
    %c0_9 = arith.constant 0 : index
    %10 = vector.load %arg5[%c0_8, %c0_9] : memref<1x384xf32, #tpu.memory_space<vmem>>, vector<1x384xf32>
    %11 = vector.broadcast %10 : vector<1x384xf32> to vector<8x384xf32>
    %12 = arith.addf %9, %11 : vector<8x384xf32>
    %13 = math.tanh %12 : vector<8x384xf32>
    %14 = arith.truncf %13 : vector<8x384xf32> to vector<8x384xbf16>
    %c0_10 = arith.constant 0 : index
    %c0_11 = arith.constant 0 : index
    %15 = vector.load %arg6[%c0_10, %c0_11] : memref<384x256xbf16, #tpu.memory_space<vmem>>, vector<384x256xbf16>
    %cst_12 = arith.constant dense<0.000000e+00> : vector<8x256xf32>
    %16 = tpu.matmul %14, %15, %cst_12 {dimension_numbers = #tpu.dot_dimension_numbers<[1], [0], [0], [1], [0, 0, 1, 1], [], []>} : vector<8x384xbf16>, vector<384x256xbf16>, vector<8x256xf32> -> vector<8x256xf32>
    %c0_13 = arith.constant 0 : index
    %c0_14 = arith.constant 0 : index
    %17 = vector.load %arg7[%c0_13, %c0_14] : memref<1x256xf32, #tpu.memory_space<vmem>>, vector<1x256xf32>
    %18 = vector.broadcast %17 : vector<1x256xf32> to vector<8x256xf32>
    %19 = arith.addf %16, %18 : vector<8x256xf32>
    %20 = math.tanh %19 : vector<8x256xf32>
    %21 = arith.truncf %20 : vector<8x256xf32> to vector<8x256xbf16>
    %c0_15 = arith.constant 0 : index
    %c0_16 = arith.constant 0 : index
    %22 = vector.load %arg8[%c0_15, %c0_16] : memref<256x128xbf16, #tpu.memory_space<vmem>>, vector<256x128xbf16>
    %cst_17 = arith.constant dense<0.000000e+00> : vector<8x128xf32>
    %23 = tpu.matmul %21, %22, %cst_17 {dimension_numbers = #tpu.dot_dimension_numbers<[1], [0], [0], [1], [0, 0, 1, 1], [], []>} : vector<8x256xbf16>, vector<256x128xbf16>, vector<8x128xf32> -> vector<8x128xf32>
    %c0_18 = arith.constant 0 : index
    %c0_19 = arith.constant 0 : index
    %24 = vector.load %arg9[%c0_18, %c0_19] : memref<1x128xf32, #tpu.memory_space<vmem>>, vector<1x128xf32>
    %25 = vector.broadcast %24 : vector<1x128xf32> to vector<8x128xf32>
    %26 = arith.addf %23, %25 : vector<8x128xf32>
    %27 = math.tanh %26 : vector<8x128xf32>
    %28 = arith.truncf %27 : vector<8x128xf32> to vector<8x128xbf16>
    %c0_20 = arith.constant 0 : index
    %c0_21 = arith.constant 0 : index
    %29 = vector.load %arg10[%c0_20, %c0_21] : memref<128x128xbf16, #tpu.memory_space<vmem>>, vector<128x128xbf16>
    %cst_22 = arith.constant dense<0.000000e+00> : vector<8x128xf32>
    %30 = tpu.matmul %28, %29, %cst_22 {dimension_numbers = #tpu.dot_dimension_numbers<[1], [0], [0], [1], [0, 0, 1, 1], [], []>} : vector<8x128xbf16>, vector<128x128xbf16>, vector<8x128xf32> -> vector<8x128xf32>
    %c0_23 = arith.constant 0 : index
    %c0_24 = arith.constant 0 : index
    %31 = vector.load %arg11[%c0_23, %c0_24] : memref<1x128xf32, #tpu.memory_space<vmem>>, vector<1x128xf32>
    %32 = vector.broadcast %31 : vector<1x128xf32> to vector<8x128xf32>
    %33 = arith.addf %30, %32 : vector<8x128xf32>
    %c0_25 = arith.constant 0 : index
    %c0_26 = arith.constant 0 : index
    %34 = vector.load %arg22[%c0_25, %c0_26] : memref<8x128xf32, #tpu.memory_space<vmem>>, vector<8x128xf32>
    tpu.vector_store %arg22[%c0_25, %c0_26], %33 {strides = array<i32>} : memref<8x128xf32, #tpu.memory_space<vmem>>, vector<8x128xf32>,
    %35 = arith.truncf %33 : vector<8x128xf32> to vector<8x128xbf16>
    %c0_27 = arith.constant 0 : index
    %c0_28 = arith.constant 0 : index
    %36 = vector.load %arg12[%c0_27, %c0_28] : memref<128x128xbf16, #tpu.memory_space<vmem>>, vector<128x128xbf16>
    %cst_29 = arith.constant dense<0.000000e+00> : vector<8x128xf32>
    %37 = tpu.matmul %35, %36, %cst_29 {dimension_numbers = #tpu.dot_dimension_numbers<[1], [0], [0], [1], [0, 0, 1, 1], [], []>} : vector<8x128xbf16>, vector<128x128xbf16>, vector<8x128xf32> -> vector<8x128xf32>
    %c0_30 = arith.constant 0 : index
    %c0_31 = arith.constant 0 : index
    %38 = vector.load %arg13[%c0_30, %c0_31] : memref<1x128xf32, #tpu.memory_space<vmem>>, vector<1x128xf32>
    %39 = vector.broadcast %38 : vector<1x128xf32> to vector<8x128xf32>
    %40 = arith.addf %37, %39 : vector<8x128xf32>
    %41 = math.tanh %40 : vector<8x128xf32>
    %42 = arith.truncf %41 : vector<8x128xf32> to vector<8x128xbf16>
    %c0_32 = arith.constant 0 : index
    %c0_33 = arith.constant 0 : index
    %43 = vector.load %arg14[%c0_32, %c0_33] : memref<128x256xbf16, #tpu.memory_space<vmem>>, vector<128x256xbf16>
    %cst_34 = arith.constant dense<0.000000e+00> : vector<8x256xf32>
    %44 = tpu.matmul %42, %43, %cst_34 {dimension_numbers = #tpu.dot_dimension_numbers<[1], [0], [0], [1], [0, 0, 1, 1], [], []>} : vector<8x128xbf16>, vector<128x256xbf16>, vector<8x256xf32> -> vector<8x256xf32>
    %c0_35 = arith.constant 0 : index
    %c0_36 = arith.constant 0 : index
    %45 = vector.load %arg15[%c0_35, %c0_36] : memref<1x256xf32, #tpu.memory_space<vmem>>, vector<1x256xf32>
    %46 = vector.broadcast %45 : vector<1x256xf32> to vector<8x256xf32>
    %47 = arith.addf %44, %46 : vector<8x256xf32>
    %48 = math.tanh %47 : vector<8x256xf32>
    %49 = arith.truncf %48 : vector<8x256xf32> to vector<8x256xbf16>
    %c0_37 = arith.constant 0 : index
    %c0_38 = arith.constant 0 : index
    %50 = vector.load %arg16[%c0_37, %c0_38] : memref<256x384xbf16, #tpu.memory_space<vmem>>, vector<256x384xbf16>
    %cst_39 = arith.constant dense<0.000000e+00> : vector<8x384xf32>
    %51 = tpu.matmul %49, %50, %cst_39 {dimension_numbers = #tpu.dot_dimension_numbers<[1], [0], [0], [1], [0, 0, 1, 1], [], []>} : vector<8x256xbf16>, vector<256x384xbf16>, vector<8x384xf32> -> vector<8x384xf32>
    %c0_40 = arith.constant 0 : index
    %c0_41 = arith.constant 0 : index
    %52 = vector.load %arg17[%c0_40, %c0_41] : memref<1x384xf32, #tpu.memory_space<vmem>>, vector<1x384xf32>
    %53 = vector.broadcast %52 : vector<1x384xf32> to vector<8x384xf32>
    %54 = arith.addf %51, %53 : vector<8x384xf32>
    %55 = math.tanh %54 : vector<8x384xf32>
    %56 = arith.truncf %55 : vector<8x384xf32> to vector<8x384xbf16>
    %c0_42 = arith.constant 0 : index
    %c0_43 = arith.constant 0 : index
    %57 = vector.load %arg18[%c0_42, %c0_43] : memref<384x768xbf16, #tpu.memory_space<vmem>>, vector<384x768xbf16>
    %cst_44 = arith.constant dense<0.000000e+00> : vector<8x768xf32>
    %58 = tpu.matmul %56, %57, %cst_44 {dimension_numbers = #tpu.dot_dimension_numbers<[1], [0], [0], [1], [0, 0, 1, 1], [], []>} : vector<8x384xbf16>, vector<384x768xbf16>, vector<8x768xf32> -> vector<8x768xf32>
    %c0_45 = arith.constant 0 : index
    %c0_46 = arith.constant 0 : index
    %59 = vector.load %arg19[%c0_45, %c0_46] : memref<1x768xf32, #tpu.memory_space<vmem>>, vector<1x768xf32>
    %60 = vector.broadcast %59 : vector<1x768xf32> to vector<8x768xf32>
    %61 = arith.addf %58, %60 : vector<8x768xf32>
    %62 = math.tanh %61 : vector<8x768xf32>
    %63 = arith.truncf %62 : vector<8x768xf32> to vector<8x768xbf16>
    %c0_47 = arith.constant 0 : index
    %c0_48 = arith.constant 0 : index
    %64 = vector.load %arg20[%c0_47, %c0_48] : memref<768x128xbf16, #tpu.memory_space<vmem>>, vector<768x128xbf16>
    %cst_49 = arith.constant dense<0.000000e+00> : vector<8x128xf32>
    %65 = tpu.matmul %63, %64, %cst_49 {dimension_numbers = #tpu.dot_dimension_numbers<[1], [0], [0], [1], [0, 0, 1, 1], [], []>} : vector<8x768xbf16>, vector<768x128xbf16>, vector<8x128xf32> -> vector<8x128xf32>
    %c0_50 = arith.constant 0 : index
    %c0_51 = arith.constant 0 : index
    %66 = vector.load %arg21[%c0_50, %c0_51] : memref<1x128xf32, #tpu.memory_space<vmem>>, vector<1x128xf32>
    %67 = vector.broadcast %66 : vector<1x128xf32> to vector<8x128xf32>
    %68 = arith.addf %65, %67 : vector<8x128xf32>
    %69 = arith.negf %68 : vector<8x128xf32>
    %70 = math.exp %69 : vector<8x128xf32>
    %cst_52 = arith.constant 1.000000e+00 : f32
    %71 = vector.broadcast %cst_52 : f32 to vector<8x128xf32>
    %72 = arith.addf %71, %70 : vector<8x128xf32>
    %73 = arith.divf %71, %72 : vector<8x128xf32>
    %c0_53 = arith.constant 0 : index
    %c0_54 = arith.constant 0 : index
    %74 = vector.load %arg23[%c0_53, %c0_54] : memref<8x128xf32, #tpu.memory_space<vmem>>, vector<8x128xf32>
    tpu.vector_store %arg23[%c0_53, %c0_54], %73 {strides = array<i32>} : memref<8x128xf32, #tpu.memory_space<vmem>>, vector<8x128xf32>,
    return
  }
  func.func @transform_0(%arg0: i32) -> (i32, i32) {
    %c0_i32 = arith.constant 0 : i32
    %c0_i32_0 = arith.constant 0 : i32
    return %arg0, %c0_i32 : i32, i32
  }
  func.func @transform_1(%arg0: i32) -> (i32, i32) {
    %c0_i32 = arith.constant 0 : i32
    %c0_i32_0 = arith.constant 0 : i32
    %c0_i32_1 = arith.constant 0 : i32
    return %c0_i32, %c0_i32_0 : i32, i32
  }
  func.func @transform_2(%arg0: i32) -> (i32, i32) {
    %c0_i32 = arith.constant 0 : i32
    %c0_i32_0 = arith.constant 0 : i32
    %c0_i32_1 = arith.constant 0 : i32
    return %c0_i32, %c0_i32_0 : i32, i32
  }
  func.func @transform_3(%arg0: i32) -> (i32, i32) {
    %c0_i32 = arith.constant 0 : i32
    %c0_i32_0 = arith.constant 0 : i32
    %c0_i32_1 = arith.constant 0 : i32
    return %c0_i32, %c0_i32_0 : i32, i32
  }
  func.func @transform_4(%arg0: i32) -> (i32, i32) {
    %c0_i32 = arith.constant 0 : i32
    %c0_i32_0 = arith.constant 0 : i32
    %c0_i32_1 = arith.constant 0 : i32
    return %c0_i32, %c0_i32_0 : i32, i32
  }
  func.func @transform_5(%arg0: i32) -> (i32, i32) {
    %c0_i32 = arith.constant 0 : i32
    %c0_i32_0 = arith.constant 0 : i32
    %c0_i32_1 = arith.constant 0 : i32
    return %c0_i32, %c0_i32_0 : i32, i32
  }
  func.func @transform_6(%arg0: i32) -> (i32, i32) {
    %c0_i32 = arith.constant 0 : i32
    %c0_i32_0 = arith.constant 0 : i32
    %c0_i32_1 = arith.constant 0 : i32
    return %c0_i32, %c0_i32_0 : i32, i32
  }
  func.func @transform_7(%arg0: i32) -> (i32, i32) {
    %c0_i32 = arith.constant 0 : i32
    %c0_i32_0 = arith.constant 0 : i32
    %c0_i32_1 = arith.constant 0 : i32
    return %c0_i32, %c0_i32_0 : i32, i32
  }
  func.func @transform_8(%arg0: i32) -> (i32, i32) {
    %c0_i32 = arith.constant 0 : i32
    %c0_i32_0 = arith.constant 0 : i32
    %c0_i32_1 = arith.constant 0 : i32
    return %c0_i32, %c0_i32_0 : i32, i32
  }
  func.func @transform_9(%arg0: i32) -> (i32, i32) {
    %c0_i32 = arith.constant 0 : i32
    %c0_i32_0 = arith.constant 0 : i32
    %c0_i32_1 = arith.constant 0 : i32
    return %c0_i32, %c0_i32_0 : i32, i32
  }
  func.func @transform_10(%arg0: i32) -> (i32, i32) {
    %c0_i32 = arith.constant 0 : i32
    %c0_i32_0 = arith.constant 0 : i32
    %c0_i32_1 = arith.constant 0 : i32
    return %c0_i32, %c0_i32_0 : i32, i32
  }
  func.func @transform_11(%arg0: i32) -> (i32, i32) {
    %c0_i32 = arith.constant 0 : i32
    %c0_i32_0 = arith.constant 0 : i32
    %c0_i32_1 = arith.constant 0 : i32
    return %c0_i32, %c0_i32_0 : i32, i32
  }
  func.func @transform_12(%arg0: i32) -> (i32, i32) {
    %c0_i32 = arith.constant 0 : i32
    %c0_i32_0 = arith.constant 0 : i32
    %c0_i32_1 = arith.constant 0 : i32
    return %c0_i32, %c0_i32_0 : i32, i32
  }
  func.func @transform_13(%arg0: i32) -> (i32, i32) {
    %c0_i32 = arith.constant 0 : i32
    %c0_i32_0 = arith.constant 0 : i32
    %c0_i32_1 = arith.constant 0 : i32
    return %c0_i32, %c0_i32_0 : i32, i32
  }
  func.func @transform_14(%arg0: i32) -> (i32, i32) {
    %c0_i32 = arith.constant 0 : i32
    %c0_i32_0 = arith.constant 0 : i32
    %c0_i32_1 = arith.constant 0 : i32
    return %c0_i32, %c0_i32_0 : i32, i32
  }
  func.func @transform_15(%arg0: i32) -> (i32, i32) {
    %c0_i32 = arith.constant 0 : i32
    %c0_i32_0 = arith.constant 0 : i32
    %c0_i32_1 = arith.constant 0 : i32
    return %c0_i32, %c0_i32_0 : i32, i32
  }
  func.func @transform_16(%arg0: i32) -> (i32, i32) {
    %c0_i32 = arith.constant 0 : i32
    %c0_i32_0 = arith.constant 0 : i32
    %c0_i32_1 = arith.constant 0 : i32
    return %c0_i32, %c0_i32_0 : i32, i32
  }
  func.func @transform_17(%arg0: i32) -> (i32, i32) {
    %c0_i32 = arith.constant 0 : i32
    %c0_i32_0 = arith.constant 0 : i32
    %c0_i32_1 = arith.constant 0 : i32
    return %c0_i32, %c0_i32_0 : i32, i32
  }
  func.func @transform_18(%arg0: i32) -> (i32, i32) {
    %c0_i32 = arith.constant 0 : i32
    %c0_i32_0 = arith.constant 0 : i32
    %c0_i32_1 = arith.constant 0 : i32
    return %c0_i32, %c0_i32_0 : i32, i32
  }
  func.func @transform_19(%arg0: i32) -> (i32, i32) {
    %c0_i32 = arith.constant 0 : i32
    %c0_i32_0 = arith.constant 0 : i32
    %c0_i32_1 = arith.constant 0 : i32
    return %c0_i32, %c0_i32_0 : i32, i32
  }
  func.func @transform_20(%arg0: i32) -> (i32, i32) {
    %c0_i32 = arith.constant 0 : i32
    %c0_i32_0 = arith.constant 0 : i32
    %c0_i32_1 = arith.constant 0 : i32
    return %c0_i32, %c0_i32_0 : i32, i32
  }
  func.func @transform_21(%arg0: i32) -> (i32, i32) {
    %c0_i32 = arith.constant 0 : i32
    %c0_i32_0 = arith.constant 0 : i32
    return %arg0, %c0_i32 : i32, i32
  }
  func.func @transform_22(%arg0: i32) -> (i32, i32) {
    %c0_i32 = arith.constant 0 : i32
    %c0_i32_0 = arith.constant 0 : i32
    return %arg0, %c0_i32 : i32, i32
  }
}

module attributes {stable_mosaic.version = 11 : i64} {
  func.func @kernel(%arg0: i32, %arg1: memref<8x128xbf16, #tpu.memory_space<vmem>>, %arg2: memref<128x768xbf16, #tpu.memory_space<vmem>>, %arg3: memref<1x768xf32, #tpu.memory_space<vmem>>, %arg4: memref<768x384xbf16, #tpu.memory_space<vmem>>, %arg5: memref<1x384xf32, #tpu.memory_space<vmem>>, %arg6: memref<384x256xbf16, #tpu.memory_space<vmem>>, %arg7: memref<1x256xf32, #tpu.memory_space<vmem>>, %arg8: memref<256x128xbf16, #tpu.memory_space<vmem>>, %arg9: memref<1x128xf32, #tpu.memory_space<vmem>>, %arg10: memref<128x128xbf16, #tpu.memory_space<vmem>>, %arg11: memref<1x128xf32, #tpu.memory_space<vmem>>, %arg12: memref<128x128xbf16, #tpu.memory_space<vmem>>, %arg13: memref<1x128xf32, #tpu.memory_space<vmem>>, %arg14: memref<128x256xbf16, #tpu.memory_space<vmem>>, %arg15: memref<1x256xf32, #tpu.memory_space<vmem>>, %arg16: memref<256x384xbf16, #tpu.memory_space<vmem>>, %arg17: memref<1x384xf32, #tpu.memory_space<vmem>>, %arg18: memref<384x768xbf16, #tpu.memory_space<vmem>>, %arg19: memref<1x768xf32, #tpu.memory_space<vmem>>, %arg20: memref<768x128xbf16, #tpu.memory_space<vmem>>, %arg21: memref<1x128xf32, #tpu.memory_space<vmem>>, %arg22: memref<8x128xf32, #tpu.memory_space<vmem>>, %arg23: memref<8x128xf32, #tpu.memory_space<vmem>>) attributes {dimension_semantics = [#tpu.dimension_semantics<parallel>], iteration_bounds = array<i64: 2>, scalar_prefetch = 0 : i64, scratch_operands = 0 : i64, tpu.core_type = #tpu.core_type<tc>, window_params = [{transform_indices = @transform_0, window_bounds = array<i64: 8, 128>}, {pipeline_mode = #tpu.pipeline_mode<synchronous>, transform_indices = @transform_1, window_bounds = array<i64: 128, 768>}, {pipeline_mode = #tpu.pipeline_mode<synchronous>, transform_indices = @transform_2, window_bounds = array<i64: 1, 768>}, {pipeline_mode = #tpu.pipeline_mode<synchronous>, transform_indices = @transform_3, window_bounds = array<i64: 768, 384>}, {pipeline_mode = #tpu.pipeline_mode<synchronous>, transform_indices = @transform_4, window_bounds = array<i64: 1, 384>}, {pipeline_mode = #tpu.pipeline_mode<synchronous>, transform_indices = @transform_5, window_bounds = array<i64: 384, 256>}, {pipeline_mode = #tpu.pipeline_mode<synchronous>, transform_indices = @transform_6, window_bounds = array<i64: 1, 256>}, {pipeline_mode = #tpu.pipeline_mode<synchronous>, transform_indices = @transform_7, window_bounds = array<i64: 256, 128>}, {pipeline_mode = #tpu.pipeline_mode<synchronous>, transform_indices = @transform_8, window_bounds = array<i64: 1, 128>}, {pipeline_mode = #tpu.pipeline_mode<synchronous>, transform_indices = @transform_9, window_bounds = array<i64: 128, 128>}, {pipeline_mode = #tpu.pipeline_mode<synchronous>, transform_indices = @transform_10, window_bounds = array<i64: 1, 128>}, {pipeline_mode = #tpu.pipeline_mode<synchronous>, transform_indices = @transform_11, window_bounds = array<i64: 128, 128>}, {pipeline_mode = #tpu.pipeline_mode<synchronous>, transform_indices = @transform_12, window_bounds = array<i64: 1, 128>}, {pipeline_mode = #tpu.pipeline_mode<synchronous>, transform_indices = @transform_13, window_bounds = array<i64: 128, 256>}, {pipeline_mode = #tpu.pipeline_mode<synchronous>, transform_indices = @transform_14, window_bounds = array<i64: 1, 256>}, {pipeline_mode = #tpu.pipeline_mode<synchronous>, transform_indices = @transform_15, window_bounds = array<i64: 256, 384>}, {pipeline_mode = #tpu.pipeline_mode<synchronous>, transform_indices = @transform_16, window_bounds = array<i64: 1, 384>}, {pipeline_mode = #tpu.pipeline_mode<synchronous>, transform_indices = @transform_17, window_bounds = array<i64: 384, 768>}, {pipeline_mode = #tpu.pipeline_mode<synchronous>, transform_indices = @transform_18, window_bounds = array<i64: 1, 768>}, {pipeline_mode = #tpu.pipeline_mode<synchronous>, transform_indices = @transform_19, window_bounds = array<i64: 768, 128>}, {pipeline_mode = #tpu.pipeline_mode<synchronous>, transform_indices = @transform_20, window_bounds = array<i64: 1, 128>}, {transform_indices = @transform_21, window_bounds = array<i64: 8, 128>}, {transform_indices = @transform_22, window_bounds = array<i64: 8, 128>}]} {
    %c0 = arith.constant 0 : index
    %c0_0 = arith.constant 0 : index
    %0 = vector.load %arg1[%c0, %c0_0] : memref<8x128xbf16, #tpu.memory_space<vmem>>, vector<8x128xbf16>
    %c0_1 = arith.constant 0 : index
    %c0_2 = arith.constant 0 : index
    %1 = vector.load %arg2[%c0_1, %c0_2] : memref<128x768xbf16, #tpu.memory_space<vmem>>, vector<128x768xbf16>
    %cst = arith.constant dense<0.000000e+00> : vector<8x768xf32>
    %2 = tpu.matmul %0, %1, %cst {dimension_numbers = #tpu.dot_dimension_numbers<[1], [0], [0], [1], [0, 0, 1, 1], [], []>} : vector<8x128xbf16>, vector<128x768xbf16>, vector<8x768xf32> -> vector<8x768xf32>
    %c0_3 = arith.constant 0 : index
    %c0_4 = arith.constant 0 : index
    %3 = vector.load %arg3[%c0_3, %c0_4] : memref<1x768xf32, #tpu.memory_space<vmem>>, vector<1x768xf32>
    %4 = vector.broadcast %3 : vector<1x768xf32> to vector<8x768xf32>
    %5 = arith.addf %2, %4 : vector<8x768xf32>
    %6 = math.tanh %5 : vector<8x768xf32>
    %7 = arith.truncf %6 : vector<8x768xf32> to vector<8x768xbf16>
    %c0_5 = arith.constant 0 : index
    %c0_6 = arith.constant 0 : index
    %8 = vector.load %arg4[%c0_5, %c0_6] : memref<768x384xbf16, #tpu.memory_space<vmem>>, vector<768x384xbf16>
    %cst_7 = arith.constant dense<0.000000e+00> : vector<8x384xf32>
    %9 = tpu.matmul %7, %8, %cst_7 {dimension_numbers = #tpu.dot_dimension_numbers<[1], [0], [0], [1], [0, 0, 1, 1], [], []>} : vector<8x768xbf16>, vector<768x384xbf16>, vector<8x384xf32> -> vector<8x384xf32>
    %c0_8 = arith.constant 0 : index
    %c0_9 = arith.constant 0 : index
    %10 = vector.load %arg5[%c0_8, %c0_9] : memref<1x384xf32, #tpu.memory_space<vmem>>, vector<1x384xf32>
    %11 = vector.broadcast %10 : vector<1x384xf32> to vector<8x384xf32>
    %12 = arith.addf %9, %11 : vector<8x384xf32>
    %13 = math.tanh %12 : vector<8x384xf32>
    %14 = arith.truncf %13 : vector<8x384xf32> to vector<8x384xbf16>
    %c0_10 = arith.constant 0 : index
    %c0_11 = arith.constant 0 : index
    %15 = vector.load %arg6[%c0_10, %c0_11] : memref<384x256xbf16, #tpu.memory_space<vmem>>, vector<384x256xbf16>
    %cst_12 = arith.constant dense<0.000000e+00> : vector<8x256xf32>
    %16 = tpu.matmul %14, %15, %cst_12 {dimension_numbers = #tpu.dot_dimension_numbers<[1], [0], [0], [1], [0, 0, 1, 1], [], []>} : vector<8x384xbf16>, vector<384x256xbf16>, vector<8x256xf32> -> vector<8x256xf32>
    %c0_13 = arith.constant 0 : index
    %c0_14 = arith.constant 0 : index
    %17 = vector.load %arg7[%c0_13, %c0_14] : memref<1x256xf32, #tpu.memory_space<vmem>>, vector<1x256xf32>
    %18 = vector.broadcast %17 : vector<1x256xf32> to vector<8x256xf32>
    %19 = arith.addf %16, %18 : vector<8x256xf32>
    %20 = math.tanh %19 : vector<8x256xf32>
    %21 = arith.truncf %20 : vector<8x256xf32> to vector<8x256xbf16>
    %c0_15 = arith.constant 0 : index
    %c0_16 = arith.constant 0 : index
    %22 = vector.load %arg8[%c0_15, %c0_16] : memref<256x128xbf16, #tpu.memory_space<vmem>>, vector<256x128xbf16>
    %cst_17 = arith.constant dense<0.000000e+00> : vector<8x128xf32>
    %23 = tpu.matmul %21, %22, %cst_17 {dimension_numbers = #tpu.dot_dimension_numbers<[1], [0], [0], [1], [0, 0, 1, 1], [], []>} : vector<8x256xbf16>, vector<256x128xbf16>, vector<8x128xf32> -> vector<8x128xf32>
    %c0_18 = arith.constant 0 : index
    %c0_19 = arith.constant 0 : index
    %24 = vector.load %arg9[%c0_18, %c0_19] : memref<1x128xf32, #tpu.memory_space<vmem>>, vector<1x128xf32>
    %25 = vector.broadcast %24 : vector<1x128xf32> to vector<8x128xf32>
    %26 = arith.addf %23, %25 : vector<8x128xf32>
    %27 = math.tanh %26 : vector<8x128xf32>
    %28 = arith.truncf %27 : vector<8x128xf32> to vector<8x128xbf16>
    %c0_20 = arith.constant 0 : index
    %c0_21 = arith.constant 0 : index
    %29 = vector.load %arg10[%c0_20, %c0_21] : memref<128x128xbf16, #tpu.memory_space<vmem>>, vector<128x128xbf16>
    %cst_22 = arith.constant dense<0.000000e+00> : vector<8x128xf32>
    %30 = tpu.matmul %28, %29, %cst_22 {dimension_numbers = #tpu.dot_dimension_numbers<[1], [0], [0], [1], [0, 0, 1, 1], [], []>} : vector<8x128xbf16>, vector<128x128xbf16>, vector<8x128xf32> -> vector<8x128xf32>
    %c0_23 = arith.constant 0 : index
    %c0_24 = arith.constant 0 : index
    %31 = vector.load %arg11[%c0_23, %c0_24] : memref<1x128xf32, #tpu.memory_space<vmem>>, vector<1x128xf32>
    %32 = vector.broadcast %31 : vector<1x128xf32> to vector<8x128xf32>
    %33 = arith.addf %30, %32 : vector<8x128xf32>
    %c0_25 = arith.constant 0 : index
    %c0_26 = arith.constant 0 : index
    %34 = vector.load %arg22[%c0_25, %c0_26] : memref<8x128xf32, #tpu.memory_space<vmem>>, vector<8x128xf32>
    tpu.vector_store %arg22[%c0_25, %c0_26], %33 {strides = array<i32>} : memref<8x128xf32, #tpu.memory_space<vmem>>, vector<8x128xf32>,
    %35 = arith.truncf %33 : vector<8x128xf32> to vector<8x128xbf16>
    %c0_27 = arith.constant 0 : index
    %c0_28 = arith.constant 0 : index
    %36 = vector.load %arg12[%c0_27, %c0_28] : memref<128x128xbf16, #tpu.memory_space<vmem>>, vector<128x128xbf16>
    %cst_29 = arith.constant dense<0.000000e+00> : vector<8x128xf32>
    %37 = tpu.matmul %35, %36, %cst_29 {dimension_numbers = #tpu.dot_dimension_numbers<[1], [0], [0], [1], [0, 0, 1, 1], [], []>} : vector<8x128xbf16>, vector<128x128xbf16>, vector<8x128xf32> -> vector<8x128xf32>
    %c0_30 = arith.constant 0 : index
    %c0_31 = arith.constant 0 : index
    %38 = vector.load %arg13[%c0_30, %c0_31] : memref<1x128xf32, #tpu.memory_space<vmem>>, vector<1x128xf32>
    %39 = vector.broadcast %38 : vector<1x128xf32> to vector<8x128xf32>
    %40 = arith.addf %37, %39 : vector<8x128xf32>
    %41 = math.tanh %40 : vector<8x128xf32>
    %42 = arith.truncf %41 : vector<8x128xf32> to vector<8x128xbf16>
    %c0_32 = arith.constant 0 : index
    %c0_33 = arith.constant 0 : index
    %43 = vector.load %arg14[%c0_32, %c0_33] : memref<128x256xbf16, #tpu.memory_space<vmem>>, vector<128x256xbf16>
    %cst_34 = arith.constant dense<0.000000e+00> : vector<8x256xf32>
    %44 = tpu.matmul %42, %43, %cst_34 {dimension_numbers = #tpu.dot_dimension_numbers<[1], [0], [0], [1], [0, 0, 1, 1], [], []>} : vector<8x128xbf16>, vector<128x256xbf16>, vector<8x256xf32> -> vector<8x256xf32>
    %c0_35 = arith.constant 0 : index
    %c0_36 = arith.constant 0 : index
    %45 = vector.load %arg15[%c0_35, %c0_36] : memref<1x256xf32, #tpu.memory_space<vmem>>, vector<1x256xf32>
    %46 = vector.broadcast %45 : vector<1x256xf32> to vector<8x256xf32>
    %47 = arith.addf %44, %46 : vector<8x256xf32>
    %48 = math.tanh %47 : vector<8x256xf32>
    %49 = arith.truncf %48 : vector<8x256xf32> to vector<8x256xbf16>
    %c0_37 = arith.constant 0 : index
    %c0_38 = arith.constant 0 : index
    %50 = vector.load %arg16[%c0_37, %c0_38] : memref<256x384xbf16, #tpu.memory_space<vmem>>, vector<256x384xbf16>
    %cst_39 = arith.constant dense<0.000000e+00> : vector<8x384xf32>
    %51 = tpu.matmul %49, %50, %cst_39 {dimension_numbers = #tpu.dot_dimension_numbers<[1], [0], [0], [1], [0, 0, 1, 1], [], []>} : vector<8x256xbf16>, vector<256x384xbf16>, vector<8x384xf32> -> vector<8x384xf32>
    %c0_40 = arith.constant 0 : index
    %c0_41 = arith.constant 0 : index
    %52 = vector.load %arg17[%c0_40, %c0_41] : memref<1x384xf32, #tpu.memory_space<vmem>>, vector<1x384xf32>
    %53 = vector.broadcast %52 : vector<1x384xf32> to vector<8x384xf32>
    %54 = arith.addf %51, %53 : vector<8x384xf32>
    %55 = math.tanh %54 : vector<8x384xf32>
    %56 = arith.truncf %55 : vector<8x384xf32> to vector<8x384xbf16>
    %c0_42 = arith.constant 0 : index
    %c0_43 = arith.constant 0 : index
    %57 = vector.load %arg18[%c0_42, %c0_43] : memref<384x768xbf16, #tpu.memory_space<vmem>>, vector<384x768xbf16>
    %cst_44 = arith.constant dense<0.000000e+00> : vector<8x768xf32>
    %58 = tpu.matmul %56, %57, %cst_44 {dimension_numbers = #tpu.dot_dimension_numbers<[1], [0], [0], [1], [0, 0, 1, 1], [], []>} : vector<8x384xbf16>, vector<384x768xbf16>, vector<8x768xf32> -> vector<8x768xf32>
    %c0_45 = arith.constant 0 : index
    %c0_46 = arith.constant 0 : index
    %59 = vector.load %arg19[%c0_45, %c0_46] : memref<1x768xf32, #tpu.memory_space<vmem>>, vector<1x768xf32>
    %60 = vector.broadcast %59 : vector<1x768xf32> to vector<8x768xf32>
    %61 = arith.addf %58, %60 : vector<8x768xf32>
    %62 = math.tanh %61 : vector<8x768xf32>
    %63 = arith.truncf %62 : vector<8x768xf32> to vector<8x768xbf16>
    %c0_47 = arith.constant 0 : index
    %c0_48 = arith.constant 0 : index
    %64 = vector.load %arg20[%c0_47, %c0_48] : memref<768x128xbf16, #tpu.memory_space<vmem>>, vector<768x128xbf16>
    %cst_49 = arith.constant dense<0.000000e+00> : vector<8x128xf32>
    %65 = tpu.matmul %63, %64, %cst_49 {dimension_numbers = #tpu.dot_dimension_numbers<[1], [0], [0], [1], [0, 0, 1, 1], [], []>} : vector<8x768xbf16>, vector<768x128xbf16>, vector<8x128xf32> -> vector<8x128xf32>
    %c0_50 = arith.constant 0 : index
    %c0_51 = arith.constant 0 : index
    %66 = vector.load %arg21[%c0_50, %c0_51] : memref<1x128xf32, #tpu.memory_space<vmem>>, vector<1x128xf32>
    %67 = vector.broadcast %66 : vector<1x128xf32> to vector<8x128xf32>
    %68 = arith.addf %65, %67 : vector<8x128xf32>
    %69 = arith.negf %68 : vector<8x128xf32>
    %70 = math.exp %69 : vector<8x128xf32>
    %cst_52 = arith.constant 1.000000e+00 : f32
    %71 = vector.broadcast %cst_52 : f32 to vector<8x128xf32>
    %72 = arith.addf %71, %70 : vector<8x128xf32>
    %73 = arith.divf %71, %72 : vector<8x128xf32>
    %c0_53 = arith.constant 0 : index
    %c0_54 = arith.constant 0 : index
    %74 = vector.load %arg23[%c0_53, %c0_54] : memref<8x128xf32, #tpu.memory_space<vmem>>, vector<8x128xf32>
    tpu.vector_store %arg23[%c0_53, %c0_54], %73 {strides = array<i32>} : memref<8x128xf32, #tpu.memory_space<vmem>>, vector<8x128xf32>,
    return
  }
  func.func @transform_0(%arg0: i32) -> (i32, i32) {
    %c0_i32 = arith.constant 0 : i32
    %c0_i32_0 = arith.constant 0 : i32
    return %arg0, %c0_i32 : i32, i32
  }
  func.func @transform_1(%arg0: i32) -> (i32, i32) {
    %c0_i32 = arith.constant 0 : i32
    %c0_i32_0 = arith.constant 0 : i32
    %c0_i32_1 = arith.constant 0 : i32
    return %c0_i32, %c0_i32_0 : i32, i32
  }
  func.func @transform_2(%arg0: i32) -> (i32, i32) {
    %c0_i32 = arith.constant 0 : i32
    %c0_i32_0 = arith.constant 0 : i32
    %c0_i32_1 = arith.constant 0 : i32
    return %c0_i32, %c0_i32_0 : i32, i32
  }
  func.func @transform_3(%arg0: i32) -> (i32, i32) {
    %c0_i32 = arith.constant 0 : i32
    %c0_i32_0 = arith.constant 0 : i32
    %c0_i32_1 = arith.constant 0 : i32
    return %c0_i32, %c0_i32_0 : i32, i32
  }
  func.func @transform_4(%arg0: i32) -> (i32, i32) {
    %c0_i32 = arith.constant 0 : i32
    %c0_i32_0 = arith.constant 0 : i32
    %c0_i32_1 = arith.constant 0 : i32
    return %c0_i32, %c0_i32_0 : i32, i32
  }
  func.func @transform_5(%arg0: i32) -> (i32, i32) {
    %c0_i32 = arith.constant 0 : i32
    %c0_i32_0 = arith.constant 0 : i32
    %c0_i32_1 = arith.constant 0 : i32
    return %c0_i32, %c0_i32_0 : i32, i32
  }
  func.func @transform_6(%arg0: i32) -> (i32, i32) {
    %c0_i32 = arith.constant 0 : i32
    %c0_i32_0 = arith.constant 0 : i32
    %c0_i32_1 = arith.constant 0 : i32
    return %c0_i32, %c0_i32_0 : i32, i32
  }
  func.func @transform_7(%arg0: i32) -> (i32, i32) {
    %c0_i32 = arith.constant 0 : i32
    %c0_i32_0 = arith.constant 0 : i32
    %c0_i32_1 = arith.constant 0 : i32
    return %c0_i32, %c0_i32_0 : i32, i32
  }
  func.func @transform_8(%arg0: i32) -> (i32, i32) {
    %c0_i32 = arith.constant 0 : i32
    %c0_i32_0 = arith.constant 0 : i32
    %c0_i32_1 = arith.constant 0 : i32
    return %c0_i32, %c0_i32_0 : i32, i32
  }
  func.func @transform_9(%arg0: i32) -> (i32, i32) {
    %c0_i32 = arith.constant 0 : i32
    %c0_i32_0 = arith.constant 0 : i32
    %c0_i32_1 = arith.constant 0 : i32
    return %c0_i32, %c0_i32_0 : i32, i32
  }
  func.func @transform_10(%arg0: i32) -> (i32, i32) {
    %c0_i32 = arith.constant 0 : i32
    %c0_i32_0 = arith.constant 0 : i32
    %c0_i32_1 = arith.constant 0 : i32
    return %c0_i32, %c0_i32_0 : i32, i32
  }
  func.func @transform_11(%arg0: i32) -> (i32, i32) {
    %c0_i32 = arith.constant 0 : i32
    %c0_i32_0 = arith.constant 0 : i32
    %c0_i32_1 = arith.constant 0 : i32
    return %c0_i32, %c0_i32_0 : i32, i32
  }
  func.func @transform_12(%arg0: i32) -> (i32, i32) {
    %c0_i32 = arith.constant 0 : i32
    %c0_i32_0 = arith.constant 0 : i32
    %c0_i32_1 = arith.constant 0 : i32
    return %c0_i32, %c0_i32_0 : i32, i32
  }
  func.func @transform_13(%arg0: i32) -> (i32, i32) {
    %c0_i32 = arith.constant 0 : i32
    %c0_i32_0 = arith.constant 0 : i32
    %c0_i32_1 = arith.constant 0 : i32
    return %c0_i32, %c0_i32_0 : i32, i32
  }
  func.func @transform_14(%arg0: i32) -> (i32, i32) {
    %c0_i32 = arith.constant 0 : i32
    %c0_i32_0 = arith.constant 0 : i32
    %c0_i32_1 = arith.constant 0 : i32
    return %c0_i32, %c0_i32_0 : i32, i32
  }
  func.func @transform_15(%arg0: i32) -> (i32, i32) {
    %c0_i32 = arith.constant 0 : i32
    %c0_i32_0 = arith.constant 0 : i32
    %c0_i32_1 = arith.constant 0 : i32
    return %c0_i32, %c0_i32_0 : i32, i32
  }
  func.func @transform_16(%arg0: i32) -> (i32, i32) {
    %c0_i32 = arith.constant 0 : i32
    %c0_i32_0 = arith.constant 0 : i32
    %c0_i32_1 = arith.constant 0 : i32
    return %c0_i32, %c0_i32_0 : i32, i32
  }
  func.func @transform_17(%arg0: i32) -> (i32, i32) {
    %c0_i32 = arith.constant 0 : i32
    %c0_i32_0 = arith.constant 0 : i32
    %c0_i32_1 = arith.constant 0 : i32
    return %c0_i32, %c0_i32_0 : i32, i32
  }
  func.func @transform_18(%arg0: i32) -> (i32, i32) {
    %c0_i32 = arith.constant 0 : i32
    %c0_i32_0 = arith.constant 0 : i32
    %c0_i32_1 = arith.constant 0 : i32
    return %c0_i32, %c0_i32_0 : i32, i32
  }
  func.func @transform_19(%arg0: i32) -> (i32, i32) {
    %c0_i32 = arith.constant 0 : i32
    %c0_i32_0 = arith.constant 0 : i32
    %c0_i32_1 = arith.constant 0 : i32
    return %c0_i32, %c0_i32_0 : i32, i32
  }
  func.func @transform_20(%arg0: i32) -> (i32, i32) {
    %c0_i32 = arith.constant 0 : i32
    %c0_i32_0 = arith.constant 0 : i32
    %c0_i32_1 = arith.constant 0 : i32
    return %c0_i32, %c0_i32_0 : i32, i32
  }
  func.func @transform_21(%arg0: i32) -> (i32, i32) {
    %c0_i32 = arith.constant 0 : i32
    %c0_i32_0 = arith.constant 0 : i32
    return %arg0, %c0_i32 : i32, i32
  }
  func.func @transform_22(%arg0: i32) -> (i32, i32) {
    %c0_i32 = arith.constant 0 : i32
    %c0_i32_0 = arith.constant 0 : i32
    return %arg0, %c0_i32 : i32, i32
  }
}

</mosaic_0001>

<bundles_post_ra>
// kernel: tpu_custom_call.1
= control target key start
LH: loop header
LB: loop body
LE: loop exit
PB: predicated region body
PF: predicated region fallthrough
CT: control target
= control target key end

     0   :  { %s9884_s0 = inlined_call_operand.hbm [shape: bf16[16,128], index: 0, kind: input, shape index: {}]   ;;  %s9885_s1 = inlined_call_operand.hbm [shape: bf16[128,768], index: 1, kind: input, shape index: {}]   ;;  %s9886_s2 = inlined_call_operand.hbm [shape: f32[1,768], index: 2, kind: input, shape index: {}]   ;;  %s9887_s3 = inlined_call_operand.hbm [shape: bf16[768,384], index: 3, kind: input, shape index: {}]   ;;  %s9888_s4 = inlined_call_operand.vmem [shape: f32[1,384], index: 4, kind: input, shape index: {}]   ;;  %s9889_s5 = inlined_call_operand.hbm [shape: bf16[384,256], index: 5, kind: input, shape index: {}]   ;;  %s9890_s6 = inlined_call_operand.hbm [shape: f32[1,256], index: 6, kind: input, shape index: {}]   ;;  %s9891_s7 = inlined_call_operand.hbm [shape: bf16[256,128], index: 7, kind: input, shape index: {}]   ;;  %s9892_s8 = inlined_call_operand.hbm [shape: f32[1,128], index: 8, kind: input, shape index: {}]   ;;  %s9893_s9 = inlined_call_operand.hbm [shape: bf16[128,128], index: 9, kind: input, shape index: {}]   ;;  %s9894_s10 = inlined_call_operand.hbm [shape: f32[1,128], index: 10, kind: input, shape index: {}]   ;;  %s9895_s11 = inlined_call_operand.hbm [shape: bf16[128,128], index: 11, kind: input, shape index: {}]   ;;  %s9896_s12 = inlined_call_operand.hbm [shape: f32[1,128], index: 12, kind: input, shape index: {}]   ;;  %s9897_s13 = inlined_call_operand.hbm [shape: bf16[128,256], index: 13, kind: input, shape index: {}]   ;;  %s9898_s14 = inlined_call_operand.hbm [shape: f32[1,256], index: 14, kind: input, shape index: {}]   ;;  %s9899_s15 = inlined_call_operand.hbm [shape: bf16[256,384], index: 15, kind: input, shape index: {}]   ;;  %s9900_s16 = inlined_call_operand.vmem [shape: f32[1,384], index: 16, kind: input, shape index: {}]   ;;  %s9901_s17 = inlined_call_operand.hbm [shape: bf16[384,768], index: 17, kind: input, shape index: {}]   ;;  %s9902_s18 = inlined_call_operand.vmem [shape: f32[1,768], index: 18, kind: input, shape index: {}]   ;;  %s9903_s19 = inlined_call_operand.hbm [shape: bf16[768,128], index: 19, kind: input, shape index: {}]   ;;  %s9904_s20 = inlined_call_operand.vmem [shape: f32[1,128], index: 20, kind: input, shape index: {}]   ;;  %s9905_s21 = inlined_call_operand.hbm [shape: f32[16,128], index: 21, kind: output, shape index: {0}]   ;;  %s9906_s22 = inlined_call_operand.hbm [shape: f32[16,128], index: 22, kind: output, shape index: {1}]  }
   0x1   :  { %9919 = sst [smem:[#allocation46_spill]] %s9884_s0 }
   0x2   :  { %9920 = sst [smem:[#allocation47_spill]] %s9885_s1 }
   0x3   :  { %9921 = sst [smem:[#allocation48_spill]] %s9886_s2 }
   0x4   :  { %9922 = sst [smem:[#allocation49_spill]] %s9887_s3 }
   0x5   :  { %9923 = sst [smem:[#allocation50_spill]] %s9888_s4 }
   0x6   :  { %9924 = sst [smem:[#allocation51_spill]] %s9889_s5 }
   0x7   :  { %9925 = sst [smem:[#allocation52_spill]] %s9890_s6 }
   0x8   :  { %9926 = sst [smem:[#allocation53_spill]] %s9891_s7 }
   0x9   :  { %9927 = sst [smem:[#allocation54_spill]] %s9892_s8 }
   0xa   :  { %9928 = sst [smem:[#allocation55_spill]] %s9893_s9 }
   0xb   :  { %9929 = sst [smem:[#allocation56_spill]] %s9894_s10 }
   0xc   :  { %9930 = sst [smem:[#allocation57_spill]] %s9895_s11 }
   0xd   :  { %9931 = sst [smem:[#allocation58_spill]] %s9896_s12 }
   0xe   :  { %9932 = sst [smem:[#allocation59_spill]] %s9900_s16 }
   0xf   :  { %9933 = sst [smem:[#allocation60_spill]] %s9902_s18 }
  0x10   :  { %9934 = sst [smem:[#allocation61_spill]] %s9904_s20 }
  0x11   :  { %9935 = sst [smem:[#allocation62_spill]] %s9905_s21 }
  0x12   :  { %9936 = sst [smem:[#allocation63_spill]] %s9906_s22 }
  0x13   :  { %28 = vsyncpa [#allocation3], 0 }
  0x14   :  { %30 = vsyncpa [#allocation3 + $0x1], 0 }
  0x15   :  { %31 = vsyncpa [#allocation6], 0 }
  0x16   :  { %32 = vsyncpa [#allocation9], 0 }
  0x17   :  { %33 = vsyncpa [#allocation12], 0 }
  0x18   :  { %34 = vsyncpa [#allocation15], 0 }
  0x19   :  { %35 = vsyncpa [#allocation18], 0 }
  0x1a   :  { %36 = vsyncpa [#allocation21], 0 }
  0x1b   :  { %37 = vsyncpa [#allocation24], 0 }
  0x1c   :  { %38 = vsyncpa [#allocation27], 0 }
  0x1d   :  { %39 = vsyncpa [#allocation4], 0 }
  0x1e   :  { %41 = vsyncpa [#allocation4 + $0x1], 0 }
  0x1f   :  { %42 = vsyncpa [#allocation31], 0 }
  0x20   :  { %44 = vsyncpa [#allocation31 + $0x1], 0  ;;  %s9456_s3 = smov 0   ;;  %s9458_s28 = smov 0  }
  0x21   :  { %s9460_s29 = smov 0   ;;  %s9462_s30 = smov 0  }
  0x22 LB: > { %9937 = sst [smem:[#allocation43_spill]] %s9303_s3  ;;  %s9480_s5 = sadd.s32 4294967295, %s9315_s30   ;;  %s9315_s30 = sphi %s9462_s30, %s9979_s30   ;;  %s9311_s29 = sphi %s9460_s29, %s9978_s29   ;;  %s9307_s28 = sphi %s9458_s28, %s9977_s28   ;;  %s9303_s3 = sphi %s9456_s3, %s9976_s3  }
  0x23   : > { %s9938_s23 = sld [smem:[#allocation47_spill]]  ;;  %p5712_p0 = scmp.ge.s32.totalorder %s9315_s30, 1 }
  0x24   : > { %9939 = sst [smem:[#allocation44_spill]] %s9480_s5  ;;  %p71_p1 = scmp.eq.s32.totalorder %s9480_s5, 0 }
  0x25   : > { %p553_p2 = scmp.lt.s32.totalorder %s9315_s30, 3  ;;  %s9317_s6 = smov [#allocation5]  }
  0x26   : > { %s566_s25 = sshll.u32 %s9317_s6, 4  ;;  %s9942_s27 = sld [smem:[#allocation49_spill]]  ;;  %s567_s25 = int_to_ptr.vmem [resolvable:$true] %s566_s25 }
  0x27   : > { %p9485_p3 = pnand %p5712_p0, %p553_p2  ;;  %s9914_s6 = smov 384  }
  0x28   : > { %s9915_s20 = smov 24   ;;  %s9916_s26 = smov 192  }
  0x29   : > { %s564_s1 = sshll.u32 %s9938_s23, 4  ;;  %p8469_p4 = pneg %p9485_p3  ;;  %s565_s1 = int_to_ptr.hbm [resolvable:$true] %s564_s1 }
  0x2a   : > { %s9940_s24 = scalar_select %p9485_p3, 1, 0 }
  0x2b   : > { %p9497_p6 = pnand %p8469_p4, %p71_p1  ;;  %s9318_s23 = smov [#allocation8]  }
  0x2c   : > { %9941 = sst [smem:[#allocation45_spill]] %s9940_s24  ;;  %s590_s4 = sshll.u32 %s9942_s27, 4  ;;  %s591_s4 = int_to_ptr.hbm [resolvable:$true] %s590_s4 }
  0x2d   : > { %s592_s22 = sshll.u32 %s9318_s23, 4  ;;  %s9917_s2 = smov 12   ;;  %s593_s22 = int_to_ptr.vmem [resolvable:$true] %s592_s22 }
  0x2e   : > { %8472 = dma.hbm_to_vmem [thread:$0]  (!%p9497_p6), %s565_s1, 6144, %s567_s25, [#allocation6], %s9914_s6, %s9914_s6, %s9915_s20  }
  0x2f   : > { %8478 = dma.hbm_to_vmem [thread:$0]  (!%p9497_p6), %s591_s4, 18432, %s593_s22, [#allocation9], %s9916_s26, %s9916_s26, %s9917_s2  }
  0x30   : > { %s9944_s18 = sld [smem:[#allocation52_spill]]  ;;  %s9323_s16 = smov [#allocation11]  }
  0x31   : > { %s624_s24 = sshll.u32 %s9323_s16, 4  ;;  %s9945_s8 = sld [smem:[#allocation54_spill]]  ;;  %s625_s24 = int_to_ptr.vmem [resolvable:$true] %s624_s24 }
  0x32   : > { %s9324_s6 = smov [#allocation14]   ;;  %s9946_s10 = sld [smem:[#allocation56_spill]] }
  0x33   : > { %s650_s20 = sshll.u32 %s9324_s6, 4  ;;  %s9947_s12 = sld [smem:[#allocation58_spill]]  ;;  %s651_s20 = int_to_ptr.vmem [resolvable:$true] %s650_s20 }
  0x34   : > { %s9325_s5 = smov [#allocation17]   ;;  %s726_s1 = sshll.u32 %s9898_s14, 4  ;;  %s727_s1 = int_to_ptr.hbm [resolvable:$true] %s726_s1 }
  0x35   : > { %s676_s27 = sshll.u32 %s9325_s5, 4  ;;  %s754_s22 = sshll.u32 %s9901_s17, 4  ;;  %s677_s27 = int_to_ptr.vmem [resolvable:$true] %s676_s27  ;;  %s755_s22 = int_to_ptr.hbm [resolvable:$true] %s754_s22 }
  0x36   : > { %s622_s23 = sshll.u32 %s9944_s18, 4  ;;  %s9327_s16 = smov [#allocation23]   ;;  %s623_s23 = int_to_ptr.hbm [resolvable:$true] %s622_s23 }
  0x37   : > { %s648_s25 = sshll.u32 %s9945_s8, 4  ;;  %s728_s18 = sshll.u32 %s9327_s16, 4  ;;  %s649_s25 = int_to_ptr.hbm [resolvable:$true] %s648_s25  ;;  %s729_s18 = int_to_ptr.vmem [resolvable:$true] %s728_s18 }
  0x38   : > { %8484 = dma.hbm_to_vmem [thread:$0]  (!%p9497_p6), %s623_s23, 32, %s625_s24, [#allocation12]  }
  0x39   : > { %s674_s21 = sshll.u32 %s9946_s10, 4  ;;  %s700_s4 = sshll.u32 %s9947_s12, 4  ;;  %s675_s21 = int_to_ptr.hbm [resolvable:$true] %s674_s21  ;;  %s701_s4 = int_to_ptr.hbm [resolvable:$true] %s700_s4 }
  0x3a   : > { %8490 = dma.hbm_to_vmem [thread:$0]  (!%p9497_p6), %s649_s25, 16, %s651_s20, [#allocation15]  }
  0x3b   : > { %8496 = dma.hbm_to_vmem [thread:$0]  (!%p9497_p6), %s675_s21, 16, %s677_s27, [#allocation18]  }
  0x3c   : > { %s9326_s24 = smov [#allocation20]   ;;  %s9328_s21 = smov [#allocation26]  }
  0x3d   : > { %s702_s6 = sshll.u32 %s9326_s24, 4  ;;  %s756_s5 = sshll.u32 %s9328_s21, 4  ;;  %s703_s6 = int_to_ptr.vmem [resolvable:$true] %s702_s6  ;;  %s757_s5 = int_to_ptr.vmem [resolvable:$true] %s756_s5 }
  0x3e   : > { %8502 = dma.hbm_to_vmem [thread:$0]  (!%p9497_p6), %s701_s4, 16, %s703_s6, [#allocation21]  }
  0x3f   : > { %8508 = dma.hbm_to_vmem [thread:$0]  (!%p9497_p6), %s727_s1, 32, %s729_s18, [#allocation24]  }
  0x40   : > { %s9948_s3 = sld [smem:[#allocation48_spill]]  ;;  %s9949_s4 = smov 24  }
  0x41   : > { %s9950_s6 = smov 384   ;;  %s9951_s16 = sld [smem:[#allocation51_spill]] }
  0x42   : > { %8514 = dma.hbm_to_vmem [thread:$0]  (!%p9497_p6), %s755_s22, 18432, %s757_s5, [#allocation27], %s9950_s6, %s9950_s6, %s9949_s4  }
  0x43   : > { %s9329_s2 = smov [#allocation7]   ;;  %s9330_s18 = smov [#allocation10]  }
  0x44   : > { %s581_s1 = sshll.u32 %s9329_s2, 4  ;;  %s609_s21 = sshll.u32 %s9330_s18, 4  ;;  %s582_s1 = int_to_ptr.vmem [resolvable:$true] %s581_s1  ;;  %s610_s21 = int_to_ptr.vmem [resolvable:$true] %s609_s21 }
  0x45   : > { %s9331_s27 = smov 128   ;;  %s9332_s24 = smov 8  }
  0x46   : > { %s579_s23 = sshll.u32 %s9948_s3, 4  ;;  %s9952_s7 = sld [smem:[#allocation53_spill]]  ;;  %s580_s23 = int_to_ptr.hbm [resolvable:$true] %s579_s23 }
  0x47   : > { %s607_s26 = sshll.u32 %s9951_s16, 4  ;;  %s9333_s3 = smov [#allocation13]   ;;  %s608_s26 = int_to_ptr.hbm [resolvable:$true] %s607_s26 }
  0x48   : > { %8475 = dma.hbm_to_vmem [thread:$0]  (!%p9497_p6), %s580_s23, 96, %s582_s1, [#allocation6]  }
  0x49   : > { %8481 = dma.hbm_to_vmem [thread:$0]  (!%p9497_p6), %s608_s26, 6144, %s610_s21, [#allocation9], %s9331_s27, %s9331_s27, %s9332_s24  }
  0x4a   : > { %s635_s4 = sshll.u32 %s9333_s3, 4  ;;  %s9953_s9 = sld [smem:[#allocation55_spill]]  ;;  %s636_s4 = int_to_ptr.vmem [resolvable:$true] %s635_s4 }
  0x4b   : > { %s9334_s25 = smov 64   ;;  %s9335_s16 = smov 4  }
  0x4c   : > { %s633_s2 = sshll.u32 %s9952_s7, 4  ;;  %s9336_s26 = smov [#allocation16]   ;;  %s634_s2 = int_to_ptr.hbm [resolvable:$true] %s633_s2 }
  0x4d   : > { %8487 = dma.hbm_to_vmem [thread:$0]  (!%p9497_p6), %s634_s2, 2048, %s636_s4, [#allocation12], %s9334_s25, %s9334_s25, %s9335_s16  }
  0x4e   : > { %s661_s1 = sshll.u32 %s9336_s26, 4  ;;  %s9954_s11 = sld [smem:[#allocation57_spill]]  ;;  %s662_s1 = int_to_ptr.vmem [resolvable:$true] %s661_s1 }
  0x4f   : > { %s711_s23 = sshll.u32 %s9897_s13, 4  ;;  %s9337_s2 = smov [#allocation19]   ;;  %s712_s23 = int_to_ptr.hbm [resolvable:$true] %s711_s23 }
  0x50   : > { %s659_s20 = sshll.u32 %s9953_s9, 4  ;;  %s687_s4 = sshll.u32 %s9337_s2, 4  ;;  %s660_s20 = int_to_ptr.hbm [resolvable:$true] %s659_s20  ;;  %s688_s4 = int_to_ptr.vmem [resolvable:$true] %s687_s4 }
  0x51   : > { %8493 = dma.hbm_to_vmem [thread:$0]  (!%p9497_p6), %s660_s20, 1024, %s662_s1, [#allocation15], %s9334_s25, %s9334_s25, %s9335_s16  }
  0x52   : > { %s9338_s6 = smov [#allocation22]   ;;  %s737_s1 = sshll.u32 %s9899_s15, 4  ;;  %s738_s1 = int_to_ptr.hbm [resolvable:$true] %s737_s1 }
  0x53   : > { %s713_s26 = sshll.u32 %s9338_s6, 4  ;;  %s771_s5 = sshll.u32 %s9903_s19, 4  ;;  %s714_s26 = int_to_ptr.vmem [resolvable:$true] %s713_s26  ;;  %s772_s5 = int_to_ptr.hbm [resolvable:$true] %s771_s5 }
  0x54   : > { %s685_s22 = sshll.u32 %s9954_s11, 4  ;;  %s9339_s3 = smov [#allocation25]   ;;  %s686_s22 = int_to_ptr.hbm [resolvable:$true] %s685_s22 }
  0x55   : > { %8499 = dma.hbm_to_vmem [thread:$0]  (!%p9497_p6), %s686_s22, 1024, %s688_s4, [#allocation18], %s9334_s25, %s9334_s25, %s9335_s16  }
  0x56   : > { %8505 = dma.hbm_to_vmem [thread:$0]  (!%p9497_p6), %s712_s23, 2048, %s714_s26, [#allocation21], %s9331_s27, %s9331_s27, %s9332_s24  }
  0x57   : > { %s9955_s2 = sld [smem:[#allocation43_spill]]  ;;  %s739_s4 = sshll.u32 %s9339_s3, 4  ;;  %s740_s4 = int_to_ptr.vmem [resolvable:$true] %s739_s4 }
  0x58   : > { %s9956_s6 = smov 12   ;;  %s9957_s18 = smov 192  }
  0x59   : > { %s9958_s20 = sld [smem:[#allocation44_spill]]  ;;  %s9340_s27 = smov [#allocation28]  }
  0x5a   : > { %8511 = dma.hbm_to_vmem [thread:$0]  (!%p9497_p6), %s738_s1, 6144, %s740_s4, [#allocation24], %s9957_s18, %s9957_s18, %s9956_s6  }
  0x5b   : > { %s773_s24 = sshll.u32 %s9340_s27, 4  ;;  %s5711_s23 = sadd.s32 4294967294, %s9315_s30   ;;  %s774_s24 = int_to_ptr.vmem [resolvable:$true] %s773_s24 }
  0x5c   : > { %8517 = dma.hbm_to_vmem [thread:$0]  (!%p9497_p6), %s772_s5, 6144, %s774_s24, [#allocation27], %s9334_s25, %s9334_s25, %s9335_s16  }
  0x5d   : > { %s9607_s26 = sadd.s32 1, %s9315_s30   ;;  %s57_s22 = sadd.s32 1, %s9311_s29 }
  0x5e   : > { %s54_s21 = ssub.s32 %s9315_s30, %s9607_s26  ;;  %p64_p8 = scmp.ne.s32.totalorder %s9311_s29, %s9307_s28 }
  0x5f   : > { %p55_p7 = scmp.eq.s32.totalorder %s54_s21, 0  ;;  %p65_p9 = scmp.eq.s32.totalorder %s9315_s30, 0 }
  0x60   : > { %p70_p10 = scmp.ne.s32.totalorder %s9307_s28, %s9955_s2  ;;  %p514_p13 = scmp.eq.s32.totalorder %s9958_s20, 1 }
  0x61   : > { %s9618_s1 = scalar_select %p55_p7, %s9311_s29, %s57_s22  }
  0x62   : > { %p9620_p11 = por %p65_p9, %p64_p8  ;;  %p9626_p12 = por %p71_p1, %p70_p10 }
  0x63   : > { %p520_p0 = scmp.eq.s32.totalorder %s5711_s23, 1  ;;  %p8545_p2 = scmp.lt.s32.totalorder %s9315_s30, 2 }
  0x64   : > { %s790_s16 = sand.u32 1, %s9311_s29   ;;  %p9633_p4 = por %p514_p13, %p64_p8 }
  0x65   : > { %p9637_p6 = por %p520_p0, %p70_p10  ;;  %s5730_s2 = sshll.u32 %s790_s16, 2 }
  0x66   : > { %s5731_s4 = sshll.u32 %s9315_s30, 2  ;;  %s9963_s27 = sld [smem:[#allocation46_spill]] }
  0x67   : > { %s794_s21 = scalar_lea.vmem [#allocation2], %s5730_s2  ;;  %p9647_p7 = pnand %p8545_p2, %p9620_p11 }
  0x68   : > { %s802_s22 = sshll.u32 %s794_s21, 4  ;;  %s791_s7 = scalar_lea.sflag [#allocation3], %s790_s16  ;;  %s803_s22 = int_to_ptr.vmem [resolvable:$true] %s802_s22 }
  0x69   : > { %p9159_p9 = pneg %p9647_p7 }
  0x6c   : > { %s798_s24 = scalar_lea.hbm %s9963_s27, %s5731_s4  ;;  %s9162_s6 = scalar_lea.hbm %s9963_s27, 8 }
  0x6d   : > { %s800_s20 = sshll.u32 %s798_s24, 4  ;;  %s801_s20 = int_to_ptr.hbm [resolvable:$true] %s800_s20 }
  0x6e   : > { %s9155_s8 = sshra.s32 %s801_s20, 4  ;;  %s9156_s8 = int_to_ptr.hbm [resolvable:$true] %s9155_s8 }
  0x6f   : > { %s9157_s9 = scalar_lea.hbm %s9156_s8, 4  ;;  %p9163_p11 = scmp.lt.s32.totalorder %s9156_s8, %s9963_s27 }
  0x70   : > { %p9158_p8 = scmp.ne.s32.totalorder %s9156_s8, %s9157_s9  ;;  %p9164_p0 = scmp.lt.s32.totalorder %s9162_s6, %s9157_s9 }
  0x72   : > { %p9160_p10 = pnand %p9159_p9, %p9158_p8  ;;  %p9165_p2 = por %p9164_p0, %p9163_p11 }
  0x74   : > { %p9161_p13 = pneg %p9160_p10 }
  0x76   : > { %p9166_p5 = pnand %p9165_p2, %p9161_p13 }
  0x78   : > { %9169 = shalt.err (!%p9166_p5)
}
  0x79   : > { %8521 = dma.hbm_to_vmem [thread:$0]  (!%p9647_p7), %s801_s20, 64, %s803_s22, %s791_s7  }
  0x7a   : > { %811 = sbr.rel (%p9485_p3) target bundleno = 1799 (0x707), region = 104  ;;  %s9664_s24 = sand.u32 (!%p9485_p3), 1, %s9307_s28  }
  0x7b   : > { %s5733_s21 = sshll.u32 (!%p9485_p3), %s9664_s24, 2  ;;  %s814_s2 = scalar_lea.sflag (!%p9485_p3), [#allocation3], %s9664_s24 }
  0x7c   : > { %s9668_s4 = scalar_lea.vmem (!%p9485_p3), [#allocation2], %s5733_s21 }
  0x7f   : > { %9258 = dma.done.wait (%p9626_p12), %s814_s2, 64  }
  0x80   : > { %9260 = vsyncadd (%p9626_p12), %s814_s2, 4294967232  ;;  %s9966_s8 = sld [smem:[#allocation44_spill]] }
  0x81   : > { %9262 = dma.done.wait (%p71_p1), [#allocation6], 6240  }
  0x82   : > { %9264 = vsyncadd (%p71_p1), [#allocation6], 4294961056 }
  0x83   : > { %9266 = dma.done.wait (%p71_p1), [#allocation9], 24576  }
  0x84   : > { %9268 = vsyncadd (%p71_p1), [#allocation9], 4294942720 }
  0x85   : > { %9270 = dma.done.wait (%p71_p1), [#allocation12], 2080  }
  0x86   : > { %9272 = vsyncadd (%p71_p1), [#allocation12], 4294965216 }
  0x87   : > { %9274 = dma.done.wait (%p71_p1), [#allocation15], 1040  }
  0x88   : > { %9276 = vsyncadd (%p71_p1), [#allocation15], 4294966256 }
  0x89   : > { %9278 = dma.done.wait (%p71_p1), [#allocation18], 1040  }
  0x8a   : > { %9280 = vsyncadd (%p71_p1), [#allocation18], 4294966256 }
  0x8b   : > { %9282 = dma.done.wait (%p71_p1), [#allocation21], 2064  }
  0x8c   : > { %9284 = vsyncadd (%p71_p1), [#allocation21], 4294965232 }
  0x8d   : > { %9286 = dma.done.wait (%p71_p1), [#allocation24], 6176  }
  0x8e   : > { %9288 = vsyncadd (%p71_p1), [#allocation24], 4294961120 }
  0x8f   : > { %9290 = dma.done.wait (%p71_p1), [#allocation27], 24576  }
  0x90   : > { %9292 = vsyncadd (%p71_p1), [#allocation27], 4294942720  ;;  %v5922_v0 = vld [vmem:[#allocation5 + $0x150] sm:$0xf]  ;;  %v7916_v1 = vld [vmem:[#allocation5 + $0x164] sm:$0xf0] }
  0x91   : > { %v7913_v2 = vld [vmem:[#allocation5 + $0x154] sm:$0xf]  ;;  %v5923_v3 = vor.u32 %v7916_v1, %v5922_v0  ;;  %v5924_v4 = vld [vmem:[#allocation5 + $0x168] sm:$0xf0]  ;;  %v5930_v5 = vld [vmem:[#allocation5 + $0x158] sm:$0xf] }
  0x92   : > { %v7917_v6 = vld [vmem:[#allocation5 + $0x16c] sm:$0xf0]  ;;  %v5927_v7 = vor.u32 %v7913_v2, %v5924_v4  ;;  %v7914_v9 = vld [vmem:[#allocation5 + $0x15c] sm:$0xf]  ;;  %v5932_v10 = vld [vmem:[#allocation5 + $0x170] sm:$0xf0] }
  0x93   : > { %v5931_v8 = vor.u32 %v7917_v6, %v5930_v5  ;;  %v5898_v11 = vld [vmem:[#allocation5 + $0x120] sm:$0xf]  ;;  %1267 = vmatpush.bf16.msra.mxu0 %v5923_v3  ;;  %v5935_v12 = vor.u32 %v7914_v9, %v5932_v10  ;;  %v7910_v13 = vld [vmem:[#allocation5 + $0x134] sm:$0xf0]  ;;  %v7907_v14 = vld [vmem:[#allocation5 + $0x124] sm:$0xf] }
  0x94   : > { %v5900_v15 = vld [vmem:[#allocation5 + $0x138] sm:$0xf0]  ;;  %1280 = vmatpush.bf16.msra.mxu1 %v5927_v7  ;;  %v5899_v16 = vor.u32 %v7910_v13, %v5898_v11  ;;  %v5906_v18 = vld [vmem:[#allocation5 + $0x128] sm:$0xf]  ;;  %v7911_v19 = vld [vmem:[#allocation5 + $0x13c] sm:$0xf0] }
  0x95   : > { %1293 = vmatpush.bf16.msra.mxu2 %v5931_v8  ;;  %v5903_v17 = vor.u32 %v7907_v14, %v5900_v15  ;;  %v7908_v20 = vld [vmem:[#allocation5 + $0x12c] sm:$0xf]  ;;  %1306 = vmatpush.bf16.msra.mxu3 %v5935_v12  ;;  %v5907_v21 = vor.u32 %v7911_v19, %v5906_v18  ;;  %v5908_v22 = vld [vmem:[#allocation5 + $0x140] sm:$0xf0]  ;;  %v5874_v23 = vld [vmem:[#allocation5 + $0xf0] sm:$0xf] }
  0x96   : > { %v7904_v24 = vld [vmem:[#allocation5 + $0x104] sm:$0xf0]  ;;  %v5911_v25 = vor.u32 %v7908_v20, %v5908_v22  ;;  %v7901_v26 = vld [vmem:[#allocation5 + $0xf4] sm:$0xf]  ;;  %v5876_v27 = vld [vmem:[#allocation5 + $0x108] sm:$0xf0] }
  0x97   : > { %v5882_v28 = vld [vmem:[#allocation5 + $0xf8] sm:$0xf]  ;;  %1268 = vmatpush.bf16.msra.mxu0 %v5899_v16  ;;  %v5875_v29 = vor.u32 %v7904_v24, %v5874_v23  ;;  %v7905_v30 = vld [vmem:[#allocation5 + $0x10c] sm:$0xf0]  ;;  %v7902_v31 = vld [vmem:[#allocation5 + $0xfc] sm:$0xf]  ;;  %v5879_v33 = vor.u32 %v7901_v26, %v5876_v27 }
  0x98   : > { %v5884_v32 = vld [vmem:[#allocation5 + $0x110] sm:$0xf0]  ;;  %1281 = vmatpush.bf16.msra.mxu1 %v5903_v17  ;;  %v5883_v34 = vor.u32 %v7905_v30, %v5882_v28  ;;  %v5850_v35 = vld [vmem:[#allocation5 + $0xc0] sm:$0xf]  ;;  %v7898_v36 = vld [vmem:[#allocation5 + $0xd4] sm:$0xf0] }
  0x99   : > { %1294 = vmatpush.bf16.msra.mxu2 %v5907_v21  ;;  %v7895_v37 = vld [vmem:[#allocation5 + $0xc4] sm:$0xf]  ;;  %1307 = vmatpush.bf16.msra.mxu3 %v5911_v25  ;;  %v5887_v38 = vor.u32 %v7902_v31, %v5884_v32  ;;  %v5852_v39 = vld [vmem:[#allocation5 + $0xd8] sm:$0xf0]  ;;  %v5858_v40 = vld [vmem:[#allocation5 + $0xc8] sm:$0xf]  ;;  %v5851_v44 = vor.u32 %v7898_v36, %v5850_v35 }
  0x9a   : > { %v7899_v41 = vld [vmem:[#allocation5 + $0xdc] sm:$0xf0]  ;;  %v7896_v42 = vld [vmem:[#allocation5 + $0xcc] sm:$0xf]  ;;  %v5860_v43 = vld [vmem:[#allocation5 + $0xe0] sm:$0xf0]  ;;  %v5855_v45 = vor.u32 %v7895_v37, %v5852_v39 }
  0x9b   : > { %1269 = vmatpush.bf16.msra.mxu0 %v5875_v29  ;;  %v5859_v46 = vor.u32 %v7899_v41, %v5858_v40  ;;  %v5826_v47 = vld [vmem:[#allocation5 + $0x90] sm:$0xf]  ;;  %v7892_v48 = vld [vmem:[#allocation5 + $0xa4] sm:$0xf0]  ;;  %v7889_v49 = vld [vmem:[#allocation5 + $0x94] sm:$0xf]  ;;  %v5863_v50 = vor.u32 %v7896_v42, %v5860_v43 }
  0x9c   : > { %1282 = vmatpush.bf16.msra.mxu1 %v5879_v33  ;;  %v5828_v51 = vld [vmem:[#allocation5 + $0xa8] sm:$0xf0]  ;;  %v5834_v52 = vld [vmem:[#allocation5 + $0x98] sm:$0xf]  ;;  %v7893_v53 = vld [vmem:[#allocation5 + $0xac] sm:$0xf0]  ;;  %v5827_v56 = vor.u32 %v7892_v48, %v5826_v47 }
  0x9d   : > { %1295 = vmatpush.bf16.msra.mxu2 %v5883_v34  ;;  %1308 = vmatpush.bf16.msra.mxu3 %v5887_v38  ;;  %v7890_v54 = vld [vmem:[#allocation5 + $0x9c] sm:$0xf]  ;;  %v5836_v55 = vld [vmem:[#allocation5 + $0xb0] sm:$0xf0]  ;;  %v5831_v57 = vor.u32 %v7889_v49, %v5828_v51  ;;  %v5835_v58 = vor.u32 %v7893_v53, %v5834_v52  ;;  %v5802_v59 = vld [vmem:[#allocation5 + $0x60] sm:$0xf] }
  0x9e   : > { %v7886_v60 = vld [vmem:[#allocation5 + $0x74] sm:$0xf0]  ;;  %v7883_v61 = vld [vmem:[#allocation5 + $0x64] sm:$0xf]  ;;  %v5839_v62 = vor.u32 %v7890_v54, %v5836_v55  ;;  %v5804_v63 = vld [vmem:[#allocation5 + $0x78] sm:$0xf0] }
  0x9f   : > { %1270 = vmatpush.bf16.msra.mxu0 %v5851_v44  ;;  %v5810_v0 = vld [vmem:[#allocation5 + $0x68] sm:$0xf]  ;;  %v7887_v1 = vld [vmem:[#allocation5 + $0x7c] sm:$0xf0]  ;;  %v7884_v2 = vld [vmem:[#allocation5 + $0x6c] sm:$0xf]  ;;  %v5803_v4 = vor.u32 %v7886_v60, %v5802_v59  ;;  %v5807_v5 = vor.u32 %v7883_v61, %v5804_v63 }
  0xa0   : > { %1283 = vmatpush.bf16.msra.mxu1 %v5855_v45  ;;  %v5812_v3 = vld [vmem:[#allocation5 + $0x80] sm:$0xf0]  ;;  %v5811_v6 = vor.u32 %v7887_v1, %v5810_v0  ;;  %v5778_v7 = vld [vmem:[#allocation5 + $0x30] sm:$0xf]  ;;  %v7880_v8 = vld [vmem:[#allocation5 + $0x44] sm:$0xf0] }
  0xa1   : > { %1296 = vmatpush.bf16.msra.mxu2 %v5859_v46  ;;  %1309 = vmatpush.bf16.msra.mxu3 %v5863_v50  ;;  %v7877_v9 = vld [vmem:[#allocation5 + $0x34] sm:$0xf]  ;;  %v5815_v10 = vor.u32 %v7884_v2, %v5812_v3  ;;  %v5780_v11 = vld [vmem:[#allocation5 + $0x48] sm:$0xf0]  ;;  %v5786_v12 = vld [vmem:[#allocation5 + $0x38] sm:$0xf]  ;;  %v5779_v16 = vor.u32 %v7880_v8, %v5778_v7 }
  0xa2   : > { %v7881_v13 = vld [vmem:[#allocation5 + $0x4c] sm:$0xf0]  ;;  %v7878_v14 = vld [vmem:[#allocation5 + $0x3c] sm:$0xf]  ;;  %v5788_v15 = vld [vmem:[#allocation5 + $0x50] sm:$0xf0]  ;;  %v5783_v18 = vor.u32 %v7877_v9, %v5780_v11 }
  0xa3   : > { %1271 = vmatpush.bf16.msra.mxu0 %v5827_v56  ;;  %v5754_v17 = vld [vmem:[#allocation5] sm:$0xf]  ;;  %v5787_v19 = vor.u32 %v7881_v13, %v5786_v12  ;;  %v7874_v20 = vld [vmem:[#allocation5 + $0x14] sm:$0xf0]  ;;  %v7871_v21 = vld [vmem:[#allocation5 + $0x4] sm:$0xf]  ;;  %v5791_v23 = vor.u32 %v7878_v14, %v5788_v15 }
  0xa4   : > { %1284 = vmatpush.bf16.msra.mxu1 %v5831_v57  ;;  %v5756_v22 = vld [vmem:[#allocation5 + $0x18] sm:$0xf0]  ;;  %v5762_v24 = vld [vmem:[#allocation5 + $0x8] sm:$0xf]  ;;  %v7875_v25 = vld [vmem:[#allocation5 + $0x1c] sm:$0xf0]  ;;  %v5755_v30 = vor.u32 %v7874_v20, %v5754_v17 }
  0xa5   : > { %1297 = vmatpush.bf16.msra.mxu2 %v5835_v58  ;;  %1310 = vmatpush.bf16.msra.mxu3 %v5839_v62  ;;  %v7872_v26 = vld [vmem:[#allocation5 + $0xc] sm:$0xf]  ;;  %v5764_v27 = vld [vmem:[#allocation5 + $0x20] sm:$0xf0]  ;;  %v5938_v28 = vld [vmem:[#allocation5 + $0x160] sm:$0xf]  ;;  %v5759_v33 = vor.u32 %v7871_v21, %v5756_v22  ;;  %v5763_v34 = vor.u32 %v7875_v25, %v5762_v24 }
  0xa6   : > { %v7918_v29 = vld [vmem:[#allocation5 + $0x174] sm:$0xf0]  ;;  %v7915_v31 = vld [vmem:[#allocation5 + $0x164] sm:$0xf]  ;;  %v5940_v32 = vld [vmem:[#allocation5 + $0x178] sm:$0xf0]  ;;  %v5767_v35 = vor.u32 %v7872_v26, %v5764_v27 }
  0xa7   : > { %1272 = vmatpush.bf16.msra.mxu0 %v5803_v4  ;;  %v5939_v36 = vor.u32 %v7918_v29, %v5938_v28  ;;  %v5943_v37 = vor.u32 %v7915_v31, %v5940_v32  ;;  %v5914_v38 = vld [vmem:[#allocation5 + $0x130] sm:$0xf]  ;;  %v7912_v39 = vld [vmem:[#allocation5 + $0x144] sm:$0xf0]  ;;  %v9707_v40 = vld [vmem:[%s9668_s4] sm:$0xf] }
  0xa8   : > { %1285 = vmatpush.bf16.msra.mxu1 %v5807_v5  ;;  %v7909_v41 = vld [vmem:[#allocation5 + $0x134] sm:$0xf]  ;;  %v5916_v42 = vld [vmem:[#allocation5 + $0x148] sm:$0xf0]  ;;  %v5890_v43 = vld [vmem:[#allocation5 + $0x100] sm:$0xf]  ;;  %v5915_v45 = vor.u32 %v7912_v39, %v5914_v38 }
  0xa9   : > { %1298 = vmatpush.bf16.msra.mxu2 %v5811_v6  ;;  %1311 = vmatpush.bf16.msra.mxu3 %v5815_v10  ;;  %v7906_v44 = vld [vmem:[#allocation5 + $0x114] sm:$0xf0]  ;;  %v7903_v46 = vld [vmem:[#allocation5 + $0x104] sm:$0xf]  ;;  %v6030_v47 = vld [vmem:[#allocation8 + $0xa8] sm:$0xf]  ;;  %v5919_v50 = vor.u32 %v7909_v41, %v5916_v42 }
  0xaa   : > { %v7941_v48 = vld [vmem:[#allocation8 + $0xb0] sm:$0xf0]  ;;  %v6126_v49 = vld [vmem:[#allocation8 + $0x168] sm:$0xf]  ;;  %v6018_v53 = vld [vmem:[#allocation8 + $0x90] sm:$0xf]  ;;  %v5891_v60 = vor.u32 %v7906_v44, %v5890_v43 }
  0xab   : > { %1273 = vmatpush.bf16.msra.mxu0 %v5779_v16  ;;  %v6031_v51 = vor.u32 %v7941_v48, %v6030_v47  ;;  %v7965_v52 = vld [vmem:[#allocation8 + $0x170] sm:$0xf0]  ;;  %v7938_v54 = vld [vmem:[#allocation8 + $0x98] sm:$0xf0]  ;;  %v6114_v57 = vld [vmem:[#allocation8 + $0x150] sm:$0xf] }
  0xac   : > { %1286 = vmatpush.bf16.msra.mxu1 %v5783_v18  ;;  %v5892_v55 = vld [vmem:[#allocation5 + $0x118] sm:$0xf0]  ;;  %v6127_v56 = vor.u32 %v7965_v52, %v6126_v49  ;;  %v7962_v58 = vld [vmem:[#allocation8 + $0x158] sm:$0xf0]  ;;  %v6019_v59 = vor.u32 %v7938_v54, %v6018_v53  ;;  %v5866_v61 = vld [vmem:[#allocation5 + $0xd0] sm:$0xf] }
  0xad   : > { %1299 = vmatpush.bf16.msra.mxu2 %v5787_v19  ;;  %1312 = vmatpush.bf16.msra.mxu3 %v5791_v23  ;;  %v6115_v62 = vor.u32 %v7962_v58, %v6114_v57  ;;  %v6006_v63 = vld [vmem:[#allocation8 + $0x78] sm:$0xf]  ;;  %v7935_v0 = vld [vmem:[#allocation8 + $0x80] sm:$0xf0]  ;;  %v5895_v1 = vor.u32 %v7903_v46, %v5892_v55  ;;  %v7897_v5 = vld [vmem:[#allocation5 + $0xd4] sm:$0xf] }
  0xae   : > { %v7900_v2 = vld [vmem:[#allocation5 + $0xe4] sm:$0xf0]  ;;  %v6102_v3 = vld [vmem:[#allocation8 + $0x138] sm:$0xf]  ;;  %v5868_v6 = vld [vmem:[#allocation5 + $0xe8] sm:$0xf0]  ;;  %v6007_v7 = vor.u32 %v7935_v0, %v6006_v63 }
  0xaf   : > { %1274 = vmatpush.bf16.msra.mxu0 %v5755_v30  ;;  %v7959_v4 = vld [vmem:[#allocation8 + $0x140] sm:$0xf0]  ;;  %v5867_v8 = vor.u32 %v7900_v2, %v5866_v61  ;;  %v5842_v9 = vld [vmem:[#allocation5 + $0xa0] sm:$0xf]  ;;  %v5994_v11 = vld [vmem:[#allocation8 + $0x60] sm:$0xf]  ;;  %v5871_v13 = vor.u32 %v7897_v5, %v5868_v6 }
  0xb0   : > { %1287 = vmatpush.bf16.msra.mxu1 %v5759_v33  ;;  %v6103_v10 = vor.u32 %v7959_v4, %v6102_v3  ;;  %v7932_v12 = vld [vmem:[#allocation8 + $0x68] sm:$0xf0]  ;;  %v7894_v14 = vld [vmem:[#allocation5 + $0xb4] sm:$0xf0]  ;;  %v6090_v15 = vld [vmem:[#allocation8 + $0x120] sm:$0xf] }
  0xb1   : > { %1300 = vmatpush.bf16.msra.mxu2 %v5763_v34  ;;  %1313 = vmatpush.bf16.msra.mxu3 %v5767_v35  ;;  %v7956_v16 = vld [vmem:[#allocation8 + $0x128] sm:$0xf0]  ;;  %v7891_v17 = vld [vmem:[#allocation5 + $0xa4] sm:$0xf]  ;;  %v5844_v18 = vld [vmem:[#allocation5 + $0xb8] sm:$0xf0]  ;;  %v5995_v19 = vor.u32 %v7932_v12, %v5994_v11  ;;  %v5843_v20 = vor.u32 %v7894_v14, %v5842_v9 }
  0xb2   : > { %1275 = vmatmul.bf16.vlgmr.msra.gmra.mxu0 %v9707_v40  ;;  %v5818_v21 = vld [vmem:[#allocation5 + $0x70] sm:$0xf]  ;;  %v6091_v22 = vor.u32 %v7956_v16, %v6090_v15  ;;  %v7929_v24 = vld [vmem:[#allocation8 + $0x50] sm:$0xf0]  ;;  %v5847_v25 = vor.u32 %v7891_v17, %v5844_v18  ;;  %v7888_v26 = vld [vmem:[#allocation5 + $0x84] sm:$0xf0] }
  0xb3   : > { %1319 = vmatpush.bf16.msrb.mxu0 %v5939_v36  ;;  %1288 = vmatmul.bf16.vlgmr.msra.gmra.mxu1 %v9707_v40  ;;  %v5982_v23 = vld [vmem:[#allocation8 + $0x48] sm:$0xf]  ;;  %v7953_v28 = vld [vmem:[#allocation8 + $0x110] sm:$0xf0]  ;;  %v7885_v29 = vld [vmem:[#allocation5 + $0x74] sm:$0xf]  ;;  %v5819_v34 = vor.u32 %v7888_v26, %v5818_v21 }
  0xb4   : > { %1332 = vmatpush.bf16.msrb.mxu1 %v5943_v37  ;;  %1301 = vmatmul.bf16.vlgmr.msra.gmra.mxu2 %v9707_v40  ;;  %v6078_v27 = vld [vmem:[#allocation8 + $0x108] sm:$0xf]  ;;  %v5794_v31 = vld [vmem:[#allocation5 + $0x40] sm:$0xf]  ;;  %v7882_v32 = vld [vmem:[#allocation5 + $0x54] sm:$0xf0]  ;;  %v5983_v33 = vor.u32 %v7929_v24, %v5982_v23 }
  0xb5   : > { %1314 = vmatmul.bf16.vlgmr.msra.gmra.mxu3 %v9707_v40  ;;  %2325 = vmatpush.bf16.msrb.mxu2 %v6031_v51  ;;  %v5820_v30 = vld [vmem:[#allocation5 + $0x88] sm:$0xf0]  ;;  %v6079_v35 = vor.u32 %v7953_v28, %v6078_v27  ;;  %v5970_v36 = vld [vmem:[#allocation8 + $0x30] sm:$0xf]  ;;  %v7926_v37 = vld [vmem:[#allocation8 + $0x38] sm:$0xf0]  ;;  %v5795_v46 = vor.u32 %v7882_v32, %v5794_v31 }
  0xb6   : > { %2338 = vmatpush.bf16.msrb.mxu3 %v6127_v56  ;;  %v5823_v38 = vor.u32 %v7885_v29, %v5820_v30  ;;  %v6066_v39 = vld [vmem:[#allocation8 + $0xf0] sm:$0xf]  ;;  %v7950_v41 = vld [vmem:[#allocation8 + $0xf8] sm:$0xf0]  ;;  %v5796_v43 = vld [vmem:[#allocation5 + $0x58] sm:$0xf0] }
  0xb7   : > { %1320 = vmatpush.bf16.msrb.mxu0 %v5915_v45  ;;  %v7879_v42 = vld [vmem:[#allocation5 + $0x44] sm:$0xf]  ;;  %v5770_v44 = vld [vmem:[#allocation5 + $0x10] sm:$0xf]  ;;  %v5971_v45 = vor.u32 %v7926_v37, %v5970_v36  ;;  %v7876_v47 = vld [vmem:[#allocation5 + $0x24] sm:$0xf0]  ;;  %v6067_v48 = vor.u32 %v7950_v41, %v6066_v39 }
  0xb8   : > { %1333 = vmatpush.bf16.msrb.mxu1 %v5919_v50  ;;  %v5958_v49 = vld [vmem:[#allocation8 + $0x18] sm:$0xf]  ;;  %v7923_v50 = vld [vmem:[#allocation8 + $0x20] sm:$0xf0]  ;;  %v5799_v51 = vor.u32 %v7879_v42, %v5796_v43  ;;  %v7873_v52 = vld [vmem:[#allocation5 + $0x14] sm:$0xf]  ;;  %v5771_v61 = vor.u32 %v7876_v47, %v5770_v44 }
  0xb9   : > { %2326 = vmatpush.bf16.msrb.mxu2 %v6019_v59  ;;  %v6054_v53 = vld [vmem:[#allocation8 + $0xd8] sm:$0xf]  ;;  %v7947_v54 = vld [vmem:[#allocation8 + $0xe0] sm:$0xf0]  ;;  %v6222_v56 = vld [vmem:[#allocation8 + $0x228] sm:$0xf] }
  0xba   : > { %2339 = vmatpush.bf16.msrb.mxu3 %v6115_v62  ;;  %v5772_v55 = vld [vmem:[#allocation5 + $0x28] sm:$0xf0]  ;;  %v7989_v57 = vld [vmem:[#allocation8 + $0x230] sm:$0xf0]  ;;  %v6210_v62 = vld [vmem:[#allocation8 + $0x210] sm:$0xf]  ;;  %v6055_v63 = vor.u32 %v7947_v54, %v6054_v53 }
  0xbb   : > { %1321 = vmatpush.bf16.msrb.mxu0 %v5891_v60  ;;  %v6318_v58 = vld [vmem:[#allocation8 + $0x2e8] sm:$0xf]  ;;  %v8013_v59 = vld [vmem:[#allocation8 + $0x2f0] sm:$0xf0]  ;;  %v5959_v60 = vor.u32 %v7923_v50, %v5958_v49  ;;  %v5946_v0 = vld [vmem:[#allocation8] sm:$0xf]  ;;  %v5775_v2 = vor.u32 %v7873_v52, %v5772_v55  ;;  %v6223_v3 = vor.u32 %v7989_v57, %v6222_v56 }
  0xbc   : > { %1334 = vmatpush.bf16.msrb.mxu1 %v5895_v1  ;;  %v7920_v1 = vld [vmem:[#allocation8 + $0x8] sm:$0xf0]  ;;  %v7986_v4 = vld [vmem:[#allocation8 + $0x218] sm:$0xf0]  ;;  %v6042_v5 = vld [vmem:[#allocation8 + $0xc0] sm:$0xf] }
  0xbd   : > { %2327 = vmatpush.bf16.msrb.mxu2 %v6007_v7  ;;  %v7944_v6 = vld [vmem:[#allocation8 + $0xc8] sm:$0xf0]  ;;  %v6319_v7 = vor.u32 %v8013_v59, %v6318_v58  ;;  %v6414_v9 = vld [vmem:[#allocation8 + $0x3a8] sm:$0xf]  ;;  %v8010_v11 = vld [vmem:[#allocation8 + $0x2d8] sm:$0xf0]  ;;  %v5947_v12 = vor.u32 %v7920_v1, %v5946_v0  ;;  %v6211_v16 = vor.u32 %v7986_v4, %v6210_v62 }
  0xbe   : > { %2340 = vmatpush.bf16.msrb.mxu3 %v6103_v10  ;;  %v8037_v10 = vld [vmem:[#allocation8 + $0x3b0] sm:$0xf0]  ;;  %v6043_v15 = vor.u32 %v7944_v6, %v6042_v5  ;;  %v6198_v17 = vld [vmem:[#allocation8 + $0x1f8] sm:$0xf]  ;;  %v7983_v18 = vld [vmem:[#allocation8 + $0x200] sm:$0xf0] }
  0xbf   : > { %1322 = vmatpush.bf16.msrb.mxu0 %v5867_v8  ;;  %v6306_v8 = vld [vmem:[#allocation8 + $0x2d0] sm:$0xf]  ;;  %v8061_v14 = vld [vmem:[#allocation8 + $0x470] sm:$0xf0]  ;;  %v6294_v21 = vld [vmem:[#allocation8 + $0x2b8] sm:$0xf]  ;;  %v6199_v28 = vor.u32 %v7983_v18, %v6198_v17 }
  0xc0   : > { %1335 = vmatpush.bf16.msrb.mxu1 %v5871_v13  ;;  %v6510_v13 = vld [vmem:[#allocation8 + $0x468] sm:$0xf]  ;;  %v6402_v23 = vld [vmem:[#allocation8 + $0x390] sm:$0xf]  ;;  %v8034_v24 = vld [vmem:[#allocation8 + $0x398] sm:$0xf0] }
  0xc1   : > { %2328 = vmatpush.bf16.msrb.mxu2 %v5995_v19  ;;  %v6415_v19 = vor.u32 %v8037_v10, %v6414_v9  ;;  %v6498_v26 = vld [vmem:[#allocation8 + $0x450] sm:$0xf]  ;;  %v8058_v27 = vld [vmem:[#allocation8 + $0x458] sm:$0xf0]  ;;  %v6186_v29 = vld [vmem:[#allocation8 + $0x1e0] sm:$0xf]  ;;  %v6403_v31 = vor.u32 %v8034_v24, %v6402_v23 }
  0xc2   : > { %2341 = vmatpush.bf16.msrb.mxu3 %v6091_v22  ;;  %v6511_v22 = vor.u32 %v8061_v14, %v6510_v13  ;;  %v7980_v30 = vld [vmem:[#allocation8 + $0x1e8] sm:$0xf0]  ;;  %v8031_v36 = vld [vmem:[#allocation8 + $0x380] sm:$0xf0]  ;;  %v7977_v42 = vld [vmem:[#allocation8 + $0x1d0] sm:$0xf0] }
  0xc3   : > { %1323 = vmatpush.bf16.msrb.mxu0 %v5843_v20  ;;  %v6307_v20 = vor.u32 %v8010_v11, %v6306_v8  ;;  %v8004_v37 = vld [vmem:[#allocation8 + $0x2a8] sm:$0xf0]  ;;  %v8055_v39 = vld [vmem:[#allocation8 + $0x440] sm:$0xf0]  ;;  %v6187_v41 = vor.u32 %v7980_v30, %v6186_v29  ;;  %v6378_v47 = vld [vmem:[#allocation8 + $0x360] sm:$0xf] }
  0xc4   : > { %1336 = vmatpush.bf16.msrb.mxu1 %v5847_v25  ;;  %v8007_v25 = vld [vmem:[#allocation8 + $0x2c0] sm:$0xf0]  ;;  %v8001_v49 = vld [vmem:[#allocation8 + $0x290] sm:$0xf0]  ;;  %v6474_v50 = vld [vmem:[#allocation8 + $0x420] sm:$0xf] }
  0xc5   : > { %2329 = vmatpush.bf16.msrb.mxu2 %v5983_v33  ;;  %v6295_v32 = vor.u32 %v8007_v25, %v6294_v21  ;;  %v6282_v33 = vld [vmem:[#allocation8 + $0x2a0] sm:$0xf]  ;;  %v6162_v53 = vld [vmem:[#allocation8 + $0x1b0] sm:$0xf]  ;;  %v7974_v54 = vld [vmem:[#allocation8 + $0x1b8] sm:$0xf0] }
  0xc6   : > { %2342 = vmatpush.bf16.msrb.mxu3 %v6079_v35  ;;  %v6390_v35 = vld [vmem:[#allocation8 + $0x378] sm:$0xf]  ;;  %v6283_v44 = vor.u32 %v8004_v37, %v6282_v33  ;;  %v6258_v57 = vld [vmem:[#allocation8 + $0x270] sm:$0xf]  ;;  %v6366_v59 = vld [vmem:[#allocation8 + $0x348] sm:$0xf]  ;;  %v6163_v0 = vor.u32 %v7974_v54, %v6162_v53 }
  0xc7   : > { %1324 = vmatpush.bf16.msrb.mxu0 %v5819_v34  ;;  %v6499_v34 = vor.u32 %v8058_v27, %v6498_v26  ;;  %v6391_v43 = vor.u32 %v8031_v36, %v6390_v35  ;;  %v6462_v62 = vld [vmem:[#allocation8 + $0x408] sm:$0xf]  ;;  %v7971_v4 = vld [vmem:[#allocation8 + $0x1a0] sm:$0xf0]  ;;  %v6246_v6 = vld [vmem:[#allocation8 + $0x258] sm:$0xf] }
  0xc8   : > { %1337 = vmatpush.bf16.msrb.mxu1 %v5823_v38  ;;  %v6486_v38 = vld [vmem:[#allocation8 + $0x438] sm:$0xf]  ;;  %v6138_v10 = vld [vmem:[#allocation8 + $0x180] sm:$0xf]  ;;  %v7968_v11 = vld [vmem:[#allocation8 + $0x188] sm:$0xf0] }
  0xc9   : > { %2330 = vmatpush.bf16.msrb.mxu2 %v5971_v45  ;;  %v6270_v45 = vld [vmem:[#allocation8 + $0x288] sm:$0xf]  ;;  %v7992_v13 = vld [vmem:[#allocation8 + $0x248] sm:$0xf0]  ;;  %v6128_v17 = vld [vmem:[#allocation8 + $0x174] sm:$0xf0]  ;;  %v6139_v18 = vor.u32 %v7968_v11, %v6138_v10 }
  0xca   : > { %2343 = vmatpush.bf16.msrb.mxu3 %v6067_v48  ;;  %v8028_v48 = vld [vmem:[#allocation8 + $0x368] sm:$0xf0]  ;;  %v6271_v56 = vor.u32 %v8001_v49, %v6270_v45  ;;  %v6020_v23 = vld [vmem:[#allocation8 + $0x9c] sm:$0xf0]  ;;  %v7961_v24 = vld [vmem:[#allocation8 + $0x154] sm:$0xf] }
  0xcb   : > { %1325 = vmatpush.bf16.msrb.mxu0 %v5795_v46  ;;  %v6487_v46 = vor.u32 %v8055_v39, %v6486_v38  ;;  %v6379_v55 = vor.u32 %v8028_v48, %v6378_v47  ;;  %v7940_v14 = vld [vmem:[#allocation8 + $0xac] sm:$0xf]  ;;  %v6116_v25 = vld [vmem:[#allocation8 + $0x15c] sm:$0xf0]  ;;  %v6008_v29 = vld [vmem:[#allocation8 + $0x84] sm:$0xf0] }
  0xcc   : > { %1338 = vmatpush.bf16.msrb.mxu1 %v5799_v51  ;;  %v8052_v51 = vld [vmem:[#allocation8 + $0x428] sm:$0xf0]  ;;  %v6119_v27 = vor.u32 %v7961_v24, %v6116_v25  ;;  %v7958_v30 = vld [vmem:[#allocation8 + $0x13c] sm:$0xf]  ;;  %v5996_v35 = vld [vmem:[#allocation8 + $0x6c] sm:$0xf0] }
  0xcd   : > { %2331 = vmatpush.bf16.msrb.mxu2 %v5959_v60  ;;  %v6475_v58 = vor.u32 %v8052_v51, %v6474_v50  ;;  %v8025_v60 = vld [vmem:[#allocation8 + $0x350] sm:$0xf0]  ;;  %v7955_v36 = vld [vmem:[#allocation8 + $0x124] sm:$0xf]  ;;  %v6092_v38 = vld [vmem:[#allocation8 + $0x12c] sm:$0xf0] }
  0xce   : > { %2344 = vmatpush.bf16.msrb.mxu3 %v6055_v63  ;;  %v8049_v63 = vld [vmem:[#allocation8 + $0x410] sm:$0xf0]  ;;  %v6367_v1 = vor.u32 %v8025_v60, %v6366_v59  ;;  %v6095_v39 = vor.u32 %v7955_v36, %v6092_v38  ;;  %v5984_v47 = vld [vmem:[#allocation8 + $0x54] sm:$0xf0]  ;;  %v7952_v48 = vld [vmem:[#allocation8 + $0x10c] sm:$0xf] }
  0xcf   : > { %1326 = vmatpush.bf16.msrb.mxu0 %v5771_v61  ;;  %v7998_v61 = vld [vmem:[#allocation8 + $0x278] sm:$0xf0]  ;;  %v6463_v5 = vor.u32 %v8049_v63, %v6462_v62  ;;  %v6080_v50 = vld [vmem:[#allocation8 + $0x114] sm:$0xf0]  ;;  %v8019_v53 = vld [vmem:[#allocation8 + $0x320] sm:$0xf0] }
  0xd0   : > { %1339 = vmatpush.bf16.msrb.mxu1 %v5775_v2  ;;  %v6259_v2 = vor.u32 %v7998_v61, %v6258_v57  ;;  %v6083_v51 = vor.u32 %v7952_v48, %v6080_v50  ;;  %v6438_v54 = vld [vmem:[#allocation8 + $0x3d8] sm:$0xf]  ;;  %v5972_v59 = vld [vmem:[#allocation8 + $0x3c] sm:$0xf0]  ;;  %v7949_v60 = vld [vmem:[#allocation8 + $0xf4] sm:$0xf] }
  0xd1   : > { %2332 = vmatpush.bf16.msrb.mxu2 %v5947_v12  ;;  %v6234_v12 = vld [vmem:[#allocation8 + $0x240] sm:$0xf]  ;;  %v8036_v48 = vld [vmem:[#allocation8 + $0x3ac] sm:$0xf]  ;;  %s9967_s25 = sld [smem:[#allocation50_spill]]  ;;  %s9918_s22 = sshll.u32 %s9664_s24, 3 }
  0xd2   : > { %1327 = vmatmul.bf16.vlgmr.msrb.gmra.mxu0 %v9707_v40  ;;  %2345 = vmatpush.bf16.msrb.mxu3 %v6043_v15  ;;  %v6032_v15 = vld [vmem:[#allocation8 + $0xb4] sm:$0xf0]  ;;  %v6068_v62 = vld [vmem:[#allocation8 + $0xfc] sm:$0xf0]  ;;  %v8060_v50 = vld [vmem:[#allocation8 + $0x46c] sm:$0xf] }
  0xd3   : > { %2351 = vmatpush.bf16.msra.mxu0 %v6223_v3  ;;  %1340 = vmatmul.bf16.vlgmr.msrb.gmra.mxu1 %v9707_v40  ;;  %v6174_v40 = vld [vmem:[#allocation8 + $0x1c8] sm:$0xf]  ;;  %v6150_v3 = vld [vmem:[#allocation8 + $0x198] sm:$0xf]  ;;  %v6071_v63 = vor.u32 %v7949_v60, %v6068_v62  ;;  %s9776_s20 = scalar_lea.vmem [#allocation29], %s9918_s22  ;;  %s9968_s18 = sld [smem:[#allocation59_spill]] }
  0xd4   : > { %2364 = vmatpush.bf16.msra.mxu1 %v6319_v7  ;;  %v6175_v52 = vor.u32 %v7977_v42, %v6174_v40  ;;  %v7995_v7 = vld [vmem:[#allocation8 + $0x260] sm:$0xf0]  ;;  %v6151_v8 = vor.u32 %v7971_v4, %v6150_v3  ;;  %v8022_v40 = vld [vmem:[#allocation8 + $0x338] sm:$0xf0]  ;;  %v6450_v42 = vld [vmem:[#allocation8 + $0x3f0] sm:$0xf] }
  0xd5   : > { %2377 = vmatpush.bf16.msra.mxu2 %v6415_v19  ;;  %v6247_v9 = vor.u32 %v7995_v7, %v6246_v6  ;;  %v6235_v19 = vor.u32 %v7992_v13, %v6234_v12  ;;  %v8040_v4 = vld [vmem:[#allocation8 + $0x3c8] sm:$0xf0]  ;;  %v7922_v6 = vld [vmem:[#allocation8 + $0x1c] sm:$0xf]  ;;  %v5960_v7 = vld [vmem:[#allocation8 + $0x24] sm:$0xf0] }
  0xd6   : > { %2390 = vmatpush.bf16.msra.mxu3 %v6511_v22  ;;  %v7937_v22 = vld [vmem:[#allocation8 + $0x94] sm:$0xf]  ;;  %v5963_v10 = vor.u32 %v7922_v6, %v5960_v7  ;;  %v7919_v12 = vld [vmem:[#allocation8 + $0x4] sm:$0xf]  ;;  %v5948_v13 = vld [vmem:[#allocation8 + $0xc] sm:$0xf0] }
  0xd7   : > { %2352 = vmatpush.bf16.msra.mxu0 %v6211_v16  ;;  %v7964_v16 = vld [vmem:[#allocation8 + $0x16c] sm:$0xf]  ;;  %v6023_v26 = vor.u32 %v7937_v22, %v6020_v23  ;;  %v6500_v6 = vld [vmem:[#allocation8 + $0x45c] sm:$0xf0]  ;;  %v7979_v7 = vld [vmem:[#allocation8 + $0x1e4] sm:$0xf] }
  0xd8   : > { %2365 = vmatpush.bf16.msra.mxu1 %v6307_v20  ;;  %v6035_v20 = vor.u32 %v7940_v14, %v6032_v15  ;;  %v6131_v21 = vor.u32 %v7964_v16, %v6128_v17  ;;  %v5951_v14 = vor.u32 %v7919_v12, %v5948_v13  ;;  %v7943_v15 = vld [vmem:[#allocation8 + $0xc4] sm:$0xf]  ;;  %v6044_v16 = vld [vmem:[#allocation8 + $0xcc] sm:$0xf0]  ;;  %s9969_s21 = sld [smem:[#allocation60_spill]]  ;;  %s7867_s2 = sshll.u32 %s9966_s8, 3 }
  0xd9   : > { %2378 = vmatpush.bf16.msra.mxu2 %v6403_v31  ;;  %v6104_v31 = vld [vmem:[#allocation8 + $0x144] sm:$0xf0]  ;;  %v6047_v17 = vor.u32 %v7943_v15, %v6044_v16  ;;  %v8054_v16 = vld [vmem:[#allocation8 + $0x43c] sm:$0xf]  ;;  %s9970_s9 = sld [smem:[#allocation62_spill]]  ;;  %s5439_s23 = sshll.u32 %s9776_s20, 4  ;;  %s5440_s23 = int_to_ptr.vmem [resolvable:$true] %s5439_s23 }
  0xda   : > { %2391 = vmatpush.bf16.msra.mxu3 %v6499_v34  ;;  %v6107_v33 = vor.u32 %v7958_v30, %v6104_v31  ;;  %v7931_v34 = vld [vmem:[#allocation8 + $0x64] sm:$0xf]  ;;  %v8012_v30 = vld [vmem:[#allocation8 + $0x2ec] sm:$0xf]  ;;  %v6320_v31 = vld [vmem:[#allocation8 + $0x2f4] sm:$0xf0] }
  0xdb   : > { %2353 = vmatpush.bf16.msra.mxu0 %v6199_v28  ;;  %v7934_v28 = vld [vmem:[#allocation8 + $0x7c] sm:$0xf]  ;;  %v5999_v37 = vor.u32 %v7931_v34, %v5996_v35  ;;  %v6392_v15 = vld [vmem:[#allocation8 + $0x384] sm:$0xf0] }
  0xdc   : > { %2366 = vmatpush.bf16.msra.mxu1 %v6295_v32  ;;  %v6011_v32 = vor.u32 %v7934_v28, %v6008_v29  ;;  %v6224_v28 = vld [vmem:[#allocation8 + $0x234] sm:$0xf0] }
  0xdd   : > { %2379 = vmatpush.bf16.msra.mxu2 %v6391_v43 }
  0xde   : > { %2392 = vmatpush.bf16.msra.mxu3 %v6487_v46  ;;  %v7928_v46 = vld [vmem:[#allocation8 + $0x4c] sm:$0xf] }
  0xdf   : > { %2354 = vmatpush.bf16.msra.mxu0 %v6187_v41  ;;  %v6354_v41 = vld [vmem:[#allocation8 + $0x330] sm:$0xf]  ;;  %v5987_v49 = vor.u32 %v7928_v46, %v5984_v47  ;;  %v6308_v46 = vld [vmem:[#allocation8 + $0x2dc] sm:$0xf0]  ;;  %s9205_s10 = scalar_lea.hbm %s9970_s9, 16 }
  0xe0   : > { %2367 = vmatpush.bf16.msra.mxu1 %v6283_v44  ;;  %v6355_v43 = vor.u32 %v8022_v40, %v6354_v41  ;;  %v8046_v44 = vld [vmem:[#allocation8 + $0x3f8] sm:$0xf0]  ;;  %v6323_v40 = vor.u32 %v8012_v30, %v6320_v31  ;;  %v6476_v31 = vld [vmem:[#allocation8 + $0x42c] sm:$0xf0] }
  0xe1   : > { %2380 = vmatpush.bf16.msra.mxu2 %v6379_v55  ;;  %v6451_v45 = vor.u32 %v8046_v44, %v6450_v42  ;;  %v7985_v42 = vld [vmem:[#allocation8 + $0x214] sm:$0xf] }
  0xe2   : > { %2393 = vmatpush.bf16.msra.mxu3 %v6475_v58  ;;  %v7925_v58 = vld [vmem:[#allocation8 + $0x34] sm:$0xf] }
  0xe3   : > { %2355 = vmatpush.bf16.msra.mxu0 %v6175_v52  ;;  %v6342_v52 = vld [vmem:[#allocation8 + $0x318] sm:$0xf]  ;;  %v5975_v61 = vor.u32 %v7925_v58, %v5972_v59 }
  0xe4   : > { %2368 = vmatpush.bf16.msra.mxu1 %v6271_v56  ;;  %v6343_v55 = vor.u32 %v8019_v53, %v6342_v52  ;;  %v8043_v56 = vld [vmem:[#allocation8 + $0x3e0] sm:$0xf0]  ;;  %v6512_v52 = vld [vmem:[#allocation8 + $0x474] sm:$0xf0]  ;;  %v7982_v53 = vld [vmem:[#allocation8 + $0x1fc] sm:$0xf] }
  0xe5   : > { %2381 = vmatpush.bf16.msra.mxu2 %v6367_v1  ;;  %v6439_v57 = vor.u32 %v8043_v56, %v6438_v54  ;;  %v8016_v1 = vld [vmem:[#allocation8 + $0x308] sm:$0xf0]  ;;  %v6200_v54 = vld [vmem:[#allocation8 + $0x204] sm:$0xf0] }
  0xe6   : > { %2394 = vmatpush.bf16.msra.mxu3 %v6463_v5  ;;  %v6296_v56 = vld [vmem:[#allocation8 + $0x2c4] sm:$0xf0] }
  0xe7   : > { %2356 = vmatpush.bf16.msra.mxu0 %v6163_v0  ;;  %v6330_v0 = vld [vmem:[#allocation8 + $0x300] sm:$0xf] }
  0xe8   : > { %2369 = vmatpush.bf16.msra.mxu1 %v6259_v2  ;;  %v6426_v2 = vld [vmem:[#allocation8 + $0x3c0] sm:$0xf]  ;;  %v6331_v3 = vor.u32 %v8016_v1, %v6330_v0  ;;  %v6203_v0 = vor.u32 %v7982_v53, %v6200_v54  ;;  %v8033_v1 = vld [vmem:[#allocation8 + $0x394] sm:$0xf]  ;;  %v7994_v53 = vld [vmem:[#allocation8 + $0x25c] sm:$0xf] }
  0xe9   : > { %2382 = vmatpush.bf16.msra.mxu2 %v6355_v43  ;;  %v6427_v5 = vor.u32 %v8040_v4, %v6426_v2  ;;  %v6212_v43 = vld [vmem:[#allocation8 + $0x21c] sm:$0xf0]  ;;  %v6248_v54 = vld [vmem:[#allocation8 + $0x264] sm:$0xf0] }
  0xea   : > { %2395 = vmatpush.bf16.msra.mxu3 %v6451_v45  ;;  %v8009_v45 = vld [vmem:[#allocation8 + $0x2d4] sm:$0xf]  ;;  %v6215_v47 = vor.u32 %v7985_v42, %v6212_v43  ;;  %v6404_v2 = vld [vmem:[#allocation8 + $0x39c] sm:$0xf0]  ;;  %v8024_v42 = vld [vmem:[#allocation8 + $0x34c] sm:$0xf] }
  0xeb   : > { %2357 = vmatpush.bf16.msra.mxu0 %v6151_v8  ;;  %v7946_v8 = vld [vmem:[#allocation8 + $0xdc] sm:$0xf]  ;;  %v6368_v43 = vld [vmem:[#allocation8 + $0x354] sm:$0xf0] }
  0xec   : > { %2370 = vmatpush.bf16.msra.mxu1 %v6247_v9  ;;  %v6056_v9 = vld [vmem:[#allocation8 + $0xe4] sm:$0xf0] }
  0xed   : > { %2383 = vmatpush.bf16.msra.mxu2 %v6343_v55  ;;  %v6059_v11 = vor.u32 %v7946_v8, %v6056_v9  ;;  %v8006_v55 = vld [vmem:[#allocation8 + $0x2bc] sm:$0xf]  ;;  %v6188_v8 = vld [vmem:[#allocation8 + $0x1ec] sm:$0xf0]  ;;  %v8003_v9 = vld [vmem:[#allocation8 + $0x2a4] sm:$0xf] }
  0xee   : > { %2396 = vmatpush.bf16.msra.mxu3 %v6439_v57  ;;  %v6191_v13 = vor.u32 %v7979_v7, %v6188_v8  ;;  %v7942_v7 = vld [vmem:[#allocation8 + $0xb8] sm:$0xf0]  ;;  %v6134_v8 = vld [vmem:[#allocation8 + $0x170] sm:$0xf] }
  0xef   : > { %2358 = vmatpush.bf16.msra.mxu0 %v6139_v18  ;;  %v9715_v18 = vld [vmem:[#allocation7] sm:$0x3f] }
  0xf0   : > { %2371 = vmatpush.bf16.msra.mxu1 %v6235_v19  ;;  %v1015_v19 = vperm.slane %v9715_v18, 0  ;;  %v1017_v25 = vperm.slane %v9715_v18, 2 }
  0xf1   : > { %2384 = vmatpush.bf16.msra.mxu2 %v6331_v3  ;;  %v8057_v3 = vld [vmem:[#allocation8 + $0x454] sm:$0xf] }
  0xf2   : > { %2397 = vmatpush.bf16.msra.mxu3 %v6427_v5  ;;  %v6299_v5 = vor.u32 %v8006_v55, %v6296_v56  ;;  %v6503_v12 = vor.u32 %v8057_v3, %v6500_v6  ;;  %v6236_v3 = vld [vmem:[#allocation8 + $0x24c] sm:$0xf0] }
  0xf3   : > { %2403 = vmatpush.bf16.msrb.mxu0 %v6035_v20  ;;  %v1016_v20 = vperm.slane %v9715_v18, 1  ;;  %v6038_v6 = vld [vmem:[#allocation8 + $0xb0] sm:$0xf] }
  0xf4   : > { %2416 = vmatpush.bf16.msrb.mxu1 %v6131_v21 }
  0xf7   : > { %2404 = vmatpush.bf16.msrb.mxu0 %v6023_v26  ;;  %v1018_v26 = vperm.slane %v9715_v18, 3 }
  0xf8   : > { %2417 = vmatpush.bf16.msrb.mxu1 %v6119_v27  ;;  %v7988_v27 = vld [vmem:[#allocation8 + $0x22c] sm:$0xf] }
  0xf9   : > { %v6227_v38 = vor.u32 %v7988_v27, %v6224_v28  ;;  %v8027_v27 = vld [vmem:[#allocation8 + $0x364] sm:$0xf]  ;;  %v6380_v28 = vld [vmem:[#allocation8 + $0x36c] sm:$0xf0] }
  0xfb   : > { %2405 = vmatpush.bf16.msrb.mxu0 %v6011_v32 }
  0xfc   : > { %2418 = vmatpush.bf16.msrb.mxu1 %v6107_v33 }
  0xff   : > { %2406 = vmatpush.bf16.msrb.mxu0 %v5999_v37 }
 0x100   : > { %2419 = vmatpush.bf16.msrb.mxu1 %v6095_v39 }
 0x103   : > { %2407 = vmatpush.bf16.msrb.mxu0 %v5987_v49  ;;  %v6416_v49 = vld [vmem:[#allocation8 + $0x3b4] sm:$0xf0] }
 0x104   : > { %2420 = vmatpush.bf16.msrb.mxu1 %v6083_v51  ;;  %v6311_v51 = vor.u32 %v8009_v45, %v6308_v46  ;;  %v6419_v59 = vor.u32 %v8036_v48, %v6416_v49  ;;  %v8048_v45 = vld [vmem:[#allocation8 + $0x40c] sm:$0xf]  ;;  %v6464_v48 = vld [vmem:[#allocation8 + $0x414] sm:$0xf0]  ;;  %v7970_v49 = vld [vmem:[#allocation8 + $0x19c] sm:$0xf] }
 0x105   : > { %v6467_v56 = vor.u32 %v8048_v45, %v6464_v48  ;;  %v6014_v45 = vld [vmem:[#allocation8 + $0x80] sm:$0xf] }
 0x107   : > { %2408 = vmatpush.bf16.msrb.mxu0 %v5975_v61 }
 0x108   : > { %2421 = vmatpush.bf16.msrb.mxu1 %v6071_v63  ;;  %v6515_v63 = vor.u32 %v8060_v50, %v6512_v52  ;;  %v6152_v50 = vld [vmem:[#allocation8 + $0x1a4] sm:$0xf0] }
 0x10b   : > { %2409 = vmatpush.bf16.msrb.mxu0 %v5963_v10  ;;  %v6284_v10 = vld [vmem:[#allocation8 + $0x2ac] sm:$0xf0] }
 0x10c   : > { %2422 = vmatpush.bf16.msrb.mxu1 %v6059_v11  ;;  %v6407_v11 = vor.u32 %v8033_v1, %v6404_v2  ;;  %v6140_v1 = vld [vmem:[#allocation8 + $0x18c] sm:$0xf0]  ;;  %v7991_v2 = vld [vmem:[#allocation8 + $0x244] sm:$0xf] }
 0x10f   : > { %2410 = vmatpush.bf16.msrb.mxu0 %v5951_v14  ;;  %v8030_v14 = vld [vmem:[#allocation8 + $0x37c] sm:$0xf] }
 0x110   : > { %2423 = vmatpush.bf16.msrb.mxu1 %v6047_v17  ;;  %v6287_v17 = vor.u32 %v8003_v9, %v6284_v10 }
 0x12f   : > { %v1276_v21 = vpop.f32.mrf.mxu0 }
 0x130   : > { %v1277_v22 = vadd.f32 %v1276_v21, %v1015_v19  ;;  %v1289_v23 = vpop.f32.mrf.mxu1  ;;  %v6488_v19 = vld [vmem:[#allocation8 + $0x444] sm:$0xf0]  ;;  %v6176_v21 = vld [vmem:[#allocation8 + $0x1d4] sm:$0xf0] }
 0x131   : > { %v1290_v24 = vadd.f32 %v1289_v23, %v1016_v20  ;;  %v7976_v20 = vld [vmem:[#allocation8 + $0x1cc] sm:$0xf]  ;;  %v6272_v23 = vld [vmem:[#allocation8 + $0x294] sm:$0xf0] }
 0x132   : > { %8623 = vtanh.f32 %v1277_v22  ;;  %v8000_v22 = vld [vmem:[#allocation8 + $0x28c] sm:$0xf] }
 0x133   : > { %8625 = vtanh.f32 %v1290_v24  ;;  %v6395_v24 = vor.u32 %v8030_v14, %v6392_v15  ;;  %v6275_v30 = vor.u32 %v8000_v22, %v6272_v23  ;;  %v6239_v15 = vor.u32 %v7991_v2, %v6236_v3  ;;  %v6026_v22 = vld [vmem:[#allocation8 + $0x98] sm:$0xf]  ;;  %v6302_v3 = vld [vmem:[#allocation8 + $0x2c0] sm:$0xf] }
 0x137   : > { %v1302_v29 = vpop.f32.mrf.mxu2  ;;  %v1278_v34 = vpop.f32.mrf.mxu0 }
 0x138   : > { %v1303_v32 = vadd.f32 %v1302_v29, %v1017_v25  ;;  %v1315_v33 = vpop.f32.mrf.mxu3  ;;  %v8624_v35 = vpop.eup %8623  ;;  %v6491_v25 = vor.u32 %v8054_v16, %v6488_v19  ;;  %v8051_v29 = vld [vmem:[#allocation8 + $0x424] sm:$0xf]  ;;  %v1019_v34 = vperm.slane %v9715_v18, 4  ;;  %v8042_v16 = vld [vmem:[#allocation8 + $0x3dc] sm:$0xf] }
 0x139   : > { %v1316_v36 = vadd.f32 %v1315_v33, %v1018_v26  ;;  %v1291_v37 = vpop.f32.mrf.mxu1  ;;  %v8626_v39 = vpop.eup %8625  ;;  %v9721_v41 = vpack.c.bf16 %v8624_v35, %v8624_v35  ;;  %v6179_v26 = vor.u32 %v7976_v20, %v6176_v21  ;;  %v6164_v33 = vld [vmem:[#allocation8 + $0x1bc] sm:$0xf0]  ;;  %v7997_v35 = vld [vmem:[#allocation8 + $0x274] sm:$0xf]  ;;  %v6039_v21 = vor.u32 %v7942_v7, %v6038_v6  ;;  %v5990_v7 = vld [vmem:[#allocation8 + $0x50] sm:$0xf] }
 0x13a   : > { %8627 = vtanh.f32 %v1303_v32  ;;  %v9723_v44 = vpack.c.bf16 %v8626_v39, %v8626_v39  ;;  %v7973_v32 = vld [vmem:[#allocation8 + $0x1b4] sm:$0xf]  ;;  %v1020_v37 = vperm.slane %v9715_v18, 5  ;;  %v6479_v39 = vor.u32 %v8051_v29, %v6476_v31  ;;  %v7963_v29 = vld [vmem:[#allocation8 + $0x160] sm:$0xf0] }
 0x13b   : > { %8629 = vtanh.f32 %v1316_v36  ;;  %2333 = vmatmul.bf16.vlgmr.msrb.gmra.mxu2 %v9721_v41  ;;  %v6260_v36 = vld [vmem:[#allocation8 + $0x27c] sm:$0xf0]  ;;  %v6371_v18 = vor.u32 %v8024_v42, %v6368_v43 }
 0x13c   : > { %2346 = vmatmul.bf16.vlgmr.msrb.gmra.mxu3 %v9723_v44  ;;  %2429 = vmatpush.bf16.msrb.mxu2 %v6227_v38  ;;  %v6383_v38 = vor.u32 %v8027_v27, %v6380_v28  ;;  %v7939_v27 = vld [vmem:[#allocation8 + $0xa0] sm:$0xf0]  ;;  %v6122_v28 = vld [vmem:[#allocation8 + $0x158] sm:$0xf] }
 0x13d   : > { %2442 = vmatpush.bf16.msrb.mxu3 %v6323_v40  ;;  %v6167_v40 = vor.u32 %v7973_v32, %v6164_v33  ;;  %v8015_v32 = vld [vmem:[#allocation8 + $0x304] sm:$0xf]  ;;  %v6332_v33 = vld [vmem:[#allocation8 + $0x30c] sm:$0xf0]  ;;  %v6123_v42 = vor.u32 %v7963_v29, %v6122_v28  ;;  %v7978_v28 = vld [vmem:[#allocation8 + $0x1d8] sm:$0xf0] }
 0x13e   : > { %v6335_v43 = vor.u32 %v8015_v32, %v6332_v33  ;;  %v8002_v32 = vld [vmem:[#allocation8 + $0x298] sm:$0xf0] }
 0x13f   : > { %v1304_v57 = vpop.f32.mrf.mxu2 }
 0x140   : > { %v8628_v58 = vpop.eup %8627  ;;  %v1317_v60 = vpop.f32.mrf.mxu3  ;;  %2430 = vmatpush.bf16.msrb.mxu2 %v6215_v47  ;;  %v6263_v47 = vor.u32 %v7997_v35, %v6260_v36  ;;  %v6155_v57 = vor.u32 %v7970_v49, %v6152_v50  ;;  %v6428_v35 = vld [vmem:[#allocation8 + $0x3cc] sm:$0xf0]  ;;  %v6110_v49 = vld [vmem:[#allocation8 + $0x140] sm:$0xf]  ;;  %v7960_v50 = vld [vmem:[#allocation8 + $0x148] sm:$0xf0] }
 0x141   : > { %v8630_v61 = vpop.eup %8629  ;;  %v9727_v62 = vpack.c.bf16 %v8628_v58, %v8628_v58  ;;  %2443 = vmatpush.bf16.msrb.mxu3 %v6311_v51  ;;  %v8021_v58 = vld [vmem:[#allocation8 + $0x334] sm:$0xf]  ;;  %v6230_v36 = vld [vmem:[#allocation8 + $0x230] sm:$0xf] }
 0x142   : > { %v9729_v4 = vpack.c.bf16 %v8630_v61, %v8630_v61  ;;  %v8045_v60 = vld [vmem:[#allocation8 + $0x3f4] sm:$0xf]  ;;  %v6251_v61 = vor.u32 %v7994_v53, %v6248_v54  ;;  %v7987_v53 = vld [vmem:[#allocation8 + $0x220] sm:$0xf0] }
 0x143   : > { %2359 = vmatmul.bf16.vlgmr.msra.gmra.mxu0 %v9727_v62 }
 0x144   : > { %2372 = vmatmul.bf16.vlgmr.msra.gmra.mxu1 %v9729_v4  ;;  %2455 = vmatpush.bf16.msra.mxu0 %v6419_v59  ;;  %v6356_v59 = vld [vmem:[#allocation8 + $0x33c] sm:$0xf0] }
 0x145   : > { %2468 = vmatpush.bf16.msra.mxu1 %v6515_v63  ;;  %2431 = vmatpush.bf16.msrb.mxu2 %v6203_v0  ;;  %v6452_v63 = vld [vmem:[#allocation8 + $0x3fc] sm:$0xf0]  ;;  %v7967_v0 = vld [vmem:[#allocation8 + $0x184] sm:$0xf] }
 0x146   : > { %2444 = vmatpush.bf16.msrb.mxu3 %v6299_v5  ;;  %v6359_v5 = vor.u32 %v8021_v58, %v6356_v59  ;;  %v6455_v9 = vor.u32 %v8045_v60, %v6452_v63  ;;  %v6143_v10 = vor.u32 %v7967_v0, %v6140_v1  ;;  %v7933_v58 = vld [vmem:[#allocation8 + $0x70] sm:$0xf0]  ;;  %v6098_v60 = vld [vmem:[#allocation8 + $0x128] sm:$0xf]  ;;  %v6206_v0 = vld [vmem:[#allocation8 + $0x200] sm:$0xf] }
 0x147   : > { %v7984_v1 = vld [vmem:[#allocation8 + $0x208] sm:$0xf0] }
 0x148   : > { %2456 = vmatpush.bf16.msra.mxu0 %v6407_v11  ;;  %v7966_v11 = vld [vmem:[#allocation8 + $0x178] sm:$0xf0] }
 0x149   : > { %2469 = vmatpush.bf16.msra.mxu1 %v6503_v12  ;;  %2432 = vmatpush.bf16.msrb.mxu2 %v6191_v13  ;;  %v8018_v12 = vld [vmem:[#allocation8 + $0x31c] sm:$0xf]  ;;  %v6344_v13 = vld [vmem:[#allocation8 + $0x324] sm:$0xf0] }
 0x14a   : > { %2445 = vmatpush.bf16.msrb.mxu3 %v6287_v17  ;;  %v6440_v17 = vld [vmem:[#allocation8 + $0x3e4] sm:$0xf0] }
 0x14b   : > { %v6443_v31 = vor.u32 %v8042_v16, %v6440_v17  ;;  %v6290_v16 = vld [vmem:[#allocation8 + $0x2a8] sm:$0xf]  ;;  %v8005_v17 = vld [vmem:[#allocation8 + $0x2b0] sm:$0xf0] }
 0x14c   : > { %2457 = vmatpush.bf16.msra.mxu0 %v6395_v24 }
 0x14d   : > { %2470 = vmatpush.bf16.msra.mxu1 %v6491_v25  ;;  %2433 = vmatpush.bf16.msrb.mxu2 %v6179_v26  ;;  %v6135_v25 = vor.u32 %v7966_v11, %v6134_v8  ;;  %v6347_v26 = vor.u32 %v8018_v12, %v6344_v13  ;;  %v7930_v8 = vld [vmem:[#allocation8 + $0x58] sm:$0xf0]  ;;  %v6194_v13 = vld [vmem:[#allocation8 + $0x1e8] sm:$0xf] }
 0x14e   : > { %2446 = vmatpush.bf16.msrb.mxu3 %v6275_v30  ;;  %v7954_v11 = vld [vmem:[#allocation8 + $0x118] sm:$0xf0] }
 0x14f   : > { %v1328_v46 = vpop.f32.mrf.mxu0 }
 0x150   : > { %v1329_v51 = vadd.f32 %v1328_v46, %v1019_v34  ;;  %v1341_v52 = vpop.f32.mrf.mxu1  ;;  %2458 = vmatpush.bf16.msra.mxu0 %v6383_v38  ;;  %v8039_v34 = vld [vmem:[#allocation8 + $0x3c4] sm:$0xf]  ;;  %v6027_v38 = vor.u32 %v7939_v27, %v6026_v22  ;;  %v7936_v46 = vld [vmem:[#allocation8 + $0x88] sm:$0xf0]  ;;  %v6182_v27 = vld [vmem:[#allocation8 + $0x1d0] sm:$0xf] }
 0x151   : > { %v1342_v55 = vadd.f32 %v1341_v52, %v1020_v37  ;;  %2471 = vmatpush.bf16.msra.mxu1 %v6479_v39  ;;  %2434 = vmatpush.bf16.msrb.mxu2 %v6167_v40  ;;  %v7990_v37 = vld [vmem:[#allocation8 + $0x238] sm:$0xf0]  ;;  %v6326_v39 = vld [vmem:[#allocation8 + $0x2f0] sm:$0xf]  ;;  %v6218_v52 = vld [vmem:[#allocation8 + $0x218] sm:$0xf]  ;;  %v6015_v54 = vor.u32 %v7936_v46, %v6014_v45 }
 0x152   : > { %8631 = vtanh.f32 %v1329_v51  ;;  %2447 = vmatpush.bf16.msrb.mxu3 %v6263_v47  ;;  %v8014_v40 = vld [vmem:[#allocation8 + $0x2f8] sm:$0xf0]  ;;  %v6431_v47 = vor.u32 %v8039_v34, %v6428_v35  ;;  %v6231_v48 = vor.u32 %v7990_v37, %v6230_v36  ;;  %v6219_v59 = vor.u32 %v7987_v53, %v6218_v52  ;;  %v5966_v34 = vld [vmem:[#allocation8 + $0x20] sm:$0xf]  ;;  %v7924_v35 = vld [vmem:[#allocation8 + $0x28] sm:$0xf0] }
 0x153   : > { %8633 = vtanh.f32 %v1342_v55  ;;  %2411 = vmatmul.bf16.vlgmr.msrb.gmra.mxu0 %v9721_v41  ;;  %v6327_v51 = vor.u32 %v8014_v40, %v6326_v39  ;;  %v6314_v55 = vld [vmem:[#allocation8 + $0x2d8] sm:$0xf]  ;;  %v6183_v36 = vor.u32 %v7978_v28, %v6182_v27  ;;  %v6062_v37 = vld [vmem:[#allocation8 + $0xe0] sm:$0xf]  ;;  %v7999_v46 = vld [vmem:[#allocation8 + $0x280] sm:$0xf0] }
 0x154   : > { %2424 = vmatmul.bf16.vlgmr.msrb.gmra.mxu1 %v9723_v44  ;;  %2459 = vmatpush.bf16.msra.mxu0 %v6371_v18  ;;  %v8011_v18 = vld [vmem:[#allocation8 + $0x2e0] sm:$0xf0]  ;;  %v6170_v40 = vld [vmem:[#allocation8 + $0x1b8] sm:$0xf]  ;;  %v6422_v53 = vld [vmem:[#allocation8 + $0x3b0] sm:$0xf] }
 0x155   : > { %2472 = vmatpush.bf16.msra.mxu1 %v6467_v56  ;;  %2435 = vmatpush.bf16.msrb.mxu2 %v6155_v57  ;;  %v6111_v56 = vor.u32 %v7960_v50, %v6110_v49  ;;  %v6002_v57 = vld [vmem:[#allocation8 + $0x68] sm:$0xf]  ;;  %v6315_v63 = vor.u32 %v8011_v18, %v6314_v55  ;;  %v6266_v45 = vld [vmem:[#allocation8 + $0x278] sm:$0xf]  ;;  %v7921_v49 = vld [vmem:[#allocation8 + $0x10] sm:$0xf0] }
 0x156   : > { %2448 = vmatpush.bf16.msrb.mxu3 %v6251_v61  ;;  %v7957_v61 = vld [vmem:[#allocation8 + $0x130] sm:$0xf0]  ;;  %v6003_v2 = vor.u32 %v7933_v58, %v6002_v57  ;;  %v6050_v50 = vld [vmem:[#allocation8 + $0xc8] sm:$0xf]  ;;  %v6518_v55 = vld [vmem:[#allocation8 + $0x470] sm:$0xf]  ;;  %v6267_v18 = vor.u32 %v7999_v46, %v6266_v45 }
 0x157   : > { %v1330_v14 = vpop.f32.mrf.mxu0  ;;  %v6099_v6 = vor.u32 %v7957_v61, %v6098_v60  ;;  %v6158_v57 = vld [vmem:[#allocation8 + $0x1a0] sm:$0xf]  ;;  %v7972_v58 = vld [vmem:[#allocation8 + $0x1a8] sm:$0xf0]  ;;  %v6482_v27 = vld [vmem:[#allocation8 + $0x428] sm:$0xf] }
 0x158   : > { %v8632_v19 = vpop.eup %8631  ;;  %v1343_v20 = vpop.f32.mrf.mxu1  ;;  %2460 = vmatpush.bf16.msra.mxu0 %v6359_v5  ;;  %v8008_v5 = vld [vmem:[#allocation8 + $0x2c8] sm:$0xf0]  ;;  %v7981_v14 = vld [vmem:[#allocation8 + $0x1f0] sm:$0xf0]  ;;  %v6254_v60 = vld [vmem:[#allocation8 + $0x260] sm:$0xf] }
 0x159   : > { %v8634_v23 = vpop.eup %8633  ;;  %v9737_v24 = vpack.c.bf16 %v8632_v19, %v8632_v19  ;;  %2473 = vmatpush.bf16.msra.mxu1 %v6455_v9  ;;  %2436 = vmatpush.bf16.msrb.mxu2 %v6143_v10  ;;  %v6207_v9 = vor.u32 %v7984_v1, %v6206_v0  ;;  %v6086_v10 = vld [vmem:[#allocation8 + $0x110] sm:$0xf]  ;;  %v6303_v12 = vor.u32 %v8008_v5, %v6302_v3  ;;  %v5978_v20 = vld [vmem:[#allocation8 + $0x38] sm:$0xf]  ;;  %v7996_v61 = vld [vmem:[#allocation8 + $0x268] sm:$0xf0] }
 0x15a   : > { %v9739_v30 = vpack.c.bf16 %v8634_v23, %v8634_v23  ;;  %2449 = vmatpush.bf16.msrb.mxu3 %v6239_v15  ;;  %v5991_v15 = vor.u32 %v7930_v8, %v5990_v7  ;;  %v6087_v19 = vor.u32 %v7954_v11, %v6086_v10  ;;  %v6195_v22 = vor.u32 %v7981_v14, %v6194_v13  ;;  %v6074_v23 = vld [vmem:[#allocation8 + $0xf8] sm:$0xf]  ;;  %v8035_v5 = vld [vmem:[#allocation8 + $0x3a0] sm:$0xf0]  ;;  %v7969_v10 = vld [vmem:[#allocation8 + $0x190] sm:$0xf0] }
 0x15b   : > { %2385 = vmatmul.bf16.vlgmr.msra.gmra.mxu2 %v9737_v24  ;;  %v6410_v3 = vld [vmem:[#allocation8 + $0x398] sm:$0xf]  ;;  %v6255_v7 = vor.u32 %v7996_v61, %v6254_v60  ;;  %v8059_v8 = vld [vmem:[#allocation8 + $0x460] sm:$0xf0]  ;;  %v6242_v11 = vld [vmem:[#allocation8 + $0x248] sm:$0xf] }
 0x15c   : > { %2398 = vmatmul.bf16.vlgmr.msra.gmra.mxu3 %v9739_v30  ;;  %2461 = vmatpush.bf16.msra.mxu0 %v6347_v26  ;;  %v6291_v26 = vor.u32 %v8005_v17, %v6290_v16  ;;  %v6411_v13 = vor.u32 %v8035_v5, %v6410_v3  ;;  %v6398_v16 = vld [vmem:[#allocation8 + $0x380] sm:$0xf]  ;;  %v8032_v17 = vld [vmem:[#allocation8 + $0x388] sm:$0xf0]  ;;  %v8053_v28 = vld [vmem:[#allocation8 + $0x430] sm:$0xf0] }
 0x15d   : > { %2481 = vmatpush.bf16.msra.mxu2 %v6039_v21  ;;  %2474 = vmatpush.bf16.msra.mxu1 %v6443_v31  ;;  %v7927_v21 = vld [vmem:[#allocation8 + $0x40] sm:$0xf0]  ;;  %v6278_v31 = vld [vmem:[#allocation8 + $0x290] sm:$0xf]  ;;  %v8044_v45 = vld [vmem:[#allocation8 + $0x3e8] sm:$0xf0] }
 0x15e   : > { %2494 = vmatpush.bf16.msra.mxu3 %v6135_v25  ;;  %v7951_v25 = vld [vmem:[#allocation8 + $0x100] sm:$0xf0]  ;;  %v5979_v29 = vor.u32 %v7927_v21, %v5978_v20  ;;  %v6279_v39 = vor.u32 %v8002_v32, %v6278_v31  ;;  %v6494_v20 = vld [vmem:[#allocation8 + $0x440] sm:$0xf]  ;;  %v8056_v21 = vld [vmem:[#allocation8 + $0x448] sm:$0xf0] }
 0x15f   : > { %v6075_v33 = vor.u32 %v7951_v25, %v6074_v23  ;;  %v6495_v23 = vor.u32 %v8056_v21, %v6494_v20  ;;  %v6386_v25 = vld [vmem:[#allocation8 + $0x368] sm:$0xf]  ;;  %v6374_v31 = vld [vmem:[#allocation8 + $0x350] sm:$0xf]  ;;  %v8074_v60 = vld [vmem:[#allocation10 + $0x54] sm:$0xf0] }
 0x160   : > { %2462 = vmatpush.bf16.msra.mxu0 %v6335_v43  ;;  %v5967_v43 = vor.u32 %v7924_v35, %v5966_v34  ;;  %v6470_v32 = vld [vmem:[#allocation8 + $0x410] sm:$0xf]  ;;  %v8077_v61 = vld [vmem:[#allocation10 + $0x74] sm:$0xf]  ;;  %v6572_v5 = vld [vmem:[#allocation10 + $0x68] sm:$0xf0] }
 0x161   : > { %2482 = vmatpush.bf16.msra.mxu2 %v6027_v38  ;;  %2475 = vmatpush.bf16.msra.mxu1 %v6431_v47  ;;  %v7948_v38 = vld [vmem:[#allocation8 + $0xe8] sm:$0xf0]  ;;  %v5954_v47 = vld [vmem:[#allocation8 + $0x8] sm:$0xf]  ;;  %v6530_v20 = vld [vmem:[#allocation10 + $0x10] sm:$0xf] }
 0x162   : > { %2495 = vmatpush.bf16.msra.mxu3 %v6123_v42  ;;  %v7975_v42 = vld [vmem:[#allocation8 + $0x1c0] sm:$0xf0]  ;;  %v8066_v21 = vld [vmem:[#allocation10 + $0x14] sm:$0xf0] }
 0x163   : > { %2463 = vmatmul.bf16.vlgmr.msra.gmra.mxu0 %v9737_v24  ;;  %v6171_v52 = vor.u32 %v7975_v42, %v6170_v40  ;;  %v6350_v42 = vld [vmem:[#allocation8 + $0x320] sm:$0xf] }
 0x164   : > { %2507 = vmatpush.bf16.msrb.mxu0 %v6231_v48  ;;  %2476 = vmatmul.bf16.vlgmr.msra.gmra.mxu1 %v9739_v30  ;;  %v6063_v48 = vor.u32 %v7948_v38, %v6062_v37  ;;  %v8023_v37 = vld [vmem:[#allocation8 + $0x340] sm:$0xf0]  ;;  %v6458_v38 = vld [vmem:[#allocation8 + $0x3f8] sm:$0xf] }
 0x165   : > { %2520 = vmatpush.bf16.msrb.mxu1 %v6327_v51  ;;  %2483 = vmatpush.bf16.msra.mxu2 %v6015_v54  ;;  %v7945_v51 = vld [vmem:[#allocation8 + $0xd0] sm:$0xf0]  ;;  %v8038_v54 = vld [vmem:[#allocation8 + $0x3b8] sm:$0xf0] }
 0x166   : > { %2496 = vmatpush.bf16.msra.mxu3 %v6111_v56  ;;  %v8062_v56 = vld [vmem:[#allocation8 + $0x478] sm:$0xf0]  ;;  %v6423_v0 = vor.u32 %v8038_v54, %v6422_v53  ;;  %v6578_v54 = vld [vmem:[#allocation10 + $0x70] sm:$0xf] }
 0x167   : > { %v6519_v1 = vor.u32 %v8062_v56, %v6518_v55  ;;  %v8078_v55 = vld [vmem:[#allocation10 + $0x74] sm:$0xf0]  ;;  %v6570_v56 = vld [vmem:[#allocation10 + $0x60] sm:$0xf] }
 0x168   : > { %2508 = vmatpush.bf16.msrb.mxu0 %v6219_v59  ;;  %v5955_v59 = vor.u32 %v7921_v49, %v5954_v47  ;;  %v8017_v49 = vld [vmem:[#allocation8 + $0x310] sm:$0xf0] }
 0x169   : > { %2521 = vmatpush.bf16.msrb.mxu1 %v6315_v63  ;;  %2484 = vmatpush.bf16.msra.mxu2 %v6003_v2  ;;  %v6051_v63 = vor.u32 %v7945_v51, %v6050_v50  ;;  %v6159_v2 = vor.u32 %v7972_v58, %v6158_v57  ;;  %v6434_v50 = vld [vmem:[#allocation8 + $0x3c8] sm:$0xf]  ;;  %v8041_v51 = vld [vmem:[#allocation8 + $0x3d0] sm:$0xf0] }
 0x16a   : > { %2497 = vmatpush.bf16.msra.mxu3 %v6099_v6  ;;  %v6506_v6 = vld [vmem:[#allocation8 + $0x458] sm:$0xf]  ;;  %v6435_v53 = vor.u32 %v8041_v51, %v6434_v50  ;;  %v8076_v57 = vld [vmem:[#allocation10 + $0x64] sm:$0xf0] }
 0x16b   : > { %2437 = vmatmul.bf16.vlgmr.msrb.gmra.mxu2 %v9727_v62  ;;  %v6507_v14 = vor.u32 %v8059_v8, %v6506_v6  ;;  %v6571_v58 = vor.u32 %v8076_v57, %v6570_v56  ;;  %v8070_v8 = vld [vmem:[#allocation10 + $0x34] sm:$0xf0]  ;;  %v6524_v57 = vld [vmem:[#allocation10 + $0x8] sm:$0xf0] }
 0x16c   : > { %2509 = vmatpush.bf16.msrb.mxu0 %v6207_v9  ;;  %2450 = vmatmul.bf16.vlgmr.msrb.gmra.mxu3 %v9729_v4  ;;  %v6146_v9 = vld [vmem:[#allocation8 + $0x188] sm:$0xf] }
 0x16d   : > { %2522 = vmatpush.bf16.msrb.mxu1 %v6303_v12  ;;  %2485 = vmatpush.bf16.msra.mxu2 %v5991_v15  ;;  %v7993_v12 = vld [vmem:[#allocation8 + $0x250] sm:$0xf0]  ;;  %v6147_v15 = vor.u32 %v7969_v10, %v6146_v9 }
 0x16e   : > { %2498 = vmatpush.bf16.msra.mxu3 %v6087_v19  ;;  %v6243_v19 = vor.u32 %v7993_v12, %v6242_v11  ;;  %v8073_v10 = vld [vmem:[#allocation10 + $0x54] sm:$0xf]  ;;  %v6564_v11 = vld [vmem:[#allocation10 + $0x58] sm:$0xf0]  ;;  %v6538_v12 = vld [vmem:[#allocation10 + $0x20] sm:$0xf] }
 0x170   : > { %2510 = vmatpush.bf16.msrb.mxu0 %v6195_v22  ;;  %v6399_v22 = vor.u32 %v8032_v17, %v6398_v16  ;;  %v8071_v16 = vld [vmem:[#allocation10 + $0x44] sm:$0xf]  ;;  %v6556_v17 = vld [vmem:[#allocation10 + $0x48] sm:$0xf0] }
 0x171   : > { %2523 = vmatpush.bf16.msrb.mxu1 %v6291_v26  ;;  %2486 = vmatpush.bf16.msra.mxu2 %v5979_v29  ;;  %v8029_v26 = vld [vmem:[#allocation8 + $0x370] sm:$0xf0] }
 0x172   : > { %2499 = vmatpush.bf16.msra.mxu3 %v6075_v33  ;;  %v6387_v29 = vor.u32 %v8029_v26, %v6386_v25  ;;  %v8050_v33 = vld [vmem:[#allocation8 + $0x418] sm:$0xf0] }
 0x173   : > { %v6471_v35 = vor.u32 %v8050_v33, %v6470_v32  ;;  %v6548_v25 = vld [vmem:[#allocation10 + $0x38] sm:$0xf0]  ;;  %v8067_v32 = vld [vmem:[#allocation10 + $0x24] sm:$0xf] }
 0x174   : > { %2511 = vmatpush.bf16.msrb.mxu0 %v6183_v36  ;;  %v6362_v36 = vld [vmem:[#allocation8 + $0x338] sm:$0xf] }
 0x175   : > { %2524 = vmatpush.bf16.msrb.mxu1 %v6279_v39  ;;  %2487 = vmatpush.bf16.msra.mxu2 %v5967_v43  ;;  %v8047_v39 = vld [vmem:[#allocation8 + $0x400] sm:$0xf0]  ;;  %v6446_v43 = vld [vmem:[#allocation8 + $0x3e0] sm:$0xf] }
 0x176   : > { %2500 = vmatpush.bf16.msra.mxu3 %v6063_v48  ;;  %v6459_v40 = vor.u32 %v8047_v39, %v6458_v38  ;;  %v6447_v47 = vor.u32 %v8044_v45, %v6446_v43  ;;  %v6338_v48 = vld [vmem:[#allocation8 + $0x308] sm:$0xf]  ;;  %v6644_v38 = vld [vmem:[#allocation10 + $0xf8] sm:$0xf0]  ;;  %v8065_v43 = vld [vmem:[#allocation10 + $0x14] sm:$0xf] }
 0x178   : > { %2512 = vmatpush.bf16.msrb.mxu0 %v6171_v52  ;;  %v6339_v52 = vor.u32 %v8017_v49, %v6338_v48  ;;  %v6636_v48 = vld [vmem:[#allocation10 + $0xe8] sm:$0xf0] }
 0x179   : > { %2525 = vmatpush.bf16.msrb.mxu1 %v6267_v18  ;;  %2488 = vmatpush.bf16.msra.mxu2 %v5955_v59  ;;  %v6579_v18 = vor.u32 %v8078_v55, %v6578_v54  ;;  %v6562_v59 = vld [vmem:[#allocation10 + $0x50] sm:$0xf]  ;;  %v8063_v54 = vld [vmem:[#allocation10 + $0x4] sm:$0xf] }
 0x17a   : > { %2501 = vmatpush.bf16.msra.mxu3 %v6051_v63  ;;  %v6563_v63 = vor.u32 %v8074_v60, %v6562_v59  ;;  %v6628_v59 = vld [vmem:[#allocation10 + $0xd8] sm:$0xf0]  ;;  %v9762_v60 = vld [vmem:[%s9967_s25] sm:$0x7]  ;;  %s5437_s25 = scalar_lea.hbm %s9970_s9, %s7867_s2 }
 0x17b   : > { %s5441_s6 = sshll.u32 %s5437_s25, 4  ;;  %s5442_s6 = int_to_ptr.hbm [resolvable:$true] %s5441_s6 }
 0x17c   : > { %2513 = vmatpush.bf16.msrb.mxu0 %v6159_v2  ;;  %2489 = vmatmul.bf16.vlgmr.msra.gmra.mxu2 %v9721_v41  ;;  %v6483_v41 = vor.u32 %v8053_v28, %v6482_v27  ;;  %v8072_v2 = vld [vmem:[#allocation10 + $0x44] sm:$0xf0]  ;;  %v6522_v27 = vld [vmem:[#allocation10] sm:$0xf]  ;;  %s9199_s0 = sshra.s32 %s5442_s6, 4  ;;  %s9200_s0 = int_to_ptr.hbm [resolvable:$true] %s9199_s0 }
 0x17d   : > { %2533 = vmatpush.bf16.msrb.mxu2 %v6423_v0  ;;  %2526 = vmatpush.bf16.msrb.mxu1 %v6255_v7  ;;  %v6580_v0 = vld [vmem:[#allocation10 + $0x78] sm:$0xf0]  ;;  %v6546_v7 = vld [vmem:[#allocation10 + $0x30] sm:$0xf]  ;;  %v8064_v28 = vld [vmem:[#allocation10 + $0x4] sm:$0xf0]  ;;  %p9206_p12 = scmp.lt.s32.totalorder %s9200_s0, %s9970_s9 }
 0x17e   : > { %2546 = vmatpush.bf16.msrb.mxu3 %v6519_v1  ;;  %v6554_v1 = vld [vmem:[#allocation10 + $0x40] sm:$0xf]  ;;  %v6583_v3 = vor.u32 %v8077_v61, %v6580_v0  ;;  %v6547_v9 = vor.u32 %v8070_v8, %v6546_v7  ;;  %v6610_v7 = vld [vmem:[#allocation10 + $0xb0] sm:$0xf]  ;;  %v8086_v8 = vld [vmem:[#allocation10 + $0xb4] sm:$0xf0] }
 0x17f   : > { %2502 = vmatmul.bf16.vlgmr.msra.gmra.mxu3 %v9723_v44  ;;  %v8026_v44 = vld [vmem:[#allocation8 + $0x358] sm:$0xf0]  ;;  %s9201_s16 = scalar_lea.hbm %s9200_s0, 8 }
 0x180   : > { %2514 = vmatpush.bf16.msrb.mxu0 %v6147_v15  ;;  %v6375_v34 = vor.u32 %v8026_v44, %v6374_v31  ;;  %v6642_v31 = vld [vmem:[#allocation10 + $0xf0] sm:$0xf]  ;;  %v8094_v44 = vld [vmem:[#allocation10 + $0xf4] sm:$0xf0]  ;;  %p9202_p1 = scmp.ne.s32.totalorder %s9200_s0, %s9201_s16  ;;  %p9207_p7 = scmp.lt.s32.totalorder %s9205_s10, %s9201_s16 }
 0x181   : > { %2534 = vmatpush.bf16.msrb.mxu2 %v6411_v13  ;;  %2527 = vmatpush.bf16.msrb.mxu1 %v6243_v19  ;;  %v6567_v13 = vor.u32 %v8073_v10, %v6564_v11  ;;  %v6559_v19 = vor.u32 %v8071_v16, %v6556_v17  ;;  %v6602_v16 = vld [vmem:[#allocation10 + $0xa0] sm:$0xf]  ;;  %v8084_v17 = vld [vmem:[#allocation10 + $0xa4] sm:$0xf0] }
 0x182   : > { %2547 = vmatpush.bf16.msrb.mxu3 %v6507_v14  ;;  %v8068_v14 = vld [vmem:[#allocation10 + $0x24] sm:$0xf0]  ;;  %p9203_p3 = pnand %p9202_p1, %p9633_p4  ;;  %p9208_p8 = por %p9207_p7, %p9206_p12 }
 0x183   : > { %2515 = vmatmul.bf16.vlgmr.msrb.gmra.mxu0 %v9727_v62  ;;  %v6363_v62 = vor.u32 %v8023_v37, %v6362_v36  ;;  %v6539_v15 = vor.u32 %v8068_v14, %v6538_v12  ;;  %v6540_v36 = vld [vmem:[#allocation10 + $0x28] sm:$0xf0]  ;;  %v8093_v37 = vld [vmem:[#allocation10 + $0xf4] sm:$0xf]  ;;  %v6611_v12 = vor.u32 %v8086_v8, %v6610_v7 }
 0x184   : > { %2528 = vmatmul.bf16.vlgmr.msrb.gmra.mxu1 %v9729_v4  ;;  %v8020_v4 = vld [vmem:[#allocation8 + $0x328] sm:$0xf0]  ;;  %2859 = vmatpush.bf16.msra.mxu0 %v6579_v18  ;;  %p9204_p5 = pneg %p9203_p3 }
 0x185   : > { %2535 = vmatpush.bf16.msrb.mxu2 %v6399_v22  ;;  %v6351_v46 = vor.u32 %v8020_v4, %v6350_v42  ;;  %v8069_v22 = vld [vmem:[#allocation10 + $0x34] sm:$0xf]  ;;  %v6634_v42 = vld [vmem:[#allocation10 + $0xe0] sm:$0xf]  ;;  %v8092_v4 = vld [vmem:[#allocation10 + $0xe4] sm:$0xf0] }
 0x186   : > { %2548 = vmatpush.bf16.msrb.mxu3 %v6495_v23  ;;  %v6531_v23 = vor.u32 %v8066_v21, %v6530_v20  ;;  %v6551_v26 = vor.u32 %v8069_v22, %v6548_v25  ;;  %v6635_v45 = vor.u32 %v8092_v4, %v6634_v42  ;;  %v6603_v21 = vor.u32 %v8084_v17, %v6602_v16  ;;  %v6604_v22 = vld [vmem:[#allocation10 + $0xa8] sm:$0xf0]  ;;  %v6594_v25 = vld [vmem:[#allocation10 + $0x90] sm:$0xf]  ;;  %p9209_p9 = pnand %p9208_p8, %p9204_p5 }
 0x187   : > { %v6684_v16 = vld [vmem:[#allocation10 + $0x148] sm:$0xf0] }
 0x188   : > { %2860 = vmatpush.bf16.msra.mxu0 %v6571_v58  ;;  %v8089_v58 = vld [vmem:[#allocation10 + $0xd4] sm:$0xf] }
 0x189   : > { %2536 = vmatpush.bf16.msrb.mxu2 %v6387_v29  ;;  %v6631_v0 = vor.u32 %v8089_v58, %v6628_v59  ;;  %v8107_v59 = vld [vmem:[#allocation10 + $0x164] sm:$0xf] }
 0x18a   : > { %2549 = vmatpush.bf16.msrb.mxu3 %v6483_v41  ;;  %v6523_v41 = vor.u32 %v8064_v28, %v6522_v27  ;;  %v8081_v27 = vld [vmem:[#allocation10 + $0x94] sm:$0xf] }
 0x18c   : > { %2861 = vmatpush.bf16.msra.mxu0 %v6563_v63  ;;  %v6527_v63 = vor.u32 %v8063_v54, %v6524_v57  ;;  %v6698_v54 = vld [vmem:[#allocation10 + $0x160] sm:$0xf] }
 0x18d   : > { %2537 = vmatpush.bf16.msrb.mxu2 %v6375_v34 }
 0x18e   : > { %2550 = vmatpush.bf16.msrb.mxu3 %v6471_v35  ;;  %v6643_v35 = vor.u32 %v8094_v44, %v6642_v31  ;;  %v6596_v31 = vld [vmem:[#allocation10 + $0x98] sm:$0xf0] }
 0x190   : > { %2872 = vmatpush.bf16.msra.mxu1 %v6643_v35  ;;  %v6586_v35 = vld [vmem:[#allocation10 + $0x80] sm:$0xf] }
 0x191   : > { %2538 = vmatpush.bf16.msrb.mxu2 %v6363_v62  ;;  %v6543_v62 = vor.u32 %v8067_v32, %v6540_v36  ;;  %v6599_v32 = vor.u32 %v8081_v27, %v6596_v31  ;;  %v8080_v36 = vld [vmem:[#allocation10 + $0x84] sm:$0xf0]  ;;  %v6666_v31 = vld [vmem:[#allocation10 + $0x120] sm:$0xf] }
 0x192   : > { %2551 = vmatpush.bf16.msrb.mxu3 %v6459_v40  ;;  %v6647_v40 = vor.u32 %v8093_v37, %v6644_v38  ;;  %v6587_v38 = vor.u32 %v8080_v36, %v6586_v35 }
 0x194   : > { %2873 = vmatpush.bf16.msra.mxu1 %v6635_v45 }
 0x195   : > { %2539 = vmatpush.bf16.msrb.mxu2 %v6351_v46  ;;  %v6532_v46 = vld [vmem:[#allocation10 + $0x18] sm:$0xf0] }
 0x196   : > { %2552 = vmatpush.bf16.msrb.mxu3 %v6447_v47  ;;  %v8091_v47 = vld [vmem:[#allocation10 + $0xe4] sm:$0xf]  ;;  %v6535_v49 = vor.u32 %v8065_v43, %v6532_v46 }
 0x197   : > { %v6639_v50 = vor.u32 %v8091_v47, %v6636_v48  ;;  %v1552_v47 = vperm.slane %v9762_v60, 1 }
 0x199   : > { %2540 = vmatpush.bf16.msrb.mxu2 %v6339_v52  ;;  %v6626_v52 = vld [vmem:[#allocation10 + $0xd0] sm:$0xf] }
 0x19a   : > { %2553 = vmatpush.bf16.msrb.mxu3 %v6435_v53  ;;  %v8090_v53 = vld [vmem:[#allocation10 + $0xd4] sm:$0xf0] }
 0x19b   : > { %v6627_v56 = vor.u32 %v8090_v53, %v6626_v52  ;;  %v8109_v52 = vld [vmem:[#allocation10 + $0x174] sm:$0xf]  ;;  %v6708_v53 = vld [vmem:[#allocation10 + $0x178] sm:$0xf0] }
 0x19c   : > { %2541 = vmatmul.bf16.vlgmr.msrb.gmra.mxu2 %v9737_v24  ;;  %v6555_v24 = vor.u32 %v8072_v2, %v6554_v1  ;;  %v6618_v1 = vld [vmem:[#allocation10 + $0xc0] sm:$0xf]  ;;  %v8088_v2 = vld [vmem:[#allocation10 + $0xc4] sm:$0xf0]  ;;  %v6711_v58 = vor.u32 %v8109_v52, %v6708_v53 }
 0x19d   : > { %2554 = vmatmul.bf16.vlgmr.msrb.gmra.mxu3 %v9739_v30  ;;  %v8075_v30 = vld [vmem:[#allocation10 + $0x64] sm:$0xf]  ;;  %2874 = vmatpush.bf16.msra.mxu1 %v6627_v56 }
 0x19e   : > { %2898 = vmatpush.bf16.msra.mxu3 %v6583_v3  ;;  %v6575_v6 = vor.u32 %v8075_v30, %v6572_v5  ;;  %2862 = vmatpush.bf16.msra.mxu0 %v6555_v24  ;;  %v8087_v3 = vld [vmem:[#allocation10 + $0xc4] sm:$0xf]  ;;  %v1551_v24 = vperm.slane %v9762_v60, 0  ;;  %v6619_v30 = vor.u32 %v8088_v2, %v6618_v1  ;;  %v6620_v5 = vld [vmem:[#allocation10 + $0xc8] sm:$0xf0] }
 0x1a1   : > { %2875 = vmatpush.bf16.msra.mxu1 %v6619_v30  ;;  %v8105_v30 = vld [vmem:[#allocation10 + $0x154] sm:$0xf] }
 0x1a2   : > { %2899 = vmatpush.bf16.msra.mxu3 %v6575_v6  ;;  %2863 = vmatpush.bf16.msra.mxu0 %v6547_v9  ;;  %v6623_v6 = vor.u32 %v8087_v3, %v6620_v5  ;;  %v8085_v9 = vld [vmem:[#allocation10 + $0xb4] sm:$0xf]  ;;  %v6690_v3 = vld [vmem:[#allocation10 + $0x150] sm:$0xf]  ;;  %v6692_v5 = vld [vmem:[#allocation10 + $0x158] sm:$0xf0] }
 0x1a5   : > { %2876 = vmatpush.bf16.msra.mxu1 %v6611_v12  ;;  %v6682_v12 = vld [vmem:[#allocation10 + $0x140] sm:$0xf] }
 0x1a6   : > { %2900 = vmatpush.bf16.msra.mxu3 %v6567_v13  ;;  %2864 = vmatpush.bf16.msra.mxu0 %v6539_v15  ;;  %v6612_v13 = vld [vmem:[#allocation10 + $0xb8] sm:$0xf0] }
 0x1a7   : > { %v6615_v15 = vor.u32 %v8085_v9, %v6612_v13  ;;  %v8104_v13 = vld [vmem:[#allocation10 + $0x144] sm:$0xf0] }
 0x1a9   : > { %2877 = vmatpush.bf16.msra.mxu1 %v6603_v21 }
 0x1aa   : > { %2901 = vmatpush.bf16.msra.mxu3 %v6559_v19  ;;  %2865 = vmatpush.bf16.msra.mxu0 %v6531_v23  ;;  %v8083_v19 = vld [vmem:[#allocation10 + $0xa4] sm:$0xf] }
 0x1ab   : > { %v6607_v23 = vor.u32 %v8083_v19, %v6604_v22  ;;  %v6683_v19 = vor.u32 %v8104_v13, %v6682_v12  ;;  %v6674_v22 = vld [vmem:[#allocation10 + $0x130] sm:$0xf] }
 0x1ac   : > { %v8116_v12 = vld [vmem:[#allocation13 + $0x28] sm:$0xff] }
 0x1ae   : > { %2902 = vmatpush.bf16.msra.mxu3 %v6551_v26  ;;  %2866 = vmatpush.bf16.msra.mxu0 %v6523_v41  ;;  %v8082_v26 = vld [vmem:[#allocation10 + $0x94] sm:$0xf0] }
 0x1af   : > { %v6595_v41 = vor.u32 %v8082_v26, %v6594_v25  ;;  %v6676_v25 = vld [vmem:[#allocation10 + $0x138] sm:$0xf0] }
 0x1b1   : > { %2878 = vmatpush.bf16.msra.mxu1 %v6595_v41 }
 0x1b2   : > { %2903 = vmatpush.bf16.msra.mxu3 %v6543_v62  ;;  %2911 = vmatpush.bf16.msrb.mxu0 %v6647_v40  ;;  %v6588_v62 = vld [vmem:[#allocation10 + $0x88] sm:$0xf0] }
 0x1b5   : > { %2879 = vmatpush.bf16.msra.mxu1 %v6587_v38 }
 0x1b6   : > { %2904 = vmatpush.bf16.msra.mxu3 %v6535_v49  ;;  %2912 = vmatpush.bf16.msrb.mxu0 %v6639_v50  ;;  %v6706_v50 = vld [vmem:[#allocation10 + $0x170] sm:$0xf] }
 0x1b9   : > { %2924 = vmatpush.bf16.msrb.mxu1 %v6711_v58 }
 0x1ba   : > { %2905 = vmatpush.bf16.msra.mxu3 %v6527_v63  ;;  %2913 = vmatpush.bf16.msrb.mxu0 %v6631_v0 }
 0x1be   : > { %v2334_v29 = vpop.f32.mrf.mxu2  ;;  %2914 = vmatpush.bf16.msrb.mxu0 %v6623_v6 }
 0x1bf   : > { %v9753_v33 = vpop.f32.mrf.mxu3  ;;  %v2335_v10 = vadd.f32 %v2334_v29, %v1551_v24  ;;  %v8106_v24 = vld [vmem:[#allocation10 + $0x154] sm:$0xf0] }
 0x1c0   : > { %v9755_v34 = vpop.f32.mrf.mxu0  ;;  %v6691_v8 = vor.u32 %v8106_v24, %v6690_v3 }
 0x1c1   : > { %v9757_v39 = vpop.f32.mrf.mxu1  ;;  %v2348_v20 = vadd.f32 %v9753_v33, %v2335_v10  ;;  %v8079_v33 = vld [vmem:[#allocation10 + $0x84] sm:$0xf] }
 0x1c2   : > { %2915 = vmatpush.bf16.msrb.mxu0 %v6615_v15  ;;  %v6591_v42 = vor.u32 %v8079_v33, %v6588_v62  ;;  %v8103_v15 = vld [vmem:[#allocation10 + $0x144] sm:$0xf]  ;;  %v6668_v33 = vld [vmem:[#allocation10 + $0x128] sm:$0xf0] }
 0x1c3   : > { %v2361_v28 = vadd.f32 %v9755_v34, %v2348_v20  ;;  %v6687_v21 = vor.u32 %v8103_v15, %v6684_v16  ;;  %v8123_v15 = vld [vmem:[#allocation13 + $0x60] sm:$0xff] }
 0x1c4   : > { %v8115_v16 = vld [vmem:[#allocation13 + $0x20] sm:$0xff] }
 0x1c5   : > { %v2374_v37 = vadd.f32 %v9757_v39, %v2361_v28 }
 0x1c6   : > { %v2336_v51 = vpop.f32.mrf.mxu2  ;;  %2916 = vmatpush.bf16.msrb.mxu0 %v6607_v23  ;;  %v8102_v23 = vld [vmem:[#allocation10 + $0x134] sm:$0xf0] }
 0x1c7   : > { %v2349_v55 = vpop.f32.mrf.mxu3  ;;  %v8110_v51 = vld [vmem:[#allocation10 + $0x174] sm:$0xf0]  ;;  %v6675_v28 = vor.u32 %v8102_v23, %v6674_v22 }
 0x1c8   : > { %v2362_v18 = vpop.f32.mrf.mxu0  ;;  %v6707_v39 = vor.u32 %v8110_v51, %v6706_v50  ;;  %v8108_v55 = vld [vmem:[#allocation10 + $0x164] sm:$0xf0]  ;;  %v8095_v51 = vld [vmem:[#allocation10 + $0x104] sm:$0xf] }
 0x1c9   : > { %v2375_v61 = vpop.f32.mrf.mxu1  ;;  %v6699_v1 = vor.u32 %v8108_v55, %v6698_v54  ;;  %v8096_v50 = vld [vmem:[#allocation10 + $0x104] sm:$0xf0] }
 0x1ca   : > { %2917 = vmatpush.bf16.msrb.mxu0 %v6599_v32  ;;  %v6700_v61 = vld [vmem:[#allocation10 + $0x168] sm:$0xf0]  ;;  %2885 = vmatpush.bf16.msra.mxu2 %v6707_v39  ;;  %v8099_v32 = vld [vmem:[#allocation10 + $0x124] sm:$0xf] }
 0x1cb   : > { %v6703_v2 = vor.u32 %v8107_v59, %v6700_v61  ;;  %v6652_v39 = vld [vmem:[#allocation10 + $0x108] sm:$0xf0] }
 0x1cc   : > { %v6655_v55 = vor.u32 %v8095_v51, %v6652_v39  ;;  %v8130_v39 = vld [vmem:[#allocation16 + $0x18] sm:$0xff] }
 0x1cd   : > { %2925 = vmatpush.bf16.msrb.mxu1 %v6703_v2 }
 0x1ce   : > { %2918 = vmatpush.bf16.msrb.mxu0 %v6591_v42  ;;  %2886 = vmatpush.bf16.msra.mxu2 %v6699_v1 }
 0x1d0   : > { %v2412_v11 = vpop.f32.mrf.mxu0 }
 0x1d1   : > { %v9765_v14 = vpop.f32.mrf.mxu1  ;;  %v2413_v56 = vadd.f32 %v2412_v11, %v1552_v47  ;;  %v6695_v11 = vor.u32 %v8105_v30, %v6692_v5  ;;  %v6660_v47 = vld [vmem:[#allocation10 + $0x118] sm:$0xf0] }
 0x1d2   : > { %2887 = vmatpush.bf16.msra.mxu2 %v6691_v8  ;;  %v8118_v8 = vld [vmem:[#allocation13 + $0x38] sm:$0xff] }
 0x1d3   : > { %v2426_v6 = vadd.f32 %v9765_v14, %v2413_v56  ;;  %2926 = vmatpush.bf16.msrb.mxu1 %v6695_v11  ;;  %v8101_v14 = vld [vmem:[#allocation10 + $0x134] sm:$0xf]  ;;  %v8124_v11 = vld [vmem:[#allocation13 + $0x68] sm:$0xff] }
 0x1d4   : > { %v6679_v41 = vor.u32 %v8101_v14, %v6676_v25  ;;  %v8121_v25 = vld [vmem:[#allocation13 + $0x50] sm:$0xff] }
 0x1d6   : > { %2888 = vmatpush.bf16.msra.mxu2 %v6683_v19  ;;  %v8122_v19 = vld [vmem:[#allocation13 + $0x58] sm:$0xff] }
 0x1d7   : > { %2927 = vmatpush.bf16.msrb.mxu1 %v6687_v21 }
 0x1d8   : > { %v2414_v29 = vpop.f32.mrf.mxu0 }
 0x1d9   : > { %v2427_v44 = vpop.f32.mrf.mxu1 }
 0x1da   : > { %2889 = vmatpush.bf16.msra.mxu2 %v6675_v28  ;;  %v8100_v44 = vld [vmem:[#allocation10 + $0x124] sm:$0xf0]  ;;  %v8113_v28 = vld [vmem:[#allocation13 + $0x10] sm:$0xff] }
 0x1db   : > { %2928 = vmatpush.bf16.msrb.mxu1 %v6679_v41  ;;  %v6667_v36 = vor.u32 %v8100_v44, %v6666_v31  ;;  %v8112_v41 = vld [vmem:[#allocation13 + $0x8] sm:$0xff]  ;;  %v8111_v31 = vld [vmem:[#allocation13] sm:$0xff] }
 0x1dc   : > { %v8134_v44 = vld [vmem:[#allocation16 + $0x38] sm:$0xff] }
 0x1de   : > { %v2386_v40 = vpop.f32.mrf.mxu2  ;;  %2890 = vmatpush.bf16.msra.mxu2 %v6667_v36  ;;  %v8132_v36 = vld [vmem:[#allocation16 + $0x28] sm:$0xff] }
 0x1df   : > { %v2387_v4 = vadd.f32 %v2386_v40, %v2374_v37  ;;  %v2399_v43 = vpop.f32.mrf.mxu3  ;;  %v6671_v40 = vor.u32 %v8099_v32, %v6668_v33  ;;  %v8133_v32 = vld [vmem:[#allocation16 + $0x30] sm:$0xff] }
 0x1e0   : > { %v2464_v45 = vpop.f32.mrf.mxu0 }
 0x1e1   : > { %v2400_v34 = vadd.f32 %v2399_v43, %v2387_v4  ;;  %v2477_v46 = vpop.f32.mrf.mxu1  ;;  %v6658_v43 = vld [vmem:[#allocation10 + $0x110] sm:$0xf]  ;;  %2929 = vmatpush.bf16.msrb.mxu1 %v6671_v40 }
 0x1e3   : > { %8635 = vtanh.f32 %v2400_v34  ;;  %v8098_v34 = vld [vmem:[#allocation10 + $0x114] sm:$0xf0] }
 0x1e6   : > { %v2388_v48 = vpop.f32.mrf.mxu2 }
 0x1e7   : > { %v2401_v49 = vpop.f32.mrf.mxu3 }
 0x1e8   : > { %v2466_v57 = vpop.f32.mrf.mxu0  ;;  %v6650_v49 = vld [vmem:[#allocation10 + $0x100] sm:$0xf] }
 0x1e9   : > { %v8636_v18 = vpop.eup %8635  ;;  %v2479_v0 = vpop.f32.mrf.mxu1  ;;  %v6651_v52 = vor.u32 %v8096_v50, %v6650_v49  ;;  %v1553_v57 = vperm.slane %v9762_v60, 2  ;;  %v8117_v60 = vld [vmem:[#allocation13 + $0x30] sm:$0xff] }
 0x1ea   : > { %v2562_v63 = vpack.c.bf16 %v8636_v18, %v8636_v18 }
 0x1ec   : > { %2867 = vmatmul.bf16.vlgmr.msra.gmra.mxu0 %v2562_v63  ;;  %2906 = vmatmul.bf16.vlgmr.msra.gmra.mxu3 %v2562_v63 }
 0x1ed   : > { %3169 = vmatpush.bf16.msra.mxu0 %v8134_v44 }
 0x1ee   : > { %v2438_v7 = vpop.f32.mrf.mxu2 }
 0x1ef   : > { %v2439_v9 = vadd.f32 %v2438_v7, %v2426_v6  ;;  %v2451_v10 = vpop.f32.mrf.mxu3  ;;  %v8126_v7 = vld [vmem:[#allocation13 + $0x78] sm:$0xff] }
 0x1f0   : > { %3086 = vmatpush.bf16.msrb.mxu3 %v8126_v7 }
 0x1f1   : > { %v2452_v17 = vadd.f32 %v2451_v10, %v2439_v9  ;;  %v8125_v9 = vld [vmem:[#allocation13 + $0x70] sm:$0xff]  ;;  %3170 = vmatpush.bf16.msra.mxu0 %v8133_v32 }
 0x1f3   : > { %v2465_v20 = vadd.f32 %v2464_v45, %v2452_v17  ;;  %v8097_v45 = vld [vmem:[#allocation10 + $0x114] sm:$0xf] }
 0x1f4   : > { %v6663_v48 = vor.u32 %v8097_v45, %v6660_v47  ;;  %3087 = vmatpush.bf16.msrb.mxu3 %v8125_v9  ;;  %v6898_v9 = vld [vmem:[#allocation22 + $0x70] sm:$0xf] }
 0x1f5   : > { %v2478_v26 = vadd.f32 %v2477_v46, %v2465_v20  ;;  %v6659_v46 = vor.u32 %v8098_v34, %v6658_v43  ;;  %3171 = vmatpush.bf16.msra.mxu0 %v8132_v36  ;;  %v8150_v36 = vld [vmem:[#allocation22 + $0x34] sm:$0xf0] }
 0x1f6   : > { %v2440_v27 = vpop.f32.mrf.mxu2  ;;  %2930 = vmatpush.bf16.msrb.mxu1 %v6663_v48 }
 0x1f7   : > { %8637 = vtanh.f32 %v2478_v26  ;;  %v2453_v29 = vpop.f32.mrf.mxu3  ;;  %2891 = vmatpush.bf16.msra.mxu2 %v6659_v46  ;;  %v8114_v26 = vld [vmem:[#allocation13 + $0x18] sm:$0xff]  ;;  %v8120_v27 = vld [vmem:[#allocation13 + $0x48] sm:$0xff] }
 0x1f8   : > { %3088 = vmatpush.bf16.msrb.mxu3 %v8124_v11  ;;  %v8119_v29 = vld [vmem:[#allocation13 + $0x40] sm:$0xff] }
 0x1fa   : > { %2931 = vmatpush.bf16.msrb.mxu1 %v6655_v55  ;;  %v8127_v55 = vld [vmem:[#allocation16] sm:$0xff] }
 0x1fb   : > { %2892 = vmatpush.bf16.msra.mxu2 %v6651_v52  ;;  %v8131_v52 = vld [vmem:[#allocation16 + $0x20] sm:$0xff] }
 0x1fc   : > { %3089 = vmatpush.bf16.msrb.mxu3 %v8123_v15  ;;  %3172 = vmatpush.bf16.msra.mxu0 %v8131_v52  ;;  %v8156_v15 = vld [vmem:[#allocation22 + $0x64] sm:$0xf0]  ;;  %v8146_v52 = vld [vmem:[#allocation22 + $0x14] sm:$0xf0] }
 0x1fd   : > { %v8638_v35 = vpop.eup %8637 }
 0x1fe   : > { %v2563_v37 = vpack.c.bf16 %v8638_v35, %v8638_v35  ;;  %v2613_v35 = vld [vmem:[#allocation11] sm:$0x3] }
 0x1ff   : > { %v2490_v62 = vpop.f32.mrf.mxu2  ;;  %3073 = vmatpush.bf16.msrb.mxu2 %v8118_v8  ;;  %v2616_v33 = vperm.slane %v2613_v35, 1  ;;  %v8135_v8 = vld [vmem:[#allocation19] sm:$0xff] }
 0x200   : > { %v2516_v38 = vpop.f32.mrf.mxu0  ;;  %2880 = vmatmul.bf16.vlgmr.msra.gmra.mxu1 %v2563_v37  ;;  %2919 = vmatmul.bf16.vlgmr.msrb.gmra.mxu0 %v2563_v37  ;;  %v2491_v58 = vadd.f32 %v2490_v62, %v1553_v57  ;;  %v8140_v57 = vld [vmem:[#allocation19 + $0x28] sm:$0xff] }
 0x201   : > { %v2529_v42 = vpop.f32.mrf.mxu1  ;;  %3090 = vmatpush.bf16.msrb.mxu3 %v8122_v19  ;;  %3173 = vmatpush.bf16.msra.mxu0 %v8130_v39  ;;  %v6892_v19 = vld [vmem:[#allocation22 + $0x68] sm:$0xf0]  ;;  %v8145_v39 = vld [vmem:[#allocation22 + $0x14] sm:$0xf] }
 0x202   : > { %v2503_v4 = vpop.f32.mrf.mxu3 }
 0x203   : > { %v2504_v59 = vadd.f32 %v2503_v4, %v2491_v58  ;;  %3074 = vmatpush.bf16.msrb.mxu2 %v8117_v60  ;;  %v8139_v58 = vld [vmem:[#allocation19 + $0x20] sm:$0xff]  ;;  %v8158_v60 = vld [vmem:[#allocation22 + $0x74] sm:$0xf0] }
 0x204   : > { %v6899_v11 = vor.u32 %v8158_v60, %v6898_v9  ;;  %v6966_v60 = vld [vmem:[#allocation25 + $0x78] sm:$0xf] }
 0x205   : > { %v2517_v61 = vadd.f32 %v2516_v38, %v2504_v59  ;;  %3091 = vmatpush.bf16.msrb.mxu3 %v8121_v25  ;;  %v2615_v38 = vperm.slane %v2613_v35, 0  ;;  %v6884_v25 = vld [vmem:[#allocation22 + $0x58] sm:$0xf0]  ;;  %v6866_v35 = vld [vmem:[#allocation22 + $0x30] sm:$0xf] }
 0x207   : > { %v2492_v54 = vpop.f32.mrf.mxu2  ;;  %v2530_v63 = vadd.f32 %v2529_v42, %v2517_v61  ;;  %3075 = vmatpush.bf16.msrb.mxu2 %v8116_v12  ;;  %v8138_v61 = vld [vmem:[#allocation19 + $0x18] sm:$0xff] }
 0x208   : > { %v2518_v53 = vpop.f32.mrf.mxu0  ;;  %v8128_v54 = vld [vmem:[#allocation16 + $0x8] sm:$0xff]  ;;  %v6900_v12 = vld [vmem:[#allocation22 + $0x78] sm:$0xf0] }
 0x209   : > { %v2531_v18 = vpop.f32.mrf.mxu1  ;;  %3092 = vmatpush.bf16.msrb.mxu3 %v8120_v27  ;;  %v8129_v53 = vld [vmem:[#allocation16 + $0x10] sm:$0xff] }
 0x20a   : > { %v2505_v56 = vpop.f32.mrf.mxu3  ;;  %3174 = vmatpush.bf16.msra.mxu0 %v8129_v53  ;;  %v8142_v18 = vld [vmem:[#allocation19 + $0x38] sm:$0xff] }
 0x20b   : > { %3076 = vmatpush.bf16.msrb.mxu2 %v8115_v16  ;;  %3252 = vmatpush.bf16.msra.mxu1 %v8142_v18  ;;  %v8141_v56 = vld [vmem:[#allocation19 + $0x30] sm:$0xff]  ;;  %v6842_v18 = vld [vmem:[#allocation22] sm:$0xf] }
 0x20d   : > { %3093 = vmatpush.bf16.msrb.mxu3 %v8119_v29  ;;  %v8152_v29 = vld [vmem:[#allocation22 + $0x44] sm:$0xf0] }
 0x20e   : > { %3175 = vmatpush.bf16.msra.mxu0 %v8128_v54  ;;  %v6852_v54 = vld [vmem:[#allocation22 + $0x18] sm:$0xf0] }
 0x20f   : > { %3077 = vmatpush.bf16.msrb.mxu2 %v8114_v26  ;;  %3253 = vmatpush.bf16.msra.mxu1 %v8141_v56  ;;  %v8144_v56 = vld [vmem:[#allocation22 + $0x4] sm:$0xf0] }
 0x212   : > { %3176 = vmatpush.bf16.msra.mxu0 %v8127_v55  ;;  %v6855_v55 = vor.u32 %v8145_v39, %v6852_v54  ;;  %v8166_v39 = vld [vmem:[#allocation25 + $0x38] sm:$0xf0] }
 0x213   : > { %3078 = vmatpush.bf16.msrb.mxu2 %v8113_v28  ;;  %3254 = vmatpush.bf16.msra.mxu1 %v8140_v57  ;;  %v6874_v28 = vld [vmem:[#allocation22 + $0x40] sm:$0xf]  ;;  %v8143_v57 = vld [vmem:[#allocation22 + $0x4] sm:$0xf] }
 0x214   : > { %v6875_v44 = vor.u32 %v8152_v29, %v6874_v28  ;;  %v7050_v28 = vld [vmem:[#allocation25 + $0x120] sm:$0xf]  ;;  %v8196_v29 = vld [vmem:[#allocation25 + $0x128] sm:$0xf0] }
 0x217   : > { %3079 = vmatpush.bf16.msrb.mxu2 %v8112_v41  ;;  %3255 = vmatpush.bf16.msra.mxu1 %v8139_v58  ;;  %v8151_v41 = vld [vmem:[#allocation22 + $0x44] sm:$0xf]  ;;  %v6843_v58 = vor.u32 %v8144_v56, %v6842_v18  ;;  %v8168_v56 = vld [vmem:[#allocation25 + $0x4c] sm:$0xf] }
 0x21b   : > { %3080 = vmatpush.bf16.msrb.mxu2 %v8111_v31  ;;  %3256 = vmatpush.bf16.msra.mxu1 %v8138_v61  ;;  %v6876_v31 = vld [vmem:[#allocation22 + $0x48] sm:$0xf0] }
 0x21c   : > { %v6879_v32 = vor.u32 %v8151_v41, %v6876_v31  ;;  %v7076_v31 = vld [vmem:[#allocation25 + $0x15c] sm:$0xf0] }
 0x21f   : > { %v2542_v0 = vpop.f32.mrf.mxu2 }
 0x220   : > { %v2543_v1 = vadd.f32 %v2542_v0, %v2530_v63  ;;  %v2555_v2 = vpop.f32.mrf.mxu3  ;;  %v8619_v63 = vld [vmem:[#allocation14] ss:$0 sm:$0xff] }
 0x222   : > { %v2556_v3 = vadd.f32 %v2555_v2, %v2543_v1  ;;  %v8137_v1 = vld [vmem:[#allocation19 + $0x10] sm:$0xff] }
 0x223   : > { %3257 = vmatpush.bf16.msra.mxu1 %v8137_v1  ;;  %v7086_v1 = vld [vmem:[#allocation25 + $0x168] sm:$0xf] }
 0x224   : > { %8639 = vtanh.f32 %v2556_v3 }
 0x227   : > { %v2544_v24 = vpop.f32.mrf.mxu2 }
 0x228   : > { %v2557_v30 = vpop.f32.mrf.mxu3 }
 0x229   : > { %v8136_v30 = vld [vmem:[#allocation19 + $0x8] sm:$0xff] }
 0x22a   : > { %v8640_v5 = vpop.eup %8639  ;;  %3258 = vmatpush.bf16.msra.mxu1 %v8136_v30  ;;  %v8178_v30 = vld [vmem:[#allocation25 + $0x98] sm:$0xf0] }
 0x22b   : > { %v2564_v6 = vpack.c.bf16 %v8640_v5, %v8640_v5 }
 0x22d   : > { %2893 = vmatmul.bf16.vlgmr.msra.gmra.mxu2 %v2564_v6  ;;  %2932 = vmatmul.bf16.vlgmr.msrb.gmra.mxu1 %v2564_v6 }
 0x22e   : > { %3259 = vmatpush.bf16.msra.mxu1 %v8135_v8  ;;  %3369 = vmatpush.bf16.msra.mxu2 %v6899_v11  ;;  %v7062_v11 = vld [vmem:[#allocation25 + $0x138] sm:$0xf] }
 0x269   : > { %v2868_v10 = vpop.f32.mrf.mxu0 }
 0x26a   : > { %v2869_v4 = vadd.f32 %v2868_v10, %v2615_v38  ;;  %v8157_v10 = vld [vmem:[#allocation22 + $0x74] sm:$0xf]  ;;  %v6867_v38 = vor.u32 %v8150_v36, %v6866_v35  ;;  %v6968_v36 = vld [vmem:[#allocation25 + $0x84] sm:$0xf0] }
 0x26b   : > { %v6903_v16 = vor.u32 %v8157_v10, %v6900_v12  ;;  %v8175_v10 = vld [vmem:[#allocation25 + $0x80] sm:$0xf0] }
 0x26c   : > { %v8199_v12 = vld [vmem:[#allocation25 + $0x140] sm:$0xf0] }
 0x26d   : > { %3382 = vmatpush.bf16.msra.mxu3 %v6903_v16 }
 0x26f   : > { %v2907_v13 = vpop.f32.mrf.mxu3 }
 0x270   : > { %v2908_v37 = vadd.f32 %v2907_v13, %v2616_v33  ;;  %v6890_v13 = vld [vmem:[#allocation22 + $0x60] sm:$0xf]  ;;  %v8149_v33 = vld [vmem:[#allocation22 + $0x34] sm:$0xf] }
 0x271   : > { %v2870_v17 = vpop.f32.mrf.mxu0 }
 0x272   : > { %v8155_v17 = vld [vmem:[#allocation22 + $0x64] sm:$0xf] }
 0x277   : > { %v2909_v20 = vpop.f32.mrf.mxu3 }
 0x278   : > { %v6891_v20 = vor.u32 %v8156_v15, %v6890_v13  ;;  %v8180_v13 = vld [vmem:[#allocation25 + $0xac] sm:$0xf]  ;;  %v6992_v15 = vld [vmem:[#allocation25 + $0xb4] sm:$0xf0] }
 0x279   : > { %v6995_v16 = vor.u32 %v8180_v13, %v6992_v15  ;;  %v8182_v13 = vld [vmem:[#allocation25 + $0xb8] sm:$0xf0] }
 0x27a   : > { %3370 = vmatpush.bf16.msra.mxu2 %v6891_v20  ;;  %v6967_v20 = vor.u32 %v8175_v10, %v6966_v60  ;;  %v8160_v60 = vld [vmem:[#allocation25 + $0x8] sm:$0xf0]  ;;  %v7002_v10 = vld [vmem:[#allocation25 + $0xc0] sm:$0xf] }
 0x27d   : > { %v2881_v21 = vpop.f32.mrf.mxu1  ;;  %v2920_v22 = vpop.f32.mrf.mxu0 }
 0x27e   : > { %v2921_v62 = vadd.f32 %v2920_v22, %v2908_v37  ;;  %v2882_v43 = vadd.f32 %v2881_v21, %v2869_v4  ;;  %v6895_v21 = vor.u32 %v8155_v17, %v6892_v19  ;;  %v6882_v22 = vld [vmem:[#allocation22 + $0x50] sm:$0xf]  ;;  %v6868_v37 = vld [vmem:[#allocation22 + $0x38] sm:$0xf0] }
 0x27f   : > { %v8204_v17 = vld [vmem:[#allocation25 + $0x16c] sm:$0xf]  ;;  %v7088_v19 = vld [vmem:[#allocation25 + $0x174] sm:$0xf0] }
 0x280   : > { %3383 = vmatpush.bf16.msra.mxu3 %v6895_v21  ;;  %v6954_v21 = vld [vmem:[#allocation25 + $0x60] sm:$0xf] }
 0x285   : > { %v2883_v23 = vpop.f32.mrf.mxu1  ;;  %v2922_v14 = vpop.f32.mrf.mxu0 }
 0x286   : > { %v8154_v23 = vld [vmem:[#allocation22 + $0x54] sm:$0xf0]  ;;  %v8153_v14 = vld [vmem:[#allocation22 + $0x54] sm:$0xf] }
 0x287   : > { %v6883_v26 = vor.u32 %v8154_v23, %v6882_v22  ;;  %v6887_v27 = vor.u32 %v8153_v14, %v6884_v25  ;;  %v8172_v22 = vld [vmem:[#allocation25 + $0x68] sm:$0xf0]  ;;  %v7091_v23 = vor.u32 %v8204_v17, %v7088_v19  ;;  %v7063_v14 = vor.u32 %v8199_v12, %v7062_v11  ;;  %v8177_v25 = vld [vmem:[#allocation25 + $0x94] sm:$0xf]  ;;  %v6998_v12 = vld [vmem:[#allocation25 + $0xb0] sm:$0xf] }
 0x288   : > { %v6955_v35 = vor.u32 %v8172_v22, %v6954_v21  ;;  %v8184_v11 = vld [vmem:[#allocation25 + $0xc8] sm:$0xf0]  ;;  %v8206_v17 = vld [vmem:[#allocation25 + $0x178] sm:$0xf0]  ;;  %v6999_v22 = vor.u32 %v8182_v13, %v6998_v12  ;;  %v6914_v13 = vld [vmem:[#allocation25 + $0x8] sm:$0xf] }
 0x289   : > { %3371 = vmatpush.bf16.msra.mxu2 %v6883_v26  ;;  %3384 = vmatpush.bf16.msra.mxu3 %v6887_v27  ;;  %v6980_v26 = vld [vmem:[#allocation25 + $0x9c] sm:$0xf0]  ;;  %v8201_v27 = vld [vmem:[#allocation25 + $0x154] sm:$0xf]  ;;  %v7003_v21 = vor.u32 %v8184_v11, %v7002_v10  ;;  %v8188_v10 = vld [vmem:[#allocation25 + $0xe8] sm:$0xf0] }
 0x28a   : > { %v6983_v41 = vor.u32 %v8177_v25, %v6980_v26  ;;  %v8165_v25 = vld [vmem:[#allocation25 + $0x34] sm:$0xf]  ;;  %v6932_v26 = vld [vmem:[#allocation25 + $0x3c] sm:$0xf0] }
 0x28d   : > { %3372 = vmatpush.bf16.msra.mxu2 %v6875_v44  ;;  %3385 = vmatpush.bf16.msra.mxu3 %v6879_v32  ;;  %v7079_v44 = vor.u32 %v8201_v27, %v7076_v31  ;;  %v8174_v32 = vld [vmem:[#allocation25 + $0x7c] sm:$0xf]  ;;  %v8189_v27 = vld [vmem:[#allocation25 + $0xf4] sm:$0xf] }
 0x291   : > { %3373 = vmatpush.bf16.msra.mxu2 %v6867_v38  ;;  %v7051_v38 = vor.u32 %v8196_v29, %v7050_v28  ;;  %v6935_v28 = vor.u32 %v8165_v25, %v6932_v26  ;;  %v7028_v29 = vld [vmem:[#allocation25 + $0xfc] sm:$0xf0]  ;;  %v8252_v25 = vld [vmem:[#allocation26 + $0x164] sm:$0xf0] }
 0x292   : > { %v7031_v31 = vor.u32 %v8189_v27, %v7028_v29  ;;  %v7242_v27 = vld [vmem:[#allocation26 + $0x120] sm:$0xf]  ;;  %v7458_v29 = vld [vmem:[#allocation26 + $0x2d0] sm:$0xf] }
 0x2aa   : > { %v2933_v40 = vpop.f32.mrf.mxu1 }
 0x2ab   : > { %v2934_v42 = vadd.f32 %v2933_v40, %v2921_v62  ;;  %v6871_v62 = vor.u32 %v8149_v33, %v6868_v37  ;;  %v8620_v40 = vld [vmem:[#allocation17] ss:$0 sm:$0xff]  ;;  %v8198_v33 = vld [vmem:[#allocation25 + $0x13c] sm:$0xf]  ;;  %v7064_v37 = vld [vmem:[#allocation25 + $0x144] sm:$0xf0] }
 0x2ad   : > { %8641 = vtanh.f32 %v2934_v42  ;;  %3386 = vmatpush.bf16.msra.mxu3 %v6871_v62  ;;  %v6942_v62 = vld [vmem:[#allocation25 + $0x48] sm:$0xf] }
 0x2b0   : > { %v2894_v34 = vpop.f32.mrf.mxu2 }
 0x2b1   : > { %v2895_v45 = vadd.f32 %v2894_v34, %v2882_v43 }
 0x2b2   : > { %v2935_v46 = vpop.f32.mrf.mxu1 }
 0x2b3   : > { %v8642_v47 = vpop.eup %8641  ;;  %8643 = vtanh.f32 %v2895_v45  ;;  %v6858_v45 = vld [vmem:[#allocation22 + $0x20] sm:$0xf]  ;;  %v8148_v46 = vld [vmem:[#allocation22 + $0x24] sm:$0xf0] }
 0x2b4   : > { %v2940_v48 = vpack.c.bf16 %v8642_v47, %v8642_v47  ;;  %v8147_v47 = vld [vmem:[#allocation22 + $0x24] sm:$0xf] }
 0x2b6   : > { %3094 = vmatmul.bf16.vlgmr.msrb.gmra.mxu3 %v2940_v48  ;;  %v6859_v48 = vor.u32 %v8148_v46, %v6858_v45  ;;  %v8171_v45 = vld [vmem:[#allocation25 + $0x64] sm:$0xf]  ;;  %v6956_v46 = vld [vmem:[#allocation25 + $0x6c] sm:$0xf0] }
 0x2b7   : > { %v6959_v54 = vor.u32 %v8171_v45, %v6956_v46  ;;  %v7070_v46 = vld [vmem:[#allocation25 + $0x140] sm:$0xf] }
 0x2b8   : > { %v2896_v49 = vpop.f32.mrf.mxu2  ;;  %3374 = vmatpush.bf16.msra.mxu2 %v6859_v48  ;;  %v7052_v48 = vld [vmem:[#allocation25 + $0x12c] sm:$0xf0] }
 0x2b9   : > { %v8644_v50 = vpop.eup %8643  ;;  %v6860_v49 = vld [vmem:[#allocation22 + $0x28] sm:$0xf0] }
 0x2ba   : > { %v2939_v51 = vpack.c.bf16 %v8644_v50, %v8644_v50  ;;  %v6863_v50 = vor.u32 %v8147_v47, %v6860_v49  ;;  %v8195_v47 = vld [vmem:[#allocation25 + $0x124] sm:$0xf]  ;;  %v8621_v49 = vld [vmem:[#allocation20] ss:$0 sm:$0xff] }
 0x2bb   : > { %v7055_v18 = vor.u32 %v8195_v47, %v7052_v48  ;;  %v8200_v47 = vld [vmem:[#allocation25 + $0x148] sm:$0xf0] }
 0x2bc   : > { %3081 = vmatmul.bf16.vlgmr.msrb.gmra.mxu2 %v2939_v51  ;;  %3387 = vmatpush.bf16.msra.mxu3 %v6863_v50  ;;  %v6850_v51 = vld [vmem:[#allocation22 + $0x10] sm:$0xf]  ;;  %v7071_v48 = vor.u32 %v8200_v47, %v7070_v46  ;;  %v7194_v47 = vld [vmem:[#allocation26 + $0xc0] sm:$0xf] }
 0x2bd   : > { %v6851_v53 = vor.u32 %v8146_v52, %v6850_v51  ;;  %v6930_v52 = vld [vmem:[#allocation25 + $0x30] sm:$0xf]  ;;  %v7268_v46 = vld [vmem:[#allocation26 + $0x168] sm:$0xf0] }
 0x2bf   : > { %3375 = vmatpush.bf16.msra.mxu2 %v6851_v53  ;;  %v7026_v53 = vld [vmem:[#allocation25 + $0xf0] sm:$0xf] }
 0x2c0   : > { %3388 = vmatpush.bf16.msra.mxu3 %v6855_v55  ;;  %v8190_v55 = vld [vmem:[#allocation25 + $0xf8] sm:$0xf0] }
 0x2c3   : > { %3376 = vmatpush.bf16.msra.mxu2 %v6843_v58  ;;  %v8192_v58 = vld [vmem:[#allocation25 + $0x10c] sm:$0xf] }
 0x2c7   : > { %3753 = vmatpush.bf16.msrb.mxu2 %v6995_v16  ;;  %v7094_v16 = vld [vmem:[#allocation25 + $0x170] sm:$0xf] }
 0x2cb   : > { %3754 = vmatpush.bf16.msrb.mxu2 %v6983_v41  ;;  %v6986_v41 = vld [vmem:[#allocation25 + $0x98] sm:$0xf] }
 0x339   : > { %v3095_v59 = vpop.f32.mrf.mxu3 }
 0x33f   : > { %v3082_v0 = vpop.f32.mrf.mxu2 }
 0x340   : > { %v3083_v2 = vadd.f32 %v8619_v63, %v3082_v0  ;;  %v6990_v63 = vld [vmem:[#allocation25 + $0xa8] sm:$0xf]  ;;  %v8181_v0 = vld [vmem:[#allocation25 + $0xb0] sm:$0xf0] }
 0x341   : > { %v3097_v3 = vpop.f32.mrf.mxu3 }
 0x342   : > { %v3096_v24 = vadd.f32 %v3095_v59, %v3083_v2  ;;  %v6844_v59 = vld [vmem:[#allocation22 + $0x8] sm:$0xf0]  ;;  %v6991_v2 = vor.u32 %v8181_v0, %v6990_v63  ;;  %v8205_v3 = vld [vmem:[#allocation25 + $0x170] sm:$0xf0]  ;;  %v7027_v0 = vor.u32 %v8190_v55, %v7026_v53 }
 0x343   : > { %v6847_v61 = vor.u32 %v8143_v57, %v6844_v59  ;;  %v6944_v57 = vld [vmem:[#allocation25 + $0x54] sm:$0xf0]  ;;  %v6962_v53 = vld [vmem:[#allocation25 + $0x68] sm:$0xf] }
 0x344   : > { %8645 = vtanh.f32 %v3096_v24  ;;  %v6978_v24 = vld [vmem:[#allocation25 + $0x90] sm:$0xf]  ;;  %3727 = vmatpush.bf16.msrb.mxu0 %v6991_v2  ;;  %v7040_v59 = vld [vmem:[#allocation25 + $0x114] sm:$0xf0]  ;;  %v8163_v2 = vld [vmem:[#allocation25 + $0x20] sm:$0xf0] }
 0x345   : > { %3389 = vmatpush.bf16.msra.mxu3 %v6847_v61  ;;  %v6979_v8 = vor.u32 %v8178_v30, %v6978_v24  ;;  %v6931_v61 = vor.u32 %v8166_v39, %v6930_v52  ;;  %v7014_v30 = vld [vmem:[#allocation25 + $0xd8] sm:$0xf]  ;;  %v7004_v39 = vld [vmem:[#allocation25 + $0xcc] sm:$0xf0] }
 0x347   : > { %v3084_v5 = vpop.f32.mrf.mxu2 }
 0x348   : > { %v7087_v5 = vor.u32 %v8205_v3, %v7086_v1  ;;  %3728 = vmatpush.bf16.msrb.mxu0 %v6979_v8  ;;  %v6918_v1 = vld [vmem:[#allocation25 + $0x18] sm:$0xf]  ;;  %v6947_v3 = vor.u32 %v8168_v56, %v6944_v57  ;;  %v7058_v56 = vld [vmem:[#allocation25 + $0x128] sm:$0xf]  ;;  %v8197_v57 = vld [vmem:[#allocation25 + $0x130] sm:$0xf0] }
 0x349   : > { %3766 = vmatpush.bf16.msrb.mxu3 %v7091_v23 }
 0x34a   : > { %v8646_v6 = vpop.eup %8645  ;;  %3740 = vmatpush.bf16.msrb.mxu1 %v7087_v5  ;;  %v8187_v5 = vld [vmem:[#allocation25 + $0xe0] sm:$0xf0] }
 0x34b   : > { %v3100_v7 = vpack.c.bf16 %v8646_v6, %v8646_v6  ;;  %v7074_v6 = vld [vmem:[#allocation25 + $0x150] sm:$0xf]  ;;  %v7015_v8 = vor.u32 %v8187_v5, %v7014_v30  ;;  %v7034_v30 = vld [vmem:[#allocation25 + $0xf8] sm:$0xf]  ;;  %v8191_v5 = vld [vmem:[#allocation25 + $0x100] sm:$0xf0] }
 0x34c   : > { %3729 = vmatpush.bf16.msrb.mxu0 %v6967_v20 }
 0x34d   : > { %3177 = vmatmul.bf16.vlgmr.msra.gmra.mxu0 %v3100_v7  ;;  %v8202_v7 = vld [vmem:[#allocation25 + $0x158] sm:$0xf0]  ;;  %3767 = vmatpush.bf16.msrb.mxu3 %v7079_v44  ;;  %v8179_v44 = vld [vmem:[#allocation25 + $0xa0] sm:$0xf0] }
 0x34e   : > { %v7075_v9 = vor.u32 %v8202_v7, %v7074_v6  ;;  %v7043_v6 = vor.u32 %v8192_v58, %v7040_v59  ;;  %v6919_v7 = vor.u32 %v8163_v2, %v6918_v1  ;;  %v7059_v58 = vor.u32 %v8197_v57, %v7058_v56  ;;  %v6950_v59 = vld [vmem:[#allocation25 + $0x50] sm:$0xf]  ;;  %v8194_v1 = vld [vmem:[#allocation25 + $0x118] sm:$0xf0] }
 0x350   : > { %3741 = vmatpush.bf16.msrb.mxu1 %v7075_v9  ;;  %3730 = vmatpush.bf16.msrb.mxu0 %v6955_v35  ;;  %v6906_v9 = vld [vmem:[#allocation25] sm:$0xf]  ;;  %v8203_v35 = vld [vmem:[#allocation25 + $0x160] sm:$0xf0] }
 0x351   : > { %v6907_v15 = vor.u32 %v8160_v60, %v6906_v9  ;;  %v8164_v9 = vld [vmem:[#allocation25 + $0x28] sm:$0xf0]  ;;  %v7022_v60 = vld [vmem:[#allocation25 + $0xe0] sm:$0xf] }
 0x352   : > { %v7023_v12 = vor.u32 %v8188_v10, %v7022_v60  ;;  %v7146_v10 = vld [vmem:[#allocation26 + $0x60] sm:$0xf] }
 0x354   : > { %3742 = vmatpush.bf16.msrb.mxu1 %v7063_v14  ;;  %v7095_v14 = vor.u32 %v8206_v17, %v7094_v16  ;;  %v7010_v16 = vld [vmem:[#allocation25 + $0xc8] sm:$0xf]  ;;  %v8185_v17 = vld [vmem:[#allocation25 + $0xd0] sm:$0xf0] }
 0x358   : > { %3743 = vmatpush.bf16.msrb.mxu1 %v7051_v38  ;;  %v6920_v38 = vld [vmem:[#allocation25 + $0x24] sm:$0xf0] }
 0x3ca   : > { %v3178_v42 = vpop.f32.mrf.mxu0 }
 0x3cb   : > { %v3179_v4 = vadd.f32 %v8620_v40, %v3178_v42  ;;  %v8169_v40 = vld [vmem:[#allocation25 + $0x50] sm:$0xf0]  ;;  %v7038_v42 = vld [vmem:[#allocation25 + $0x108] sm:$0xf] }
 0x3cc   : > { %v6943_v50 = vor.u32 %v8169_v40, %v6942_v62  ;;  %v8186_v62 = vld [vmem:[#allocation25 + $0xdc] sm:$0xf] }
 0x3cd   : > { %3182 = vst [vmem:[%s9776_s20] sm:$0xff] %v3179_v4  ;;  %v3183_v43 = vpack.c.bf16 %v3179_v4, %v3179_v4  ;;  %v6971_v4 = vor.u32 %v8174_v32, %v6968_v36  ;;  %v7082_v32 = vld [vmem:[#allocation25 + $0x158] sm:$0xf]  ;;  %v6987_v36 = vor.u32 %v8179_v44, %v6986_v41 }
 0x3ce   : > { %3731 = vmatpush.bf16.msrb.mxu0 %v6943_v50  ;;  %v6908_v50 = vld [vmem:[#allocation25 + $0xc] sm:$0xf0] }
 0x3cf   : > { %3260 = vmatmul.bf16.vlgmr.msra.gmra.mxu1 %v3183_v43  ;;  %v8193_v43 = vld [vmem:[#allocation25 + $0x110] sm:$0xf0]  ;;  %3755 = vmatpush.bf16.msrb.mxu2 %v6971_v4  ;;  %v6974_v4 = vld [vmem:[#allocation25 + $0x80] sm:$0xf] }
 0x3d0   : > { %v7039_v51 = vor.u32 %v8193_v43, %v7038_v42  ;;  %v7016_v42 = vld [vmem:[#allocation25 + $0xe4] sm:$0xf0]  ;;  %v8176_v43 = vld [vmem:[#allocation25 + $0x88] sm:$0xf0] }
 0x3d1   : > { %v6975_v45 = vor.u32 %v8176_v43, %v6974_v4  ;;  %v7410_v43 = vld [vmem:[#allocation26 + $0x270] sm:$0xf] }
 0x3d2   : > { %v3180_v34 = vpop.f32.mrf.mxu0  ;;  %3744 = vmatpush.bf16.msrb.mxu1 %v7039_v51  ;;  %3732 = vmatpush.bf16.msrb.mxu0 %v6931_v61  ;;  %v8183_v51 = vld [vmem:[#allocation25 + $0xc4] sm:$0xf]  ;;  %v8170_v61 = vld [vmem:[#allocation25 + $0x58] sm:$0xf0] }
 0x3d3   : > { %v7067_v34 = vor.u32 %v8198_v33, %v7064_v37  ;;  %3756 = vmatpush.bf16.msrb.mxu2 %v6959_v54  ;;  %v7083_v33 = vor.u32 %v8203_v35, %v7082_v32  ;;  %v8162_v37 = vld [vmem:[#allocation25 + $0x1c] sm:$0xf]  ;;  %v8173_v54 = vld [vmem:[#allocation25 + $0x70] sm:$0xf0]  ;;  %v7007_v55 = vor.u32 %v8183_v51, %v7004_v39  ;;  %v8300_v32 = vld [vmem:[#allocation26 + $0x2e4] sm:$0xf0] }
 0x3d4   : > { %v6923_v40 = vor.u32 %v8162_v37, %v6920_v38  ;;  %v7218_v37 = vld [vmem:[#allocation26 + $0xf0] sm:$0xf]  ;;  %v8240_v38 = vld [vmem:[#allocation26 + $0x104] sm:$0xf0] }
 0x3d5   : > { %3768 = vmatpush.bf16.msrb.mxu3 %v7067_v34  ;;  %v7019_v34 = vor.u32 %v8186_v62, %v7016_v42  ;;  %v7434_v62 = vld [vmem:[#allocation26 + $0x2a0] sm:$0xf]  ;;  %v7219_v4 = vor.u32 %v8240_v38, %v7218_v37  ;;  %v8348_v39 = vld [vmem:[#allocation26 + $0x464] sm:$0xf0]  ;;  %v8210_v37 = vld [vmem:[#allocation26 + $0x14] sm:$0xf0] }
 0x3d6   : > { %3745 = vmatpush.bf16.msrb.mxu1 %v7027_v0  ;;  %3733 = vmatpush.bf16.msrb.mxu0 %v6919_v7  ;;  %v6951_v0 = vor.u32 %v8170_v61, %v6950_v59  ;;  %v7035_v7 = vor.u32 %v8191_v5, %v7034_v30  ;;  %v7244_v59 = vld [vmem:[#allocation26 + $0x138] sm:$0xf0]  ;;  %v8342_v30 = vld [vmem:[#allocation26 + $0x434] sm:$0xf0]  ;;  %v7362_v5 = vld [vmem:[#allocation26 + $0x210] sm:$0xf] }
 0x3d7   : > { %3757 = vmatpush.bf16.msrb.mxu2 %v6947_v3  ;;  %v6938_v3 = vld [vmem:[#allocation25 + $0x38] sm:$0xf] }
 0x3d9   : > { %3769 = vmatpush.bf16.msrb.mxu3 %v7055_v18  ;;  %v6963_v18 = vor.u32 %v8173_v54, %v6962_v53  ;;  %v7386_v53 = vld [vmem:[#allocation26 + $0x240] sm:$0xf]  ;;  %v8282_v54 = vld [vmem:[#allocation26 + $0x254] sm:$0xf0] }
 0x3da   : > { %3746 = vmatpush.bf16.msrb.mxu1 %v7015_v8  ;;  %3734 = vmatpush.bf16.msrb.mxu0 %v6907_v15  ;;  %v6926_v8 = vld [vmem:[#allocation25 + $0x20] sm:$0xf]  ;;  %v8161_v15 = vld [vmem:[#allocation25 + $0x10] sm:$0xf0] }
 0x3db   : > { %3758 = vmatpush.bf16.msrb.mxu2 %v6935_v28  ;;  %v6927_v11 = vor.u32 %v8164_v9, %v6926_v8  ;;  %v8246_v28 = vld [vmem:[#allocation26 + $0x134] sm:$0xf0]  ;;  %v8237_v8 = vld [vmem:[#allocation26 + $0xf4] sm:$0xf]  ;;  %v7220_v9 = vld [vmem:[#allocation26 + $0x108] sm:$0xf0] }
 0x3dc   : > { %v7243_v44 = vor.u32 %v8246_v28, %v7242_v27  ;;  %v7578_v28 = vld [vmem:[#allocation26 + $0x3c0] sm:$0xf] }
 0x3dd   : > { %3770 = vmatpush.bf16.msrb.mxu3 %v7043_v6 }
 0x3de   : > { %3747 = vmatpush.bf16.msrb.mxu1 %v7003_v21  ;;  %3779 = vmatpush.bf16.msra.mxu0 %v6999_v22  ;;  %v3283_v21 = vld [vmem:[#allocation23] sm:$0x3] }
 0x3df   : > { %3759 = vmatpush.bf16.msrb.mxu2 %v6923_v40  ;;  %v3285_v22 = vperm.slane %v3283_v21, 0  ;;  %v8294_v40 = vld [vmem:[#allocation26 + $0x2b4] sm:$0xf0] }
 0x3e0   : > { %v7435_v42 = vor.u32 %v8294_v40, %v7434_v62  ;;  %v8297_v62 = vld [vmem:[#allocation26 + $0x2d4] sm:$0xf] }
 0x3e1   : > { %3771 = vmatpush.bf16.msrb.mxu3 %v7031_v31 }
 0x3e2   : > { %3792 = vmatpush.bf16.msra.mxu1 %v7095_v14  ;;  %3780 = vmatpush.bf16.msra.mxu0 %v6987_v36  ;;  %v7266_v14 = vld [vmem:[#allocation26 + $0x150] sm:$0xf] }
 0x3e3   : > { %v7267_v26 = vor.u32 %v8252_v25, %v7266_v14  ;;  %v7122_v14 = vld [vmem:[#allocation26 + $0x30] sm:$0xf]  ;;  %v8216_v25 = vld [vmem:[#allocation26 + $0x44] sm:$0xf0] }
 0x3e5   : > { %3772 = vmatpush.bf16.msrb.mxu3 %v7019_v34  ;;  %v8288_v34 = vld [vmem:[#allocation26 + $0x284] sm:$0xf0] }
 0x3e6   : > { %3793 = vmatpush.bf16.msra.mxu1 %v7083_v33  ;;  %3781 = vmatpush.bf16.msra.mxu0 %v6975_v45  ;;  %v7459_v33 = vor.u32 %v8300_v32, %v7458_v29  ;;  %v8249_v45 = vld [vmem:[#allocation26 + $0x154] sm:$0xf]  ;;  %v8330_v29 = vld [vmem:[#allocation26 + $0x3d4] sm:$0xf0] }
 0x3e7   : > { %v7271_v57 = vor.u32 %v8249_v45, %v7268_v46  ;;  %v8225_v32 = vld [vmem:[#allocation26 + $0x94] sm:$0xf]  ;;  %v7579_v38 = vor.u32 %v8330_v29, %v7578_v28  ;;  %v8258_v45 = vld [vmem:[#allocation26 + $0x194] sm:$0xf0]  ;;  %v7394_v29 = vld [vmem:[#allocation26 + $0x248] sm:$0xf] }
 0x3e9   : > { %3773 = vmatpush.bf16.msrb.mxu3 %v7007_v55 }
 0x3ea   : > { %3794 = vmatpush.bf16.msra.mxu1 %v7071_v48  ;;  %3782 = vmatpush.bf16.msra.mxu0 %v6963_v18  ;;  %v8234_v48 = vld [vmem:[#allocation26 + $0xd4] sm:$0xf0] }
 0x3eb   : > { %v7195_v61 = vor.u32 %v8234_v48, %v7194_v47  ;;  %v8345_v48 = vld [vmem:[#allocation26 + $0x454] sm:$0xf] }
 0x3ee   : > { %3795 = vmatpush.bf16.msra.mxu1 %v7059_v58  ;;  %3783 = vmatpush.bf16.msra.mxu0 %v6951_v0  ;;  %v8243_v58 = vld [vmem:[#allocation26 + $0x124] sm:$0xf]  ;;  %v7170_v0 = vld [vmem:[#allocation26 + $0x90] sm:$0xf] }
 0x44c   : > { %v3261_v63 = vpop.f32.mrf.mxu1 }
 0x44d   : > { %v3262_v24 = vadd.f32 %v8621_v49, %v3261_v63  ;;  %v8159_v49 = vld [vmem:[#allocation25 + $0x4] sm:$0xf]  ;;  %v7046_v63 = vld [vmem:[#allocation25 + $0x110] sm:$0xf] }
 0x44e   : > { %v6911_v52 = vor.u32 %v8159_v49, %v6908_v50  ;;  %v7047_v2 = vor.u32 %v8194_v1, %v7046_v63  ;;  %v7411_v49 = vor.u32 %v8288_v34, %v7410_v43  ;;  %v7650_v50 = vld [vmem:[#allocation26 + $0x450] sm:$0xf]  ;;  %v8228_v1 = vld [vmem:[#allocation26 + $0xa4] sm:$0xf0]  ;;  %v7290_v34 = vld [vmem:[#allocation26 + $0x180] sm:$0xf] }
 0x44f   : > { %8647 = vtanh.f32 %v3262_v24  ;;  %v8167_v24 = vld [vmem:[#allocation25 + $0x40] sm:$0xf0]  ;;  %v7171_v60 = vor.u32 %v8228_v1, %v7170_v0  ;;  %v8324_v43 = vld [vmem:[#allocation26 + $0x3a4] sm:$0xf0]  ;;  %v7628_v0 = vld [vmem:[#allocation26 + $0x438] sm:$0xf0] }
 0x450   : > { %3760 = vmatpush.bf16.msrb.mxu2 %v6911_v52  ;;  %3796 = vmatpush.bf16.msra.mxu1 %v7047_v2  ;;  %v6939_v6 = vor.u32 %v8167_v24, %v6938_v3  ;;  %v7651_v2 = vor.u32 %v8348_v39, %v7650_v50  ;;  %v7387_v3 = vor.u32 %v8282_v54, %v7386_v53  ;;  %v7626_v24 = vld [vmem:[#allocation26 + $0x420] sm:$0xf]  ;;  %v8219_v50 = vld [vmem:[#allocation26 + $0x64] sm:$0xf]  ;;  %v7436_v54 = vld [vmem:[#allocation26 + $0x2b8] sm:$0xf0] }
 0x451   : > { %v8291_v53 = vld [vmem:[#allocation26 + $0x2a4] sm:$0xf]  ;;  %v8213_v1 = vld [vmem:[#allocation26 + $0x34] sm:$0xf] }
 0x452   : > { %3784 = vmatpush.bf16.msra.mxu0 %v6939_v6  ;;  %v8276_v6 = vld [vmem:[#allocation26 + $0x224] sm:$0xf0] }
 0x454   : > { %v3263_v19 = vpop.f32.mrf.mxu1  ;;  %3797 = vmatpush.bf16.msra.mxu1 %v7035_v7  ;;  %v7247_v7 = vor.u32 %v8243_v58, %v7244_v59 }
 0x455   : > { %v8648_v20 = vpop.eup %8647  ;;  %v6915_v19 = vor.u32 %v8161_v15, %v6914_v13  ;;  %v7363_v13 = vor.u32 %v8276_v6, %v7362_v5  ;;  %v7602_v15 = vld [vmem:[#allocation26 + $0x3f0] sm:$0xf]  ;;  %v8312_v6 = vld [vmem:[#allocation26 + $0x344] sm:$0xf0] }
 0x456   : > { %v3266_v23 = vpack.c.bf16 %v8648_v20, %v8648_v20  ;;  %3785 = vmatpush.bf16.msra.mxu0 %v6927_v11  ;;  %v7011_v20 = vor.u32 %v8185_v17, %v7010_v16  ;;  %v8222_v11 = vld [vmem:[#allocation26 + $0x74] sm:$0xf0]  ;;  %v8336_v16 = vld [vmem:[#allocation26 + $0x404] sm:$0xf0]  ;;  %v7338_v17 = vld [vmem:[#allocation26 + $0x1e0] sm:$0xf] }
 0x457   : > { %v7506_v5 = vld [vmem:[#allocation26 + $0x330] sm:$0xf] }
 0x458   : > { %3377 = vmatmul.bf16.vlgmr.msra.gmra.mxu2 %v3266_v23  ;;  %3390 = vmatmul.bf16.vlgmr.msra.gmra.mxu3 %v3266_v23  ;;  %v3286_v23 = vperm.slane %v3283_v21, 1  ;;  %v8231_v21 = vld [vmem:[#allocation26 + $0xc4] sm:$0xf] }
 0x459   : > { %3798 = vmatpush.bf16.msra.mxu1 %v7023_v12  ;;  %4689 = vmatpush.bf16.msra.mxu2 %v7267_v26  ;;  %v7627_v12 = vor.u32 %v8342_v30, %v7626_v24  ;;  %v7603_v26 = vor.u32 %v8336_v16, %v7602_v15  ;;  %v8285_v30 = vld [vmem:[#allocation26 + $0x274] sm:$0xf]  ;;  %v8301_v15 = vld [vmem:[#allocation26 + $0x2ec] sm:$0xf0]  ;;  %v8279_v16 = vld [vmem:[#allocation26 + $0x244] sm:$0xf] }
 0x45a   : > { %3786 = vmatpush.bf16.msra.mxu0 %v6915_v19  ;;  %4702 = vmatpush.bf16.msra.mxu3 %v7459_v33  ;;  %v8270_v19 = vld [vmem:[#allocation26 + $0x1f4] sm:$0xf0]  ;;  %v7098_v33 = vld [vmem:[#allocation26] sm:$0xf] }
 0x45b   : > { %v7339_v27 = vor.u32 %v8270_v19, %v7338_v17  ;;  %v7099_v47 = vor.u32 %v8210_v37, %v7098_v33  ;;  %v7388_v17 = vld [vmem:[#allocation26 + $0x258] sm:$0xf0]  ;;  %v7364_v33 = vld [vmem:[#allocation26 + $0x228] sm:$0xf0]  ;;  %v7274_v37 = vld [vmem:[#allocation26 + $0x158] sm:$0xf] }
 0x45d   : > { %3799 = vmatpush.bf16.msra.mxu1 %v7011_v20  ;;  %4690 = vmatpush.bf16.msra.mxu2 %v7243_v44  ;;  %v7223_v20 = vor.u32 %v8237_v8, %v7220_v9  ;;  %v8333_v8 = vld [vmem:[#allocation26 + $0x3f4] sm:$0xf]  ;;  %v7604_v9 = vld [vmem:[#allocation26 + $0x408] sm:$0xf0] }
 0x45e   : > { %4703 = vmatpush.bf16.msra.mxu3 %v7435_v42  ;;  %v7460_v42 = vld [vmem:[#allocation26 + $0x2e8] sm:$0xf0]  ;;  %v7607_v19 = vor.u32 %v8333_v8, %v7604_v9  ;;  %v7202_v8 = vld [vmem:[#allocation26 + $0xc8] sm:$0xf] }
 0x461   : > { %4691 = vmatpush.bf16.msra.mxu2 %v7219_v4  ;;  %v7554_v4 = vld [vmem:[#allocation26 + $0x390] sm:$0xf] }
 0x462   : > { %4704 = vmatpush.bf16.msra.mxu3 %v7411_v49  ;;  %v7652_v49 = vld [vmem:[#allocation26 + $0x468] sm:$0xf0]  ;;  %v7555_v39 = vor.u32 %v8324_v43, %v7554_v4 }
 0x463   : > { %v7655_v58 = vor.u32 %v8345_v48, %v7652_v49  ;;  %v7340_v48 = vld [vmem:[#allocation26 + $0x1f8] sm:$0xf0]  ;;  %v7250_v49 = vld [vmem:[#allocation26 + $0x128] sm:$0xf] }
 0x465   : > { %4692 = vmatpush.bf16.msra.mxu2 %v7195_v61  ;;  %v8339_v61 = vld [vmem:[#allocation26 + $0x424] sm:$0xf] }
 0x466   : > { %4705 = vmatpush.bf16.msra.mxu3 %v7387_v3  ;;  %v7439_v3 = vor.u32 %v8291_v53, %v7436_v54 }
 0x469   : > { %4693 = vmatpush.bf16.msra.mxu2 %v7171_v60  ;;  %v8207_v60 = vld [vmem:[#allocation26 + $0x4] sm:$0xf] }
 0x46a   : > { %4706 = vmatpush.bf16.msra.mxu3 %v7363_v13  ;;  %v7507_v13 = vor.u32 %v8312_v6, %v7506_v5  ;;  %v7532_v5 = vld [vmem:[#allocation26 + $0x378] sm:$0xf0] }
 0x46e   : > { %4707 = vmatpush.bf16.msra.mxu3 %v7339_v27  ;;  %v8289_v27 = vld [vmem:[#allocation26 + $0x28c] sm:$0xf0] }
 0x4db   : > { %v3378_v41 = vpop.f32.mrf.mxu2  ;;  %v3391_v31 = vpop.f32.mrf.mxu3 }
 0x4dc   : > { %v3379_v35 = vadd.f32 %v3378_v41, %v3285_v22  ;;  %v3392_v36 = vadd.f32 %v3391_v31, %v3286_v23  ;;  %v7196_v22 = vld [vmem:[#allocation26 + $0xd8] sm:$0xf0]  ;;  %v7147_v23 = vor.u32 %v8222_v11, %v7146_v10  ;;  %v7314_v41 = vld [vmem:[#allocation26 + $0x1b0] sm:$0xf]  ;;  %v8264_v31 = vld [vmem:[#allocation26 + $0x1c4] sm:$0xf0] }
 0x4dd   : > { %v7199_v44 = vor.u32 %v8231_v21, %v7196_v22  ;;  %v7315_v40 = vor.u32 %v8264_v31, %v7314_v41  ;;  %v7100_v10 = vld [vmem:[#allocation26 + $0x18] sm:$0xf0]  ;;  %v7466_v11 = vld [vmem:[#allocation26 + $0x2d8] sm:$0xf]  ;;  %v7391_v22 = vor.u32 %v8279_v16, %v7388_v17  ;;  %v8283_v41 = vld [vmem:[#allocation26 + $0x25c] sm:$0xf0] }
 0x4de   : > { %8649 = vtanh.f32 %v3379_v35  ;;  %v7172_v35 = vld [vmem:[#allocation26 + $0xa8] sm:$0xf0]  ;;  %4694 = vmatpush.bf16.msra.mxu2 %v7147_v23  ;;  %v7467_v21 = vor.u32 %v8301_v15, %v7466_v11  ;;  %v7442_v23 = vld [vmem:[#allocation26 + $0x2a8] sm:$0xf]  ;;  %v7395_v31 = vor.u32 %v8283_v41, %v7394_v29  ;;  %v8259_v11 = vld [vmem:[#allocation26 + $0x19c] sm:$0xf0] }
 0x4df   : > { %8651 = vtanh.f32 %v3392_v36  ;;  %v7123_v36 = vor.u32 %v8216_v25, %v7122_v14  ;;  %v7175_v46 = vor.u32 %v8225_v32, %v7172_v35  ;;  %4708 = vmatpush.bf16.msra.mxu3 %v7315_v40  ;;  %v8295_v14 = vld [vmem:[#allocation26 + $0x2bc] sm:$0xf0]  ;;  %v8306_v32 = vld [vmem:[#allocation26 + $0x314] sm:$0xf0]  ;;  %v8309_v15 = vld [vmem:[#allocation26 + $0x334] sm:$0xf] }
 0x4e0   : > { %v7443_v25 = vor.u32 %v8295_v14, %v7442_v23  ;;  %v7370_v40 = vld [vmem:[#allocation26 + $0x218] sm:$0xf]  ;;  %v7508_v16 = vld [vmem:[#allocation26 + $0x348] sm:$0xf0]  ;;  %v7484_v23 = vld [vmem:[#allocation26 + $0x318] sm:$0xf0] }
 0x4e1   : > { %v7511_v17 = vor.u32 %v8309_v15, %v7508_v16  ;;  %v8217_v29 = vld [vmem:[#allocation26 + $0x4c] sm:$0xf0]  ;;  %v7586_v16 = vld [vmem:[#allocation26 + $0x3c8] sm:$0xf] }
 0x4e2   : > { %4695 = vmatpush.bf16.msra.mxu2 %v7123_v36  ;;  %v8273_v36 = vld [vmem:[#allocation26 + $0x214] sm:$0xf] }
 0x4e3   : > { %v3380_v51 = vpop.f32.mrf.mxu2  ;;  %v3393_v52 = vpop.f32.mrf.mxu3 }
 0x4e4   : > { %v8650_v55 = vpop.eup %8649  ;;  %v7148_v51 = vld [vmem:[#allocation26 + $0x78] sm:$0xf0]  ;;  %v7463_v52 = vor.u32 %v8297_v62, %v7460_v42  ;;  %v8253_v62 = vld [vmem:[#allocation26 + $0x16c] sm:$0xf0] }
 0x4e5   : > { %v8652_v18 = vpop.eup %8651  ;;  %v9779_v56 = vpack.c.bf16 %v8650_v55, %v8650_v55  ;;  %v7291_v55 = vor.u32 %v8258_v45, %v7290_v34  ;;  %v7151_v59 = vor.u32 %v8219_v50, %v7148_v51  ;;  %v8277_v42 = vld [vmem:[#allocation26 + $0x22c] sm:$0xf0]  ;;  %v7275_v4 = vor.u32 %v8253_v62, %v7274_v37  ;;  %v8327_v34 = vld [vmem:[#allocation26 + $0x3c4] sm:$0xf]  ;;  %v7580_v45 = vld [vmem:[#allocation26 + $0x3d8] sm:$0xf0] }
 0x4e6   : > { %v9781_v63 = vpack.c.bf16 %v8652_v18, %v8652_v18  ;;  %v7530_v18 = vld [vmem:[#allocation26 + $0x360] sm:$0xf]  ;;  %4696 = vmatpush.bf16.msra.mxu2 %v7099_v47  ;;  %v7371_v43 = vor.u32 %v8277_v42, %v7370_v40  ;;  %v8267_v47 = vld [vmem:[#allocation26 + $0x1e4] sm:$0xf] }
 0x4e7   : > { %3735 = vmatmul.bf16.vlgmr.msrb.gmra.mxu0 %v9779_v56  ;;  %3761 = vmatmul.bf16.vlgmr.msrb.gmra.mxu2 %v9779_v56  ;;  %v7343_v50 = vor.u32 %v8267_v47, %v7340_v48  ;;  %v8247_v51 = vld [vmem:[#allocation26 + $0x13c] sm:$0xf0]  ;;  %v8346_v47 = vld [vmem:[#allocation26 + $0x45c] sm:$0xf]  ;;  %v7660_v48 = vld [vmem:[#allocation26 + $0x470] sm:$0xf0] }
 0x4e8   : > { %3748 = vmatmul.bf16.vlgmr.msrb.gmra.mxu1 %v9781_v63  ;;  %3774 = vmatmul.bf16.vlgmr.msrb.gmra.mxu3 %v9781_v63  ;;  %v7251_v53 = vor.u32 %v8247_v51, %v7250_v49 }
 0x4e9   : > { %4728 = vmatpush.bf16.msrb.mxu1 %v7271_v57  ;;  %4715 = vmatpush.bf16.msrb.mxu0 %v7651_v2  ;;  %v8318_v57 = vld [vmem:[#allocation26 + $0x374] sm:$0xf0]  ;;  %v7124_v2 = vld [vmem:[#allocation26 + $0x48] sm:$0xf0] }
 0x4ea   : > { %4741 = vmatpush.bf16.msrb.mxu2 %v7463_v52  ;;  %v7531_v24 = vor.u32 %v8318_v57, %v7530_v18  ;;  %4709 = vmatpush.bf16.msra.mxu3 %v7291_v55  ;;  %v7346_v52 = vld [vmem:[#allocation26 + $0x1e8] sm:$0xf]  ;;  %v8321_v55 = vld [vmem:[#allocation26 + $0x394] sm:$0xf]  ;;  %v7556_v18 = vld [vmem:[#allocation26 + $0x3a8] sm:$0xf0] }
 0x4eb   : > { %v7559_v57 = vor.u32 %v8321_v55, %v7556_v18  ;;  %v8343_v55 = vld [vmem:[#allocation26 + $0x43c] sm:$0xf0]  ;;  %v8340_v18 = vld [vmem:[#allocation26 + $0x42c] sm:$0xf] }
 0x4ed   : > { %4729 = vmatpush.bf16.msrb.mxu1 %v7247_v7  ;;  %4716 = vmatpush.bf16.msrb.mxu0 %v7627_v12  ;;  %v7631_v7 = vor.u32 %v8339_v61, %v7628_v0  ;;  %v7226_v61 = vld [vmem:[#allocation26 + $0xf8] sm:$0xf] }
 0x4ee   : > { %4754 = vmatpush.bf16.msrb.mxu3 %v7655_v58  ;;  %4742 = vmatpush.bf16.msrb.mxu2 %v7439_v3  ;;  %v8261_v58 = vld [vmem:[#allocation26 + $0x1b4] sm:$0xf]  ;;  %v8265_v3 = vld [vmem:[#allocation26 + $0x1cc] sm:$0xf0] }
 0x4f1   : > { %4730 = vmatpush.bf16.msrb.mxu1 %v7223_v20  ;;  %4717 = vmatpush.bf16.msrb.mxu0 %v7603_v26  ;;  %v7103_v20 = vor.u32 %v8207_v60, %v7100_v10  ;;  %v7418_v26 = vld [vmem:[#allocation26 + $0x278] sm:$0xf]  ;;  %v8235_v60 = vld [vmem:[#allocation26 + $0xdc] sm:$0xf0]  ;;  %v7298_v10 = vld [vmem:[#allocation26 + $0x188] sm:$0xf] }
 0x4f2   : > { %4755 = vmatpush.bf16.msrb.mxu3 %v7631_v7  ;;  %v7419_v28 = vor.u32 %v8289_v27, %v7418_v26  ;;  %v8255_v7 = vld [vmem:[#allocation26 + $0x184] sm:$0xf]  ;;  %v8223_v26 = vld [vmem:[#allocation26 + $0x7c] sm:$0xf0] }
 0x4f5   : > { %4731 = vmatpush.bf16.msrb.mxu1 %v7199_v44  ;;  %4718 = vmatpush.bf16.msrb.mxu0 %v7579_v38  ;;  %v7482_v44 = vld [vmem:[#allocation26 + $0x300] sm:$0xf]  ;;  %v7367_v38 = vor.u32 %v8273_v36, %v7364_v33 }
 0x4f6   : > { %4756 = vmatpush.bf16.msrb.mxu3 %v7607_v19  ;;  %v7483_v35 = vor.u32 %v8306_v32, %v7482_v44  ;;  %v7178_v19 = vld [vmem:[#allocation26 + $0x98] sm:$0xf]  ;;  %v7106_v44 = vld [vmem:[#allocation26 + $0x8] sm:$0xf]  ;;  %v8211_v32 = vld [vmem:[#allocation26 + $0x1c] sm:$0xf0] }
 0x4f7   : > { %3787 = vmatmul.bf16.vlgmr.msra.gmra.mxu0 %v9779_v56  ;;  %v7412_v56 = vld [vmem:[#allocation26 + $0x288] sm:$0xf0] }
 0x4f8   : > { %3800 = vmatmul.bf16.vlgmr.msra.gmra.mxu1 %v9781_v63  ;;  %v7127_v63 = vor.u32 %v8213_v1, %v7124_v2  ;;  %v7415_v12 = vor.u32 %v8285_v30, %v7412_v56  ;;  %v8241_v1 = vld [vmem:[#allocation26 + $0x10c] sm:$0xf0]  ;;  %v7322_v2 = vld [vmem:[#allocation26 + $0x1b8] sm:$0xf]  ;;  %v8315_v56 = vld [vmem:[#allocation26 + $0x364] sm:$0xf] }
 0x4f9   : > { %4732 = vmatpush.bf16.msrb.mxu1 %v7175_v46  ;;  %4719 = vmatpush.bf16.msrb.mxu0 %v7555_v39  ;;  %v7583_v46 = vor.u32 %v8327_v34, %v7580_v45  ;;  %v8271_v39 = vld [vmem:[#allocation26 + $0x1fc] sm:$0xf0]  ;;  %v7323_v30 = vor.u32 %v8265_v3, %v7322_v2  ;;  %v7535_v6 = vor.u32 %v8315_v56, %v7532_v5  ;;  %v7658_v34 = vld [vmem:[#allocation26 + $0x458] sm:$0xf]  ;;  %v8337_v56 = vld [vmem:[#allocation26 + $0x40c] sm:$0xf0] }
 0x4fa   : > { %4743 = vmatpush.bf16.msrb.mxu2 %v7415_v12  ;;  %v7347_v54 = vor.u32 %v8271_v39, %v7346_v52  ;;  %v7203_v12 = vor.u32 %v8235_v60, %v7202_v8  ;;  %v7663_v39 = vor.u32 %v8346_v47, %v7660_v48  ;;  %v8334_v5 = vld [vmem:[#allocation26 + $0x3fc] sm:$0xf]  ;;  %v8316_v47 = vld [vmem:[#allocation26 + $0x36c] sm:$0xf]  ;;  %v7540_v48 = vld [vmem:[#allocation26 + $0x380] sm:$0xf0] }
 0x4fb   : > { %4757 = vmatpush.bf16.msrb.mxu3 %v7583_v46  ;;  %v8349_v46 = vld [vmem:[#allocation26 + $0x46c] sm:$0xf0] }
 0x4fc   : > { %v7659_v52 = vor.u32 %v8349_v46, %v7658_v34  ;;  %v8292_v34 = vld [vmem:[#allocation26 + $0x2ac] sm:$0xf]  ;;  %v7444_v46 = vld [vmem:[#allocation26 + $0x2c0] sm:$0xf0] }
 0x4fd   : > { %4733 = vmatpush.bf16.msrb.mxu1 %v7151_v59  ;;  %4720 = vmatpush.bf16.msrb.mxu0 %v7531_v24  ;;  %v7316_v59 = vld [vmem:[#allocation26 + $0x1c8] sm:$0xf0]  ;;  %v7227_v24 = vor.u32 %v8241_v1, %v7226_v61  ;;  %v8250_v61 = vld [vmem:[#allocation26 + $0x15c] sm:$0xf] }
 0x4fe   : > { %4744 = vmatpush.bf16.msrb.mxu2 %v7391_v22  ;;  %v7319_v0 = vor.u32 %v8261_v58, %v7316_v59  ;;  %v8303_v22 = vld [vmem:[#allocation26 + $0x304] sm:$0xf] }
 0x4ff   : > { %4758 = vmatpush.bf16.msrb.mxu3 %v7559_v57  ;;  %v7487_v14 = vor.u32 %v8303_v22, %v7484_v23  ;;  %v7636_v57 = vld [vmem:[#allocation26 + $0x440] sm:$0xf0]  ;;  %v8238_v22 = vld [vmem:[#allocation26 + $0xfc] sm:$0xf]  ;;  %v7228_v23 = vld [vmem:[#allocation26 + $0x110] sm:$0xf0] }
 0x500   : > { %v7639_v3 = vor.u32 %v8340_v18, %v7636_v57  ;;  %v8286_v18 = vld [vmem:[#allocation26 + $0x27c] sm:$0xf]  ;;  %v7420_v57 = vld [vmem:[#allocation26 + $0x290] sm:$0xf0] }
 0x501   : > { %4734 = vmatpush.bf16.msrb.mxu1 %v7127_v63  ;;  %4721 = vmatpush.bf16.msrb.mxu0 %v7507_v13  ;;  %v7292_v63 = vld [vmem:[#allocation26 + $0x198] sm:$0xf0]  ;;  %v7299_v13 = vor.u32 %v8259_v11, %v7298_v10  ;;  %v8244_v10 = vld [vmem:[#allocation26 + $0x12c] sm:$0xf]  ;;  %v7252_v11 = vld [vmem:[#allocation26 + $0x140] sm:$0xf0] }
 0x502   : > { %4745 = vmatpush.bf16.msrb.mxu2 %v7367_v38  ;;  %v7295_v9 = vor.u32 %v8255_v7, %v7292_v63 }
 0x503   : > { %4759 = vmatpush.bf16.msrb.mxu3 %v7535_v6  ;;  %v7612_v6 = vld [vmem:[#allocation26 + $0x410] sm:$0xf0] }
 0x504   : > { %v7615_v15 = vor.u32 %v8334_v5, %v7612_v6  ;;  %v8280_v5 = vld [vmem:[#allocation26 + $0x24c] sm:$0xf]  ;;  %v7396_v6 = vld [vmem:[#allocation26 + $0x260] sm:$0xf0] }
 0x505   : > { %4735 = vmatpush.bf16.msrb.mxu1 %v7103_v20  ;;  %4722 = vmatpush.bf16.msrb.mxu0 %v7483_v35  ;;  %v8229_v20 = vld [vmem:[#allocation26 + $0xac] sm:$0xf0]  ;;  %v7107_v35 = vor.u32 %v8211_v32, %v7106_v44  ;;  %v7468_v44 = vld [vmem:[#allocation26 + $0x2f0] sm:$0xf0]  ;;  %v8322_v32 = vld [vmem:[#allocation26 + $0x39c] sm:$0xf] }
 0x506   : > { %4746 = vmatpush.bf16.msrb.mxu2 %v7343_v50 }
 0x507   : > { %4760 = vmatpush.bf16.msrb.mxu3 %v7511_v17  ;;  %v8331_v17 = vld [vmem:[#allocation26 + $0x3dc] sm:$0xf0] }
 0x509   : > { %4780 = vmatpush.bf16.msra.mxu1 %v7467_v21  ;;  %4767 = vmatpush.bf16.msra.mxu0 %v7275_v4  ;;  %v7179_v21 = vor.u32 %v8229_v20, %v7178_v19  ;;  %v8328_v19 = vld [vmem:[#allocation26 + $0x3cc] sm:$0xf]  ;;  %v7588_v20 = vld [vmem:[#allocation26 + $0x3e0] sm:$0xf0] }
 0x50a   : > { %4747 = vmatpush.bf16.msrb.mxu2 %v7319_v0  ;;  %v7276_v0 = vld [vmem:[#allocation26 + $0x170] sm:$0xf0] }
 0x50b   : > { %4761 = vmatpush.bf16.msrb.mxu3 %v7487_v14  ;;  %v7587_v14 = vor.u32 %v8331_v17, %v7586_v16  ;;  %v7132_v16 = vld [vmem:[#allocation26 + $0x50] sm:$0xf0]  ;;  %v7399_v17 = vor.u32 %v8280_v5, %v7396_v6  ;;  %v8227_v6 = vld [vmem:[#allocation26 + $0xa4] sm:$0xf] }
 0x50d   : > { %4781 = vmatpush.bf16.msra.mxu1 %v7443_v25  ;;  %4768 = vmatpush.bf16.msra.mxu0 %v7251_v53  ;;  %v7154_v25 = vld [vmem:[#allocation26 + $0x68] sm:$0xf] }
 0x50e   : > { %4748 = vmatpush.bf16.msrb.mxu2 %v7295_v9  ;;  %v7155_v27 = vor.u32 %v8223_v26, %v7154_v25  ;;  %v7634_v53 = vld [vmem:[#allocation26 + $0x428] sm:$0xf]  ;;  %v7279_v9 = vor.u32 %v8250_v61, %v7276_v0  ;;  %v7591_v25 = vor.u32 %v8328_v19, %v7588_v20 }
 0x50f   : > { %v7635_v2 = vor.u32 %v8343_v55, %v7634_v53  ;;  %v7514_v53 = vld [vmem:[#allocation26 + $0x338] sm:$0xf]  ;;  %v8313_v55 = vld [vmem:[#allocation26 + $0x34c] sm:$0xf0] }
 0x510   : > { %v7515_v0 = vor.u32 %v8313_v55, %v7514_v53  ;;  %v8233_v53 = vld [vmem:[#allocation26 + $0xd4] sm:$0xf]  ;;  %v7212_v55 = vld [vmem:[#allocation26 + $0xe8] sm:$0xf0] }
 0x511   : > { %4782 = vmatpush.bf16.msra.mxu1 %v7419_v28  ;;  %4769 = vmatpush.bf16.msra.mxu0 %v7227_v24  ;;  %v7130_v28 = vld [vmem:[#allocation26 + $0x38] sm:$0xf] }
 0x512   : > { %v7131_v41 = vor.u32 %v8217_v29, %v7130_v28  ;;  %v7610_v24 = vld [vmem:[#allocation26 + $0x3f8] sm:$0xf]  ;;  %v8325_v28 = vld [vmem:[#allocation26 + $0x3ac] sm:$0xf0]  ;;  %v8298_v29 = vld [vmem:[#allocation26 + $0x2dc] sm:$0xf] }
 0x515   : > { %4783 = vmatpush.bf16.msra.mxu1 %v7395_v31  ;;  %4770 = vmatpush.bf16.msra.mxu0 %v7203_v12  ;;  %v3463_v31 = vld [vmem:[%s9968_s18] sm:$0x7]  ;;  %s5422_s18 = scalar_lea.sflag [#allocation4], %s9664_s24 }
 0x516   : > { %v3465_v36 = vperm.slane %v3463_v31, 0  ;;  %v3466_v40 = vperm.slane %v3463_v31, 1  ;;  %v3467_v58 = vperm.slane %v3463_v31, 2  ;;  %v7231_v31 = vor.u32 %v8238_v22, %v7228_v23  ;;  %v8274_v22 = vld [vmem:[#allocation26 + $0x21c] sm:$0xf] }
 0x517   : > { %v7372_v23 = vld [vmem:[#allocation26 + $0x230] sm:$0xf0] }
 0x519   : > { %4784 = vmatpush.bf16.msra.mxu1 %v7371_v43  ;;  %4771 = vmatpush.bf16.msra.mxu0 %v7179_v21  ;;  %v7255_v21 = vor.u32 %v8244_v10, %v7252_v11  ;;  %v8254_v10 = vld [vmem:[#allocation26 + $0x174] sm:$0xf0]  ;;  %v8251_v11 = vld [vmem:[#allocation26 + $0x164] sm:$0xf] }
 0x51d   : > { %4785 = vmatpush.bf16.msra.mxu1 %v7347_v54  ;;  %4772 = vmatpush.bf16.msra.mxu0 %v7155_v27  ;;  %v7562_v27 = vld [vmem:[#allocation26 + $0x398] sm:$0xf] }
 0x521   : > { %4786 = vmatpush.bf16.msra.mxu1 %v7323_v30  ;;  %4773 = vmatpush.bf16.msra.mxu0 %v7131_v41 }
 0x525   : > { %4787 = vmatpush.bf16.msra.mxu1 %v7299_v13  ;;  %4774 = vmatpush.bf16.msra.mxu0 %v7107_v35  ;;  %v7611_v13 = vor.u32 %v8337_v56, %v7610_v24  ;;  %v7564_v35 = vld [vmem:[#allocation26 + $0x3b0] sm:$0xf0]  ;;  %v7423_v24 = vor.u32 %v8286_v18, %v7420_v57  ;;  %v8307_v56 = vld [vmem:[#allocation26 + $0x31c] sm:$0xf0] }
 0x564   : > { %v3736_v33 = vpop.f32.mrf.mxu0 }
 0x565   : > { %v3737_v37 = vadd.f32 %v3736_v33, %v3465_v36  ;;  %v3749_v38 = vpop.f32.mrf.mxu1  ;;  %v8232_v36 = vld [vmem:[#allocation26 + $0xcc] sm:$0xf]  ;;  %v7204_v33 = vld [vmem:[#allocation26 + $0xe0] sm:$0xf0] }
 0x567   : > { %v3750_v62 = vadd.f32 %v3749_v38, %v3737_v37  ;;  %v7563_v38 = vor.u32 %v8325_v28, %v7562_v27  ;;  %v8245_v27 = vld [vmem:[#allocation26 + $0x134] sm:$0xf]  ;;  %v7260_v28 = vld [vmem:[#allocation26 + $0x148] sm:$0xf0] }
 0x569   : > { %8653 = vtanh.f32 %v3750_v62 }
 0x56a   : > { %v3762_v42 = vpop.f32.mrf.mxu2 }
 0x56b   : > { %v3763_v4 = vadd.f32 %v3762_v42, %v3466_v40  ;;  %v3775_v43 = vpop.f32.mrf.mxu3  ;;  %v7471_v40 = vor.u32 %v8298_v29, %v7468_v44  ;;  %v7567_v42 = vor.u32 %v8322_v32, %v7564_v35  ;;  %v8208_v29 = vld [vmem:[#allocation26 + $0xc] sm:$0xf]  ;;  %v7474_v44 = vld [vmem:[#allocation26 + $0x2e0] sm:$0xf]  ;;  %v8302_v32 = vld [vmem:[#allocation26 + $0x2f4] sm:$0xf0] }
 0x56c   : > { %v3738_v45 = vpop.f32.mrf.mxu0 }
 0x56d   : > { %v3776_v49 = vadd.f32 %v3775_v43, %v3763_v4  ;;  %v3751_v50 = vpop.f32.mrf.mxu1  ;;  %v7538_v4 = vld [vmem:[#allocation26 + $0x368] sm:$0xf]  ;;  %v8319_v43 = vld [vmem:[#allocation26 + $0x37c] sm:$0xf0]  ;;  %v7207_v45 = vor.u32 %v8232_v36, %v7204_v33  ;;  %v7263_v36 = vor.u32 %v8245_v27, %v7260_v28  ;;  %v8268_v33 = vld [vmem:[#allocation26 + $0x1ec] sm:$0xf] }
 0x56e   : > { %v8226_v50 = vld [vmem:[#allocation26 + $0x9c] sm:$0xf]  ;;  %v8218_v28 = vld [vmem:[#allocation26 + $0x54] sm:$0xf0] }
 0x56f   : > { %v8654_v51 = vpop.eup %8653  ;;  %8655 = vtanh.f32 %v3776_v49  ;;  %v7539_v49 = vor.u32 %v8319_v43, %v7538_v4  ;;  %v8239_v4 = vld [vmem:[#allocation26 + $0x104] sm:$0xf]  ;;  %v7236_v43 = vld [vmem:[#allocation26 + $0x118] sm:$0xf0] }
 0x570   : > { %v9792_v54 = vpack.c.bf16 %v8654_v51, %v8654_v51  ;;  %v7180_v51 = vld [vmem:[#allocation26 + $0xb0] sm:$0xf0] }
 0x571   : > { %v7183_v61 = vor.u32 %v8226_v50, %v7180_v51  ;;  %v8262_v50 = vld [vmem:[#allocation26 + $0x1bc] sm:$0xf]  ;;  %v7324_v51 = vld [vmem:[#allocation26 + $0x1d0] sm:$0xf0] }
 0x572   : > { %v3764_v59 = vpop.f32.mrf.mxu2  ;;  %4697 = vmatmul.bf16.vlgmr.msra.gmra.mxu2 %v9792_v54  ;;  %4736 = vmatmul.bf16.vlgmr.msrb.gmra.mxu1 %v9792_v54  ;;  %v7327_v57 = vor.u32 %v8262_v50, %v7324_v51  ;;  %v8266_v50 = vld [vmem:[#allocation26 + $0x1d4] sm:$0xf0] }
 0x573   : > { %v3777_v1 = vpop.f32.mrf.mxu3  ;;  %4793 = vmatpush.bf16.msra.mxu2 %v7659_v52  ;;  %4832 = vmatpush.bf16.msrb.mxu1 %v7663_v39  ;;  %v7447_v52 = vor.u32 %v8292_v34, %v7444_v46  ;;  %v7543_v39 = vor.u32 %v8316_v47, %v7540_v48  ;;  %v7516_v59 = vld [vmem:[#allocation26 + $0x350] sm:$0xf0]  ;;  %v7475_v34 = vor.u32 %v8302_v32, %v7474_v44  ;;  %v7450_v46 = vld [vmem:[#allocation26 + $0x2b0] sm:$0xf]  ;;  %v8296_v47 = vld [vmem:[#allocation26 + $0x2c4] sm:$0xf0] }
 0x574   : > { %v3788_v30 = vpop.f32.mrf.mxu0  ;;  %v8220_v1 = vld [vmem:[#allocation26 + $0x6c] sm:$0xf]  ;;  %v7451_v18 = vor.u32 %v8296_v47, %v7450_v46  ;;  %v8215_v44 = vld [vmem:[#allocation26 + $0x44] sm:$0xf]  ;;  %v7140_v32 = vld [vmem:[#allocation26 + $0x58] sm:$0xf0] }
 0x575   : > { %v8656_v7 = vpop.eup %8655  ;;  %v3789_v63 = vadd.f32 %v3788_v30, %v3467_v58  ;;  %v3801_v8 = vpop.f32.mrf.mxu1  ;;  %v8310_v58 = vld [vmem:[#allocation26 + $0x33c] sm:$0xf]  ;;  %v7116_v46 = vld [vmem:[#allocation26 + $0x28] sm:$0xf0]  ;;  %v8299_v47 = vld [vmem:[#allocation26 + $0x2e4] sm:$0xf] }
 0x576   : > { %v9796_v60 = vpack.c.bf16 %v8656_v7, %v8656_v7  ;;  %v7519_v30 = vor.u32 %v8310_v58, %v7516_v59  ;;  %v8304_v7 = vld [vmem:[#allocation26 + $0x30c] sm:$0xf]  ;;  %v7426_v58 = vld [vmem:[#allocation26 + $0x280] sm:$0xf]  ;;  %v8290_v59 = vld [vmem:[#allocation26 + $0x294] sm:$0xf0] }
 0x577   : > { %v3802_v12 = vadd.f32 %v3801_v8, %v3789_v63  ;;  %4794 = vmatpush.bf16.msra.mxu2 %v7635_v2  ;;  %4833 = vmatpush.bf16.msrb.mxu1 %v7639_v3  ;;  %v7156_v2 = vld [vmem:[#allocation26 + $0x80] sm:$0xf0]  ;;  %v7490_v3 = vld [vmem:[#allocation26 + $0x308] sm:$0xf]  ;;  %v7282_v8 = vld [vmem:[#allocation26 + $0x160] sm:$0xf]  ;;  %v7427_v5 = vor.u32 %v8290_v59, %v7426_v58 }
 0x578   : > { %4710 = vmatmul.bf16.vlgmr.msra.gmra.mxu3 %v9796_v60  ;;  %v7492_v63 = vld [vmem:[#allocation26 + $0x320] sm:$0xf0]  ;;  %v7283_v20 = vor.u32 %v8254_v10, %v7282_v8  ;;  %v7402_v8 = vld [vmem:[#allocation26 + $0x250] sm:$0xf]  ;;  %v8293_v58 = vld [vmem:[#allocation26 + $0x2b4] sm:$0xf] }
 0x579   : > { %8657 = vtanh.f32 %v3802_v12  ;;  %4806 = vmatpush.bf16.msra.mxu3 %v7279_v9  ;;  %v7159_v9 = vor.u32 %v8220_v1, %v7156_v2  ;;  %v7284_v12 = vld [vmem:[#allocation26 + $0x178] sm:$0xf0]  ;;  %v7495_v19 = vor.u32 %v8304_v7, %v7492_v63  ;;  %v8256_v1 = vld [vmem:[#allocation26 + $0x18c] sm:$0xf]  ;;  %v7300_v2 = vld [vmem:[#allocation26 + $0x1a0] sm:$0xf0] }
 0x57a   : > { %v7188_v7 = vld [vmem:[#allocation26 + $0xb8] sm:$0xf0]  ;;  %v7303_v63 = vor.u32 %v8256_v1, %v7300_v2  ;;  %v7452_v59 = vld [vmem:[#allocation26 + $0x2c8] sm:$0xf0]  ;;  %v8347_v2 = vld [vmem:[#allocation26 + $0x464] sm:$0xf] }
 0x57b   : > { %4795 = vmatpush.bf16.msra.mxu2 %v7611_v13  ;;  %4834 = vmatpush.bf16.msrb.mxu1 %v7615_v15  ;;  %v7491_v13 = vor.u32 %v8307_v56, %v7490_v3  ;;  %v8214_v15 = vld [vmem:[#allocation26 + $0x3c] sm:$0xf]  ;;  %v7186_v3 = vld [vmem:[#allocation26 + $0xa0] sm:$0xf]  ;;  %v8350_v56 = vld [vmem:[#allocation26 + $0x474] sm:$0xf0] }
 0x57c   : > { %v3790_v26 = vpop.f32.mrf.mxu0 }
 0x57d   : > { %v3803_v41 = vpop.f32.mrf.mxu1  ;;  %4807 = vmatpush.bf16.msra.mxu3 %v7255_v21  ;;  %v7287_v21 = vor.u32 %v8251_v11, %v7284_v12  ;;  %v8248_v26 = vld [vmem:[#allocation26 + $0x144] sm:$0xf0]  ;;  %v7162_v12 = vld [vmem:[#allocation26 + $0x70] sm:$0xf] }
 0x57e   : > { %v7108_v41 = vld [vmem:[#allocation26 + $0x20] sm:$0xf0] }
 0x57f   : > { %v8658_v37 = vpop.eup %8657  ;;  %4796 = vmatpush.bf16.msra.mxu2 %v7587_v14  ;;  %4835 = vmatpush.bf16.msrb.mxu1 %v7591_v25  ;;  %v7258_v14 = vld [vmem:[#allocation26 + $0x130] sm:$0xf]  ;;  %v7135_v25 = vor.u32 %v8214_v15, %v7132_v16  ;;  %v8224_v15 = vld [vmem:[#allocation26 + $0x84] sm:$0xf0] }
 0x580   : > { %v9799_v62 = vpack.c.bf16 %v8658_v37, %v8658_v37  ;;  %v7259_v35 = vor.u32 %v8248_v26, %v7258_v14  ;;  %v7348_v37 = vld [vmem:[#allocation26 + $0x200] sm:$0xf0]  ;;  %v7642_v16 = vld [vmem:[#allocation26 + $0x430] sm:$0xf]  ;;  %v7163_v14 = vor.u32 %v8224_v15, %v7162_v12  ;;  %v7138_v26 = vld [vmem:[#allocation26 + $0x40] sm:$0xf] }
 0x581   : > { %4808 = vmatpush.bf16.msra.mxu3 %v7231_v31  ;;  %v7375_v31 = vor.u32 %v8274_v22, %v7372_v23  ;;  %v7378_v22 = vld [vmem:[#allocation26 + $0x220] sm:$0xf]  ;;  %v8278_v23 = vld [vmem:[#allocation26 + $0x234] sm:$0xf0]  ;;  %v8281_v15 = vld [vmem:[#allocation26 + $0x254] sm:$0xf] }
 0x582   : > { %4723 = vmatmul.bf16.vlgmr.msrb.gmra.mxu0 %v9799_v62  ;;  %4749 = vmatmul.bf16.vlgmr.msrb.gmra.mxu2 %v9796_v60  ;;  %v7522_v12 = vld [vmem:[#allocation26 + $0x340] sm:$0xf] }
 0x583   : > { %4788 = vmatmul.bf16.vlgmr.msra.gmra.mxu1 %v9796_v60  ;;  %4797 = vmatpush.bf16.msra.mxu2 %v7563_v38  ;;  %v7234_v38 = vld [vmem:[#allocation26 + $0x100] sm:$0xf] }
 0x584   : > { %4819 = vmatpush.bf16.msrb.mxu0 %v7471_v40  ;;  %4836 = vmatpush.bf16.msrb.mxu1 %v7567_v42  ;;  %v7111_v40 = vor.u32 %v8208_v29, %v7108_v41  ;;  %v8242_v42 = vld [vmem:[#allocation26 + $0x114] sm:$0xf0]  ;;  %v7618_v29 = vld [vmem:[#allocation26 + $0x400] sm:$0xf] }
 0x585   : > { %4809 = vmatpush.bf16.msra.mxu3 %v7207_v45  ;;  %v7351_v45 = vor.u32 %v8268_v33, %v7348_v37  ;;  %v7235_v48 = vor.u32 %v8242_v42, %v7234_v38  ;;  %v8338_v41 = vld [vmem:[#allocation26 + $0x414] sm:$0xf0]  ;;  %v7139_v33 = vor.u32 %v8218_v28, %v7138_v26  ;;  %v7114_v38 = vld [vmem:[#allocation26 + $0x10] sm:$0xf]  ;;  %v7143_v42 = vor.u32 %v8215_v44, %v7140_v32  ;;  %v8329_v28 = vld [vmem:[#allocation26 + $0x3d4] sm:$0xf] }
 0x586   : > { %v7619_v37 = vor.u32 %v8338_v41, %v7618_v29  ;;  %v7596_v29 = vld [vmem:[#allocation26 + $0x3e8] sm:$0xf0]  ;;  %v8269_v44 = vld [vmem:[#allocation26 + $0x1f4] sm:$0xf] }
 0x587   : > { %4798 = vmatpush.bf16.msra.mxu2 %v7539_v49  ;;  %v7239_v49 = vor.u32 %v8239_v4, %v7236_v43  ;;  %v7594_v4 = vld [vmem:[#allocation26 + $0x3d0] sm:$0xf]  ;;  %v8332_v43 = vld [vmem:[#allocation26 + $0x3e4] sm:$0xf0]  ;;  %v7356_v32 = vld [vmem:[#allocation26 + $0x208] sm:$0xf0] }
 0x588   : > { %4820 = vmatpush.bf16.msrb.mxu0 %v7447_v52  ;;  %4837 = vmatpush.bf16.msrb.mxu1 %v7543_v39  ;;  %v7210_v52 = vld [vmem:[#allocation26 + $0xd0] sm:$0xf]  ;;  %v8236_v39 = vld [vmem:[#allocation26 + $0xe4] sm:$0xf0] }
 0x589   : > { %4762 = vmatmul.bf16.vlgmr.msrb.gmra.mxu3 %v9799_v62 }
 0x58a   : > { %4810 = vmatpush.bf16.msra.mxu3 %v7183_v61  ;;  %v7211_v61 = vor.u32 %v8236_v39, %v7210_v52  ;;  %v7595_v52 = vor.u32 %v8332_v43, %v7594_v4  ;;  %v8317_v4 = vld [vmem:[#allocation26 + $0x374] sm:$0xf]  ;;  %v7548_v43 = vld [vmem:[#allocation26 + $0x388] sm:$0xf0] }
 0x58b   : > { %4799 = vmatpush.bf16.msra.mxu2 %v7515_v0  ;;  %v7215_v0 = vor.u32 %v8233_v53, %v7212_v55  ;;  %v7570_v55 = vld [vmem:[#allocation26 + $0x3a0] sm:$0xf] }
 0x58c   : > { %4821 = vmatpush.bf16.msrb.mxu0 %v7423_v24  ;;  %4838 = vmatpush.bf16.msrb.mxu1 %v7519_v30  ;;  %v8230_v24 = vld [vmem:[#allocation26 + $0xb4] sm:$0xf0]  ;;  %v7666_v30 = vld [vmem:[#allocation26 + $0x460] sm:$0xf] }
 0x58d   : > { %v7187_v10 = vor.u32 %v8230_v24, %v7186_v3  ;;  %v7667_v11 = vor.u32 %v8350_v56, %v7666_v30  ;;  %v7668_v3 = vld [vmem:[#allocation26 + $0x478] sm:$0xf0]  ;;  %v7455_v24 = vor.u32 %v8293_v58, %v7452_v59  ;;  %v7546_v30 = vld [vmem:[#allocation26 + $0x370] sm:$0xf]  ;;  %v8320_v56 = vld [vmem:[#allocation26 + $0x384] sm:$0xf0] }
 0x58e   : > { %4811 = vmatpush.bf16.msra.mxu3 %v7159_v9  ;;  %v8284_v9 = vld [vmem:[#allocation26 + $0x264] sm:$0xf0]  ;;  %v8366_v58 = vld [vmem:[#allocation28 + $0x78] sm:$0xff] }
 0x58f   : > { %4800 = vmatpush.bf16.msra.mxu2 %v7491_v13  ;;  %v7191_v13 = vor.u32 %v8227_v6, %v7188_v7  ;;  %v8287_v6 = vld [vmem:[#allocation26 + $0x284] sm:$0xf]  ;;  %v7428_v7 = vld [vmem:[#allocation26 + $0x298] sm:$0xf0] }
 0x590   : > { %4822 = vmatpush.bf16.msrb.mxu0 %v7399_v17  ;;  %4839 = vmatpush.bf16.msrb.mxu1 %v7495_v19  ;;  %v8344_v17 = vld [vmem:[#allocation26 + $0x444] sm:$0xf0]  ;;  %v7403_v19 = vor.u32 %v8284_v9, %v7402_v8  ;;  %v7547_v8 = vor.u32 %v8320_v56, %v7546_v30  ;;  %v8341_v9 = vld [vmem:[#allocation26 + $0x434] sm:$0xf]  ;;  %v8354_v59 = vld [vmem:[#allocation28 + $0x18] sm:$0xff] }
 0x591   : > { %v8362_v30 = vld [vmem:[#allocation28 + $0x58] sm:$0xff]  ;;  %v8372_v56 = vld [vmem:[#allocation28 + $0xa8] sm:$0xff] }
 0x592   : > { %4812 = vmatpush.bf16.msra.mxu3 %v7135_v25  ;;  %4775 = vmatmul.bf16.vlgmr.msra.gmra.mxu0 %v9792_v54  ;;  %v7643_v25 = vor.u32 %v8344_v17, %v7642_v16  ;;  %v7404_v16 = vld [vmem:[#allocation26 + $0x268] sm:$0xf0] }
 0x593   : > { %4845 = vmatpush.bf16.msrb.mxu2 %v7283_v20  ;;  %4840 = vmatmul.bf16.vlgmr.msrb.gmra.mxu1 %v9799_v62  ;;  %v8221_v20 = vld [vmem:[#allocation26 + $0x74] sm:$0xf] }
 0x594   : > { %4884 = vmatpush.bf16.msra.mxu1 %v7287_v21  ;;  %4801 = vmatmul.bf16.vlgmr.msra.gmra.mxu2 %v9799_v62  ;;  %v7164_v21 = vld [vmem:[#allocation26 + $0x88] sm:$0xf0] }
 0x595   : > { %4823 = vmatpush.bf16.msrb.mxu0 %v7375_v31  ;;  %v7167_v27 = vor.u32 %v8221_v20, %v7164_v21  ;;  %v7379_v31 = vor.u32 %v8278_v23, %v7378_v22  ;;  %v8335_v20 = vld [vmem:[#allocation26 + $0x404] sm:$0xf]  ;;  %v7620_v21 = vld [vmem:[#allocation26 + $0x418] sm:$0xf0]  ;;  %v7498_v22 = vld [vmem:[#allocation26 + $0x310] sm:$0xf] }
 0x596   : > { %4813 = vmatpush.bf16.msra.mxu3 %v7111_v40  ;;  %v8212_v40 = vld [vmem:[#allocation26 + $0x24] sm:$0xf0]  ;;  %v7623_v26 = vor.u32 %v8335_v20, %v7620_v21 }
 0x597   : > { %4846 = vmatpush.bf16.msrb.mxu2 %v7259_v35  ;;  %v7354_v35 = vld [vmem:[#allocation26 + $0x1f0] sm:$0xf]  ;;  %v7115_v51 = vor.u32 %v8212_v40, %v7114_v38  ;;  %v8308_v23 = vld [vmem:[#allocation26 + $0x324] sm:$0xf0]  ;;  %v8263_v38 = vld [vmem:[#allocation26 + $0x1c4] sm:$0xf] }
 0x598   : > { %4885 = vmatpush.bf16.msra.mxu1 %v7263_v36  ;;  %v8272_v36 = vld [vmem:[#allocation26 + $0x204] sm:$0xf0]  ;;  %v7332_v40 = vld [vmem:[#allocation26 + $0x1d8] sm:$0xf0] }
 0x599   : > { %4824 = vmatpush.bf16.msrb.mxu0 %v7351_v45  ;;  %4814 = vmatmul.bf16.vlgmr.msra.gmra.mxu3 %v9792_v54  ;;  %v7355_v45 = vor.u32 %v8272_v36, %v7354_v35  ;;  %v7599_v35 = vor.u32 %v8329_v28, %v7596_v29  ;;  %v8323_v36 = vld [vmem:[#allocation26 + $0x3a4] sm:$0xf]  ;;  %v8368_v21 = vld [vmem:[#allocation28 + $0x88] sm:$0xff] }
 0x59a   : > { %4858 = vmatpush.bf16.msrb.mxu3 %v7475_v34  ;;  %v8209_v34 = vld [vmem:[#allocation26 + $0x14] sm:$0xf] }
 0x59b   : > { %4847 = vmatpush.bf16.msrb.mxu2 %v7235_v48  ;;  %v7476_v48 = vld [vmem:[#allocation26 + $0x2f8] sm:$0xf0]  ;;  %v7119_v39 = vor.u32 %v8209_v34, %v7116_v46  ;;  %v7335_v34 = vor.u32 %v8263_v38, %v7332_v40  ;;  %v7308_v46 = vld [vmem:[#allocation26 + $0x1a8] sm:$0xf0] }
 0x59c   : > { %4886 = vmatpush.bf16.msra.mxu1 %v7239_v49  ;;  %v7330_v49 = vld [vmem:[#allocation26 + $0x1c0] sm:$0xf]  ;;  %v7479_v53 = vor.u32 %v8299_v47, %v7476_v48  ;;  %v7551_v47 = vor.u32 %v8317_v4, %v7548_v43  ;;  %v8311_v48 = vld [vmem:[#allocation26 + $0x344] sm:$0xf] }
 0x59d   : > { %4825 = vmatpush.bf16.msrb.mxu0 %v7327_v57  ;;  %v7331_v57 = vor.u32 %v8266_v50, %v7330_v49  ;;  %v7524_v49 = vld [vmem:[#allocation26 + $0x358] sm:$0xf0]  ;;  %v8375_v43 = vld [vmem:[#allocation28 + $0xc0] sm:$0xff] }
 0x59e   : > { %4859 = vmatpush.bf16.msrb.mxu3 %v7451_v18  ;;  %v8326_v18 = vld [vmem:[#allocation26 + $0x3b4] sm:$0xf0] }
 0x59f   : > { %4848 = vmatpush.bf16.msrb.mxu2 %v7211_v61  ;;  %v7306_v61 = vld [vmem:[#allocation26 + $0x190] sm:$0xf]  ;;  %v7571_v1 = vor.u32 %v8326_v18, %v7570_v55  ;;  %v8356_v18 = vld [vmem:[#allocation28 + $0x28] sm:$0xff] }
 0x5a0   : > { %4887 = vmatpush.bf16.msra.mxu1 %v7215_v0  ;;  %v8260_v0 = vld [vmem:[#allocation26 + $0x1a4] sm:$0xf0]  ;;  %v8357_v55 = vld [vmem:[#allocation28 + $0x30] sm:$0xff] }
 0x5a1   : > { %4826 = vmatpush.bf16.msrb.mxu0 %v7303_v63  ;;  %v7671_v63 = vor.u32 %v8347_v2, %v7668_v3  ;;  %v8352_v2 = vld [vmem:[#allocation28 + $0x8] sm:$0xff]  ;;  %v8363_v3 = vld [vmem:[#allocation28 + $0x60] sm:$0xff] }
 0x5a2   : > { %4860 = vmatpush.bf16.msrb.mxu3 %v7427_v5  ;;  %v7307_v5 = vor.u32 %v8260_v0, %v7306_v61  ;;  %v8365_v61 = vld [vmem:[#allocation28 + $0x70] sm:$0xff] }
 0x5a3   : > { %4849 = vmatpush.bf16.msrb.mxu2 %v7187_v10  ;;  %v7644_v10 = vld [vmem:[#allocation26 + $0x448] sm:$0xf0]  ;;  %v8353_v0 = vld [vmem:[#allocation28 + $0x10] sm:$0xff] }
 0x5a4   : > { %4888 = vmatpush.bf16.msra.mxu1 %v7191_v13  ;;  %4827 = vmatmul.bf16.vlgmr.msrb.gmra.mxu0 %v9796_v60  ;;  %v8314_v13 = vld [vmem:[#allocation26 + $0x354] sm:$0xf0]  ;;  %v7647_v17 = vor.u32 %v8341_v9, %v7644_v10  ;;  %v8381_v10 = vld [vmem:[#allocation28 + $0xf0] sm:$0xff] }
 0x5a5   : > { %4871 = vmatpush.bf16.msra.mxu0 %v7667_v11  ;;  %v7431_v11 = vor.u32 %v8287_v6, %v7428_v7  ;;  %v8371_v7 = vld [vmem:[#allocation28 + $0xa0] sm:$0xff]  ;;  %v8370_v9 = vld [vmem:[#allocation28 + $0x98] sm:$0xff] }
 0x5a6   : > { %4861 = vmatpush.bf16.msrb.mxu3 %v7403_v19  ;;  %v7523_v19 = vor.u32 %v8314_v13, %v7522_v12  ;;  %v8359_v12 = vld [vmem:[#allocation28 + $0x40] sm:$0xff]  ;;  %v9819_v13 = vld [vmem:[%s9969_s21] sm:$0x3f] }
 0x5a7   : > { %4850 = vmatpush.bf16.msrb.mxu2 %v7163_v14  ;;  %v8275_v14 = vld [vmem:[#allocation26 + $0x224] sm:$0xf] }
 0x5a8   : > { %4889 = vmatpush.bf16.msra.mxu1 %v7167_v27  ;;  %v7499_v27 = vor.u32 %v8308_v23, %v7498_v22 }
 0x5a9   : > { %4872 = vmatpush.bf16.msra.mxu0 %v7643_v25  ;;  %v7380_v25 = vld [vmem:[#allocation26 + $0x238] sm:$0xf0] }
 0x5aa   : > { %4862 = vmatpush.bf16.msrb.mxu3 %v7379_v31  ;;  %v7383_v41 = vor.u32 %v8275_v14, %v7380_v25  ;;  %v8358_v31 = vld [vmem:[#allocation28 + $0x38] sm:$0xff] }
 0x5ab   : > { %4851 = vmatpush.bf16.msrb.mxu2 %v7139_v33  ;;  %v7572_v33 = vld [vmem:[#allocation26 + $0x3b8] sm:$0xf0] }
 0x5ac   : > { %4890 = vmatpush.bf16.msra.mxu1 %v7143_v42  ;;  %v7575_v42 = vor.u32 %v8323_v36, %v7572_v33  ;;  %v8376_v36 = vld [vmem:[#allocation28 + $0xc8] sm:$0xff] }
 0x5ad   : > { %4873 = vmatpush.bf16.msra.mxu0 %v7619_v37  ;;  %v7359_v37 = vor.u32 %v8269_v44, %v7356_v32  ;;  %v3958_v44 = vperm.slane %v9819_v13, 1 }
 0x5ae   : > { %4863 = vmatpush.bf16.msrb.mxu3 %v7355_v45  ;;  %v8257_v45 = vld [vmem:[#allocation26 + $0x194] sm:$0xf] }
 0x5af   : > { %4852 = vmatpush.bf16.msrb.mxu2 %v7115_v51  ;;  %v7311_v50 = vor.u32 %v8257_v45, %v7308_v46  ;;  %v7527_v51 = vor.u32 %v8311_v48, %v7524_v49  ;;  %v8389_v48 = vld [vmem:[#allocation28 + $0x130] sm:$0xff] }
 0x5b0   : > { %4891 = vmatpush.bf16.msra.mxu1 %v7119_v39  ;;  %v7500_v39 = vld [vmem:[#allocation26 + $0x328] sm:$0xf0] }
 0x5b1   : > { %4874 = vmatpush.bf16.msra.mxu0 %v7595_v52  ;;  %v8305_v52 = vld [vmem:[#allocation26 + $0x314] sm:$0xf] }
 0x5b2   : > { %4864 = vmatpush.bf16.msrb.mxu3 %v7331_v57  ;;  %4853 = vmatmul.bf16.vlgmr.msrb.gmra.mxu2 %v9792_v54  ;;  %v8355_v57 = vld [vmem:[#allocation28 + $0x20] sm:$0xff] }
 0x5b3   : > { %4897 = vmatpush.bf16.msra.mxu2 %v7479_v53  ;;  %4892 = vmatmul.bf16.vlgmr.msra.gmra.mxu1 %v9792_v54  ;;  %v7407_v54 = vor.u32 %v8281_v15, %v7404_v16  ;;  %v7503_v53 = vor.u32 %v8305_v52, %v7500_v39  ;;  %v8369_v16 = vld [vmem:[#allocation28 + $0x90] sm:$0xff] }
 0x5b4   : > { %5336 = vmatpush.bf16.msrb.mxu1 %v8366_v58 }
 0x5b5   : > { %4875 = vmatpush.bf16.msra.mxu0 %v7571_v1  ;;  %v8364_v1 = vld [vmem:[#allocation28 + $0x68] sm:$0xff] }
 0x5b6   : > { %4865 = vmatpush.bf16.msrb.mxu3 %v7307_v5  ;;  %v8361_v5 = vld [vmem:[#allocation28 + $0x50] sm:$0xff] }
 0x5b7   : > { %4898 = vmatpush.bf16.msra.mxu2 %v7455_v24  ;;  %v8351_v24 = vld [vmem:[#allocation28] sm:$0xff] }
 0x5b8   : > { %5337 = vmatpush.bf16.msrb.mxu1 %v8365_v61 }
 0x5b9   : > { %4876 = vmatpush.bf16.msra.mxu0 %v7547_v8  ;;  %4866 = vmatmul.bf16.vlgmr.msrb.gmra.mxu3 %v9796_v60  ;;  %v8360_v8 = vld [vmem:[#allocation28 + $0x48] sm:$0xff] }
 0x5ba   : > { %4910 = vmatpush.bf16.msra.mxu3 %v7671_v63  ;;  %v8382_v63 = vld [vmem:[#allocation28 + $0xf8] sm:$0xff] }
 0x5bb   : > { %4899 = vmatpush.bf16.msra.mxu2 %v7431_v11 }
 0x5bc   : > { %5338 = vmatpush.bf16.msrb.mxu1 %v8364_v1  ;;  %v8386_v1 = vld [vmem:[#allocation28 + $0x118] sm:$0xff] }
 0x5bd   : > { %4877 = vmatpush.bf16.msra.mxu0 %v7523_v19  ;;  %v3957_v19 = vperm.slane %v9819_v13, 0 }
 0x5be   : > { %4911 = vmatpush.bf16.msra.mxu3 %v7647_v17  ;;  %v8380_v17 = vld [vmem:[#allocation28 + $0xe8] sm:$0xff] }
 0x5bf   : > { %4900 = vmatpush.bf16.msra.mxu2 %v7407_v54  ;;  %v8379_v54 = vld [vmem:[#allocation28 + $0xe0] sm:$0xff] }
 0x5c0   : > { %5339 = vmatpush.bf16.msrb.mxu1 %v8363_v3  ;;  %v8385_v3 = vld [vmem:[#allocation28 + $0x110] sm:$0xff] }
 0x5c1   : > { %4878 = vmatpush.bf16.msra.mxu0 %v7499_v27  ;;  %v8378_v27 = vld [vmem:[#allocation28 + $0xd8] sm:$0xff] }
 0x5c2   : > { %4912 = vmatpush.bf16.msra.mxu3 %v7623_v26  ;;  %v8367_v26 = vld [vmem:[#allocation28 + $0x80] sm:$0xff] }
 0x5c3   : > { %4901 = vmatpush.bf16.msra.mxu2 %v7383_v41 }
 0x5c4   : > { %4879 = vmatmul.bf16.vlgmr.msra.gmra.mxu0 %v9799_v62  ;;  %5340 = vmatpush.bf16.msrb.mxu1 %v8362_v30 }
 0x5c5   : > { %5323 = vmatpush.bf16.msrb.mxu0 %v8358_v31  ;;  %v8377_v31 = vld [vmem:[#allocation28 + $0xd0] sm:$0xff] }
 0x5c6   : > { %4913 = vmatpush.bf16.msra.mxu3 %v7599_v35 }
 0x5c7   : > { %4902 = vmatpush.bf16.msra.mxu2 %v7359_v37 }
 0x5c8   : > { %5341 = vmatpush.bf16.msrb.mxu1 %v8361_v5 }
 0x5c9   : > { %5324 = vmatpush.bf16.msrb.mxu0 %v8357_v55 }
 0x5ca   : > { %4914 = vmatpush.bf16.msra.mxu3 %v7575_v42  ;;  %v8390_v42 = vld [vmem:[#allocation28 + $0x138] sm:$0xff] }
 0x5cb   : > { %4903 = vmatpush.bf16.msra.mxu2 %v7335_v34 }
 0x5cc   : > { %5342 = vmatpush.bf16.msrb.mxu1 %v8360_v8 }
 0x5cd   : > { %5325 = vmatpush.bf16.msrb.mxu0 %v8356_v18  ;;  %v8387_v18 = vld [vmem:[#allocation28 + $0x120] sm:$0xff] }
 0x5ce   : > { %4915 = vmatpush.bf16.msra.mxu3 %v7551_v47  ;;  %v3959_v47 = vperm.slane %v9819_v13, 2 }
 0x5cf   : > { %4904 = vmatpush.bf16.msra.mxu2 %v7311_v50 }
 0x5d0   : > { %5343 = vmatpush.bf16.msrb.mxu1 %v8359_v12 }
 0x5d1   : > { %5326 = vmatpush.bf16.msrb.mxu0 %v8355_v57 }
 0x5d2   : > { %4916 = vmatpush.bf16.msra.mxu3 %v7527_v51  ;;  %4905 = vmatmul.bf16.vlgmr.msra.gmra.mxu2 %v9796_v60  ;;  %v8374_v60 = vld [vmem:[#allocation28 + $0xb8] sm:$0xff]  ;;  %v8388_v51 = vld [vmem:[#allocation28 + $0x128] sm:$0xff] }
 0x5d3   : > { %5349 = vmatpush.bf16.msrb.mxu2 %v8374_v60  ;;  %v3960_v60 = vperm.slane %v9819_v13, 3 }
 0x5d5   : > { %5327 = vmatpush.bf16.msrb.mxu0 %v8354_v59 }
 0x5d6   : > { %4917 = vmatpush.bf16.msra.mxu3 %v7503_v53 }
 0x5d9   : > { %4918 = vmatmul.bf16.vlgmr.msra.gmra.mxu3 %v9799_v62  ;;  %5328 = vmatpush.bf16.msrb.mxu0 %v8353_v0  ;;  %v8373_v62 = vld [vmem:[#allocation28 + $0xb0] sm:$0xff] }
 0x5da   : > { %5350 = vmatpush.bf16.msrb.mxu2 %v8373_v62  ;;  %5362 = vmatpush.bf16.msrb.mxu3 %v8382_v63  ;;  %v8398_v63 = vld [vmem:[#allocation28 + $0x178] sm:$0xff] }
 0x5db   : > { %5388 = vmatpush.bf16.msra.mxu1 %v8398_v63 }
 0x5dd   : > { %5329 = vmatpush.bf16.msrb.mxu0 %v8352_v2 }
 0x5de   : > { %5351 = vmatpush.bf16.msrb.mxu2 %v8372_v56  ;;  %5363 = vmatpush.bf16.msrb.mxu3 %v8381_v10  ;;  %v8383_v10 = vld [vmem:[#allocation28 + $0x100] sm:$0xff] }
 0x5e1   : > { %5330 = vmatpush.bf16.msrb.mxu0 %v8351_v24 }
 0x5e2   : > { %5352 = vmatpush.bf16.msrb.mxu2 %v8371_v7  ;;  %5364 = vmatpush.bf16.msrb.mxu3 %v8380_v17  ;;  %v8384_v7 = vld [vmem:[#allocation28 + $0x108] sm:$0xff] }
 0x5e5   : > { %5375 = vmatpush.bf16.msra.mxu0 %v8390_v42 }
 0x5e6   : > { %5353 = vmatpush.bf16.msrb.mxu2 %v8370_v9  ;;  %5365 = vmatpush.bf16.msrb.mxu3 %v8379_v54 }
 0x5e9   : > { %5376 = vmatpush.bf16.msra.mxu0 %v8389_v48 }
 0x5ea   : > { %5354 = vmatpush.bf16.msrb.mxu2 %v8369_v16  ;;  %5366 = vmatpush.bf16.msrb.mxu3 %v8378_v27  ;;  %v8392_v27 = vld [vmem:[#allocation28 + $0x148] sm:$0xff] }
 0x5ed   : > { %5377 = vmatpush.bf16.msra.mxu0 %v8388_v51 }
 0x5ee   : > { %5355 = vmatpush.bf16.msrb.mxu2 %v8368_v21  ;;  %5367 = vmatpush.bf16.msrb.mxu3 %v8377_v31  ;;  %v8394_v21 = vld [vmem:[#allocation28 + $0x158] sm:$0xff] }
 0x5ef   : > { %v4737_v6 = vpop.f32.mrf.mxu1 }
 0x5f0   : > { %v4738_v38 = vadd.f32 %v4737_v6, %v3958_v44  ;;  %v8391_v44 = vld [vmem:[#allocation28 + $0x140] sm:$0xff] }
 0x5f1   : > { %5378 = vmatpush.bf16.msra.mxu0 %v8387_v18 }
 0x5f2   : > { %5356 = vmatpush.bf16.msrb.mxu2 %v8367_v26  ;;  %5368 = vmatpush.bf16.msrb.mxu3 %v8376_v36 }
 0x5f5   : > { %v4698_v11 = vpop.f32.mrf.mxu2  ;;  %5379 = vmatpush.bf16.msra.mxu0 %v8386_v1 }
 0x5f6   : > { %v4699_v22 = vadd.f32 %v4698_v11, %v3957_v19  ;;  %5369 = vmatpush.bf16.msrb.mxu3 %v8375_v43  ;;  %v8397_v11 = vld [vmem:[#allocation28 + $0x170] sm:$0xff]  ;;  %v8395_v19 = vld [vmem:[#allocation28 + $0x160] sm:$0xff] }
 0x5f7   : > { %v4739_v15 = vpop.f32.mrf.mxu1  ;;  %5389 = vmatpush.bf16.msra.mxu1 %v8397_v11 }
 0x5f8   : > { %v8396_v15 = vld [vmem:[#allocation28 + $0x168] sm:$0xff] }
 0x5f9   : > { %5380 = vmatpush.bf16.msra.mxu0 %v8385_v3 }
 0x5fb   : > { %v4711_v20 = vpop.f32.mrf.mxu3  ;;  %5390 = vmatpush.bf16.msra.mxu1 %v8396_v15 }
 0x5fc   : > { %v4712_v14 = vadd.f32 %v4711_v20, %v4699_v22  ;;  %v3961_v22 = vperm.slane %v9819_v13, 4 }
 0x5fd   : > { %v4700_v23 = vpop.f32.mrf.mxu2  ;;  %5381 = vmatpush.bf16.msra.mxu0 %v8384_v7 }
 0x5ff   : > { %v4724_v25 = vpop.f32.mrf.mxu0  ;;  %5391 = vmatpush.bf16.msra.mxu1 %v8395_v19 }
 0x600   : > { %v4725_v28 = vadd.f32 %v4724_v25, %v4712_v14  ;;  %v4789_v29 = vpop.f32.mrf.mxu1  ;;  %v8393_v14 = vld [vmem:[#allocation28 + $0x150] sm:$0xff] }
 0x601   : > { %5382 = vmatpush.bf16.msra.mxu0 %v8383_v10 }
 0x602   : > { %8659 = vtanh.f32 %v4725_v28 }
 0x603   : > { %v4713_v41 = vpop.f32.mrf.mxu3  ;;  %5392 = vmatpush.bf16.msra.mxu1 %v8394_v21 }
 0x605   : > { %v4750_v32 = vpop.f32.mrf.mxu2 }
 0x606   : > { %v4751_v4 = vadd.f32 %v4750_v32, %v4738_v38 }
 0x607   : > { %v4726_v35 = vpop.f32.mrf.mxu0  ;;  %5393 = vmatpush.bf16.msra.mxu1 %v8393_v14 }
 0x608   : > { %v8660_v33 = vpop.eup %8659  ;;  %v4791_v37 = vpop.f32.mrf.mxu1 }
 0x609   : > { %v4929_v40 = vpack.c.bf16 %v8660_v33, %v8660_v33  ;;  %v3962_v37 = vperm.slane %v9819_v13, 5 }
 0x60b   : > { %5331 = vmatmul.bf16.vlgmr.msrb.gmra.mxu0 %v4929_v40  ;;  %5394 = vmatpush.bf16.msra.mxu1 %v8392_v27 }
 0x60c   : > { %v4763_v34 = vpop.f32.mrf.mxu3 }
 0x60d   : > { %v4764_v45 = vadd.f32 %v4763_v34, %v4751_v4  ;;  %v4752_v46 = vpop.f32.mrf.mxu2 }
 0x60f   : > { %8661 = vtanh.f32 %v4764_v45  ;;  %v4776_v49 = vpop.f32.mrf.mxu0  ;;  %5395 = vmatpush.bf16.msra.mxu1 %v8391_v44 }
 0x610   : > { %v4841_v50 = vpop.f32.mrf.mxu1  ;;  %v4777_v52 = vadd.f32 %v4776_v49, %v3959_v47 }
 0x612   : > { %v4790_v55 = vadd.f32 %v4789_v29, %v4777_v52 }
 0x614   : > { %v4765_v39 = vpop.f32.mrf.mxu3 }
 0x615   : > { %v8662_v53 = vpop.eup %8661 }
 0x616   : > { %v4930_v57 = vpack.c.bf16 %v8662_v53, %v8662_v53 }
 0x617   : > { %v4802_v58 = vpop.f32.mrf.mxu2  ;;  %v4778_v61 = vpop.f32.mrf.mxu0 }
 0x618   : > { %v4803_v59 = vadd.f32 %v4802_v58, %v4790_v55  ;;  %v4843_v0 = vpop.f32.mrf.mxu1  ;;  %5344 = vmatmul.bf16.vlgmr.msrb.gmra.mxu1 %v4930_v57 }
 0x61a   : > { %8663 = vtanh.f32 %v4803_v59 }
 0x61c   : > { %v4815_v2 = vpop.f32.mrf.mxu3 }
 0x61d   : > { %v4816_v30 = vadd.f32 %v4815_v2, %v3960_v60 }
 0x61f   : > { %v4804_v62 = vpop.f32.mrf.mxu2 }
 0x620   : > { %v8664_v24 = vpop.eup %8663 }
 0x621   : > { %v4931_v56 = vpack.c.bf16 %v8664_v24, %v8664_v24  ;;  %v4828_v5 = vpop.f32.mrf.mxu0 }
 0x622   : > { %v4829_v6 = vadd.f32 %v4828_v5, %v4816_v30 }
 0x623   : > { %5357 = vmatmul.bf16.vlgmr.msrb.gmra.mxu2 %v4931_v56 }
 0x624   : > { %v4842_v8 = vadd.f32 %v4841_v50, %v4829_v6  ;;  %v4817_v9 = vpop.f32.mrf.mxu3 }
 0x626   : > { %8665 = vtanh.f32 %v4842_v8 }
 0x629   : > { %v4830_v12 = vpop.f32.mrf.mxu0 }
 0x62c   : > { %v8666_v16 = vpop.eup %8665 }
 0x62d   : > { %v4932_v17 = vpack.c.bf16 %v8666_v16, %v8666_v16 }
 0x62f   : > { %5370 = vmatmul.bf16.vlgmr.msrb.gmra.mxu3 %v4932_v17 }
 0x630   : > { %v4893_v20 = vpop.f32.mrf.mxu1 }
 0x631   : > { %v4894_v40 = vadd.f32 %v4893_v20, %v3962_v37 }
 0x635   : > { %v4854_v54 = vpop.f32.mrf.mxu2 }
 0x636   : > { %v4855_v26 = vadd.f32 %v4854_v54, %v3961_v22 }
 0x638   : > { %v4895_v23 = vpop.f32.mrf.mxu1 }
 0x63c   : > { %v4867_v25 = vpop.f32.mrf.mxu3 }
 0x63d   : > { %v4856_v28 = vpop.f32.mrf.mxu2  ;;  %v4868_v29 = vadd.f32 %v4867_v25, %v4855_v26 }
 0x641   : > { %v4880_v41 = vpop.f32.mrf.mxu0 }
 0x642   : > { %v4881_v31 = vadd.f32 %v4880_v41, %v4868_v29 }
 0x644   : > { %8667 = vtanh.f32 %v4881_v31  ;;  %v4869_v32 = vpop.f32.mrf.mxu3 }
 0x649   : > { %v4882_v35 = vpop.f32.mrf.mxu0 }
 0x64a   : > { %v8668_v36 = vpop.eup %8667 }
 0x64b   : > { %v4933_v33 = vpack.c.bf16 %v8668_v36, %v8668_v36 }
 0x64d   : > { %5383 = vmatmul.bf16.vlgmr.msra.gmra.mxu0 %v4933_v33 }
 0x655   : > { %v4906_v38 = vpop.f32.mrf.mxu2 }
 0x656   : > { %v4907_v42 = vadd.f32 %v4906_v38, %v4894_v40 }
 0x65c   : > { %v4919_v4 = vpop.f32.mrf.mxu3 }
 0x65d   : > { %v4920_v43 = vadd.f32 %v4919_v4, %v4907_v42  ;;  %v4908_v34 = vpop.f32.mrf.mxu2 }
 0x65f   : > { %8669 = vtanh.f32 %v4920_v43 }
 0x664   : > { %v4921_v45 = vpop.f32.mrf.mxu3 }
 0x665   : > { %v8670_v46 = vpop.eup %8669 }
 0x666   : > { %v4934_v47 = vpack.c.bf16 %v8670_v46, %v8670_v46 }
 0x668   : > { %5396 = vmatmul.bf16.vlgmr.msra.gmra.mxu1 %v4934_v47 }
 0x669   : > { %9212 = shalt.err (!%p9209_p9)
}
 0x66a   : > { %8465 = dma.vmem_to_hbm [thread:$0]  (%p9633_p4), %s5440_s23, 128, %s5442_s6, %s5422_s18  }
 0x66b   : > { %s9971_s7 = sld [smem:[#allocation61_spill]]  ;;  %s9973_s25 = sshll.u32 %s9664_s24, 3 }
 0x66c   : > { %s9972_s12 = sld [smem:[#allocation63_spill]]  ;;  %s963_s23 = scalar_lea.vmem [#allocation30], %s9973_s25 }
 0x66d   : > { %s5453_s6 = sshll.u32 %s963_s23, 4  ;;  %s5427_s8 = scalar_lea.sflag [#allocation31], %s9664_s24  ;;  %s5454_s6 = int_to_ptr.vmem [resolvable:$true] %s5453_s6 }
 0x671   : > { %v8622_v48 = vld [vmem:[%s9971_s7] ss:$0 sm:$0xff] }
 0x672   : > { %s5451_s22 = scalar_lea.hbm %s9972_s12, %s7867_s2  ;;  %s9233_s20 = scalar_lea.hbm %s9972_s12, 16 }
 0x673   : > { %s5455_s18 = sshll.u32 %s5451_s22, 4  ;;  %s5456_s18 = int_to_ptr.hbm [resolvable:$true] %s5455_s18 }
 0x674   : > { %s9227_s2 = sshra.s32 %s5456_s18, 4  ;;  %s9228_s2 = int_to_ptr.hbm [resolvable:$true] %s9227_s2 }
 0x675   : > { %s9229_s0 = scalar_lea.hbm %s9228_s2, 8  ;;  %p9234_p0 = scmp.lt.s32.totalorder %s9228_s2, %s9972_s12 }
 0x676   : > { %p9230_p10 = scmp.ne.s32.totalorder %s9228_s2, %s9229_s0  ;;  %p9235_p2 = scmp.lt.s32.totalorder %s9233_s20, %s9229_s0 }
 0x678   : > { %p9231_p13 = pnand %p9230_p10, %p9633_p4  ;;  %p9236_p1 = por %p9235_p2, %p9234_p0 }
 0x67a   : > { %p9232_p11 = pneg %p9231_p13 }
 0x67c   : > { %p9237_p3 = pnand %p9236_p1, %p9232_p11 }
 0x688   : > { %v5332_v13 = vpop.f32.mrf.mxu0 }
 0x689   : > { %v5333_v50 = vadd.f32 %v8622_v48, %v5332_v13 }
 0x690   : > { %v5334_v49 = vpop.f32.mrf.mxu0 }
 0x695   : > { %v5345_v51 = vpop.f32.mrf.mxu1 }
 0x696   : > { %v5346_v52 = vadd.f32 %v5345_v51, %v5333_v50 }
 0x69d   : > { %v5347_v39 = vpop.f32.mrf.mxu1 }
 0x6a6   : > { %v5358_v53 = vpop.f32.mrf.mxu2 }
 0x6a7   : > { %v5359_v61 = vadd.f32 %v5358_v53, %v5346_v52 }
 0x6ae   : > { %v5360_v55 = vpop.f32.mrf.mxu2 }
 0x6b2   : > { %v5371_v18 = vpop.f32.mrf.mxu3 }
 0x6b3   : > { %v5372_v0 = vadd.f32 %v5371_v18, %v5359_v61 }
 0x6ba   : > { %v5373_v57 = vpop.f32.mrf.mxu3 }
 0x6ca   : > { %v5384_v58 = vpop.f32.mrf.mxu0 }
 0x6cb   : > { %v5385_v1 = vadd.f32 %v5384_v58, %v5372_v0 }
 0x6d2   : > { %v5386_v59 = vpop.f32.mrf.mxu0 }
 0x6e5   : > { %v5397_v60 = vpop.f32.mrf.mxu1 }
 0x6e6   : > { %v5398_v2 = vadd.f32 %v5397_v60, %v5385_v1 }
 0x6e8   : > { %v7864_v3 = vmul.f32 -1.442695, %v5398_v2 }
 0x6ea   : > { %8671 = vpow2.f32 %v7864_v3 }
 0x6ed   : > { %v5399_v62 = vpop.f32.mrf.mxu1 }
 0x6f0   : > { %v8672_v24 = vpop.eup %8671 }
 0x6f1   : > { %v5404_v30 = vadd.f32 1.0, %v8672_v24 }
 0x6f3   : > { %8673 = vrcp.f32 %v5404_v30  ;;  %v5416_v7 = vand.u32 2147483648, %v5404_v30  ;;  %v5414_v8 = vand.u32 2147483647, %v5404_v30  ;;  %vm5410_vm1 = vweird.f32 %v5404_v30 }
 0x6f5   : > { %v5417_v10 = vor.u32 1.1754944e-38, %v5416_v7  ;;  %vm5415_vm3 = vcmp.eq.f32.partialorder %v5414_v8, 8.507059e+37 }
 0x6f9   : > { %v8674_v56 = vpop.eup %8673 }
 0x6fa   : > { %v5406_v5 = vmul.f32 %v8674_v56, %v5404_v30  ;;  %vm5411_vm0 = vweird.f32 %v8674_v56 }
 0x6fb   : > { %vm5412_vm2 = vmor %vm5410_vm1, %vm5411_vm0 }
 0x6fc   : > { %v5407_v6 = vsub.f32 1.0, %v5406_v5 }
 0x6fe   : > { %v5408_v63 = vmul.f32 %v8674_v56, %v5407_v6 }
 0x700   : > { %v5409_v9 = vadd.f32 %v8674_v56, %v5408_v63 }
 0x702   : > { %v5413_v11 = vsel %vm5412_vm2, %v8674_v56, %v5409_v9 }
 0x703   : > { %v5418_v12 = vsel %vm5415_vm3, %v5417_v10, %v5413_v11 }
 0x704   : > { %5420 = vst [vmem:[%s963_s23] sm:$0xff] %v5418_v12 }
 0x705   : > { %9240 = shalt.err (!%p9237_p3)
}
 0x706   : > { %8466 = dma.vmem_to_hbm [thread:$0]  (%p9633_p4), %s5454_s6, 128, %s5456_s18, %s5427_s8  }
 0x707 PF: > { %s9974_s24 = sld [smem:[#allocation43_spill]]  ;;  %p9975_p5 = scmp.ge.s32.totalorder %s9315_s30, 2 }
 0x709   : > { %p8523_p12 = pnand %p9975_p5, %p9637_p6 }
 0x70b   : > { %p8524_p7 = pneg %p8523_p12 }
 0x70d   : > { %s5467_s10 = sand.u32 1, %s9974_s24  }
 0x70e   : > { %s5468_s11 = scalar_lea.sflag [#allocation4], %s5467_s10 }
 0x70f   : > { %9294 = dma.done.wait (%p8524_p7), %s5468_s11, 128  }
 0x710   : > { %9296 = vsyncadd (%p8524_p7), %s5468_s11, 4294967168  ;;  %s5478_s22 = scalar_lea.sflag [#allocation31], %s5467_s10 }
 0x711   : > { %9298 = dma.done.wait (%p8524_p7), %s5478_s22, 128  }
 0x712   : > { %9300 = vsyncadd (%p8524_p7), %s5478_s22, 4294967168  ;;  %p47_p4 = scmp.ge.s32.totalorder %s9607_s26, 4   ;;  %s9976_s3 = smov %s9307_s28 }
 0x713   : > { %s9977_s28 = smov %s9311_s29  ;;  %s9978_s29 = smov %s9618_s1 }
 0x714   : > { %s9979_s30 = smov %s9607_s26  ;;  %49 = sbr.rel (!%p47_p4) target bundleno = 34 (0x22), region = 230 }
 0x719   :  { %5484 = vsyncpa [#allocation3], 1 }
 0x71a   :  { %5486 = vsyncpa [#allocation3 + $0x1], 1 }
 0x71b   :  { %5487 = vsyncpa [#allocation6], 1 }
 0x71c   :  { %5488 = vsyncpa [#allocation9], 1 }
 0x71d   :  { %5489 = vsyncpa [#allocation12], 1 }
 0x71e   :  { %5490 = vsyncpa [#allocation15], 1 }
 0x71f   :  { %5491 = vsyncpa [#allocation18], 1 }
 0x720   :  { %5492 = vsyncpa [#allocation21], 1 }
 0x721   :  { %5493 = vsyncpa [#allocation24], 1 }
 0x722   :  { %5494 = vsyncpa [#allocation27], 1 }
 0x723   :  { %5495 = vsyncpa [#allocation4], 1 }
 0x724   :  { %5497 = vsyncpa [#allocation4 + $0x1], 1 }
 0x725   :  { %5498 = vsyncpa [#allocation31], 1 }
 0x726   :  { %5500 = vsyncpa [#allocation31 + $0x1], 1 }

// kernel: tpu_custom_call.1
= control target key start
LH: loop header
LB: loop body
LE: loop exit
PB: predicated region body
PF: predicated region fallthrough
CT: control target
= control target key end

     0   :  { %s9884_s0 = inlined_call_operand.hbm [shape: bf16[16,128], index: 0, kind: input, shape index: {}]   ;;  %s9885_s1 = inlined_call_operand.hbm [shape: bf16[128,768], index: 1, kind: input, shape index: {}]   ;;  %s9886_s2 = inlined_call_operand.hbm [shape: f32[1,768], index: 2, kind: input, shape index: {}]   ;;  %s9887_s3 = inlined_call_operand.hbm [shape: bf16[768,384], index: 3, kind: input, shape index: {}]   ;;  %s9888_s4 = inlined_call_operand.vmem [shape: f32[1,384], index: 4, kind: input, shape index: {}]   ;;  %s9889_s5 = inlined_call_operand.hbm [shape: bf16[384,256], index: 5, kind: input, shape index: {}]   ;;  %s9890_s6 = inlined_call_operand.hbm [shape: f32[1,256], index: 6, kind: input, shape index: {}]   ;;  %s9891_s7 = inlined_call_operand.hbm [shape: bf16[256,128], index: 7, kind: input, shape index: {}]   ;;  %s9892_s8 = inlined_call_operand.hbm [shape: f32[1,128], index: 8, kind: input, shape index: {}]   ;;  %s9893_s9 = inlined_call_operand.hbm [shape: bf16[128,128], index: 9, kind: input, shape index: {}]   ;;  %s9894_s10 = inlined_call_operand.hbm [shape: f32[1,128], index: 10, kind: input, shape index: {}]   ;;  %s9895_s11 = inlined_call_operand.hbm [shape: bf16[128,128], index: 11, kind: input, shape index: {}]   ;;  %s9896_s12 = inlined_call_operand.hbm [shape: f32[1,128], index: 12, kind: input, shape index: {}]   ;;  %s9897_s13 = inlined_call_operand.hbm [shape: bf16[128,256], index: 13, kind: input, shape index: {}]   ;;  %s9898_s14 = inlined_call_operand.hbm [shape: f32[1,256], index: 14, kind: input, shape index: {}]   ;;  %s9899_s15 = inlined_call_operand.hbm [shape: bf16[256,384], index: 15, kind: input, shape index: {}]   ;;  %s9900_s16 = inlined_call_operand.vmem [shape: f32[1,384], index: 16, kind: input, shape index: {}]   ;;  %s9901_s17 = inlined_call_operand.hbm [shape: bf16[384,768], index: 17, kind: input, shape index: {}]   ;;  %s9902_s18 = inlined_call_operand.vmem [shape: f32[1,768], index: 18, kind: input, shape index: {}]   ;;  %s9903_s19 = inlined_call_operand.hbm [shape: bf16[768,128], index: 19, kind: input, shape index: {}]   ;;  %s9904_s20 = inlined_call_operand.vmem [shape: f32[1,128], index: 20, kind: input, shape index: {}]   ;;  %s9905_s21 = inlined_call_operand.hbm [shape: f32[16,128], index: 21, kind: output, shape index: {0}]   ;;  %s9906_s22 = inlined_call_operand.hbm [shape: f32[16,128], index: 22, kind: output, shape index: {1}]  }
   0x1   :  { %9919 = sst [smem:[#allocation46_spill]] %s9884_s0 }
   0x2   :  { %9920 = sst [smem:[#allocation47_spill]] %s9885_s1 }
   0x3   :  { %9921 = sst [smem:[#allocation48_spill]] %s9886_s2 }
   0x4   :  { %9922 = sst [smem:[#allocation49_spill]] %s9887_s3 }
   0x5   :  { %9923 = sst [smem:[#allocation50_spill]] %s9888_s4 }
   0x6   :  { %9924 = sst [smem:[#allocation51_spill]] %s9889_s5 }
   0x7   :  { %9925 = sst [smem:[#allocation52_spill]] %s9890_s6 }
   0x8   :  { %9926 = sst [smem:[#allocation53_spill]] %s9891_s7 }
   0x9   :  { %9927 = sst [smem:[#allocation54_spill]] %s9892_s8 }
   0xa   :  { %9928 = sst [smem:[#allocation55_spill]] %s9893_s9 }
   0xb   :  { %9929 = sst [smem:[#allocation56_spill]] %s9894_s10 }
   0xc   :  { %9930 = sst [smem:[#allocation57_spill]] %s9895_s11 }
   0xd   :  { %9931 = sst [smem:[#allocation58_spill]] %s9896_s12 }
   0xe   :  { %9932 = sst [smem:[#allocation59_spill]] %s9900_s16 }
   0xf   :  { %9933 = sst [smem:[#allocation60_spill]] %s9902_s18 }
  0x10   :  { %9934 = sst [smem:[#allocation61_spill]] %s9904_s20 }
  0x11   :  { %9935 = sst [smem:[#allocation62_spill]] %s9905_s21 }
  0x12   :  { %9936 = sst [smem:[#allocation63_spill]] %s9906_s22 }
  0x13   :  { %28 = vsyncpa [#allocation3], 0 }
  0x14   :  { %30 = vsyncpa [#allocation3 + $0x1], 0 }
  0x15   :  { %31 = vsyncpa [#allocation6], 0 }
  0x16   :  { %32 = vsyncpa [#allocation9], 0 }
  0x17   :  { %33 = vsyncpa [#allocation12], 0 }
  0x18   :  { %34 = vsyncpa [#allocation15], 0 }
  0x19   :  { %35 = vsyncpa [#allocation18], 0 }
  0x1a   :  { %36 = vsyncpa [#allocation21], 0 }
  0x1b   :  { %37 = vsyncpa [#allocation24], 0 }
  0x1c   :  { %38 = vsyncpa [#allocation27], 0 }
  0x1d   :  { %39 = vsyncpa [#allocation4], 0 }
  0x1e   :  { %41 = vsyncpa [#allocation4 + $0x1], 0 }
  0x1f   :  { %42 = vsyncpa [#allocation31], 0 }
  0x20   :  { %44 = vsyncpa [#allocation31 + $0x1], 0  ;;  %s9456_s3 = smov 0   ;;  %s9458_s28 = smov 0  }
  0x21   :  { %s9460_s29 = smov 0   ;;  %s9462_s30 = smov 0  }
  0x22 LB: > { %9937 = sst [smem:[#allocation43_spill]] %s9303_s3  ;;  %s9480_s5 = sadd.s32 4294967295, %s9315_s30   ;;  %s9315_s30 = sphi %s9462_s30, %s9979_s30   ;;  %s9311_s29 = sphi %s9460_s29, %s9978_s29   ;;  %s9307_s28 = sphi %s9458_s28, %s9977_s28   ;;  %s9303_s3 = sphi %s9456_s3, %s9976_s3  }
  0x23   : > { %s9938_s23 = sld [smem:[#allocation47_spill]]  ;;  %p5712_p0 = scmp.ge.s32.totalorder %s9315_s30, 1 }
  0x24   : > { %9939 = sst [smem:[#allocation44_spill]] %s9480_s5  ;;  %p71_p1 = scmp.eq.s32.totalorder %s9480_s5, 0 }
  0x25   : > { %p553_p2 = scmp.lt.s32.totalorder %s9315_s30, 3  ;;  %s9317_s6 = smov [#allocation5]  }
  0x26   : > { %s566_s25 = sshll.u32 %s9317_s6, 4  ;;  %s9942_s27 = sld [smem:[#allocation49_spill]]  ;;  %s567_s25 = int_to_ptr.vmem [resolvable:$true] %s566_s25 }
  0x27   : > { %p9485_p3 = pnand %p5712_p0, %p553_p2  ;;  %s9914_s6 = smov 384  }
  0x28   : > { %s9915_s20 = smov 24   ;;  %s9916_s26 = smov 192  }
  0x29   : > { %s564_s1 = sshll.u32 %s9938_s23, 4  ;;  %p8469_p4 = pneg %p9485_p3  ;;  %s565_s1 = int_to_ptr.hbm [resolvable:$true] %s564_s1 }
  0x2a   : > { %s9940_s24 = scalar_select %p9485_p3, 1, 0 }
  0x2b   : > { %p9497_p6 = pnand %p8469_p4, %p71_p1  ;;  %s9318_s23 = smov [#allocation8]  }
  0x2c   : > { %9941 = sst [smem:[#allocation45_spill]] %s9940_s24  ;;  %s590_s4 = sshll.u32 %s9942_s27, 4  ;;  %s591_s4 = int_to_ptr.hbm [resolvable:$true] %s590_s4 }
  0x2d   : > { %s592_s22 = sshll.u32 %s9318_s23, 4  ;;  %s9917_s2 = smov 12   ;;  %s593_s22 = int_to_ptr.vmem [resolvable:$true] %s592_s22 }
  0x2e   : > { %8472 = dma.hbm_to_vmem [thread:$0]  (!%p9497_p6), %s565_s1, 6144, %s567_s25, [#allocation6], %s9914_s6, %s9914_s6, %s9915_s20  }
  0x2f   : > { %8478 = dma.hbm_to_vmem [thread:$0]  (!%p9497_p6), %s591_s4, 18432, %s593_s22, [#allocation9], %s9916_s26, %s9916_s26, %s9917_s2  }
  0x30   : > { %s9944_s18 = sld [smem:[#allocation52_spill]]  ;;  %s9323_s16 = smov [#allocation11]  }
  0x31   : > { %s624_s24 = sshll.u32 %s9323_s16, 4  ;;  %s9945_s8 = sld [smem:[#allocation54_spill]]  ;;  %s625_s24 = int_to_ptr.vmem [resolvable:$true] %s624_s24 }
  0x32   : > { %s9324_s6 = smov [#allocation14]   ;;  %s9946_s10 = sld [smem:[#allocation56_spill]] }
  0x33   : > { %s650_s20 = sshll.u32 %s9324_s6, 4  ;;  %s9947_s12 = sld [smem:[#allocation58_spill]]  ;;  %s651_s20 = int_to_ptr.vmem [resolvable:$true] %s650_s20 }
  0x34   : > { %s9325_s5 = smov [#allocation17]   ;;  %s726_s1 = sshll.u32 %s9898_s14, 4  ;;  %s727_s1 = int_to_ptr.hbm [resolvable:$true] %s726_s1 }
  0x35   : > { %s676_s27 = sshll.u32 %s9325_s5, 4  ;;  %s754_s22 = sshll.u32 %s9901_s17, 4  ;;  %s677_s27 = int_to_ptr.vmem [resolvable:$true] %s676_s27  ;;  %s755_s22 = int_to_ptr.hbm [resolvable:$true] %s754_s22 }
  0x36   : > { %s622_s23 = sshll.u32 %s9944_s18, 4  ;;  %s9327_s16 = smov [#allocation23]   ;;  %s623_s23 = int_to_ptr.hbm [resolvable:$true] %s622_s23 }
  0x37   : > { %s648_s25 = sshll.u32 %s9945_s8, 4  ;;  %s728_s18 = sshll.u32 %s9327_s16, 4  ;;  %s649_s25 = int_to_ptr.hbm [resolvable:$true] %s648_s25  ;;  %s729_s18 = int_to_ptr.vmem [resolvable:$true] %s728_s18 }
  0x38   : > { %8484 = dma.hbm_to_vmem [thread:$0]  (!%p9497_p6), %s623_s23, 32, %s625_s24, [#allocation12]  }
  0x39   : > { %s674_s21 = sshll.u32 %s9946_s10, 4  ;;  %s700_s4 = sshll.u32 %s9947_s12, 4  ;;  %s675_s21 = int_to_ptr.hbm [resolvable:$true] %s674_s21  ;;  %s701_s4 = int_to_ptr.hbm [resolvable:$true] %s700_s4 }
  0x3a   : > { %8490 = dma.hbm_to_vmem [thread:$0]  (!%p9497_p6), %s649_s25, 16, %s651_s20, [#allocation15]  }
  0x3b   : > { %8496 = dma.hbm_to_vmem [thread:$0]  (!%p9497_p6), %s675_s21, 16, %s677_s27, [#allocation18]  }
  0x3c   : > { %s9326_s24 = smov [#allocation20]   ;;  %s9328_s21 = smov [#allocation26]  }
  0x3d   : > { %s702_s6 = sshll.u32 %s9326_s24, 4  ;;  %s756_s5 = sshll.u32 %s9328_s21, 4  ;;  %s703_s6 = int_to_ptr.vmem [resolvable:$true] %s702_s6  ;;  %s757_s5 = int_to_ptr.vmem [resolvable:$true] %s756_s5 }
  0x3e   : > { %8502 = dma.hbm_to_vmem [thread:$0]  (!%p9497_p6), %s701_s4, 16, %s703_s6, [#allocation21]  }
  0x3f   : > { %8508 = dma.hbm_to_vmem [thread:$0]  (!%p9497_p6), %s727_s1, 32, %s729_s18, [#allocation24]  }
  0x40   : > { %s9948_s3 = sld [smem:[#allocation48_spill]]  ;;  %s9949_s4 = smov 24  }
  0x41   : > { %s9950_s6 = smov 384   ;;  %s9951_s16 = sld [smem:[#allocation51_spill]] }
  0x42   : > { %8514 = dma.hbm_to_vmem [thread:$0]  (!%p9497_p6), %s755_s22, 18432, %s757_s5, [#allocation27], %s9950_s6, %s9950_s6, %s9949_s4  }
  0x43   : > { %s9329_s2 = smov [#allocation7]   ;;  %s9330_s18 = smov [#allocation10]  }
  0x44   : > { %s581_s1 = sshll.u32 %s9329_s2, 4  ;;  %s609_s21 = sshll.u32 %s9330_s18, 4  ;;  %s582_s1 = int_to_ptr.vmem [resolvable:$true] %s581_s1  ;;  %s610_s21 = int_to_ptr.vmem [resolvable:$true] %s609_s21 }
  0x45   : > { %s9331_s27 = smov 128   ;;  %s9332_s24 = smov 8  }
  0x46   : > { %s579_s23 = sshll.u32 %s9948_s3, 4  ;;  %s9952_s7 = sld [smem:[#allocation53_spill]]  ;;  %s580_s23 = int_to_ptr.hbm [resolvable:$true] %s579_s23 }
  0x47   : > { %s607_s26 = sshll.u32 %s9951_s16, 4  ;;  %s9333_s3 = smov [#allocation13]   ;;  %s608_s26 = int_to_ptr.hbm [resolvable:$true] %s607_s26 }
  0x48   : > { %8475 = dma.hbm_to_vmem [thread:$0]  (!%p9497_p6), %s580_s23, 96, %s582_s1, [#allocation6]  }
  0x49   : > { %8481 = dma.hbm_to_vmem [thread:$0]  (!%p9497_p6), %s608_s26, 6144, %s610_s21, [#allocation9], %s9331_s27, %s9331_s27, %s9332_s24  }
  0x4a   : > { %s635_s4 = sshll.u32 %s9333_s3, 4  ;;  %s9953_s9 = sld [smem:[#allocation55_spill]]  ;;  %s636_s4 = int_to_ptr.vmem [resolvable:$true] %s635_s4 }
  0x4b   : > { %s9334_s25 = smov 64   ;;  %s9335_s16 = smov 4  }
  0x4c   : > { %s633_s2 = sshll.u32 %s9952_s7, 4  ;;  %s9336_s26 = smov [#allocation16]   ;;  %s634_s2 = int_to_ptr.hbm [resolvable:$true] %s633_s2 }
  0x4d   : > { %8487 = dma.hbm_to_vmem [thread:$0]  (!%p9497_p6), %s634_s2, 2048, %s636_s4, [#allocation12], %s9334_s25, %s9334_s25, %s9335_s16  }
  0x4e   : > { %s661_s1 = sshll.u32 %s9336_s26, 4  ;;  %s9954_s11 = sld [smem:[#allocation57_spill]]  ;;  %s662_s1 = int_to_ptr.vmem [resolvable:$true] %s661_s1 }
  0x4f   : > { %s711_s23 = sshll.u32 %s9897_s13, 4  ;;  %s9337_s2 = smov [#allocation19]   ;;  %s712_s23 = int_to_ptr.hbm [resolvable:$true] %s711_s23 }
  0x50   : > { %s659_s20 = sshll.u32 %s9953_s9, 4  ;;  %s687_s4 = sshll.u32 %s9337_s2, 4  ;;  %s660_s20 = int_to_ptr.hbm [resolvable:$true] %s659_s20  ;;  %s688_s4 = int_to_ptr.vmem [resolvable:$true] %s687_s4 }
  0x51   : > { %8493 = dma.hbm_to_vmem [thread:$0]  (!%p9497_p6), %s660_s20, 1024, %s662_s1, [#allocation15], %s9334_s25, %s9334_s25, %s9335_s16  }
  0x52   : > { %s9338_s6 = smov [#allocation22]   ;;  %s737_s1 = sshll.u32 %s9899_s15, 4  ;;  %s738_s1 = int_to_ptr.hbm [resolvable:$true] %s737_s1 }
  0x53   : > { %s713_s26 = sshll.u32 %s9338_s6, 4  ;;  %s771_s5 = sshll.u32 %s9903_s19, 4  ;;  %s714_s26 = int_to_ptr.vmem [resolvable:$true] %s713_s26  ;;  %s772_s5 = int_to_ptr.hbm [resolvable:$true] %s771_s5 }
  0x54   : > { %s685_s22 = sshll.u32 %s9954_s11, 4  ;;  %s9339_s3 = smov [#allocation25]   ;;  %s686_s22 = int_to_ptr.hbm [resolvable:$true] %s685_s22 }
  0x55   : > { %8499 = dma.hbm_to_vmem [thread:$0]  (!%p9497_p6), %s686_s22, 1024, %s688_s4, [#allocation18], %s9334_s25, %s9334_s25, %s9335_s16  }
  0x56   : > { %8505 = dma.hbm_to_vmem [thread:$0]  (!%p9497_p6), %s712_s23, 2048, %s714_s26, [#allocation21], %s9331_s27, %s9331_s27, %s9332_s24  }
  0x57   : > { %s9955_s2 = sld [smem:[#allocation43_spill]]  ;;  %s739_s4 = sshll.u32 %s9339_s3, 4  ;;  %s740_s4 = int_to_ptr.vmem [resolvable:$true] %s739_s4 }
  0x58   : > { %s9956_s6 = smov 12   ;;  %s9957_s18 = smov 192  }
  0x59   : > { %s9958_s20 = sld [smem:[#allocation44_spill]]  ;;  %s9340_s27 = smov [#allocation28]  }
  0x5a   : > { %8511 = dma.hbm_to_vmem [thread:$0]  (!%p9497_p6), %s738_s1, 6144, %s740_s4, [#allocation24], %s9957_s18, %s9957_s18, %s9956_s6  }
  0x5b   : > { %s773_s24 = sshll.u32 %s9340_s27, 4  ;;  %s5711_s23 = sadd.s32 4294967294, %s9315_s30   ;;  %s774_s24 = int_to_ptr.vmem [resolvable:$true] %s773_s24 }
  0x5c   : > { %8517 = dma.hbm_to_vmem [thread:$0]  (!%p9497_p6), %s772_s5, 6144, %s774_s24, [#allocation27], %s9334_s25, %s9334_s25, %s9335_s16  }
  0x5d   : > { %s9607_s26 = sadd.s32 1, %s9315_s30   ;;  %s57_s22 = sadd.s32 1, %s9311_s29 }
  0x5e   : > { %s54_s21 = ssub.s32 %s9315_s30, %s9607_s26  ;;  %p64_p8 = scmp.ne.s32.totalorder %s9311_s29, %s9307_s28 }
  0x5f   : > { %p55_p7 = scmp.eq.s32.totalorder %s54_s21, 0  ;;  %p65_p9 = scmp.eq.s32.totalorder %s9315_s30, 0 }
  0x60   : > { %p70_p10 = scmp.ne.s32.totalorder %s9307_s28, %s9955_s2  ;;  %p514_p13 = scmp.eq.s32.totalorder %s9958_s20, 1 }
  0x61   : > { %s9618_s1 = scalar_select %p55_p7, %s9311_s29, %s57_s22  }
  0x62   : > { %p9620_p11 = por %p65_p9, %p64_p8  ;;  %p9626_p12 = por %p71_p1, %p70_p10 }
  0x63   : > { %p520_p0 = scmp.eq.s32.totalorder %s5711_s23, 1  ;;  %p8545_p2 = scmp.lt.s32.totalorder %s9315_s30, 2 }
  0x64   : > { %s790_s16 = sand.u32 1, %s9311_s29   ;;  %p9633_p4 = por %p514_p13, %p64_p8 }
  0x65   : > { %p9637_p6 = por %p520_p0, %p70_p10  ;;  %s5730_s2 = sshll.u32 %s790_s16, 2 }
  0x66   : > { %s5731_s4 = sshll.u32 %s9315_s30, 2  ;;  %s9963_s27 = sld [smem:[#allocation46_spill]] }
  0x67   : > { %s794_s21 = scalar_lea.vmem [#allocation2], %s5730_s2  ;;  %p9647_p7 = pnand %p8545_p2, %p9620_p11 }
  0x68   : > { %s802_s22 = sshll.u32 %s794_s21, 4  ;;  %s791_s7 = scalar_lea.sflag [#allocation3], %s790_s16  ;;  %s803_s22 = int_to_ptr.vmem [resolvable:$true] %s802_s22 }
  0x69   : > { %p9159_p9 = pneg %p9647_p7 }
  0x6c   : > { %s798_s24 = scalar_lea.hbm %s9963_s27, %s5731_s4  ;;  %s9162_s6 = scalar_lea.hbm %s9963_s27, 8 }
  0x6d   : > { %s800_s20 = sshll.u32 %s798_s24, 4  ;;  %s801_s20 = int_to_ptr.hbm [resolvable:$true] %s800_s20 }
  0x6e   : > { %s9155_s8 = sshra.s32 %s801_s20, 4  ;;  %s9156_s8 = int_to_ptr.hbm [resolvable:$true] %s9155_s8 }
  0x6f   : > { %s9157_s9 = scalar_lea.hbm %s9156_s8, 4  ;;  %p9163_p11 = scmp.lt.s32.totalorder %s9156_s8, %s9963_s27 }
  0x70   : > { %p9158_p8 = scmp.ne.s32.totalorder %s9156_s8, %s9157_s9  ;;  %p9164_p0 = scmp.lt.s32.totalorder %s9162_s6, %s9157_s9 }
  0x72   : > { %p9160_p10 = pnand %p9159_p9, %p9158_p8  ;;  %p9165_p2 = por %p9164_p0, %p9163_p11 }
  0x74   : > { %p9161_p13 = pneg %p9160_p10 }
  0x76   : > { %p9166_p5 = pnand %p9165_p2, %p9161_p13 }
  0x78   : > { %9169 = shalt.err (!%p9166_p5)
}
  0x79   : > { %8521 = dma.hbm_to_vmem [thread:$0]  (!%p9647_p7), %s801_s20, 64, %s803_s22, %s791_s7  }
  0x7a   : > { %811 = sbr.rel (%p9485_p3) target bundleno = 1799 (0x707), region = 104  ;;  %s9664_s24 = sand.u32 (!%p9485_p3), 1, %s9307_s28  }
  0x7b   : > { %s5733_s21 = sshll.u32 (!%p9485_p3), %s9664_s24, 2  ;;  %s814_s2 = scalar_lea.sflag (!%p9485_p3), [#allocation3], %s9664_s24 }
  0x7c   : > { %s9668_s4 = scalar_lea.vmem (!%p9485_p3), [#allocation2], %s5733_s21 }
  0x7f   : > { %9258 = dma.done.wait (%p9626_p12), %s814_s2, 64  }
  0x80   : > { %9260 = vsyncadd (%p9626_p12), %s814_s2, 4294967232  ;;  %s9966_s8 = sld [smem:[#allocation44_spill]] }
  0x81   : > { %9262 = dma.done.wait (%p71_p1), [#allocation6], 6240  }
  0x82   : > { %9264 = vsyncadd (%p71_p1), [#allocation6], 4294961056 }
  0x83   : > { %9266 = dma.done.wait (%p71_p1), [#allocation9], 24576  }
  0x84   : > { %9268 = vsyncadd (%p71_p1), [#allocation9], 4294942720 }
  0x85   : > { %9270 = dma.done.wait (%p71_p1), [#allocation12], 2080  }
  0x86   : > { %9272 = vsyncadd (%p71_p1), [#allocation12], 4294965216 }
  0x87   : > { %9274 = dma.done.wait (%p71_p1), [#allocation15], 1040  }
  0x88   : > { %9276 = vsyncadd (%p71_p1), [#allocation15], 4294966256 }
  0x89   : > { %9278 = dma.done.wait (%p71_p1), [#allocation18], 1040  }
  0x8a   : > { %9280 = vsyncadd (%p71_p1), [#allocation18], 4294966256 }
  0x8b   : > { %9282 = dma.done.wait (%p71_p1), [#allocation21], 2064  }
  0x8c   : > { %9284 = vsyncadd (%p71_p1), [#allocation21], 4294965232 }
  0x8d   : > { %9286 = dma.done.wait (%p71_p1), [#allocation24], 6176  }
  0x8e   : > { %9288 = vsyncadd (%p71_p1), [#allocation24], 4294961120 }
  0x8f   : > { %9290 = dma.done.wait (%p71_p1), [#allocation27], 24576  }
  0x90   : > { %9292 = vsyncadd (%p71_p1), [#allocation27], 4294942720  ;;  %v5922_v0 = vld [vmem:[#allocation5 + $0x150] sm:$0xf]  ;;  %v7916_v1 = vld [vmem:[#allocation5 + $0x164] sm:$0xf0] }
  0x91   : > { %v7913_v2 = vld [vmem:[#allocation5 + $0x154] sm:$0xf]  ;;  %v5923_v3 = vor.u32 %v7916_v1, %v5922_v0  ;;  %v5924_v4 = vld [vmem:[#allocation5 + $0x168] sm:$0xf0]  ;;  %v5930_v5 = vld [vmem:[#allocation5 + $0x158] sm:$0xf] }
  0x92   : > { %v7917_v6 = vld [vmem:[#allocation5 + $0x16c] sm:$0xf0]  ;;  %v5927_v7 = vor.u32 %v7913_v2, %v5924_v4  ;;  %v7914_v9 = vld [vmem:[#allocation5 + $0x15c] sm:$0xf]  ;;  %v5932_v10 = vld [vmem:[#allocation5 + $0x170] sm:$0xf0] }
  0x93   : > { %v5931_v8 = vor.u32 %v7917_v6, %v5930_v5  ;;  %v5898_v11 = vld [vmem:[#allocation5 + $0x120] sm:$0xf]  ;;  %1267 = vmatpush.bf16.msra.mxu0 %v5923_v3  ;;  %v5935_v12 = vor.u32 %v7914_v9, %v5932_v10  ;;  %v7910_v13 = vld [vmem:[#allocation5 + $0x134] sm:$0xf0]  ;;  %v7907_v14 = vld [vmem:[#allocation5 + $0x124] sm:$0xf] }
  0x94   : > { %v5900_v15 = vld [vmem:[#allocation5 + $0x138] sm:$0xf0]  ;;  %1280 = vmatpush.bf16.msra.mxu1 %v5927_v7  ;;  %v5899_v16 = vor.u32 %v7910_v13, %v5898_v11  ;;  %v5906_v18 = vld [vmem:[#allocation5 + $0x128] sm:$0xf]  ;;  %v7911_v19 = vld [vmem:[#allocation5 + $0x13c] sm:$0xf0] }
  0x95   : > { %1293 = vmatpush.bf16.msra.mxu2 %v5931_v8  ;;  %v5903_v17 = vor.u32 %v7907_v14, %v5900_v15  ;;  %v7908_v20 = vld [vmem:[#allocation5 + $0x12c] sm:$0xf]  ;;  %1306 = vmatpush.bf16.msra.mxu3 %v5935_v12  ;;  %v5907_v21 = vor.u32 %v7911_v19, %v5906_v18  ;;  %v5908_v22 = vld [vmem:[#allocation5 + $0x140] sm:$0xf0]  ;;  %v5874_v23 = vld [vmem:[#allocation5 + $0xf0] sm:$0xf] }
  0x96   : > { %v7904_v24 = vld [vmem:[#allocation5 + $0x104] sm:$0xf0]  ;;  %v5911_v25 = vor.u32 %v7908_v20, %v5908_v22  ;;  %v7901_v26 = vld [vmem:[#allocation5 + $0xf4] sm:$0xf]  ;;  %v5876_v27 = vld [vmem:[#allocation5 + $0x108] sm:$0xf0] }
  0x97   : > { %v5882_v28 = vld [vmem:[#allocation5 + $0xf8] sm:$0xf]  ;;  %1268 = vmatpush.bf16.msra.mxu0 %v5899_v16  ;;  %v5875_v29 = vor.u32 %v7904_v24, %v5874_v23  ;;  %v7905_v30 = vld [vmem:[#allocation5 + $0x10c] sm:$0xf0]  ;;  %v7902_v31 = vld [vmem:[#allocation5 + $0xfc] sm:$0xf]  ;;  %v5879_v33 = vor.u32 %v7901_v26, %v5876_v27 }
  0x98   : > { %v5884_v32 = vld [vmem:[#allocation5 + $0x110] sm:$0xf0]  ;;  %1281 = vmatpush.bf16.msra.mxu1 %v5903_v17  ;;  %v5883_v34 = vor.u32 %v7905_v30, %v5882_v28  ;;  %v5850_v35 = vld [vmem:[#allocation5 + $0xc0] sm:$0xf]  ;;  %v7898_v36 = vld [vmem:[#allocation5 + $0xd4] sm:$0xf0] }
  0x99   : > { %1294 = vmatpush.bf16.msra.mxu2 %v5907_v21  ;;  %v7895_v37 = vld [vmem:[#allocation5 + $0xc4] sm:$0xf]  ;;  %1307 = vmatpush.bf16.msra.mxu3 %v5911_v25  ;;  %v5887_v38 = vor.u32 %v7902_v31, %v5884_v32  ;;  %v5852_v39 = vld [vmem:[#allocation5 + $0xd8] sm:$0xf0]  ;;  %v5858_v40 = vld [vmem:[#allocation5 + $0xc8] sm:$0xf]  ;;  %v5851_v44 = vor.u32 %v7898_v36, %v5850_v35 }
  0x9a   : > { %v7899_v41 = vld [vmem:[#allocation5 + $0xdc] sm:$0xf0]  ;;  %v7896_v42 = vld [vmem:[#allocation5 + $0xcc] sm:$0xf]  ;;  %v5860_v43 = vld [vmem:[#allocation5 + $0xe0] sm:$0xf0]  ;;  %v5855_v45 = vor.u32 %v7895_v37, %v5852_v39 }
  0x9b   : > { %1269 = vmatpush.bf16.msra.mxu0 %v5875_v29  ;;  %v5859_v46 = vor.u32 %v7899_v41, %v5858_v40  ;;  %v5826_v47 = vld [vmem:[#allocation5 + $0x90] sm:$0xf]  ;;  %v7892_v48 = vld [vmem:[#allocation5 + $0xa4] sm:$0xf0]  ;;  %v7889_v49 = vld [vmem:[#allocation5 + $0x94] sm:$0xf]  ;;  %v5863_v50 = vor.u32 %v7896_v42, %v5860_v43 }
  0x9c   : > { %1282 = vmatpush.bf16.msra.mxu1 %v5879_v33  ;;  %v5828_v51 = vld [vmem:[#allocation5 + $0xa8] sm:$0xf0]  ;;  %v5834_v52 = vld [vmem:[#allocation5 + $0x98] sm:$0xf]  ;;  %v7893_v53 = vld [vmem:[#allocation5 + $0xac] sm:$0xf0]  ;;  %v5827_v56 = vor.u32 %v7892_v48, %v5826_v47 }
  0x9d   : > { %1295 = vmatpush.bf16.msra.mxu2 %v5883_v34  ;;  %1308 = vmatpush.bf16.msra.mxu3 %v5887_v38  ;;  %v7890_v54 = vld [vmem:[#allocation5 + $0x9c] sm:$0xf]  ;;  %v5836_v55 = vld [vmem:[#allocation5 + $0xb0] sm:$0xf0]  ;;  %v5831_v57 = vor.u32 %v7889_v49, %v5828_v51  ;;  %v5835_v58 = vor.u32 %v7893_v53, %v5834_v52  ;;  %v5802_v59 = vld [vmem:[#allocation5 + $0x60] sm:$0xf] }
  0x9e   : > { %v7886_v60 = vld [vmem:[#allocation5 + $0x74] sm:$0xf0]  ;;  %v7883_v61 = vld [vmem:[#allocation5 + $0x64] sm:$0xf]  ;;  %v5839_v62 = vor.u32 %v7890_v54, %v5836_v55  ;;  %v5804_v63 = vld [vmem:[#allocation5 + $0x78] sm:$0xf0] }
  0x9f   : > { %1270 = vmatpush.bf16.msra.mxu0 %v5851_v44  ;;  %v5810_v0 = vld [vmem:[#allocation5 + $0x68] sm:$0xf]  ;;  %v7887_v1 = vld [vmem:[#allocation5 + $0x7c] sm:$0xf0]  ;;  %v7884_v2 = vld [vmem:[#allocation5 + $0x6c] sm:$0xf]  ;;  %v5803_v4 = vor.u32 %v7886_v60, %v5802_v59  ;;  %v5807_v5 = vor.u32 %v7883_v61, %v5804_v63 }
  0xa0   : > { %1283 = vmatpush.bf16.msra.mxu1 %v5855_v45  ;;  %v5812_v3 = vld [vmem:[#allocation5 + $0x80] sm:$0xf0]  ;;  %v5811_v6 = vor.u32 %v7887_v1, %v5810_v0  ;;  %v5778_v7 = vld [vmem:[#allocation5 + $0x30] sm:$0xf]  ;;  %v7880_v8 = vld [vmem:[#allocation5 + $0x44] sm:$0xf0] }
  0xa1   : > { %1296 = vmatpush.bf16.msra.mxu2 %v5859_v46  ;;  %1309 = vmatpush.bf16.msra.mxu3 %v5863_v50  ;;  %v7877_v9 = vld [vmem:[#allocation5 + $0x34] sm:$0xf]  ;;  %v5815_v10 = vor.u32 %v7884_v2, %v5812_v3  ;;  %v5780_v11 = vld [vmem:[#allocation5 + $0x48] sm:$0xf0]  ;;  %v5786_v12 = vld [vmem:[#allocation5 + $0x38] sm:$0xf]  ;;  %v5779_v16 = vor.u32 %v7880_v8, %v5778_v7 }
  0xa2   : > { %v7881_v13 = vld [vmem:[#allocation5 + $0x4c] sm:$0xf0]  ;;  %v7878_v14 = vld [vmem:[#allocation5 + $0x3c] sm:$0xf]  ;;  %v5788_v15 = vld [vmem:[#allocation5 + $0x50] sm:$0xf0]  ;;  %v5783_v18 = vor.u32 %v7877_v9, %v5780_v11 }
  0xa3   : > { %1271 = vmatpush.bf16.msra.mxu0 %v5827_v56  ;;  %v5754_v17 = vld [vmem:[#allocation5] sm:$0xf]  ;;  %v5787_v19 = vor.u32 %v7881_v13, %v5786_v12  ;;  %v7874_v20 = vld [vmem:[#allocation5 + $0x14] sm:$0xf0]  ;;  %v7871_v21 = vld [vmem:[#allocation5 + $0x4] sm:$0xf]  ;;  %v5791_v23 = vor.u32 %v7878_v14, %v5788_v15 }
  0xa4   : > { %1284 = vmatpush.bf16.msra.mxu1 %v5831_v57  ;;  %v5756_v22 = vld [vmem:[#allocation5 + $0x18] sm:$0xf0]  ;;  %v5762_v24 = vld [vmem:[#allocation5 + $0x8] sm:$0xf]  ;;  %v7875_v25 = vld [vmem:[#allocation5 + $0x1c] sm:$0xf0]  ;;  %v5755_v30 = vor.u32 %v7874_v20, %v5754_v17 }
  0xa5   : > { %1297 = vmatpush.bf16.msra.mxu2 %v5835_v58  ;;  %1310 = vmatpush.bf16.msra.mxu3 %v5839_v62  ;;  %v7872_v26 = vld [vmem:[#allocation5 + $0xc] sm:$0xf]  ;;  %v5764_v27 = vld [vmem:[#allocation5 + $0x20] sm:$0xf0]  ;;  %v5938_v28 = vld [vmem:[#allocation5 + $0x160] sm:$0xf]  ;;  %v5759_v33 = vor.u32 %v7871_v21, %v5756_v22  ;;  %v5763_v34 = vor.u32 %v7875_v25, %v5762_v24 }
  0xa6   : > { %v7918_v29 = vld [vmem:[#allocation5 + $0x174] sm:$0xf0]  ;;  %v7915_v31 = vld [vmem:[#allocation5 + $0x164] sm:$0xf]  ;;  %v5940_v32 = vld [vmem:[#allocation5 + $0x178] sm:$0xf0]  ;;  %v5767_v35 = vor.u32 %v7872_v26, %v5764_v27 }
  0xa7   : > { %1272 = vmatpush.bf16.msra.mxu0 %v5803_v4  ;;  %v5939_v36 = vor.u32 %v7918_v29, %v5938_v28  ;;  %v5943_v37 = vor.u32 %v7915_v31, %v5940_v32  ;;  %v5914_v38 = vld [vmem:[#allocation5 + $0x130] sm:$0xf]  ;;  %v7912_v39 = vld [vmem:[#allocation5 + $0x144] sm:$0xf0]  ;;  %v9707_v40 = vld [vmem:[%s9668_s4] sm:$0xf] }
  0xa8   : > { %1285 = vmatpush.bf16.msra.mxu1 %v5807_v5  ;;  %v7909_v41 = vld [vmem:[#allocation5 + $0x134] sm:$0xf]  ;;  %v5916_v42 = vld [vmem:[#allocation5 + $0x148] sm:$0xf0]  ;;  %v5890_v43 = vld [vmem:[#allocation5 + $0x100] sm:$0xf]  ;;  %v5915_v45 = vor.u32 %v7912_v39, %v5914_v38 }
  0xa9   : > { %1298 = vmatpush.bf16.msra.mxu2 %v5811_v6  ;;  %1311 = vmatpush.bf16.msra.mxu3 %v5815_v10  ;;  %v7906_v44 = vld [vmem:[#allocation5 + $0x114] sm:$0xf0]  ;;  %v7903_v46 = vld [vmem:[#allocation5 + $0x104] sm:$0xf]  ;;  %v6030_v47 = vld [vmem:[#allocation8 + $0xa8] sm:$0xf]  ;;  %v5919_v50 = vor.u32 %v7909_v41, %v5916_v42 }
  0xaa   : > { %v7941_v48 = vld [vmem:[#allocation8 + $0xb0] sm:$0xf0]  ;;  %v6126_v49 = vld [vmem:[#allocation8 + $0x168] sm:$0xf]  ;;  %v6018_v53 = vld [vmem:[#allocation8 + $0x90] sm:$0xf]  ;;  %v5891_v60 = vor.u32 %v7906_v44, %v5890_v43 }
  0xab   : > { %1273 = vmatpush.bf16.msra.mxu0 %v5779_v16  ;;  %v6031_v51 = vor.u32 %v7941_v48, %v6030_v47  ;;  %v7965_v52 = vld [vmem:[#allocation8 + $0x170] sm:$0xf0]  ;;  %v7938_v54 = vld [vmem:[#allocation8 + $0x98] sm:$0xf0]  ;;  %v6114_v57 = vld [vmem:[#allocation8 + $0x150] sm:$0xf] }
  0xac   : > { %1286 = vmatpush.bf16.msra.mxu1 %v5783_v18  ;;  %v5892_v55 = vld [vmem:[#allocation5 + $0x118] sm:$0xf0]  ;;  %v6127_v56 = vor.u32 %v7965_v52, %v6126_v49  ;;  %v7962_v58 = vld [vmem:[#allocation8 + $0x158] sm:$0xf0]  ;;  %v6019_v59 = vor.u32 %v7938_v54, %v6018_v53  ;;  %v5866_v61 = vld [vmem:[#allocation5 + $0xd0] sm:$0xf] }
  0xad   : > { %1299 = vmatpush.bf16.msra.mxu2 %v5787_v19  ;;  %1312 = vmatpush.bf16.msra.mxu3 %v5791_v23  ;;  %v6115_v62 = vor.u32 %v7962_v58, %v6114_v57  ;;  %v6006_v63 = vld [vmem:[#allocation8 + $0x78] sm:$0xf]  ;;  %v7935_v0 = vld [vmem:[#allocation8 + $0x80] sm:$0xf0]  ;;  %v5895_v1 = vor.u32 %v7903_v46, %v5892_v55  ;;  %v7897_v5 = vld [vmem:[#allocation5 + $0xd4] sm:$0xf] }
  0xae   : > { %v7900_v2 = vld [vmem:[#allocation5 + $0xe4] sm:$0xf0]  ;;  %v6102_v3 = vld [vmem:[#allocation8 + $0x138] sm:$0xf]  ;;  %v5868_v6 = vld [vmem:[#allocation5 + $0xe8] sm:$0xf0]  ;;  %v6007_v7 = vor.u32 %v7935_v0, %v6006_v63 }
  0xaf   : > { %1274 = vmatpush.bf16.msra.mxu0 %v5755_v30  ;;  %v7959_v4 = vld [vmem:[#allocation8 + $0x140] sm:$0xf0]  ;;  %v5867_v8 = vor.u32 %v7900_v2, %v5866_v61  ;;  %v5842_v9 = vld [vmem:[#allocation5 + $0xa0] sm:$0xf]  ;;  %v5994_v11 = vld [vmem:[#allocation8 + $0x60] sm:$0xf]  ;;  %v5871_v13 = vor.u32 %v7897_v5, %v5868_v6 }
  0xb0   : > { %1287 = vmatpush.bf16.msra.mxu1 %v5759_v33  ;;  %v6103_v10 = vor.u32 %v7959_v4, %v6102_v3  ;;  %v7932_v12 = vld [vmem:[#allocation8 + $0x68] sm:$0xf0]  ;;  %v7894_v14 = vld [vmem:[#allocation5 + $0xb4] sm:$0xf0]  ;;  %v6090_v15 = vld [vmem:[#allocation8 + $0x120] sm:$0xf] }
  0xb1   : > { %1300 = vmatpush.bf16.msra.mxu2 %v5763_v34  ;;  %1313 = vmatpush.bf16.msra.mxu3 %v5767_v35  ;;  %v7956_v16 = vld [vmem:[#allocation8 + $0x128] sm:$0xf0]  ;;  %v7891_v17 = vld [vmem:[#allocation5 + $0xa4] sm:$0xf]  ;;  %v5844_v18 = vld [vmem:[#allocation5 + $0xb8] sm:$0xf0]  ;;  %v5995_v19 = vor.u32 %v7932_v12, %v5994_v11  ;;  %v5843_v20 = vor.u32 %v7894_v14, %v5842_v9 }
  0xb2   : > { %1275 = vmatmul.bf16.vlgmr.msra.gmra.mxu0 %v9707_v40  ;;  %v5818_v21 = vld [vmem:[#allocation5 + $0x70] sm:$0xf]  ;;  %v6091_v22 = vor.u32 %v7956_v16, %v6090_v15  ;;  %v7929_v24 = vld [vmem:[#allocation8 + $0x50] sm:$0xf0]  ;;  %v5847_v25 = vor.u32 %v7891_v17, %v5844_v18  ;;  %v7888_v26 = vld [vmem:[#allocation5 + $0x84] sm:$0xf0] }
  0xb3   : > { %1319 = vmatpush.bf16.msrb.mxu0 %v5939_v36  ;;  %1288 = vmatmul.bf16.vlgmr.msra.gmra.mxu1 %v9707_v40  ;;  %v5982_v23 = vld [vmem:[#allocation8 + $0x48] sm:$0xf]  ;;  %v7953_v28 = vld [vmem:[#allocation8 + $0x110] sm:$0xf0]  ;;  %v7885_v29 = vld [vmem:[#allocation5 + $0x74] sm:$0xf]  ;;  %v5819_v34 = vor.u32 %v7888_v26, %v5818_v21 }
  0xb4   : > { %1332 = vmatpush.bf16.msrb.mxu1 %v5943_v37  ;;  %1301 = vmatmul.bf16.vlgmr.msra.gmra.mxu2 %v9707_v40  ;;  %v6078_v27 = vld [vmem:[#allocation8 + $0x108] sm:$0xf]  ;;  %v5794_v31 = vld [vmem:[#allocation5 + $0x40] sm:$0xf]  ;;  %v7882_v32 = vld [vmem:[#allocation5 + $0x54] sm:$0xf0]  ;;  %v5983_v33 = vor.u32 %v7929_v24, %v5982_v23 }
  0xb5   : > { %1314 = vmatmul.bf16.vlgmr.msra.gmra.mxu3 %v9707_v40  ;;  %2325 = vmatpush.bf16.msrb.mxu2 %v6031_v51  ;;  %v5820_v30 = vld [vmem:[#allocation5 + $0x88] sm:$0xf0]  ;;  %v6079_v35 = vor.u32 %v7953_v28, %v6078_v27  ;;  %v5970_v36 = vld [vmem:[#allocation8 + $0x30] sm:$0xf]  ;;  %v7926_v37 = vld [vmem:[#allocation8 + $0x38] sm:$0xf0]  ;;  %v5795_v46 = vor.u32 %v7882_v32, %v5794_v31 }
  0xb6   : > { %2338 = vmatpush.bf16.msrb.mxu3 %v6127_v56  ;;  %v5823_v38 = vor.u32 %v7885_v29, %v5820_v30  ;;  %v6066_v39 = vld [vmem:[#allocation8 + $0xf0] sm:$0xf]  ;;  %v7950_v41 = vld [vmem:[#allocation8 + $0xf8] sm:$0xf0]  ;;  %v5796_v43 = vld [vmem:[#allocation5 + $0x58] sm:$0xf0] }
  0xb7   : > { %1320 = vmatpush.bf16.msrb.mxu0 %v5915_v45  ;;  %v7879_v42 = vld [vmem:[#allocation5 + $0x44] sm:$0xf]  ;;  %v5770_v44 = vld [vmem:[#allocation5 + $0x10] sm:$0xf]  ;;  %v5971_v45 = vor.u32 %v7926_v37, %v5970_v36  ;;  %v7876_v47 = vld [vmem:[#allocation5 + $0x24] sm:$0xf0]  ;;  %v6067_v48 = vor.u32 %v7950_v41, %v6066_v39 }
  0xb8   : > { %1333 = vmatpush.bf16.msrb.mxu1 %v5919_v50  ;;  %v5958_v49 = vld [vmem:[#allocation8 + $0x18] sm:$0xf]  ;;  %v7923_v50 = vld [vmem:[#allocation8 + $0x20] sm:$0xf0]  ;;  %v5799_v51 = vor.u32 %v7879_v42, %v5796_v43  ;;  %v7873_v52 = vld [vmem:[#allocation5 + $0x14] sm:$0xf]  ;;  %v5771_v61 = vor.u32 %v7876_v47, %v5770_v44 }
  0xb9   : > { %2326 = vmatpush.bf16.msrb.mxu2 %v6019_v59  ;;  %v6054_v53 = vld [vmem:[#allocation8 + $0xd8] sm:$0xf]  ;;  %v7947_v54 = vld [vmem:[#allocation8 + $0xe0] sm:$0xf0]  ;;  %v6222_v56 = vld [vmem:[#allocation8 + $0x228] sm:$0xf] }
  0xba   : > { %2339 = vmatpush.bf16.msrb.mxu3 %v6115_v62  ;;  %v5772_v55 = vld [vmem:[#allocation5 + $0x28] sm:$0xf0]  ;;  %v7989_v57 = vld [vmem:[#allocation8 + $0x230] sm:$0xf0]  ;;  %v6210_v62 = vld [vmem:[#allocation8 + $0x210] sm:$0xf]  ;;  %v6055_v63 = vor.u32 %v7947_v54, %v6054_v53 }
  0xbb   : > { %1321 = vmatpush.bf16.msrb.mxu0 %v5891_v60  ;;  %v6318_v58 = vld [vmem:[#allocation8 + $0x2e8] sm:$0xf]  ;;  %v8013_v59 = vld [vmem:[#allocation8 + $0x2f0] sm:$0xf0]  ;;  %v5959_v60 = vor.u32 %v7923_v50, %v5958_v49  ;;  %v5946_v0 = vld [vmem:[#allocation8] sm:$0xf]  ;;  %v5775_v2 = vor.u32 %v7873_v52, %v5772_v55  ;;  %v6223_v3 = vor.u32 %v7989_v57, %v6222_v56 }
  0xbc   : > { %1334 = vmatpush.bf16.msrb.mxu1 %v5895_v1  ;;  %v7920_v1 = vld [vmem:[#allocation8 + $0x8] sm:$0xf0]  ;;  %v7986_v4 = vld [vmem:[#allocation8 + $0x218] sm:$0xf0]  ;;  %v6042_v5 = vld [vmem:[#allocation8 + $0xc0] sm:$0xf] }
  0xbd   : > { %2327 = vmatpush.bf16.msrb.mxu2 %v6007_v7  ;;  %v7944_v6 = vld [vmem:[#allocation8 + $0xc8] sm:$0xf0]  ;;  %v6319_v7 = vor.u32 %v8013_v59, %v6318_v58  ;;  %v6414_v9 = vld [vmem:[#allocation8 + $0x3a8] sm:$0xf]  ;;  %v8010_v11 = vld [vmem:[#allocation8 + $0x2d8] sm:$0xf0]  ;;  %v5947_v12 = vor.u32 %v7920_v1, %v5946_v0  ;;  %v6211_v16 = vor.u32 %v7986_v4, %v6210_v62 }
  0xbe   : > { %2340 = vmatpush.bf16.msrb.mxu3 %v6103_v10  ;;  %v8037_v10 = vld [vmem:[#allocation8 + $0x3b0] sm:$0xf0]  ;;  %v6043_v15 = vor.u32 %v7944_v6, %v6042_v5  ;;  %v6198_v17 = vld [vmem:[#allocation8 + $0x1f8] sm:$0xf]  ;;  %v7983_v18 = vld [vmem:[#allocation8 + $0x200] sm:$0xf0] }
  0xbf   : > { %1322 = vmatpush.bf16.msrb.mxu0 %v5867_v8  ;;  %v6306_v8 = vld [vmem:[#allocation8 + $0x2d0] sm:$0xf]  ;;  %v8061_v14 = vld [vmem:[#allocation8 + $0x470] sm:$0xf0]  ;;  %v6294_v21 = vld [vmem:[#allocation8 + $0x2b8] sm:$0xf]  ;;  %v6199_v28 = vor.u32 %v7983_v18, %v6198_v17 }
  0xc0   : > { %1335 = vmatpush.bf16.msrb.mxu1 %v5871_v13  ;;  %v6510_v13 = vld [vmem:[#allocation8 + $0x468] sm:$0xf]  ;;  %v6402_v23 = vld [vmem:[#allocation8 + $0x390] sm:$0xf]  ;;  %v8034_v24 = vld [vmem:[#allocation8 + $0x398] sm:$0xf0] }
  0xc1   : > { %2328 = vmatpush.bf16.msrb.mxu2 %v5995_v19  ;;  %v6415_v19 = vor.u32 %v8037_v10, %v6414_v9  ;;  %v6498_v26 = vld [vmem:[#allocation8 + $0x450] sm:$0xf]  ;;  %v8058_v27 = vld [vmem:[#allocation8 + $0x458] sm:$0xf0]  ;;  %v6186_v29 = vld [vmem:[#allocation8 + $0x1e0] sm:$0xf]  ;;  %v6403_v31 = vor.u32 %v8034_v24, %v6402_v23 }
  0xc2   : > { %2341 = vmatpush.bf16.msrb.mxu3 %v6091_v22  ;;  %v6511_v22 = vor.u32 %v8061_v14, %v6510_v13  ;;  %v7980_v30 = vld [vmem:[#allocation8 + $0x1e8] sm:$0xf0]  ;;  %v8031_v36 = vld [vmem:[#allocation8 + $0x380] sm:$0xf0]  ;;  %v7977_v42 = vld [vmem:[#allocation8 + $0x1d0] sm:$0xf0] }
  0xc3   : > { %1323 = vmatpush.bf16.msrb.mxu0 %v5843_v20  ;;  %v6307_v20 = vor.u32 %v8010_v11, %v6306_v8  ;;  %v8004_v37 = vld [vmem:[#allocation8 + $0x2a8] sm:$0xf0]  ;;  %v8055_v39 = vld [vmem:[#allocation8 + $0x440] sm:$0xf0]  ;;  %v6187_v41 = vor.u32 %v7980_v30, %v6186_v29  ;;  %v6378_v47 = vld [vmem:[#allocation8 + $0x360] sm:$0xf] }
  0xc4   : > { %1336 = vmatpush.bf16.msrb.mxu1 %v5847_v25  ;;  %v8007_v25 = vld [vmem:[#allocation8 + $0x2c0] sm:$0xf0]  ;;  %v8001_v49 = vld [vmem:[#allocation8 + $0x290] sm:$0xf0]  ;;  %v6474_v50 = vld [vmem:[#allocation8 + $0x420] sm:$0xf] }
  0xc5   : > { %2329 = vmatpush.bf16.msrb.mxu2 %v5983_v33  ;;  %v6295_v32 = vor.u32 %v8007_v25, %v6294_v21  ;;  %v6282_v33 = vld [vmem:[#allocation8 + $0x2a0] sm:$0xf]  ;;  %v6162_v53 = vld [vmem:[#allocation8 + $0x1b0] sm:$0xf]  ;;  %v7974_v54 = vld [vmem:[#allocation8 + $0x1b8] sm:$0xf0] }
  0xc6   : > { %2342 = vmatpush.bf16.msrb.mxu3 %v6079_v35  ;;  %v6390_v35 = vld [vmem:[#allocation8 + $0x378] sm:$0xf]  ;;  %v6283_v44 = vor.u32 %v8004_v37, %v6282_v33  ;;  %v6258_v57 = vld [vmem:[#allocation8 + $0x270] sm:$0xf]  ;;  %v6366_v59 = vld [vmem:[#allocation8 + $0x348] sm:$0xf]  ;;  %v6163_v0 = vor.u32 %v7974_v54, %v6162_v53 }
  0xc7   : > { %1324 = vmatpush.bf16.msrb.mxu0 %v5819_v34  ;;  %v6499_v34 = vor.u32 %v8058_v27, %v6498_v26  ;;  %v6391_v43 = vor.u32 %v8031_v36, %v6390_v35  ;;  %v6462_v62 = vld [vmem:[#allocation8 + $0x408] sm:$0xf]  ;;  %v7971_v4 = vld [vmem:[#allocation8 + $0x1a0] sm:$0xf0]  ;;  %v6246_v6 = vld [vmem:[#allocation8 + $0x258] sm:$0xf] }
  0xc8   : > { %1337 = vmatpush.bf16.msrb.mxu1 %v5823_v38  ;;  %v6486_v38 = vld [vmem:[#allocation8 + $0x438] sm:$0xf]  ;;  %v6138_v10 = vld [vmem:[#allocation8 + $0x180] sm:$0xf]  ;;  %v7968_v11 = vld [vmem:[#allocation8 + $0x188] sm:$0xf0] }
  0xc9   : > { %2330 = vmatpush.bf16.msrb.mxu2 %v5971_v45  ;;  %v6270_v45 = vld [vmem:[#allocation8 + $0x288] sm:$0xf]  ;;  %v7992_v13 = vld [vmem:[#allocation8 + $0x248] sm:$0xf0]  ;;  %v6128_v17 = vld [vmem:[#allocation8 + $0x174] sm:$0xf0]  ;;  %v6139_v18 = vor.u32 %v7968_v11, %v6138_v10 }
  0xca   : > { %2343 = vmatpush.bf16.msrb.mxu3 %v6067_v48  ;;  %v8028_v48 = vld [vmem:[#allocation8 + $0x368] sm:$0xf0]  ;;  %v6271_v56 = vor.u32 %v8001_v49, %v6270_v45  ;;  %v6020_v23 = vld [vmem:[#allocation8 + $0x9c] sm:$0xf0]  ;;  %v7961_v24 = vld [vmem:[#allocation8 + $0x154] sm:$0xf] }
  0xcb   : > { %1325 = vmatpush.bf16.msrb.mxu0 %v5795_v46  ;;  %v6487_v46 = vor.u32 %v8055_v39, %v6486_v38  ;;  %v6379_v55 = vor.u32 %v8028_v48, %v6378_v47  ;;  %v7940_v14 = vld [vmem:[#allocation8 + $0xac] sm:$0xf]  ;;  %v6116_v25 = vld [vmem:[#allocation8 + $0x15c] sm:$0xf0]  ;;  %v6008_v29 = vld [vmem:[#allocation8 + $0x84] sm:$0xf0] }
  0xcc   : > { %1338 = vmatpush.bf16.msrb.mxu1 %v5799_v51  ;;  %v8052_v51 = vld [vmem:[#allocation8 + $0x428] sm:$0xf0]  ;;  %v6119_v27 = vor.u32 %v7961_v24, %v6116_v25  ;;  %v7958_v30 = vld [vmem:[#allocation8 + $0x13c] sm:$0xf]  ;;  %v5996_v35 = vld [vmem:[#allocation8 + $0x6c] sm:$0xf0] }
  0xcd   : > { %2331 = vmatpush.bf16.msrb.mxu2 %v5959_v60  ;;  %v6475_v58 = vor.u32 %v8052_v51, %v6474_v50  ;;  %v8025_v60 = vld [vmem:[#allocation8 + $0x350] sm:$0xf0]  ;;  %v7955_v36 = vld [vmem:[#allocation8 + $0x124] sm:$0xf]  ;;  %v6092_v38 = vld [vmem:[#allocation8 + $0x12c] sm:$0xf0] }
  0xce   : > { %2344 = vmatpush.bf16.msrb.mxu3 %v6055_v63  ;;  %v8049_v63 = vld [vmem:[#allocation8 + $0x410] sm:$0xf0]  ;;  %v6367_v1 = vor.u32 %v8025_v60, %v6366_v59  ;;  %v6095_v39 = vor.u32 %v7955_v36, %v6092_v38  ;;  %v5984_v47 = vld [vmem:[#allocation8 + $0x54] sm:$0xf0]  ;;  %v7952_v48 = vld [vmem:[#allocation8 + $0x10c] sm:$0xf] }
  0xcf   : > { %1326 = vmatpush.bf16.msrb.mxu0 %v5771_v61  ;;  %v7998_v61 = vld [vmem:[#allocation8 + $0x278] sm:$0xf0]  ;;  %v6463_v5 = vor.u32 %v8049_v63, %v6462_v62  ;;  %v6080_v50 = vld [vmem:[#allocation8 + $0x114] sm:$0xf0]  ;;  %v8019_v53 = vld [vmem:[#allocation8 + $0x320] sm:$0xf0] }
  0xd0   : > { %1339 = vmatpush.bf16.msrb.mxu1 %v5775_v2  ;;  %v6259_v2 = vor.u32 %v7998_v61, %v6258_v57  ;;  %v6083_v51 = vor.u32 %v7952_v48, %v6080_v50  ;;  %v6438_v54 = vld [vmem:[#allocation8 + $0x3d8] sm:$0xf]  ;;  %v5972_v59 = vld [vmem:[#allocation8 + $0x3c] sm:$0xf0]  ;;  %v7949_v60 = vld [vmem:[#allocation8 + $0xf4] sm:$0xf] }
  0xd1   : > { %2332 = vmatpush.bf16.msrb.mxu2 %v5947_v12  ;;  %v6234_v12 = vld [vmem:[#allocation8 + $0x240] sm:$0xf]  ;;  %v8036_v48 = vld [vmem:[#allocation8 + $0x3ac] sm:$0xf]  ;;  %s9967_s25 = sld [smem:[#allocation50_spill]]  ;;  %s9918_s22 = sshll.u32 %s9664_s24, 3 }
  0xd2   : > { %1327 = vmatmul.bf16.vlgmr.msrb.gmra.mxu0 %v9707_v40  ;;  %2345 = vmatpush.bf16.msrb.mxu3 %v6043_v15  ;;  %v6032_v15 = vld [vmem:[#allocation8 + $0xb4] sm:$0xf0]  ;;  %v6068_v62 = vld [vmem:[#allocation8 + $0xfc] sm:$0xf0]  ;;  %v8060_v50 = vld [vmem:[#allocation8 + $0x46c] sm:$0xf] }
  0xd3   : > { %2351 = vmatpush.bf16.msra.mxu0 %v6223_v3  ;;  %1340 = vmatmul.bf16.vlgmr.msrb.gmra.mxu1 %v9707_v40  ;;  %v6174_v40 = vld [vmem:[#allocation8 + $0x1c8] sm:$0xf]  ;;  %v6150_v3 = vld [vmem:[#allocation8 + $0x198] sm:$0xf]  ;;  %v6071_v63 = vor.u32 %v7949_v60, %v6068_v62  ;;  %s9776_s20 = scalar_lea.vmem [#allocation29], %s9918_s22  ;;  %s9968_s18 = sld [smem:[#allocation59_spill]] }
  0xd4   : > { %2364 = vmatpush.bf16.msra.mxu1 %v6319_v7  ;;  %v6175_v52 = vor.u32 %v7977_v42, %v6174_v40  ;;  %v7995_v7 = vld [vmem:[#allocation8 + $0x260] sm:$0xf0]  ;;  %v6151_v8 = vor.u32 %v7971_v4, %v6150_v3  ;;  %v8022_v40 = vld [vmem:[#allocation8 + $0x338] sm:$0xf0]  ;;  %v6450_v42 = vld [vmem:[#allocation8 + $0x3f0] sm:$0xf] }
  0xd5   : > { %2377 = vmatpush.bf16.msra.mxu2 %v6415_v19  ;;  %v6247_v9 = vor.u32 %v7995_v7, %v6246_v6  ;;  %v6235_v19 = vor.u32 %v7992_v13, %v6234_v12  ;;  %v8040_v4 = vld [vmem:[#allocation8 + $0x3c8] sm:$0xf0]  ;;  %v7922_v6 = vld [vmem:[#allocation8 + $0x1c] sm:$0xf]  ;;  %v5960_v7 = vld [vmem:[#allocation8 + $0x24] sm:$0xf0] }
  0xd6   : > { %2390 = vmatpush.bf16.msra.mxu3 %v6511_v22  ;;  %v7937_v22 = vld [vmem:[#allocation8 + $0x94] sm:$0xf]  ;;  %v5963_v10 = vor.u32 %v7922_v6, %v5960_v7  ;;  %v7919_v12 = vld [vmem:[#allocation8 + $0x4] sm:$0xf]  ;;  %v5948_v13 = vld [vmem:[#allocation8 + $0xc] sm:$0xf0] }
  0xd7   : > { %2352 = vmatpush.bf16.msra.mxu0 %v6211_v16  ;;  %v7964_v16 = vld [vmem:[#allocation8 + $0x16c] sm:$0xf]  ;;  %v6023_v26 = vor.u32 %v7937_v22, %v6020_v23  ;;  %v6500_v6 = vld [vmem:[#allocation8 + $0x45c] sm:$0xf0]  ;;  %v7979_v7 = vld [vmem:[#allocation8 + $0x1e4] sm:$0xf] }
  0xd8   : > { %2365 = vmatpush.bf16.msra.mxu1 %v6307_v20  ;;  %v6035_v20 = vor.u32 %v7940_v14, %v6032_v15  ;;  %v6131_v21 = vor.u32 %v7964_v16, %v6128_v17  ;;  %v5951_v14 = vor.u32 %v7919_v12, %v5948_v13  ;;  %v7943_v15 = vld [vmem:[#allocation8 + $0xc4] sm:$0xf]  ;;  %v6044_v16 = vld [vmem:[#allocation8 + $0xcc] sm:$0xf0]  ;;  %s9969_s21 = sld [smem:[#allocation60_spill]]  ;;  %s7867_s2 = sshll.u32 %s9966_s8, 3 }
  0xd9   : > { %2378 = vmatpush.bf16.msra.mxu2 %v6403_v31  ;;  %v6104_v31 = vld [vmem:[#allocation8 + $0x144] sm:$0xf0]  ;;  %v6047_v17 = vor.u32 %v7943_v15, %v6044_v16  ;;  %v8054_v16 = vld [vmem:[#allocation8 + $0x43c] sm:$0xf]  ;;  %s9970_s9 = sld [smem:[#allocation62_spill]]  ;;  %s5439_s23 = sshll.u32 %s9776_s20, 4  ;;  %s5440_s23 = int_to_ptr.vmem [resolvable:$true] %s5439_s23 }
  0xda   : > { %2391 = vmatpush.bf16.msra.mxu3 %v6499_v34  ;;  %v6107_v33 = vor.u32 %v7958_v30, %v6104_v31  ;;  %v7931_v34 = vld [vmem:[#allocation8 + $0x64] sm:$0xf]  ;;  %v8012_v30 = vld [vmem:[#allocation8 + $0x2ec] sm:$0xf]  ;;  %v6320_v31 = vld [vmem:[#allocation8 + $0x2f4] sm:$0xf0] }
  0xdb   : > { %2353 = vmatpush.bf16.msra.mxu0 %v6199_v28  ;;  %v7934_v28 = vld [vmem:[#allocation8 + $0x7c] sm:$0xf]  ;;  %v5999_v37 = vor.u32 %v7931_v34, %v5996_v35  ;;  %v6392_v15 = vld [vmem:[#allocation8 + $0x384] sm:$0xf0] }
  0xdc   : > { %2366 = vmatpush.bf16.msra.mxu1 %v6295_v32  ;;  %v6011_v32 = vor.u32 %v7934_v28, %v6008_v29  ;;  %v6224_v28 = vld [vmem:[#allocation8 + $0x234] sm:$0xf0] }
  0xdd   : > { %2379 = vmatpush.bf16.msra.mxu2 %v6391_v43 }
  0xde   : > { %2392 = vmatpush.bf16.msra.mxu3 %v6487_v46  ;;  %v7928_v46 = vld [vmem:[#allocation8 + $0x4c] sm:$0xf] }
  0xdf   : > { %2354 = vmatpush.bf16.msra.mxu0 %v6187_v41  ;;  %v6354_v41 = vld [vmem:[#allocation8 + $0x330] sm:$0xf]  ;;  %v5987_v49 = vor.u32 %v7928_v46, %v5984_v47  ;;  %v6308_v46 = vld [vmem:[#allocation8 + $0x2dc] sm:$0xf0]  ;;  %s9205_s10 = scalar_lea.hbm %s9970_s9, 16 }
  0xe0   : > { %2367 = vmatpush.bf16.msra.mxu1 %v6283_v44  ;;  %v6355_v43 = vor.u32 %v8022_v40, %v6354_v41  ;;  %v8046_v44 = vld [vmem:[#allocation8 + $0x3f8] sm:$0xf0]  ;;  %v6323_v40 = vor.u32 %v8012_v30, %v6320_v31  ;;  %v6476_v31 = vld [vmem:[#allocation8 + $0x42c] sm:$0xf0] }
  0xe1   : > { %2380 = vmatpush.bf16.msra.mxu2 %v6379_v55  ;;  %v6451_v45 = vor.u32 %v8046_v44, %v6450_v42  ;;  %v7985_v42 = vld [vmem:[#allocation8 + $0x214] sm:$0xf] }
  0xe2   : > { %2393 = vmatpush.bf16.msra.mxu3 %v6475_v58  ;;  %v7925_v58 = vld [vmem:[#allocation8 + $0x34] sm:$0xf] }
  0xe3   : > { %2355 = vmatpush.bf16.msra.mxu0 %v6175_v52  ;;  %v6342_v52 = vld [vmem:[#allocation8 + $0x318] sm:$0xf]  ;;  %v5975_v61 = vor.u32 %v7925_v58, %v5972_v59 }
  0xe4   : > { %2368 = vmatpush.bf16.msra.mxu1 %v6271_v56  ;;  %v6343_v55 = vor.u32 %v8019_v53, %v6342_v52  ;;  %v8043_v56 = vld [vmem:[#allocation8 + $0x3e0] sm:$0xf0]  ;;  %v6512_v52 = vld [vmem:[#allocation8 + $0x474] sm:$0xf0]  ;;  %v7982_v53 = vld [vmem:[#allocation8 + $0x1fc] sm:$0xf] }
  0xe5   : > { %2381 = vmatpush.bf16.msra.mxu2 %v6367_v1  ;;  %v6439_v57 = vor.u32 %v8043_v56, %v6438_v54  ;;  %v8016_v1 = vld [vmem:[#allocation8 + $0x308] sm:$0xf0]  ;;  %v6200_v54 = vld [vmem:[#allocation8 + $0x204] sm:$0xf0] }
  0xe6   : > { %2394 = vmatpush.bf16.msra.mxu3 %v6463_v5  ;;  %v6296_v56 = vld [vmem:[#allocation8 + $0x2c4] sm:$0xf0] }
  0xe7   : > { %2356 = vmatpush.bf16.msra.mxu0 %v6163_v0  ;;  %v6330_v0 = vld [vmem:[#allocation8 + $0x300] sm:$0xf] }
  0xe8   : > { %2369 = vmatpush.bf16.msra.mxu1 %v6259_v2  ;;  %v6426_v2 = vld [vmem:[#allocation8 + $0x3c0] sm:$0xf]  ;;  %v6331_v3 = vor.u32 %v8016_v1, %v6330_v0  ;;  %v6203_v0 = vor.u32 %v7982_v53, %v6200_v54  ;;  %v8033_v1 = vld [vmem:[#allocation8 + $0x394] sm:$0xf]  ;;  %v7994_v53 = vld [vmem:[#allocation8 + $0x25c] sm:$0xf] }
  0xe9   : > { %2382 = vmatpush.bf16.msra.mxu2 %v6355_v43  ;;  %v6427_v5 = vor.u32 %v8040_v4, %v6426_v2  ;;  %v6212_v43 = vld [vmem:[#allocation8 + $0x21c] sm:$0xf0]  ;;  %v6248_v54 = vld [vmem:[#allocation8 + $0x264] sm:$0xf0] }
  0xea   : > { %2395 = vmatpush.bf16.msra.mxu3 %v6451_v45  ;;  %v8009_v45 = vld [vmem:[#allocation8 + $0x2d4] sm:$0xf]  ;;  %v6215_v47 = vor.u32 %v7985_v42, %v6212_v43  ;;  %v6404_v2 = vld [vmem:[#allocation8 + $0x39c] sm:$0xf0]  ;;  %v8024_v42 = vld [vmem:[#allocation8 + $0x34c] sm:$0xf] }
  0xeb   : > { %2357 = vmatpush.bf16.msra.mxu0 %v6151_v8  ;;  %v7946_v8 = vld [vmem:[#allocation8 + $0xdc] sm:$0xf]  ;;  %v6368_v43 = vld [vmem:[#allocation8 + $0x354] sm:$0xf0] }
  0xec   : > { %2370 = vmatpush.bf16.msra.mxu1 %v6247_v9  ;;  %v6056_v9 = vld [vmem:[#allocation8 + $0xe4] sm:$0xf0] }
  0xed   : > { %2383 = vmatpush.bf16.msra.mxu2 %v6343_v55  ;;  %v6059_v11 = vor.u32 %v7946_v8, %v6056_v9  ;;  %v8006_v55 = vld [vmem:[#allocation8 + $0x2bc] sm:$0xf]  ;;  %v6188_v8 = vld [vmem:[#allocation8 + $0x1ec] sm:$0xf0]  ;;  %v8003_v9 = vld [vmem:[#allocation8 + $0x2a4] sm:$0xf] }
  0xee   : > { %2396 = vmatpush.bf16.msra.mxu3 %v6439_v57  ;;  %v6191_v13 = vor.u32 %v7979_v7, %v6188_v8  ;;  %v7942_v7 = vld [vmem:[#allocation8 + $0xb8] sm:$0xf0]  ;;  %v6134_v8 = vld [vmem:[#allocation8 + $0x170] sm:$0xf] }
  0xef   : > { %2358 = vmatpush.bf16.msra.mxu0 %v6139_v18  ;;  %v9715_v18 = vld [vmem:[#allocation7] sm:$0x3f] }
  0xf0   : > { %2371 = vmatpush.bf16.msra.mxu1 %v6235_v19  ;;  %v1015_v19 = vperm.slane %v9715_v18, 0  ;;  %v1017_v25 = vperm.slane %v9715_v18, 2 }
  0xf1   : > { %2384 = vmatpush.bf16.msra.mxu2 %v6331_v3  ;;  %v8057_v3 = vld [vmem:[#allocation8 + $0x454] sm:$0xf] }
  0xf2   : > { %2397 = vmatpush.bf16.msra.mxu3 %v6427_v5  ;;  %v6299_v5 = vor.u32 %v8006_v55, %v6296_v56  ;;  %v6503_v12 = vor.u32 %v8057_v3, %v6500_v6  ;;  %v6236_v3 = vld [vmem:[#allocation8 + $0x24c] sm:$0xf0] }
  0xf3   : > { %2403 = vmatpush.bf16.msrb.mxu0 %v6035_v20  ;;  %v1016_v20 = vperm.slane %v9715_v18, 1  ;;  %v6038_v6 = vld [vmem:[#allocation8 + $0xb0] sm:$0xf] }
  0xf4   : > { %2416 = vmatpush.bf16.msrb.mxu1 %v6131_v21 }
  0xf7   : > { %2404 = vmatpush.bf16.msrb.mxu0 %v6023_v26  ;;  %v1018_v26 = vperm.slane %v9715_v18, 3 }
  0xf8   : > { %2417 = vmatpush.bf16.msrb.mxu1 %v6119_v27  ;;  %v7988_v27 = vld [vmem:[#allocation8 + $0x22c] sm:$0xf] }
  0xf9   : > { %v6227_v38 = vor.u32 %v7988_v27, %v6224_v28  ;;  %v8027_v27 = vld [vmem:[#allocation8 + $0x364] sm:$0xf]  ;;  %v6380_v28 = vld [vmem:[#allocation8 + $0x36c] sm:$0xf0] }
  0xfb   : > { %2405 = vmatpush.bf16.msrb.mxu0 %v6011_v32 }
  0xfc   : > { %2418 = vmatpush.bf16.msrb.mxu1 %v6107_v33 }
  0xff   : > { %2406 = vmatpush.bf16.msrb.mxu0 %v5999_v37 }
 0x100   : > { %2419 = vmatpush.bf16.msrb.mxu1 %v6095_v39 }
 0x103   : > { %2407 = vmatpush.bf16.msrb.mxu0 %v5987_v49  ;;  %v6416_v49 = vld [vmem:[#allocation8 + $0x3b4] sm:$0xf0] }
 0x104   : > { %2420 = vmatpush.bf16.msrb.mxu1 %v6083_v51  ;;  %v6311_v51 = vor.u32 %v8009_v45, %v6308_v46  ;;  %v6419_v59 = vor.u32 %v8036_v48, %v6416_v49  ;;  %v8048_v45 = vld [vmem:[#allocation8 + $0x40c] sm:$0xf]  ;;  %v6464_v48 = vld [vmem:[#allocation8 + $0x414] sm:$0xf0]  ;;  %v7970_v49 = vld [vmem:[#allocation8 + $0x19c] sm:$0xf] }
 0x105   : > { %v6467_v56 = vor.u32 %v8048_v45, %v6464_v48  ;;  %v6014_v45 = vld [vmem:[#allocation8 + $0x80] sm:$0xf] }
 0x107   : > { %2408 = vmatpush.bf16.msrb.mxu0 %v5975_v61 }
 0x108   : > { %2421 = vmatpush.bf16.msrb.mxu1 %v6071_v63  ;;  %v6515_v63 = vor.u32 %v8060_v50, %v6512_v52  ;;  %v6152_v50 = vld [vmem:[#allocation8 + $0x1a4] sm:$0xf0] }
 0x10b   : > { %2409 = vmatpush.bf16.msrb.mxu0 %v5963_v10  ;;  %v6284_v10 = vld [vmem:[#allocation8 + $0x2ac] sm:$0xf0] }
 0x10c   : > { %2422 = vmatpush.bf16.msrb.mxu1 %v6059_v11  ;;  %v6407_v11 = vor.u32 %v8033_v1, %v6404_v2  ;;  %v6140_v1 = vld [vmem:[#allocation8 + $0x18c] sm:$0xf0]  ;;  %v7991_v2 = vld [vmem:[#allocation8 + $0x244] sm:$0xf] }
 0x10f   : > { %2410 = vmatpush.bf16.msrb.mxu0 %v5951_v14  ;;  %v8030_v14 = vld [vmem:[#allocation8 + $0x37c] sm:$0xf] }
 0x110   : > { %2423 = vmatpush.bf16.msrb.mxu1 %v6047_v17  ;;  %v6287_v17 = vor.u32 %v8003_v9, %v6284_v10 }
 0x12f   : > { %v1276_v21 = vpop.f32.mrf.mxu0 }
 0x130   : > { %v1277_v22 = vadd.f32 %v1276_v21, %v1015_v19  ;;  %v1289_v23 = vpop.f32.mrf.mxu1  ;;  %v6488_v19 = vld [vmem:[#allocation8 + $0x444] sm:$0xf0]  ;;  %v6176_v21 = vld [vmem:[#allocation8 + $0x1d4] sm:$0xf0] }
 0x131   : > { %v1290_v24 = vadd.f32 %v1289_v23, %v1016_v20  ;;  %v7976_v20 = vld [vmem:[#allocation8 + $0x1cc] sm:$0xf]  ;;  %v6272_v23 = vld [vmem:[#allocation8 + $0x294] sm:$0xf0] }
 0x132   : > { %8623 = vtanh.f32 %v1277_v22  ;;  %v8000_v22 = vld [vmem:[#allocation8 + $0x28c] sm:$0xf] }
 0x133   : > { %8625 = vtanh.f32 %v1290_v24  ;;  %v6395_v24 = vor.u32 %v8030_v14, %v6392_v15  ;;  %v6275_v30 = vor.u32 %v8000_v22, %v6272_v23  ;;  %v6239_v15 = vor.u32 %v7991_v2, %v6236_v3  ;;  %v6026_v22 = vld [vmem:[#allocation8 + $0x98] sm:$0xf]  ;;  %v6302_v3 = vld [vmem:[#allocation8 + $0x2c0] sm:$0xf] }
 0x137   : > { %v1302_v29 = vpop.f32.mrf.mxu2  ;;  %v1278_v34 = vpop.f32.mrf.mxu0 }
 0x138   : > { %v1303_v32 = vadd.f32 %v1302_v29, %v1017_v25  ;;  %v1315_v33 = vpop.f32.mrf.mxu3  ;;  %v8624_v35 = vpop.eup %8623  ;;  %v6491_v25 = vor.u32 %v8054_v16, %v6488_v19  ;;  %v8051_v29 = vld [vmem:[#allocation8 + $0x424] sm:$0xf]  ;;  %v1019_v34 = vperm.slane %v9715_v18, 4  ;;  %v8042_v16 = vld [vmem:[#allocation8 + $0x3dc] sm:$0xf] }
 0x139   : > { %v1316_v36 = vadd.f32 %v1315_v33, %v1018_v26  ;;  %v1291_v37 = vpop.f32.mrf.mxu1  ;;  %v8626_v39 = vpop.eup %8625  ;;  %v9721_v41 = vpack.c.bf16 %v8624_v35, %v8624_v35  ;;  %v6179_v26 = vor.u32 %v7976_v20, %v6176_v21  ;;  %v6164_v33 = vld [vmem:[#allocation8 + $0x1bc] sm:$0xf0]  ;;  %v7997_v35 = vld [vmem:[#allocation8 + $0x274] sm:$0xf]  ;;  %v6039_v21 = vor.u32 %v7942_v7, %v6038_v6  ;;  %v5990_v7 = vld [vmem:[#allocation8 + $0x50] sm:$0xf] }
 0x13a   : > { %8627 = vtanh.f32 %v1303_v32  ;;  %v9723_v44 = vpack.c.bf16 %v8626_v39, %v8626_v39  ;;  %v7973_v32 = vld [vmem:[#allocation8 + $0x1b4] sm:$0xf]  ;;  %v1020_v37 = vperm.slane %v9715_v18, 5  ;;  %v6479_v39 = vor.u32 %v8051_v29, %v6476_v31  ;;  %v7963_v29 = vld [vmem:[#allocation8 + $0x160] sm:$0xf0] }
 0x13b   : > { %8629 = vtanh.f32 %v1316_v36  ;;  %2333 = vmatmul.bf16.vlgmr.msrb.gmra.mxu2 %v9721_v41  ;;  %v6260_v36 = vld [vmem:[#allocation8 + $0x27c] sm:$0xf0]  ;;  %v6371_v18 = vor.u32 %v8024_v42, %v6368_v43 }
 0x13c   : > { %2346 = vmatmul.bf16.vlgmr.msrb.gmra.mxu3 %v9723_v44  ;;  %2429 = vmatpush.bf16.msrb.mxu2 %v6227_v38  ;;  %v6383_v38 = vor.u32 %v8027_v27, %v6380_v28  ;;  %v7939_v27 = vld [vmem:[#allocation8 + $0xa0] sm:$0xf0]  ;;  %v6122_v28 = vld [vmem:[#allocation8 + $0x158] sm:$0xf] }
 0x13d   : > { %2442 = vmatpush.bf16.msrb.mxu3 %v6323_v40  ;;  %v6167_v40 = vor.u32 %v7973_v32, %v6164_v33  ;;  %v8015_v32 = vld [vmem:[#allocation8 + $0x304] sm:$0xf]  ;;  %v6332_v33 = vld [vmem:[#allocation8 + $0x30c] sm:$0xf0]  ;;  %v6123_v42 = vor.u32 %v7963_v29, %v6122_v28  ;;  %v7978_v28 = vld [vmem:[#allocation8 + $0x1d8] sm:$0xf0] }
 0x13e   : > { %v6335_v43 = vor.u32 %v8015_v32, %v6332_v33  ;;  %v8002_v32 = vld [vmem:[#allocation8 + $0x298] sm:$0xf0] }
 0x13f   : > { %v1304_v57 = vpop.f32.mrf.mxu2 }
 0x140   : > { %v8628_v58 = vpop.eup %8627  ;;  %v1317_v60 = vpop.f32.mrf.mxu3  ;;  %2430 = vmatpush.bf16.msrb.mxu2 %v6215_v47  ;;  %v6263_v47 = vor.u32 %v7997_v35, %v6260_v36  ;;  %v6155_v57 = vor.u32 %v7970_v49, %v6152_v50  ;;  %v6428_v35 = vld [vmem:[#allocation8 + $0x3cc] sm:$0xf0]  ;;  %v6110_v49 = vld [vmem:[#allocation8 + $0x140] sm:$0xf]  ;;  %v7960_v50 = vld [vmem:[#allocation8 + $0x148] sm:$0xf0] }
 0x141   : > { %v8630_v61 = vpop.eup %8629  ;;  %v9727_v62 = vpack.c.bf16 %v8628_v58, %v8628_v58  ;;  %2443 = vmatpush.bf16.msrb.mxu3 %v6311_v51  ;;  %v8021_v58 = vld [vmem:[#allocation8 + $0x334] sm:$0xf]  ;;  %v6230_v36 = vld [vmem:[#allocation8 + $0x230] sm:$0xf] }
 0x142   : > { %v9729_v4 = vpack.c.bf16 %v8630_v61, %v8630_v61  ;;  %v8045_v60 = vld [vmem:[#allocation8 + $0x3f4] sm:$0xf]  ;;  %v6251_v61 = vor.u32 %v7994_v53, %v6248_v54  ;;  %v7987_v53 = vld [vmem:[#allocation8 + $0x220] sm:$0xf0] }
 0x143   : > { %2359 = vmatmul.bf16.vlgmr.msra.gmra.mxu0 %v9727_v62 }
 0x144   : > { %2372 = vmatmul.bf16.vlgmr.msra.gmra.mxu1 %v9729_v4  ;;  %2455 = vmatpush.bf16.msra.mxu0 %v6419_v59  ;;  %v6356_v59 = vld [vmem:[#allocation8 + $0x33c] sm:$0xf0] }
 0x145   : > { %2468 = vmatpush.bf16.msra.mxu1 %v6515_v63  ;;  %2431 = vmatpush.bf16.msrb.mxu2 %v6203_v0  ;;  %v6452_v63 = vld [vmem:[#allocation8 + $0x3fc] sm:$0xf0]  ;;  %v7967_v0 = vld [vmem:[#allocation8 + $0x184] sm:$0xf] }
 0x146   : > { %2444 = vmatpush.bf16.msrb.mxu3 %v6299_v5  ;;  %v6359_v5 = vor.u32 %v8021_v58, %v6356_v59  ;;  %v6455_v9 = vor.u32 %v8045_v60, %v6452_v63  ;;  %v6143_v10 = vor.u32 %v7967_v0, %v6140_v1  ;;  %v7933_v58 = vld [vmem:[#allocation8 + $0x70] sm:$0xf0]  ;;  %v6098_v60 = vld [vmem:[#allocation8 + $0x128] sm:$0xf]  ;;  %v6206_v0 = vld [vmem:[#allocation8 + $0x200] sm:$0xf] }
 0x147   : > { %v7984_v1 = vld [vmem:[#allocation8 + $0x208] sm:$0xf0] }
 0x148   : > { %2456 = vmatpush.bf16.msra.mxu0 %v6407_v11  ;;  %v7966_v11 = vld [vmem:[#allocation8 + $0x178] sm:$0xf0] }
 0x149   : > { %2469 = vmatpush.bf16.msra.mxu1 %v6503_v12  ;;  %2432 = vmatpush.bf16.msrb.mxu2 %v6191_v13  ;;  %v8018_v12 = vld [vmem:[#allocation8 + $0x31c] sm:$0xf]  ;;  %v6344_v13 = vld [vmem:[#allocation8 + $0x324] sm:$0xf0] }
 0x14a   : > { %2445 = vmatpush.bf16.msrb.mxu3 %v6287_v17  ;;  %v6440_v17 = vld [vmem:[#allocation8 + $0x3e4] sm:$0xf0] }
 0x14b   : > { %v6443_v31 = vor.u32 %v8042_v16, %v6440_v17  ;;  %v6290_v16 = vld [vmem:[#allocation8 + $0x2a8] sm:$0xf]  ;;  %v8005_v17 = vld [vmem:[#allocation8 + $0x2b0] sm:$0xf0] }
 0x14c   : > { %2457 = vmatpush.bf16.msra.mxu0 %v6395_v24 }
 0x14d   : > { %2470 = vmatpush.bf16.msra.mxu1 %v6491_v25  ;;  %2433 = vmatpush.bf16.msrb.mxu2 %v6179_v26  ;;  %v6135_v25 = vor.u32 %v7966_v11, %v6134_v8  ;;  %v6347_v26 = vor.u32 %v8018_v12, %v6344_v13  ;;  %v7930_v8 = vld [vmem:[#allocation8 + $0x58] sm:$0xf0]  ;;  %v6194_v13 = vld [vmem:[#allocation8 + $0x1e8] sm:$0xf] }
 0x14e   : > { %2446 = vmatpush.bf16.msrb.mxu3 %v6275_v30  ;;  %v7954_v11 = vld [vmem:[#allocation8 + $0x118] sm:$0xf0] }
 0x14f   : > { %v1328_v46 = vpop.f32.mrf.mxu0 }
 0x150   : > { %v1329_v51 = vadd.f32 %v1328_v46, %v1019_v34  ;;  %v1341_v52 = vpop.f32.mrf.mxu1  ;;  %2458 = vmatpush.bf16.msra.mxu0 %v6383_v38  ;;  %v8039_v34 = vld [vmem:[#allocation8 + $0x3c4] sm:$0xf]  ;;  %v6027_v38 = vor.u32 %v7939_v27, %v6026_v22  ;;  %v7936_v46 = vld [vmem:[#allocation8 + $0x88] sm:$0xf0]  ;;  %v6182_v27 = vld [vmem:[#allocation8 + $0x1d0] sm:$0xf] }
 0x151   : > { %v1342_v55 = vadd.f32 %v1341_v52, %v1020_v37  ;;  %2471 = vmatpush.bf16.msra.mxu1 %v6479_v39  ;;  %2434 = vmatpush.bf16.msrb.mxu2 %v6167_v40  ;;  %v7990_v37 = vld [vmem:[#allocation8 + $0x238] sm:$0xf0]  ;;  %v6326_v39 = vld [vmem:[#allocation8 + $0x2f0] sm:$0xf]  ;;  %v6218_v52 = vld [vmem:[#allocation8 + $0x218] sm:$0xf]  ;;  %v6015_v54 = vor.u32 %v7936_v46, %v6014_v45 }
 0x152   : > { %8631 = vtanh.f32 %v1329_v51  ;;  %2447 = vmatpush.bf16.msrb.mxu3 %v6263_v47  ;;  %v8014_v40 = vld [vmem:[#allocation8 + $0x2f8] sm:$0xf0]  ;;  %v6431_v47 = vor.u32 %v8039_v34, %v6428_v35  ;;  %v6231_v48 = vor.u32 %v7990_v37, %v6230_v36  ;;  %v6219_v59 = vor.u32 %v7987_v53, %v6218_v52  ;;  %v5966_v34 = vld [vmem:[#allocation8 + $0x20] sm:$0xf]  ;;  %v7924_v35 = vld [vmem:[#allocation8 + $0x28] sm:$0xf0] }
 0x153   : > { %8633 = vtanh.f32 %v1342_v55  ;;  %2411 = vmatmul.bf16.vlgmr.msrb.gmra.mxu0 %v9721_v41  ;;  %v6327_v51 = vor.u32 %v8014_v40, %v6326_v39  ;;  %v6314_v55 = vld [vmem:[#allocation8 + $0x2d8] sm:$0xf]  ;;  %v6183_v36 = vor.u32 %v7978_v28, %v6182_v27  ;;  %v6062_v37 = vld [vmem:[#allocation8 + $0xe0] sm:$0xf]  ;;  %v7999_v46 = vld [vmem:[#allocation8 + $0x280] sm:$0xf0] }
 0x154   : > { %2424 = vmatmul.bf16.vlgmr.msrb.gmra.mxu1 %v9723_v44  ;;  %2459 = vmatpush.bf16.msra.mxu0 %v6371_v18  ;;  %v8011_v18 = vld [vmem:[#allocation8 + $0x2e0] sm:$0xf0]  ;;  %v6170_v40 = vld [vmem:[#allocation8 + $0x1b8] sm:$0xf]  ;;  %v6422_v53 = vld [vmem:[#allocation8 + $0x3b0] sm:$0xf] }
 0x155   : > { %2472 = vmatpush.bf16.msra.mxu1 %v6467_v56  ;;  %2435 = vmatpush.bf16.msrb.mxu2 %v6155_v57  ;;  %v6111_v56 = vor.u32 %v7960_v50, %v6110_v49  ;;  %v6002_v57 = vld [vmem:[#allocation8 + $0x68] sm:$0xf]  ;;  %v6315_v63 = vor.u32 %v8011_v18, %v6314_v55  ;;  %v6266_v45 = vld [vmem:[#allocation8 + $0x278] sm:$0xf]  ;;  %v7921_v49 = vld [vmem:[#allocation8 + $0x10] sm:$0xf0] }
 0x156   : > { %2448 = vmatpush.bf16.msrb.mxu3 %v6251_v61  ;;  %v7957_v61 = vld [vmem:[#allocation8 + $0x130] sm:$0xf0]  ;;  %v6003_v2 = vor.u32 %v7933_v58, %v6002_v57  ;;  %v6050_v50 = vld [vmem:[#allocation8 + $0xc8] sm:$0xf]  ;;  %v6518_v55 = vld [vmem:[#allocation8 + $0x470] sm:$0xf]  ;;  %v6267_v18 = vor.u32 %v7999_v46, %v6266_v45 }
 0x157   : > { %v1330_v14 = vpop.f32.mrf.mxu0  ;;  %v6099_v6 = vor.u32 %v7957_v61, %v6098_v60  ;;  %v6158_v57 = vld [vmem:[#allocation8 + $0x1a0] sm:$0xf]  ;;  %v7972_v58 = vld [vmem:[#allocation8 + $0x1a8] sm:$0xf0]  ;;  %v6482_v27 = vld [vmem:[#allocation8 + $0x428] sm:$0xf] }
 0x158   : > { %v8632_v19 = vpop.eup %8631  ;;  %v1343_v20 = vpop.f32.mrf.mxu1  ;;  %2460 = vmatpush.bf16.msra.mxu0 %v6359_v5  ;;  %v8008_v5 = vld [vmem:[#allocation8 + $0x2c8] sm:$0xf0]  ;;  %v7981_v14 = vld [vmem:[#allocation8 + $0x1f0] sm:$0xf0]  ;;  %v6254_v60 = vld [vmem:[#allocation8 + $0x260] sm:$0xf] }
 0x159   : > { %v8634_v23 = vpop.eup %8633  ;;  %v9737_v24 = vpack.c.bf16 %v8632_v19, %v8632_v19  ;;  %2473 = vmatpush.bf16.msra.mxu1 %v6455_v9  ;;  %2436 = vmatpush.bf16.msrb.mxu2 %v6143_v10  ;;  %v6207_v9 = vor.u32 %v7984_v1, %v6206_v0  ;;  %v6086_v10 = vld [vmem:[#allocation8 + $0x110] sm:$0xf]  ;;  %v6303_v12 = vor.u32 %v8008_v5, %v6302_v3  ;;  %v5978_v20 = vld [vmem:[#allocation8 + $0x38] sm:$0xf]  ;;  %v7996_v61 = vld [vmem:[#allocation8 + $0x268] sm:$0xf0] }
 0x15a   : > { %v9739_v30 = vpack.c.bf16 %v8634_v23, %v8634_v23  ;;  %2449 = vmatpush.bf16.msrb.mxu3 %v6239_v15  ;;  %v5991_v15 = vor.u32 %v7930_v8, %v5990_v7  ;;  %v6087_v19 = vor.u32 %v7954_v11, %v6086_v10  ;;  %v6195_v22 = vor.u32 %v7981_v14, %v6194_v13  ;;  %v6074_v23 = vld [vmem:[#allocation8 + $0xf8] sm:$0xf]  ;;  %v8035_v5 = vld [vmem:[#allocation8 + $0x3a0] sm:$0xf0]  ;;  %v7969_v10 = vld [vmem:[#allocation8 + $0x190] sm:$0xf0] }
 0x15b   : > { %2385 = vmatmul.bf16.vlgmr.msra.gmra.mxu2 %v9737_v24  ;;  %v6410_v3 = vld [vmem:[#allocation8 + $0x398] sm:$0xf]  ;;  %v6255_v7 = vor.u32 %v7996_v61, %v6254_v60  ;;  %v8059_v8 = vld [vmem:[#allocation8 + $0x460] sm:$0xf0]  ;;  %v6242_v11 = vld [vmem:[#allocation8 + $0x248] sm:$0xf] }
 0x15c   : > { %2398 = vmatmul.bf16.vlgmr.msra.gmra.mxu3 %v9739_v30  ;;  %2461 = vmatpush.bf16.msra.mxu0 %v6347_v26  ;;  %v6291_v26 = vor.u32 %v8005_v17, %v6290_v16  ;;  %v6411_v13 = vor.u32 %v8035_v5, %v6410_v3  ;;  %v6398_v16 = vld [vmem:[#allocation8 + $0x380] sm:$0xf]  ;;  %v8032_v17 = vld [vmem:[#allocation8 + $0x388] sm:$0xf0]  ;;  %v8053_v28 = vld [vmem:[#allocation8 + $0x430] sm:$0xf0] }
 0x15d   : > { %2481 = vmatpush.bf16.msra.mxu2 %v6039_v21  ;;  %2474 = vmatpush.bf16.msra.mxu1 %v6443_v31  ;;  %v7927_v21 = vld [vmem:[#allocation8 + $0x40] sm:$0xf0]  ;;  %v6278_v31 = vld [vmem:[#allocation8 + $0x290] sm:$0xf]  ;;  %v8044_v45 = vld [vmem:[#allocation8 + $0x3e8] sm:$0xf0] }
 0x15e   : > { %2494 = vmatpush.bf16.msra.mxu3 %v6135_v25  ;;  %v7951_v25 = vld [vmem:[#allocation8 + $0x100] sm:$0xf0]  ;;  %v5979_v29 = vor.u32 %v7927_v21, %v5978_v20  ;;  %v6279_v39 = vor.u32 %v8002_v32, %v6278_v31  ;;  %v6494_v20 = vld [vmem:[#allocation8 + $0x440] sm:$0xf]  ;;  %v8056_v21 = vld [vmem:[#allocation8 + $0x448] sm:$0xf0] }
 0x15f   : > { %v6075_v33 = vor.u32 %v7951_v25, %v6074_v23  ;;  %v6495_v23 = vor.u32 %v8056_v21, %v6494_v20  ;;  %v6386_v25 = vld [vmem:[#allocation8 + $0x368] sm:$0xf]  ;;  %v6374_v31 = vld [vmem:[#allocation8 + $0x350] sm:$0xf]  ;;  %v8074_v60 = vld [vmem:[#allocation10 + $0x54] sm:$0xf0] }
 0x160   : > { %2462 = vmatpush.bf16.msra.mxu0 %v6335_v43  ;;  %v5967_v43 = vor.u32 %v7924_v35, %v5966_v34  ;;  %v6470_v32 = vld [vmem:[#allocation8 + $0x410] sm:$0xf]  ;;  %v8077_v61 = vld [vmem:[#allocation10 + $0x74] sm:$0xf]  ;;  %v6572_v5 = vld [vmem:[#allocation10 + $0x68] sm:$0xf0] }
 0x161   : > { %2482 = vmatpush.bf16.msra.mxu2 %v6027_v38  ;;  %2475 = vmatpush.bf16.msra.mxu1 %v6431_v47  ;;  %v7948_v38 = vld [vmem:[#allocation8 + $0xe8] sm:$0xf0]  ;;  %v5954_v47 = vld [vmem:[#allocation8 + $0x8] sm:$0xf]  ;;  %v6530_v20 = vld [vmem:[#allocation10 + $0x10] sm:$0xf] }
 0x162   : > { %2495 = vmatpush.bf16.msra.mxu3 %v6123_v42  ;;  %v7975_v42 = vld [vmem:[#allocation8 + $0x1c0] sm:$0xf0]  ;;  %v8066_v21 = vld [vmem:[#allocation10 + $0x14] sm:$0xf0] }
 0x163   : > { %2463 = vmatmul.bf16.vlgmr.msra.gmra.mxu0 %v9737_v24  ;;  %v6171_v52 = vor.u32 %v7975_v42, %v6170_v40  ;;  %v6350_v42 = vld [vmem:[#allocation8 + $0x320] sm:$0xf] }
 0x164   : > { %2507 = vmatpush.bf16.msrb.mxu0 %v6231_v48  ;;  %2476 = vmatmul.bf16.vlgmr.msra.gmra.mxu1 %v9739_v30  ;;  %v6063_v48 = vor.u32 %v7948_v38, %v6062_v37  ;;  %v8023_v37 = vld [vmem:[#allocation8 + $0x340] sm:$0xf0]  ;;  %v6458_v38 = vld [vmem:[#allocation8 + $0x3f8] sm:$0xf] }
 0x165   : > { %2520 = vmatpush.bf16.msrb.mxu1 %v6327_v51  ;;  %2483 = vmatpush.bf16.msra.mxu2 %v6015_v54  ;;  %v7945_v51 = vld [vmem:[#allocation8 + $0xd0] sm:$0xf0]  ;;  %v8038_v54 = vld [vmem:[#allocation8 + $0x3b8] sm:$0xf0] }
 0x166   : > { %2496 = vmatpush.bf16.msra.mxu3 %v6111_v56  ;;  %v8062_v56 = vld [vmem:[#allocation8 + $0x478] sm:$0xf0]  ;;  %v6423_v0 = vor.u32 %v8038_v54, %v6422_v53  ;;  %v6578_v54 = vld [vmem:[#allocation10 + $0x70] sm:$0xf] }
 0x167   : > { %v6519_v1 = vor.u32 %v8062_v56, %v6518_v55  ;;  %v8078_v55 = vld [vmem:[#allocation10 + $0x74] sm:$0xf0]  ;;  %v6570_v56 = vld [vmem:[#allocation10 + $0x60] sm:$0xf] }
 0x168   : > { %2508 = vmatpush.bf16.msrb.mxu0 %v6219_v59  ;;  %v5955_v59 = vor.u32 %v7921_v49, %v5954_v47  ;;  %v8017_v49 = vld [vmem:[#allocation8 + $0x310] sm:$0xf0] }
 0x169   : > { %2521 = vmatpush.bf16.msrb.mxu1 %v6315_v63  ;;  %2484 = vmatpush.bf16.msra.mxu2 %v6003_v2  ;;  %v6051_v63 = vor.u32 %v7945_v51, %v6050_v50  ;;  %v6159_v2 = vor.u32 %v7972_v58, %v6158_v57  ;;  %v6434_v50 = vld [vmem:[#allocation8 + $0x3c8] sm:$0xf]  ;;  %v8041_v51 = vld [vmem:[#allocation8 + $0x3d0] sm:$0xf0] }
 0x16a   : > { %2497 = vmatpush.bf16.msra.mxu3 %v6099_v6  ;;  %v6506_v6 = vld [vmem:[#allocation8 + $0x458] sm:$0xf]  ;;  %v6435_v53 = vor.u32 %v8041_v51, %v6434_v50  ;;  %v8076_v57 = vld [vmem:[#allocation10 + $0x64] sm:$0xf0] }
 0x16b   : > { %2437 = vmatmul.bf16.vlgmr.msrb.gmra.mxu2 %v9727_v62  ;;  %v6507_v14 = vor.u32 %v8059_v8, %v6506_v6  ;;  %v6571_v58 = vor.u32 %v8076_v57, %v6570_v56  ;;  %v8070_v8 = vld [vmem:[#allocation10 + $0x34] sm:$0xf0]  ;;  %v6524_v57 = vld [vmem:[#allocation10 + $0x8] sm:$0xf0] }
 0x16c   : > { %2509 = vmatpush.bf16.msrb.mxu0 %v6207_v9  ;;  %2450 = vmatmul.bf16.vlgmr.msrb.gmra.mxu3 %v9729_v4  ;;  %v6146_v9 = vld [vmem:[#allocation8 + $0x188] sm:$0xf] }
 0x16d   : > { %2522 = vmatpush.bf16.msrb.mxu1 %v6303_v12  ;;  %2485 = vmatpush.bf16.msra.mxu2 %v5991_v15  ;;  %v7993_v12 = vld [vmem:[#allocation8 + $0x250] sm:$0xf0]  ;;  %v6147_v15 = vor.u32 %v7969_v10, %v6146_v9 }
 0x16e   : > { %2498 = vmatpush.bf16.msra.mxu3 %v6087_v19  ;;  %v6243_v19 = vor.u32 %v7993_v12, %v6242_v11  ;;  %v8073_v10 = vld [vmem:[#allocation10 + $0x54] sm:$0xf]  ;;  %v6564_v11 = vld [vmem:[#allocation10 + $0x58] sm:$0xf0]  ;;  %v6538_v12 = vld [vmem:[#allocation10 + $0x20] sm:$0xf] }
 0x170   : > { %2510 = vmatpush.bf16.msrb.mxu0 %v6195_v22  ;;  %v6399_v22 = vor.u32 %v8032_v17, %v6398_v16  ;;  %v8071_v16 = vld [vmem:[#allocation10 + $0x44] sm:$0xf]  ;;  %v6556_v17 = vld [vmem:[#allocation10 + $0x48] sm:$0xf0] }
 0x171   : > { %2523 = vmatpush.bf16.msrb.mxu1 %v6291_v26  ;;  %2486 = vmatpush.bf16.msra.mxu2 %v5979_v29  ;;  %v8029_v26 = vld [vmem:[#allocation8 + $0x370] sm:$0xf0] }
 0x172   : > { %2499 = vmatpush.bf16.msra.mxu3 %v6075_v33  ;;  %v6387_v29 = vor.u32 %v8029_v26, %v6386_v25  ;;  %v8050_v33 = vld [vmem:[#allocation8 + $0x418] sm:$0xf0] }
 0x173   : > { %v6471_v35 = vor.u32 %v8050_v33, %v6470_v32  ;;  %v6548_v25 = vld [vmem:[#allocation10 + $0x38] sm:$0xf0]  ;;  %v8067_v32 = vld [vmem:[#allocation10 + $0x24] sm:$0xf] }
 0x174   : > { %2511 = vmatpush.bf16.msrb.mxu0 %v6183_v36  ;;  %v6362_v36 = vld [vmem:[#allocation8 + $0x338] sm:$0xf] }
 0x175   : > { %2524 = vmatpush.bf16.msrb.mxu1 %v6279_v39  ;;  %2487 = vmatpush.bf16.msra.mxu2 %v5967_v43  ;;  %v8047_v39 = vld [vmem:[#allocation8 + $0x400] sm:$0xf0]  ;;  %v6446_v43 = vld [vmem:[#allocation8 + $0x3e0] sm:$0xf] }
 0x176   : > { %2500 = vmatpush.bf16.msra.mxu3 %v6063_v48  ;;  %v6459_v40 = vor.u32 %v8047_v39, %v6458_v38  ;;  %v6447_v47 = vor.u32 %v8044_v45, %v6446_v43  ;;  %v6338_v48 = vld [vmem:[#allocation8 + $0x308] sm:$0xf]  ;;  %v6644_v38 = vld [vmem:[#allocation10 + $0xf8] sm:$0xf0]  ;;  %v8065_v43 = vld [vmem:[#allocation10 + $0x14] sm:$0xf] }
 0x178   : > { %2512 = vmatpush.bf16.msrb.mxu0 %v6171_v52  ;;  %v6339_v52 = vor.u32 %v8017_v49, %v6338_v48  ;;  %v6636_v48 = vld [vmem:[#allocation10 + $0xe8] sm:$0xf0] }
 0x179   : > { %2525 = vmatpush.bf16.msrb.mxu1 %v6267_v18  ;;  %2488 = vmatpush.bf16.msra.mxu2 %v5955_v59  ;;  %v6579_v18 = vor.u32 %v8078_v55, %v6578_v54  ;;  %v6562_v59 = vld [vmem:[#allocation10 + $0x50] sm:$0xf]  ;;  %v8063_v54 = vld [vmem:[#allocation10 + $0x4] sm:$0xf] }
 0x17a   : > { %2501 = vmatpush.bf16.msra.mxu3 %v6051_v63  ;;  %v6563_v63 = vor.u32 %v8074_v60, %v6562_v59  ;;  %v6628_v59 = vld [vmem:[#allocation10 + $0xd8] sm:$0xf0]  ;;  %v9762_v60 = vld [vmem:[%s9967_s25] sm:$0x7]  ;;  %s5437_s25 = scalar_lea.hbm %s9970_s9, %s7867_s2 }
 0x17b   : > { %s5441_s6 = sshll.u32 %s5437_s25, 4  ;;  %s5442_s6 = int_to_ptr.hbm [resolvable:$true] %s5441_s6 }
 0x17c   : > { %2513 = vmatpush.bf16.msrb.mxu0 %v6159_v2  ;;  %2489 = vmatmul.bf16.vlgmr.msra.gmra.mxu2 %v9721_v41  ;;  %v6483_v41 = vor.u32 %v8053_v28, %v6482_v27  ;;  %v8072_v2 = vld [vmem:[#allocation10 + $0x44] sm:$0xf0]  ;;  %v6522_v27 = vld [vmem:[#allocation10] sm:$0xf]  ;;  %s9199_s0 = sshra.s32 %s5442_s6, 4  ;;  %s9200_s0 = int_to_ptr.hbm [resolvable:$true] %s9199_s0 }
 0x17d   : > { %2533 = vmatpush.bf16.msrb.mxu2 %v6423_v0  ;;  %2526 = vmatpush.bf16.msrb.mxu1 %v6255_v7  ;;  %v6580_v0 = vld [vmem:[#allocation10 + $0x78] sm:$0xf0]  ;;  %v6546_v7 = vld [vmem:[#allocation10 + $0x30] sm:$0xf]  ;;  %v8064_v28 = vld [vmem:[#allocation10 + $0x4] sm:$0xf0]  ;;  %p9206_p12 = scmp.lt.s32.totalorder %s9200_s0, %s9970_s9 }
 0x17e   : > { %2546 = vmatpush.bf16.msrb.mxu3 %v6519_v1  ;;  %v6554_v1 = vld [vmem:[#allocation10 + $0x40] sm:$0xf]  ;;  %v6583_v3 = vor.u32 %v8077_v61, %v6580_v0  ;;  %v6547_v9 = vor.u32 %v8070_v8, %v6546_v7  ;;  %v6610_v7 = vld [vmem:[#allocation10 + $0xb0] sm:$0xf]  ;;  %v8086_v8 = vld [vmem:[#allocation10 + $0xb4] sm:$0xf0] }
 0x17f   : > { %2502 = vmatmul.bf16.vlgmr.msra.gmra.mxu3 %v9723_v44  ;;  %v8026_v44 = vld [vmem:[#allocation8 + $0x358] sm:$0xf0]  ;;  %s9201_s16 = scalar_lea.hbm %s9200_s0, 8 }
 0x180   : > { %2514 = vmatpush.bf16.msrb.mxu0 %v6147_v15  ;;  %v6375_v34 = vor.u32 %v8026_v44, %v6374_v31  ;;  %v6642_v31 = vld [vmem:[#allocation10 + $0xf0] sm:$0xf]  ;;  %v8094_v44 = vld [vmem:[#allocation10 + $0xf4] sm:$0xf0]  ;;  %p9202_p1 = scmp.ne.s32.totalorder %s9200_s0, %s9201_s16  ;;  %p9207_p7 = scmp.lt.s32.totalorder %s9205_s10, %s9201_s16 }
 0x181   : > { %2534 = vmatpush.bf16.msrb.mxu2 %v6411_v13  ;;  %2527 = vmatpush.bf16.msrb.mxu1 %v6243_v19  ;;  %v6567_v13 = vor.u32 %v8073_v10, %v6564_v11  ;;  %v6559_v19 = vor.u32 %v8071_v16, %v6556_v17  ;;  %v6602_v16 = vld [vmem:[#allocation10 + $0xa0] sm:$0xf]  ;;  %v8084_v17 = vld [vmem:[#allocation10 + $0xa4] sm:$0xf0] }
 0x182   : > { %2547 = vmatpush.bf16.msrb.mxu3 %v6507_v14  ;;  %v8068_v14 = vld [vmem:[#allocation10 + $0x24] sm:$0xf0]  ;;  %p9203_p3 = pnand %p9202_p1, %p9633_p4  ;;  %p9208_p8 = por %p9207_p7, %p9206_p12 }
 0x183   : > { %2515 = vmatmul.bf16.vlgmr.msrb.gmra.mxu0 %v9727_v62  ;;  %v6363_v62 = vor.u32 %v8023_v37, %v6362_v36  ;;  %v6539_v15 = vor.u32 %v8068_v14, %v6538_v12  ;;  %v6540_v36 = vld [vmem:[#allocation10 + $0x28] sm:$0xf0]  ;;  %v8093_v37 = vld [vmem:[#allocation10 + $0xf4] sm:$0xf]  ;;  %v6611_v12 = vor.u32 %v8086_v8, %v6610_v7 }
 0x184   : > { %2528 = vmatmul.bf16.vlgmr.msrb.gmra.mxu1 %v9729_v4  ;;  %v8020_v4 = vld [vmem:[#allocation8 + $0x328] sm:$0xf0]  ;;  %2859 = vmatpush.bf16.msra.mxu0 %v6579_v18  ;;  %p9204_p5 = pneg %p9203_p3 }
 0x185   : > { %2535 = vmatpush.bf16.msrb.mxu2 %v6399_v22  ;;  %v6351_v46 = vor.u32 %v8020_v4, %v6350_v42  ;;  %v8069_v22 = vld [vmem:[#allocation10 + $0x34] sm:$0xf]  ;;  %v6634_v42 = vld [vmem:[#allocation10 + $0xe0] sm:$0xf]  ;;  %v8092_v4 = vld [vmem:[#allocation10 + $0xe4] sm:$0xf0] }
 0x186   : > { %2548 = vmatpush.bf16.msrb.mxu3 %v6495_v23  ;;  %v6531_v23 = vor.u32 %v8066_v21, %v6530_v20  ;;  %v6551_v26 = vor.u32 %v8069_v22, %v6548_v25  ;;  %v6635_v45 = vor.u32 %v8092_v4, %v6634_v42  ;;  %v6603_v21 = vor.u32 %v8084_v17, %v6602_v16  ;;  %v6604_v22 = vld [vmem:[#allocation10 + $0xa8] sm:$0xf0]  ;;  %v6594_v25 = vld [vmem:[#allocation10 + $0x90] sm:$0xf]  ;;  %p9209_p9 = pnand %p9208_p8, %p9204_p5 }
 0x187   : > { %v6684_v16 = vld [vmem:[#allocation10 + $0x148] sm:$0xf0] }
 0x188   : > { %2860 = vmatpush.bf16.msra.mxu0 %v6571_v58  ;;  %v8089_v58 = vld [vmem:[#allocation10 + $0xd4] sm:$0xf] }
 0x189   : > { %2536 = vmatpush.bf16.msrb.mxu2 %v6387_v29  ;;  %v6631_v0 = vor.u32 %v8089_v58, %v6628_v59  ;;  %v8107_v59 = vld [vmem:[#allocation10 + $0x164] sm:$0xf] }
 0x18a   : > { %2549 = vmatpush.bf16.msrb.mxu3 %v6483_v41  ;;  %v6523_v41 = vor.u32 %v8064_v28, %v6522_v27  ;;  %v8081_v27 = vld [vmem:[#allocation10 + $0x94] sm:$0xf] }
 0x18c   : > { %2861 = vmatpush.bf16.msra.mxu0 %v6563_v63  ;;  %v6527_v63 = vor.u32 %v8063_v54, %v6524_v57  ;;  %v6698_v54 = vld [vmem:[#allocation10 + $0x160] sm:$0xf] }
 0x18d   : > { %2537 = vmatpush.bf16.msrb.mxu2 %v6375_v34 }
 0x18e   : > { %2550 = vmatpush.bf16.msrb.mxu3 %v6471_v35  ;;  %v6643_v35 = vor.u32 %v8094_v44, %v6642_v31  ;;  %v6596_v31 = vld [vmem:[#allocation10 + $0x98] sm:$0xf0] }
 0x190   : > { %2872 = vmatpush.bf16.msra.mxu1 %v6643_v35  ;;  %v6586_v35 = vld [vmem:[#allocation10 + $0x80] sm:$0xf] }
 0x191   : > { %2538 = vmatpush.bf16.msrb.mxu2 %v6363_v62  ;;  %v6543_v62 = vor.u32 %v8067_v32, %v6540_v36  ;;  %v6599_v32 = vor.u32 %v8081_v27, %v6596_v31  ;;  %v8080_v36 = vld [vmem:[#allocation10 + $0x84] sm:$0xf0]  ;;  %v6666_v31 = vld [vmem:[#allocation10 + $0x120] sm:$0xf] }
 0x192   : > { %2551 = vmatpush.bf16.msrb.mxu3 %v6459_v40  ;;  %v6647_v40 = vor.u32 %v8093_v37, %v6644_v38  ;;  %v6587_v38 = vor.u32 %v8080_v36, %v6586_v35 }
 0x194   : > { %2873 = vmatpush.bf16.msra.mxu1 %v6635_v45 }
 0x195   : > { %2539 = vmatpush.bf16.msrb.mxu2 %v6351_v46  ;;  %v6532_v46 = vld [vmem:[#allocation10 + $0x18] sm:$0xf0] }
 0x196   : > { %2552 = vmatpush.bf16.msrb.mxu3 %v6447_v47  ;;  %v8091_v47 = vld [vmem:[#allocation10 + $0xe4] sm:$0xf]  ;;  %v6535_v49 = vor.u32 %v8065_v43, %v6532_v46 }
 0x197   : > { %v6639_v50 = vor.u32 %v8091_v47, %v6636_v48  ;;  %v1552_v47 = vperm.slane %v9762_v60, 1 }
 0x199   : > { %2540 = vmatpush.bf16.msrb.mxu2 %v6339_v52  ;;  %v6626_v52 = vld [vmem:[#allocation10 + $0xd0] sm:$0xf] }
 0x19a   : > { %2553 = vmatpush.bf16.msrb.mxu3 %v6435_v53  ;;  %v8090_v53 = vld [vmem:[#allocation10 + $0xd4] sm:$0xf0] }
 0x19b   : > { %v6627_v56 = vor.u32 %v8090_v53, %v6626_v52  ;;  %v8109_v52 = vld [vmem:[#allocation10 + $0x174] sm:$0xf]  ;;  %v6708_v53 = vld [vmem:[#allocation10 + $0x178] sm:$0xf0] }
 0x19c   : > { %2541 = vmatmul.bf16.vlgmr.msrb.gmra.mxu2 %v9737_v24  ;;  %v6555_v24 = vor.u32 %v8072_v2, %v6554_v1  ;;  %v6618_v1 = vld [vmem:[#allocation10 + $0xc0] sm:$0xf]  ;;  %v8088_v2 = vld [vmem:[#allocation10 + $0xc4] sm:$0xf0]  ;;  %v6711_v58 = vor.u32 %v8109_v52, %v6708_v53 }
 0x19d   : > { %2554 = vmatmul.bf16.vlgmr.msrb.gmra.mxu3 %v9739_v30  ;;  %v8075_v30 = vld [vmem:[#allocation10 + $0x64] sm:$0xf]  ;;  %2874 = vmatpush.bf16.msra.mxu1 %v6627_v56 }
 0x19e   : > { %2898 = vmatpush.bf16.msra.mxu3 %v6583_v3  ;;  %v6575_v6 = vor.u32 %v8075_v30, %v6572_v5  ;;  %2862 = vmatpush.bf16.msra.mxu0 %v6555_v24  ;;  %v8087_v3 = vld [vmem:[#allocation10 + $0xc4] sm:$0xf]  ;;  %v1551_v24 = vperm.slane %v9762_v60, 0  ;;  %v6619_v30 = vor.u32 %v8088_v2, %v6618_v1  ;;  %v6620_v5 = vld [vmem:[#allocation10 + $0xc8] sm:$0xf0] }
 0x1a1   : > { %2875 = vmatpush.bf16.msra.mxu1 %v6619_v30  ;;  %v8105_v30 = vld [vmem:[#allocation10 + $0x154] sm:$0xf] }
 0x1a2   : > { %2899 = vmatpush.bf16.msra.mxu3 %v6575_v6  ;;  %2863 = vmatpush.bf16.msra.mxu0 %v6547_v9  ;;  %v6623_v6 = vor.u32 %v8087_v3, %v6620_v5  ;;  %v8085_v9 = vld [vmem:[#allocation10 + $0xb4] sm:$0xf]  ;;  %v6690_v3 = vld [vmem:[#allocation10 + $0x150] sm:$0xf]  ;;  %v6692_v5 = vld [vmem:[#allocation10 + $0x158] sm:$0xf0] }
 0x1a5   : > { %2876 = vmatpush.bf16.msra.mxu1 %v6611_v12  ;;  %v6682_v12 = vld [vmem:[#allocation10 + $0x140] sm:$0xf] }
 0x1a6   : > { %2900 = vmatpush.bf16.msra.mxu3 %v6567_v13  ;;  %2864 = vmatpush.bf16.msra.mxu0 %v6539_v15  ;;  %v6612_v13 = vld [vmem:[#allocation10 + $0xb8] sm:$0xf0] }
 0x1a7   : > { %v6615_v15 = vor.u32 %v8085_v9, %v6612_v13  ;;  %v8104_v13 = vld [vmem:[#allocation10 + $0x144] sm:$0xf0] }
 0x1a9   : > { %2877 = vmatpush.bf16.msra.mxu1 %v6603_v21 }
 0x1aa   : > { %2901 = vmatpush.bf16.msra.mxu3 %v6559_v19  ;;  %2865 = vmatpush.bf16.msra.mxu0 %v6531_v23  ;;  %v8083_v19 = vld [vmem:[#allocation10 + $0xa4] sm:$0xf] }
 0x1ab   : > { %v6607_v23 = vor.u32 %v8083_v19, %v6604_v22  ;;  %v6683_v19 = vor.u32 %v8104_v13, %v6682_v12  ;;  %v6674_v22 = vld [vmem:[#allocation10 + $0x130] sm:$0xf] }
 0x1ac   : > { %v8116_v12 = vld [vmem:[#allocation13 + $0x28] sm:$0xff] }
 0x1ae   : > { %2902 = vmatpush.bf16.msra.mxu3 %v6551_v26  ;;  %2866 = vmatpush.bf16.msra.mxu0 %v6523_v41  ;;  %v8082_v26 = vld [vmem:[#allocation10 + $0x94] sm:$0xf0] }
 0x1af   : > { %v6595_v41 = vor.u32 %v8082_v26, %v6594_v25  ;;  %v6676_v25 = vld [vmem:[#allocation10 + $0x138] sm:$0xf0] }
 0x1b1   : > { %2878 = vmatpush.bf16.msra.mxu1 %v6595_v41 }
 0x1b2   : > { %2903 = vmatpush.bf16.msra.mxu3 %v6543_v62  ;;  %2911 = vmatpush.bf16.msrb.mxu0 %v6647_v40  ;;  %v6588_v62 = vld [vmem:[#allocation10 + $0x88] sm:$0xf0] }
 0x1b5   : > { %2879 = vmatpush.bf16.msra.mxu1 %v6587_v38 }
 0x1b6   : > { %2904 = vmatpush.bf16.msra.mxu3 %v6535_v49  ;;  %2912 = vmatpush.bf16.msrb.mxu0 %v6639_v50  ;;  %v6706_v50 = vld [vmem:[#allocation10 + $0x170] sm:$0xf] }
 0x1b9   : > { %2924 = vmatpush.bf16.msrb.mxu1 %v6711_v58 }
 0x1ba   : > { %2905 = vmatpush.bf16.msra.mxu3 %v6527_v63  ;;  %2913 = vmatpush.bf16.msrb.mxu0 %v6631_v0 }
 0x1be   : > { %v2334_v29 = vpop.f32.mrf.mxu2  ;;  %2914 = vmatpush.bf16.msrb.mxu0 %v6623_v6 }
 0x1bf   : > { %v9753_v33 = vpop.f32.mrf.mxu3  ;;  %v2335_v10 = vadd.f32 %v2334_v29, %v1551_v24  ;;  %v8106_v24 = vld [vmem:[#allocation10 + $0x154] sm:$0xf0] }
 0x1c0   : > { %v9755_v34 = vpop.f32.mrf.mxu0  ;;  %v6691_v8 = vor.u32 %v8106_v24, %v6690_v3 }
 0x1c1   : > { %v9757_v39 = vpop.f32.mrf.mxu1  ;;  %v2348_v20 = vadd.f32 %v9753_v33, %v2335_v10  ;;  %v8079_v33 = vld [vmem:[#allocation10 + $0x84] sm:$0xf] }
 0x1c2   : > { %2915 = vmatpush.bf16.msrb.mxu0 %v6615_v15  ;;  %v6591_v42 = vor.u32 %v8079_v33, %v6588_v62  ;;  %v8103_v15 = vld [vmem:[#allocation10 + $0x144] sm:$0xf]  ;;  %v6668_v33 = vld [vmem:[#allocation10 + $0x128] sm:$0xf0] }
 0x1c3   : > { %v2361_v28 = vadd.f32 %v9755_v34, %v2348_v20  ;;  %v6687_v21 = vor.u32 %v8103_v15, %v6684_v16  ;;  %v8123_v15 = vld [vmem:[#allocation13 + $0x60] sm:$0xff] }
 0x1c4   : > { %v8115_v16 = vld [vmem:[#allocation13 + $0x20] sm:$0xff] }
 0x1c5   : > { %v2374_v37 = vadd.f32 %v9757_v39, %v2361_v28 }
 0x1c6   : > { %v2336_v51 = vpop.f32.mrf.mxu2  ;;  %2916 = vmatpush.bf16.msrb.mxu0 %v6607_v23  ;;  %v8102_v23 = vld [vmem:[#allocation10 + $0x134] sm:$0xf0] }
 0x1c7   : > { %v2349_v55 = vpop.f32.mrf.mxu3  ;;  %v8110_v51 = vld [vmem:[#allocation10 + $0x174] sm:$0xf0]  ;;  %v6675_v28 = vor.u32 %v8102_v23, %v6674_v22 }
 0x1c8   : > { %v2362_v18 = vpop.f32.mrf.mxu0  ;;  %v6707_v39 = vor.u32 %v8110_v51, %v6706_v50  ;;  %v8108_v55 = vld [vmem:[#allocation10 + $0x164] sm:$0xf0]  ;;  %v8095_v51 = vld [vmem:[#allocation10 + $0x104] sm:$0xf] }
 0x1c9   : > { %v2375_v61 = vpop.f32.mrf.mxu1  ;;  %v6699_v1 = vor.u32 %v8108_v55, %v6698_v54  ;;  %v8096_v50 = vld [vmem:[#allocation10 + $0x104] sm:$0xf0] }
 0x1ca   : > { %2917 = vmatpush.bf16.msrb.mxu0 %v6599_v32  ;;  %v6700_v61 = vld [vmem:[#allocation10 + $0x168] sm:$0xf0]  ;;  %2885 = vmatpush.bf16.msra.mxu2 %v6707_v39  ;;  %v8099_v32 = vld [vmem:[#allocation10 + $0x124] sm:$0xf] }
 0x1cb   : > { %v6703_v2 = vor.u32 %v8107_v59, %v6700_v61  ;;  %v6652_v39 = vld [vmem:[#allocation10 + $0x108] sm:$0xf0] }
 0x1cc   : > { %v6655_v55 = vor.u32 %v8095_v51, %v6652_v39  ;;  %v8130_v39 = vld [vmem:[#allocation16 + $0x18] sm:$0xff] }
 0x1cd   : > { %2925 = vmatpush.bf16.msrb.mxu1 %v6703_v2 }
 0x1ce   : > { %2918 = vmatpush.bf16.msrb.mxu0 %v6591_v42  ;;  %2886 = vmatpush.bf16.msra.mxu2 %v6699_v1 }
 0x1d0   : > { %v2412_v11 = vpop.f32.mrf.mxu0 }
 0x1d1   : > { %v9765_v14 = vpop.f32.mrf.mxu1  ;;  %v2413_v56 = vadd.f32 %v2412_v11, %v1552_v47  ;;  %v6695_v11 = vor.u32 %v8105_v30, %v6692_v5  ;;  %v6660_v47 = vld [vmem:[#allocation10 + $0x118] sm:$0xf0] }
 0x1d2   : > { %2887 = vmatpush.bf16.msra.mxu2 %v6691_v8  ;;  %v8118_v8 = vld [vmem:[#allocation13 + $0x38] sm:$0xff] }
 0x1d3   : > { %v2426_v6 = vadd.f32 %v9765_v14, %v2413_v56  ;;  %2926 = vmatpush.bf16.msrb.mxu1 %v6695_v11  ;;  %v8101_v14 = vld [vmem:[#allocation10 + $0x134] sm:$0xf]  ;;  %v8124_v11 = vld [vmem:[#allocation13 + $0x68] sm:$0xff] }
 0x1d4   : > { %v6679_v41 = vor.u32 %v8101_v14, %v6676_v25  ;;  %v8121_v25 = vld [vmem:[#allocation13 + $0x50] sm:$0xff] }
 0x1d6   : > { %2888 = vmatpush.bf16.msra.mxu2 %v6683_v19  ;;  %v8122_v19 = vld [vmem:[#allocation13 + $0x58] sm:$0xff] }
 0x1d7   : > { %2927 = vmatpush.bf16.msrb.mxu1 %v6687_v21 }
 0x1d8   : > { %v2414_v29 = vpop.f32.mrf.mxu0 }
 0x1d9   : > { %v2427_v44 = vpop.f32.mrf.mxu1 }
 0x1da   : > { %2889 = vmatpush.bf16.msra.mxu2 %v6675_v28  ;;  %v8100_v44 = vld [vmem:[#allocation10 + $0x124] sm:$0xf0]  ;;  %v8113_v28 = vld [vmem:[#allocation13 + $0x10] sm:$0xff] }
 0x1db   : > { %2928 = vmatpush.bf16.msrb.mxu1 %v6679_v41  ;;  %v6667_v36 = vor.u32 %v8100_v44, %v6666_v31  ;;  %v8112_v41 = vld [vmem:[#allocation13 + $0x8] sm:$0xff]  ;;  %v8111_v31 = vld [vmem:[#allocation13] sm:$0xff] }
 0x1dc   : > { %v8134_v44 = vld [vmem:[#allocation16 + $0x38] sm:$0xff] }
 0x1de   : > { %v2386_v40 = vpop.f32.mrf.mxu2  ;;  %2890 = vmatpush.bf16.msra.mxu2 %v6667_v36  ;;  %v8132_v36 = vld [vmem:[#allocation16 + $0x28] sm:$0xff] }
 0x1df   : > { %v2387_v4 = vadd.f32 %v2386_v40, %v2374_v37  ;;  %v2399_v43 = vpop.f32.mrf.mxu3  ;;  %v6671_v40 = vor.u32 %v8099_v32, %v6668_v33  ;;  %v8133_v32 = vld [vmem:[#allocation16 + $0x30] sm:$0xff] }
 0x1e0   : > { %v2464_v45 = vpop.f32.mrf.mxu0 }
 0x1e1   : > { %v2400_v34 = vadd.f32 %v2399_v43, %v2387_v4  ;;  %v2477_v46 = vpop.f32.mrf.mxu1  ;;  %v6658_v43 = vld [vmem:[#allocation10 + $0x110] sm:$0xf]  ;;  %2929 = vmatpush.bf16.msrb.mxu1 %v6671_v40 }
 0x1e3   : > { %8635 = vtanh.f32 %v2400_v34  ;;  %v8098_v34 = vld [vmem:[#allocation10 + $0x114] sm:$0xf0] }
 0x1e6   : > { %v2388_v48 = vpop.f32.mrf.mxu2 }
 0x1e7   : > { %v2401_v49 = vpop.f32.mrf.mxu3 }
 0x1e8   : > { %v2466_v57 = vpop.f32.mrf.mxu0  ;;  %v6650_v49 = vld [vmem:[#allocation10 + $0x100] sm:$0xf] }
 0x1e9   : > { %v8636_v18 = vpop.eup %8635  ;;  %v2479_v0 = vpop.f32.mrf.mxu1  ;;  %v6651_v52 = vor.u32 %v8096_v50, %v6650_v49  ;;  %v1553_v57 = vperm.slane %v9762_v60, 2  ;;  %v8117_v60 = vld [vmem:[#allocation13 + $0x30] sm:$0xff] }
 0x1ea   : > { %v2562_v63 = vpack.c.bf16 %v8636_v18, %v8636_v18 }
 0x1ec   : > { %2867 = vmatmul.bf16.vlgmr.msra.gmra.mxu0 %v2562_v63  ;;  %2906 = vmatmul.bf16.vlgmr.msra.gmra.mxu3 %v2562_v63 }
 0x1ed   : > { %3169 = vmatpush.bf16.msra.mxu0 %v8134_v44 }
 0x1ee   : > { %v2438_v7 = vpop.f32.mrf.mxu2 }
 0x1ef   : > { %v2439_v9 = vadd.f32 %v2438_v7, %v2426_v6  ;;  %v2451_v10 = vpop.f32.mrf.mxu3  ;;  %v8126_v7 = vld [vmem:[#allocation13 + $0x78] sm:$0xff] }
 0x1f0   : > { %3086 = vmatpush.bf16.msrb.mxu3 %v8126_v7 }
 0x1f1   : > { %v2452_v17 = vadd.f32 %v2451_v10, %v2439_v9  ;;  %v8125_v9 = vld [vmem:[#allocation13 + $0x70] sm:$0xff]  ;;  %3170 = vmatpush.bf16.msra.mxu0 %v8133_v32 }
 0x1f3   : > { %v2465_v20 = vadd.f32 %v2464_v45, %v2452_v17  ;;  %v8097_v45 = vld [vmem:[#allocation10 + $0x114] sm:$0xf] }
 0x1f4   : > { %v6663_v48 = vor.u32 %v8097_v45, %v6660_v47  ;;  %3087 = vmatpush.bf16.msrb.mxu3 %v8125_v9  ;;  %v6898_v9 = vld [vmem:[#allocation22 + $0x70] sm:$0xf] }
 0x1f5   : > { %v2478_v26 = vadd.f32 %v2477_v46, %v2465_v20  ;;  %v6659_v46 = vor.u32 %v8098_v34, %v6658_v43  ;;  %3171 = vmatpush.bf16.msra.mxu0 %v8132_v36  ;;  %v8150_v36 = vld [vmem:[#allocation22 + $0x34] sm:$0xf0] }
 0x1f6   : > { %v2440_v27 = vpop.f32.mrf.mxu2  ;;  %2930 = vmatpush.bf16.msrb.mxu1 %v6663_v48 }
 0x1f7   : > { %8637 = vtanh.f32 %v2478_v26  ;;  %v2453_v29 = vpop.f32.mrf.mxu3  ;;  %2891 = vmatpush.bf16.msra.mxu2 %v6659_v46  ;;  %v8114_v26 = vld [vmem:[#allocation13 + $0x18] sm:$0xff]  ;;  %v8120_v27 = vld [vmem:[#allocation13 + $0x48] sm:$0xff] }
 0x1f8   : > { %3088 = vmatpush.bf16.msrb.mxu3 %v8124_v11  ;;  %v8119_v29 = vld [vmem:[#allocation13 + $0x40] sm:$0xff] }
 0x1fa   : > { %2931 = vmatpush.bf16.msrb.mxu1 %v6655_v55  ;;  %v8127_v55 = vld [vmem:[#allocation16] sm:$0xff] }
 0x1fb   : > { %2892 = vmatpush.bf16.msra.mxu2 %v6651_v52  ;;  %v8131_v52 = vld [vmem:[#allocation16 + $0x20] sm:$0xff] }
 0x1fc   : > { %3089 = vmatpush.bf16.msrb.mxu3 %v8123_v15  ;;  %3172 = vmatpush.bf16.msra.mxu0 %v8131_v52  ;;  %v8156_v15 = vld [vmem:[#allocation22 + $0x64] sm:$0xf0]  ;;  %v8146_v52 = vld [vmem:[#allocation22 + $0x14] sm:$0xf0] }
 0x1fd   : > { %v8638_v35 = vpop.eup %8637 }
 0x1fe   : > { %v2563_v37 = vpack.c.bf16 %v8638_v35, %v8638_v35  ;;  %v2613_v35 = vld [vmem:[#allocation11] sm:$0x3] }
 0x1ff   : > { %v2490_v62 = vpop.f32.mrf.mxu2  ;;  %3073 = vmatpush.bf16.msrb.mxu2 %v8118_v8  ;;  %v2616_v33 = vperm.slane %v2613_v35, 1  ;;  %v8135_v8 = vld [vmem:[#allocation19] sm:$0xff] }
 0x200   : > { %v2516_v38 = vpop.f32.mrf.mxu0  ;;  %2880 = vmatmul.bf16.vlgmr.msra.gmra.mxu1 %v2563_v37  ;;  %2919 = vmatmul.bf16.vlgmr.msrb.gmra.mxu0 %v2563_v37  ;;  %v2491_v58 = vadd.f32 %v2490_v62, %v1553_v57  ;;  %v8140_v57 = vld [vmem:[#allocation19 + $0x28] sm:$0xff] }
 0x201   : > { %v2529_v42 = vpop.f32.mrf.mxu1  ;;  %3090 = vmatpush.bf16.msrb.mxu3 %v8122_v19  ;;  %3173 = vmatpush.bf16.msra.mxu0 %v8130_v39  ;;  %v6892_v19 = vld [vmem:[#allocation22 + $0x68] sm:$0xf0]  ;;  %v8145_v39 = vld [vmem:[#allocation22 + $0x14] sm:$0xf] }
 0x202   : > { %v2503_v4 = vpop.f32.mrf.mxu3 }
 0x203   : > { %v2504_v59 = vadd.f32 %v2503_v4, %v2491_v58  ;;  %3074 = vmatpush.bf16.msrb.mxu2 %v8117_v60  ;;  %v8139_v58 = vld [vmem:[#allocation19 + $0x20] sm:$0xff]  ;;  %v8158_v60 = vld [vmem:[#allocation22 + $0x74] sm:$0xf0] }
 0x204   : > { %v6899_v11 = vor.u32 %v8158_v60, %v6898_v9  ;;  %v6966_v60 = vld [vmem:[#allocation25 + $0x78] sm:$0xf] }
 0x205   : > { %v2517_v61 = vadd.f32 %v2516_v38, %v2504_v59  ;;  %3091 = vmatpush.bf16.msrb.mxu3 %v8121_v25  ;;  %v2615_v38 = vperm.slane %v2613_v35, 0  ;;  %v6884_v25 = vld [vmem:[#allocation22 + $0x58] sm:$0xf0]  ;;  %v6866_v35 = vld [vmem:[#allocation22 + $0x30] sm:$0xf] }
 0x207   : > { %v2492_v54 = vpop.f32.mrf.mxu2  ;;  %v2530_v63 = vadd.f32 %v2529_v42, %v2517_v61  ;;  %3075 = vmatpush.bf16.msrb.mxu2 %v8116_v12  ;;  %v8138_v61 = vld [vmem:[#allocation19 + $0x18] sm:$0xff] }
 0x208   : > { %v2518_v53 = vpop.f32.mrf.mxu0  ;;  %v8128_v54 = vld [vmem:[#allocation16 + $0x8] sm:$0xff]  ;;  %v6900_v12 = vld [vmem:[#allocation22 + $0x78] sm:$0xf0] }
 0x209   : > { %v2531_v18 = vpop.f32.mrf.mxu1  ;;  %3092 = vmatpush.bf16.msrb.mxu3 %v8120_v27  ;;  %v8129_v53 = vld [vmem:[#allocation16 + $0x10] sm:$0xff] }
 0x20a   : > { %v2505_v56 = vpop.f32.mrf.mxu3  ;;  %3174 = vmatpush.bf16.msra.mxu0 %v8129_v53  ;;  %v8142_v18 = vld [vmem:[#allocation19 + $0x38] sm:$0xff] }
 0x20b   : > { %3076 = vmatpush.bf16.msrb.mxu2 %v8115_v16  ;;  %3252 = vmatpush.bf16.msra.mxu1 %v8142_v18  ;;  %v8141_v56 = vld [vmem:[#allocation19 + $0x30] sm:$0xff]  ;;  %v6842_v18 = vld [vmem:[#allocation22] sm:$0xf] }
 0x20d   : > { %3093 = vmatpush.bf16.msrb.mxu3 %v8119_v29  ;;  %v8152_v29 = vld [vmem:[#allocation22 + $0x44] sm:$0xf0] }
 0x20e   : > { %3175 = vmatpush.bf16.msra.mxu0 %v8128_v54  ;;  %v6852_v54 = vld [vmem:[#allocation22 + $0x18] sm:$0xf0] }
 0x20f   : > { %3077 = vmatpush.bf16.msrb.mxu2 %v8114_v26  ;;  %3253 = vmatpush.bf16.msra.mxu1 %v8141_v56  ;;  %v8144_v56 = vld [vmem:[#allocation22 + $0x4] sm:$0xf0] }
 0x212   : > { %3176 = vmatpush.bf16.msra.mxu0 %v8127_v55  ;;  %v6855_v55 = vor.u32 %v8145_v39, %v6852_v54  ;;  %v8166_v39 = vld [vmem:[#allocation25 + $0x38] sm:$0xf0] }
 0x213   : > { %3078 = vmatpush.bf16.msrb.mxu2 %v8113_v28  ;;  %3254 = vmatpush.bf16.msra.mxu1 %v8140_v57  ;;  %v6874_v28 = vld [vmem:[#allocation22 + $0x40] sm:$0xf]  ;;  %v8143_v57 = vld [vmem:[#allocation22 + $0x4] sm:$0xf] }
 0x214   : > { %v6875_v44 = vor.u32 %v8152_v29, %v6874_v28  ;;  %v7050_v28 = vld [vmem:[#allocation25 + $0x120] sm:$0xf]  ;;  %v8196_v29 = vld [vmem:[#allocation25 + $0x128] sm:$0xf0] }
 0x217   : > { %3079 = vmatpush.bf16.msrb.mxu2 %v8112_v41  ;;  %3255 = vmatpush.bf16.msra.mxu1 %v8139_v58  ;;  %v8151_v41 = vld [vmem:[#allocation22 + $0x44] sm:$0xf]  ;;  %v6843_v58 = vor.u32 %v8144_v56, %v6842_v18  ;;  %v8168_v56 = vld [vmem:[#allocation25 + $0x4c] sm:$0xf] }
 0x21b   : > { %3080 = vmatpush.bf16.msrb.mxu2 %v8111_v31  ;;  %3256 = vmatpush.bf16.msra.mxu1 %v8138_v61  ;;  %v6876_v31 = vld [vmem:[#allocation22 + $0x48] sm:$0xf0] }
 0x21c   : > { %v6879_v32 = vor.u32 %v8151_v41, %v6876_v31  ;;  %v7076_v31 = vld [vmem:[#allocation25 + $0x15c] sm:$0xf0] }
 0x21f   : > { %v2542_v0 = vpop.f32.mrf.mxu2 }
 0x220   : > { %v2543_v1 = vadd.f32 %v2542_v0, %v2530_v63  ;;  %v2555_v2 = vpop.f32.mrf.mxu3  ;;  %v8619_v63 = vld [vmem:[#allocation14] ss:$0 sm:$0xff] }
 0x222   : > { %v2556_v3 = vadd.f32 %v2555_v2, %v2543_v1  ;;  %v8137_v1 = vld [vmem:[#allocation19 + $0x10] sm:$0xff] }
 0x223   : > { %3257 = vmatpush.bf16.msra.mxu1 %v8137_v1  ;;  %v7086_v1 = vld [vmem:[#allocation25 + $0x168] sm:$0xf] }
 0x224   : > { %8639 = vtanh.f32 %v2556_v3 }
 0x227   : > { %v2544_v24 = vpop.f32.mrf.mxu2 }
 0x228   : > { %v2557_v30 = vpop.f32.mrf.mxu3 }
 0x229   : > { %v8136_v30 = vld [vmem:[#allocation19 + $0x8] sm:$0xff] }
 0x22a   : > { %v8640_v5 = vpop.eup %8639  ;;  %3258 = vmatpush.bf16.msra.mxu1 %v8136_v30  ;;  %v8178_v30 = vld [vmem:[#allocation25 + $0x98] sm:$0xf0] }
 0x22b   : > { %v2564_v6 = vpack.c.bf16 %v8640_v5, %v8640_v5 }
 0x22d   : > { %2893 = vmatmul.bf16.vlgmr.msra.gmra.mxu2 %v2564_v6  ;;  %2932 = vmatmul.bf16.vlgmr.msrb.gmra.mxu1 %v2564_v6 }
 0x22e   : > { %3259 = vmatpush.bf16.msra.mxu1 %v8135_v8  ;;  %3369 = vmatpush.bf16.msra.mxu2 %v6899_v11  ;;  %v7062_v11 = vld [vmem:[#allocation25 + $0x138] sm:$0xf] }
 0x269   : > { %v2868_v10 = vpop.f32.mrf.mxu0 }
 0x26a   : > { %v2869_v4 = vadd.f32 %v2868_v10, %v2615_v38  ;;  %v8157_v10 = vld [vmem:[#allocation22 + $0x74] sm:$0xf]  ;;  %v6867_v38 = vor.u32 %v8150_v36, %v6866_v35  ;;  %v6968_v36 = vld [vmem:[#allocation25 + $0x84] sm:$0xf0] }
 0x26b   : > { %v6903_v16 = vor.u32 %v8157_v10, %v6900_v12  ;;  %v8175_v10 = vld [vmem:[#allocation25 + $0x80] sm:$0xf0] }
 0x26c   : > { %v8199_v12 = vld [vmem:[#allocation25 + $0x140] sm:$0xf0] }
 0x26d   : > { %3382 = vmatpush.bf16.msra.mxu3 %v6903_v16 }
 0x26f   : > { %v2907_v13 = vpop.f32.mrf.mxu3 }
 0x270   : > { %v2908_v37 = vadd.f32 %v2907_v13, %v2616_v33  ;;  %v6890_v13 = vld [vmem:[#allocation22 + $0x60] sm:$0xf]  ;;  %v8149_v33 = vld [vmem:[#allocation22 + $0x34] sm:$0xf] }
 0x271   : > { %v2870_v17 = vpop.f32.mrf.mxu0 }
 0x272   : > { %v8155_v17 = vld [vmem:[#allocation22 + $0x64] sm:$0xf] }
 0x277   : > { %v2909_v20 = vpop.f32.mrf.mxu3 }
 0x278   : > { %v6891_v20 = vor.u32 %v8156_v15, %v6890_v13  ;;  %v8180_v13 = vld [vmem:[#allocation25 + $0xac] sm:$0xf]  ;;  %v6992_v15 = vld [vmem:[#allocation25 + $0xb4] sm:$0xf0] }
 0x279   : > { %v6995_v16 = vor.u32 %v8180_v13, %v6992_v15  ;;  %v8182_v13 = vld [vmem:[#allocation25 + $0xb8] sm:$0xf0] }
 0x27a   : > { %3370 = vmatpush.bf16.msra.mxu2 %v6891_v20  ;;  %v6967_v20 = vor.u32 %v8175_v10, %v6966_v60  ;;  %v8160_v60 = vld [vmem:[#allocation25 + $0x8] sm:$0xf0]  ;;  %v7002_v10 = vld [vmem:[#allocation25 + $0xc0] sm:$0xf] }
 0x27d   : > { %v2881_v21 = vpop.f32.mrf.mxu1  ;;  %v2920_v22 = vpop.f32.mrf.mxu0 }
 0x27e   : > { %v2921_v62 = vadd.f32 %v2920_v22, %v2908_v37  ;;  %v2882_v43 = vadd.f32 %v2881_v21, %v2869_v4  ;;  %v6895_v21 = vor.u32 %v8155_v17, %v6892_v19  ;;  %v6882_v22 = vld [vmem:[#allocation22 + $0x50] sm:$0xf]  ;;  %v6868_v37 = vld [vmem:[#allocation22 + $0x38] sm:$0xf0] }
 0x27f   : > { %v8204_v17 = vld [vmem:[#allocation25 + $0x16c] sm:$0xf]  ;;  %v7088_v19 = vld [vmem:[#allocation25 + $0x174] sm:$0xf0] }
 0x280   : > { %3383 = vmatpush.bf16.msra.mxu3 %v6895_v21  ;;  %v6954_v21 = vld [vmem:[#allocation25 + $0x60] sm:$0xf] }
 0x285   : > { %v2883_v23 = vpop.f32.mrf.mxu1  ;;  %v2922_v14 = vpop.f32.mrf.mxu0 }
 0x286   : > { %v8154_v23 = vld [vmem:[#allocation22 + $0x54] sm:$0xf0]  ;;  %v8153_v14 = vld [vmem:[#allocation22 + $0x54] sm:$0xf] }
 0x287   : > { %v6883_v26 = vor.u32 %v8154_v23, %v6882_v22  ;;  %v6887_v27 = vor.u32 %v8153_v14, %v6884_v25  ;;  %v8172_v22 = vld [vmem:[#allocation25 + $0x68] sm:$0xf0]  ;;  %v7091_v23 = vor.u32 %v8204_v17, %v7088_v19  ;;  %v7063_v14 = vor.u32 %v8199_v12, %v7062_v11  ;;  %v8177_v25 = vld [vmem:[#allocation25 + $0x94] sm:$0xf]  ;;  %v6998_v12 = vld [vmem:[#allocation25 + $0xb0] sm:$0xf] }
 0x288   : > { %v6955_v35 = vor.u32 %v8172_v22, %v6954_v21  ;;  %v8184_v11 = vld [vmem:[#allocation25 + $0xc8] sm:$0xf0]  ;;  %v8206_v17 = vld [vmem:[#allocation25 + $0x178] sm:$0xf0]  ;;  %v6999_v22 = vor.u32 %v8182_v13, %v6998_v12  ;;  %v6914_v13 = vld [vmem:[#allocation25 + $0x8] sm:$0xf] }
 0x289   : > { %3371 = vmatpush.bf16.msra.mxu2 %v6883_v26  ;;  %3384 = vmatpush.bf16.msra.mxu3 %v6887_v27  ;;  %v6980_v26 = vld [vmem:[#allocation25 + $0x9c] sm:$0xf0]  ;;  %v8201_v27 = vld [vmem:[#allocation25 + $0x154] sm:$0xf]  ;;  %v7003_v21 = vor.u32 %v8184_v11, %v7002_v10  ;;  %v8188_v10 = vld [vmem:[#allocation25 + $0xe8] sm:$0xf0] }
 0x28a   : > { %v6983_v41 = vor.u32 %v8177_v25, %v6980_v26  ;;  %v8165_v25 = vld [vmem:[#allocation25 + $0x34] sm:$0xf]  ;;  %v6932_v26 = vld [vmem:[#allocation25 + $0x3c] sm:$0xf0] }
 0x28d   : > { %3372 = vmatpush.bf16.msra.mxu2 %v6875_v44  ;;  %3385 = vmatpush.bf16.msra.mxu3 %v6879_v32  ;;  %v7079_v44 = vor.u32 %v8201_v27, %v7076_v31  ;;  %v8174_v32 = vld [vmem:[#allocation25 + $0x7c] sm:$0xf]  ;;  %v8189_v27 = vld [vmem:[#allocation25 + $0xf4] sm:$0xf] }
 0x291   : > { %3373 = vmatpush.bf16.msra.mxu2 %v6867_v38  ;;  %v7051_v38 = vor.u32 %v8196_v29, %v7050_v28  ;;  %v6935_v28 = vor.u32 %v8165_v25, %v6932_v26  ;;  %v7028_v29 = vld [vmem:[#allocation25 + $0xfc] sm:$0xf0]  ;;  %v8252_v25 = vld [vmem:[#allocation26 + $0x164] sm:$0xf0] }
 0x292   : > { %v7031_v31 = vor.u32 %v8189_v27, %v7028_v29  ;;  %v7242_v27 = vld [vmem:[#allocation26 + $0x120] sm:$0xf]  ;;  %v7458_v29 = vld [vmem:[#allocation26 + $0x2d0] sm:$0xf] }
 0x2aa   : > { %v2933_v40 = vpop.f32.mrf.mxu1 }
 0x2ab   : > { %v2934_v42 = vadd.f32 %v2933_v40, %v2921_v62  ;;  %v6871_v62 = vor.u32 %v8149_v33, %v6868_v37  ;;  %v8620_v40 = vld [vmem:[#allocation17] ss:$0 sm:$0xff]  ;;  %v8198_v33 = vld [vmem:[#allocation25 + $0x13c] sm:$0xf]  ;;  %v7064_v37 = vld [vmem:[#allocation25 + $0x144] sm:$0xf0] }
 0x2ad   : > { %8641 = vtanh.f32 %v2934_v42  ;;  %3386 = vmatpush.bf16.msra.mxu3 %v6871_v62  ;;  %v6942_v62 = vld [vmem:[#allocation25 + $0x48] sm:$0xf] }
 0x2b0   : > { %v2894_v34 = vpop.f32.mrf.mxu2 }
 0x2b1   : > { %v2895_v45 = vadd.f32 %v2894_v34, %v2882_v43 }
 0x2b2   : > { %v2935_v46 = vpop.f32.mrf.mxu1 }
 0x2b3   : > { %v8642_v47 = vpop.eup %8641  ;;  %8643 = vtanh.f32 %v2895_v45  ;;  %v6858_v45 = vld [vmem:[#allocation22 + $0x20] sm:$0xf]  ;;  %v8148_v46 = vld [vmem:[#allocation22 + $0x24] sm:$0xf0] }
 0x2b4   : > { %v2940_v48 = vpack.c.bf16 %v8642_v47, %v8642_v47  ;;  %v8147_v47 = vld [vmem:[#allocation22 + $0x24] sm:$0xf] }
 0x2b6   : > { %3094 = vmatmul.bf16.vlgmr.msrb.gmra.mxu3 %v2940_v48  ;;  %v6859_v48 = vor.u32 %v8148_v46, %v6858_v45  ;;  %v8171_v45 = vld [vmem:[#allocation25 + $0x64] sm:$0xf]  ;;  %v6956_v46 = vld [vmem:[#allocation25 + $0x6c] sm:$0xf0] }
 0x2b7   : > { %v6959_v54 = vor.u32 %v8171_v45, %v6956_v46  ;;  %v7070_v46 = vld [vmem:[#allocation25 + $0x140] sm:$0xf] }
 0x2b8   : > { %v2896_v49 = vpop.f32.mrf.mxu2  ;;  %3374 = vmatpush.bf16.msra.mxu2 %v6859_v48  ;;  %v7052_v48 = vld [vmem:[#allocation25 + $0x12c] sm:$0xf0] }
 0x2b9   : > { %v8644_v50 = vpop.eup %8643  ;;  %v6860_v49 = vld [vmem:[#allocation22 + $0x28] sm:$0xf0] }
 0x2ba   : > { %v2939_v51 = vpack.c.bf16 %v8644_v50, %v8644_v50  ;;  %v6863_v50 = vor.u32 %v8147_v47, %v6860_v49  ;;  %v8195_v47 = vld [vmem:[#allocation25 + $0x124] sm:$0xf]  ;;  %v8621_v49 = vld [vmem:[#allocation20] ss:$0 sm:$0xff] }
 0x2bb   : > { %v7055_v18 = vor.u32 %v8195_v47, %v7052_v48  ;;  %v8200_v47 = vld [vmem:[#allocation25 + $0x148] sm:$0xf0] }
 0x2bc   : > { %3081 = vmatmul.bf16.vlgmr.msrb.gmra.mxu2 %v2939_v51  ;;  %3387 = vmatpush.bf16.msra.mxu3 %v6863_v50  ;;  %v6850_v51 = vld [vmem:[#allocation22 + $0x10] sm:$0xf]  ;;  %v7071_v48 = vor.u32 %v8200_v47, %v7070_v46  ;;  %v7194_v47 = vld [vmem:[#allocation26 + $0xc0] sm:$0xf] }
 0x2bd   : > { %v6851_v53 = vor.u32 %v8146_v52, %v6850_v51  ;;  %v6930_v52 = vld [vmem:[#allocation25 + $0x30] sm:$0xf]  ;;  %v7268_v46 = vld [vmem:[#allocation26 + $0x168] sm:$0xf0] }
 0x2bf   : > { %3375 = vmatpush.bf16.msra.mxu2 %v6851_v53  ;;  %v7026_v53 = vld [vmem:[#allocation25 + $0xf0] sm:$0xf] }
 0x2c0   : > { %3388 = vmatpush.bf16.msra.mxu3 %v6855_v55  ;;  %v8190_v55 = vld [vmem:[#allocation25 + $0xf8] sm:$0xf0] }
 0x2c3   : > { %3376 = vmatpush.bf16.msra.mxu2 %v6843_v58  ;;  %v8192_v58 = vld [vmem:[#allocation25 + $0x10c] sm:$0xf] }
 0x2c7   : > { %3753 = vmatpush.bf16.msrb.mxu2 %v6995_v16  ;;  %v7094_v16 = vld [vmem:[#allocation25 + $0x170] sm:$0xf] }
 0x2cb   : > { %3754 = vmatpush.bf16.msrb.mxu2 %v6983_v41  ;;  %v6986_v41 = vld [vmem:[#allocation25 + $0x98] sm:$0xf] }
 0x339   : > { %v3095_v59 = vpop.f32.mrf.mxu3 }
 0x33f   : > { %v3082_v0 = vpop.f32.mrf.mxu2 }
 0x340   : > { %v3083_v2 = vadd.f32 %v8619_v63, %v3082_v0  ;;  %v6990_v63 = vld [vmem:[#allocation25 + $0xa8] sm:$0xf]  ;;  %v8181_v0 = vld [vmem:[#allocation25 + $0xb0] sm:$0xf0] }
 0x341   : > { %v3097_v3 = vpop.f32.mrf.mxu3 }
 0x342   : > { %v3096_v24 = vadd.f32 %v3095_v59, %v3083_v2  ;;  %v6844_v59 = vld [vmem:[#allocation22 + $0x8] sm:$0xf0]  ;;  %v6991_v2 = vor.u32 %v8181_v0, %v6990_v63  ;;  %v8205_v3 = vld [vmem:[#allocation25 + $0x170] sm:$0xf0]  ;;  %v7027_v0 = vor.u32 %v8190_v55, %v7026_v53 }
 0x343   : > { %v6847_v61 = vor.u32 %v8143_v57, %v6844_v59  ;;  %v6944_v57 = vld [vmem:[#allocation25 + $0x54] sm:$0xf0]  ;;  %v6962_v53 = vld [vmem:[#allocation25 + $0x68] sm:$0xf] }
 0x344   : > { %8645 = vtanh.f32 %v3096_v24  ;;  %v6978_v24 = vld [vmem:[#allocation25 + $0x90] sm:$0xf]  ;;  %3727 = vmatpush.bf16.msrb.mxu0 %v6991_v2  ;;  %v7040_v59 = vld [vmem:[#allocation25 + $0x114] sm:$0xf0]  ;;  %v8163_v2 = vld [vmem:[#allocation25 + $0x20] sm:$0xf0] }
 0x345   : > { %3389 = vmatpush.bf16.msra.mxu3 %v6847_v61  ;;  %v6979_v8 = vor.u32 %v8178_v30, %v6978_v24  ;;  %v6931_v61 = vor.u32 %v8166_v39, %v6930_v52  ;;  %v7014_v30 = vld [vmem:[#allocation25 + $0xd8] sm:$0xf]  ;;  %v7004_v39 = vld [vmem:[#allocation25 + $0xcc] sm:$0xf0] }
 0x347   : > { %v3084_v5 = vpop.f32.mrf.mxu2 }
 0x348   : > { %v7087_v5 = vor.u32 %v8205_v3, %v7086_v1  ;;  %3728 = vmatpush.bf16.msrb.mxu0 %v6979_v8  ;;  %v6918_v1 = vld [vmem:[#allocation25 + $0x18] sm:$0xf]  ;;  %v6947_v3 = vor.u32 %v8168_v56, %v6944_v57  ;;  %v7058_v56 = vld [vmem:[#allocation25 + $0x128] sm:$0xf]  ;;  %v8197_v57 = vld [vmem:[#allocation25 + $0x130] sm:$0xf0] }
 0x349   : > { %3766 = vmatpush.bf16.msrb.mxu3 %v7091_v23 }
 0x34a   : > { %v8646_v6 = vpop.eup %8645  ;;  %3740 = vmatpush.bf16.msrb.mxu1 %v7087_v5  ;;  %v8187_v5 = vld [vmem:[#allocation25 + $0xe0] sm:$0xf0] }
 0x34b   : > { %v3100_v7 = vpack.c.bf16 %v8646_v6, %v8646_v6  ;;  %v7074_v6 = vld [vmem:[#allocation25 + $0x150] sm:$0xf]  ;;  %v7015_v8 = vor.u32 %v8187_v5, %v7014_v30  ;;  %v7034_v30 = vld [vmem:[#allocation25 + $0xf8] sm:$0xf]  ;;  %v8191_v5 = vld [vmem:[#allocation25 + $0x100] sm:$0xf0] }
 0x34c   : > { %3729 = vmatpush.bf16.msrb.mxu0 %v6967_v20 }
 0x34d   : > { %3177 = vmatmul.bf16.vlgmr.msra.gmra.mxu0 %v3100_v7  ;;  %v8202_v7 = vld [vmem:[#allocation25 + $0x158] sm:$0xf0]  ;;  %3767 = vmatpush.bf16.msrb.mxu3 %v7079_v44  ;;  %v8179_v44 = vld [vmem:[#allocation25 + $0xa0] sm:$0xf0] }
 0x34e   : > { %v7075_v9 = vor.u32 %v8202_v7, %v7074_v6  ;;  %v7043_v6 = vor.u32 %v8192_v58, %v7040_v59  ;;  %v6919_v7 = vor.u32 %v8163_v2, %v6918_v1  ;;  %v7059_v58 = vor.u32 %v8197_v57, %v7058_v56  ;;  %v6950_v59 = vld [vmem:[#allocation25 + $0x50] sm:$0xf]  ;;  %v8194_v1 = vld [vmem:[#allocation25 + $0x118] sm:$0xf0] }
 0x350   : > { %3741 = vmatpush.bf16.msrb.mxu1 %v7075_v9  ;;  %3730 = vmatpush.bf16.msrb.mxu0 %v6955_v35  ;;  %v6906_v9 = vld [vmem:[#allocation25] sm:$0xf]  ;;  %v8203_v35 = vld [vmem:[#allocation25 + $0x160] sm:$0xf0] }
 0x351   : > { %v6907_v15 = vor.u32 %v8160_v60, %v6906_v9  ;;  %v8164_v9 = vld [vmem:[#allocation25 + $0x28] sm:$0xf0]  ;;  %v7022_v60 = vld [vmem:[#allocation25 + $0xe0] sm:$0xf] }
 0x352   : > { %v7023_v12 = vor.u32 %v8188_v10, %v7022_v60  ;;  %v7146_v10 = vld [vmem:[#allocation26 + $0x60] sm:$0xf] }
 0x354   : > { %3742 = vmatpush.bf16.msrb.mxu1 %v7063_v14  ;;  %v7095_v14 = vor.u32 %v8206_v17, %v7094_v16  ;;  %v7010_v16 = vld [vmem:[#allocation25 + $0xc8] sm:$0xf]  ;;  %v8185_v17 = vld [vmem:[#allocation25 + $0xd0] sm:$0xf0] }
 0x358   : > { %3743 = vmatpush.bf16.msrb.mxu1 %v7051_v38  ;;  %v6920_v38 = vld [vmem:[#allocation25 + $0x24] sm:$0xf0] }
 0x3ca   : > { %v3178_v42 = vpop.f32.mrf.mxu0 }
 0x3cb   : > { %v3179_v4 = vadd.f32 %v8620_v40, %v3178_v42  ;;  %v8169_v40 = vld [vmem:[#allocation25 + $0x50] sm:$0xf0]  ;;  %v7038_v42 = vld [vmem:[#allocation25 + $0x108] sm:$0xf] }
 0x3cc   : > { %v6943_v50 = vor.u32 %v8169_v40, %v6942_v62  ;;  %v8186_v62 = vld [vmem:[#allocation25 + $0xdc] sm:$0xf] }
 0x3cd   : > { %3182 = vst [vmem:[%s9776_s20] sm:$0xff] %v3179_v4  ;;  %v3183_v43 = vpack.c.bf16 %v3179_v4, %v3179_v4  ;;  %v6971_v4 = vor.u32 %v8174_v32, %v6968_v36  ;;  %v7082_v32 = vld [vmem:[#allocation25 + $0x158] sm:$0xf]  ;;  %v6987_v36 = vor.u32 %v8179_v44, %v6986_v41 }
 0x3ce   : > { %3731 = vmatpush.bf16.msrb.mxu0 %v6943_v50  ;;  %v6908_v50 = vld [vmem:[#allocation25 + $0xc] sm:$0xf0] }
 0x3cf   : > { %3260 = vmatmul.bf16.vlgmr.msra.gmra.mxu1 %v3183_v43  ;;  %v8193_v43 = vld [vmem:[#allocation25 + $0x110] sm:$0xf0]  ;;  %3755 = vmatpush.bf16.msrb.mxu2 %v6971_v4  ;;  %v6974_v4 = vld [vmem:[#allocation25 + $0x80] sm:$0xf] }
 0x3d0   : > { %v7039_v51 = vor.u32 %v8193_v43, %v7038_v42  ;;  %v7016_v42 = vld [vmem:[#allocation25 + $0xe4] sm:$0xf0]  ;;  %v8176_v43 = vld [vmem:[#allocation25 + $0x88] sm:$0xf0] }
 0x3d1   : > { %v6975_v45 = vor.u32 %v8176_v43, %v6974_v4  ;;  %v7410_v43 = vld [vmem:[#allocation26 + $0x270] sm:$0xf] }
 0x3d2   : > { %v3180_v34 = vpop.f32.mrf.mxu0  ;;  %3744 = vmatpush.bf16.msrb.mxu1 %v7039_v51  ;;  %3732 = vmatpush.bf16.msrb.mxu0 %v6931_v61  ;;  %v8183_v51 = vld [vmem:[#allocation25 + $0xc4] sm:$0xf]  ;;  %v8170_v61 = vld [vmem:[#allocation25 + $0x58] sm:$0xf0] }
 0x3d3   : > { %v7067_v34 = vor.u32 %v8198_v33, %v7064_v37  ;;  %3756 = vmatpush.bf16.msrb.mxu2 %v6959_v54  ;;  %v7083_v33 = vor.u32 %v8203_v35, %v7082_v32  ;;  %v8162_v37 = vld [vmem:[#allocation25 + $0x1c] sm:$0xf]  ;;  %v8173_v54 = vld [vmem:[#allocation25 + $0x70] sm:$0xf0]  ;;  %v7007_v55 = vor.u32 %v8183_v51, %v7004_v39  ;;  %v8300_v32 = vld [vmem:[#allocation26 + $0x2e4] sm:$0xf0] }
 0x3d4   : > { %v6923_v40 = vor.u32 %v8162_v37, %v6920_v38  ;;  %v7218_v37 = vld [vmem:[#allocation26 + $0xf0] sm:$0xf]  ;;  %v8240_v38 = vld [vmem:[#allocation26 + $0x104] sm:$0xf0] }
 0x3d5   : > { %3768 = vmatpush.bf16.msrb.mxu3 %v7067_v34  ;;  %v7019_v34 = vor.u32 %v8186_v62, %v7016_v42  ;;  %v7434_v62 = vld [vmem:[#allocation26 + $0x2a0] sm:$0xf]  ;;  %v7219_v4 = vor.u32 %v8240_v38, %v7218_v37  ;;  %v8348_v39 = vld [vmem:[#allocation26 + $0x464] sm:$0xf0]  ;;  %v8210_v37 = vld [vmem:[#allocation26 + $0x14] sm:$0xf0] }
 0x3d6   : > { %3745 = vmatpush.bf16.msrb.mxu1 %v7027_v0  ;;  %3733 = vmatpush.bf16.msrb.mxu0 %v6919_v7  ;;  %v6951_v0 = vor.u32 %v8170_v61, %v6950_v59  ;;  %v7035_v7 = vor.u32 %v8191_v5, %v7034_v30  ;;  %v7244_v59 = vld [vmem:[#allocation26 + $0x138] sm:$0xf0]  ;;  %v8342_v30 = vld [vmem:[#allocation26 + $0x434] sm:$0xf0]  ;;  %v7362_v5 = vld [vmem:[#allocation26 + $0x210] sm:$0xf] }
 0x3d7   : > { %3757 = vmatpush.bf16.msrb.mxu2 %v6947_v3  ;;  %v6938_v3 = vld [vmem:[#allocation25 + $0x38] sm:$0xf] }
 0x3d9   : > { %3769 = vmatpush.bf16.msrb.mxu3 %v7055_v18  ;;  %v6963_v18 = vor.u32 %v8173_v54, %v6962_v53  ;;  %v7386_v53 = vld [vmem:[#allocation26 + $0x240] sm:$0xf]  ;;  %v8282_v54 = vld [vmem:[#allocation26 + $0x254] sm:$0xf0] }
 0x3da   : > { %3746 = vmatpush.bf16.msrb.mxu1 %v7015_v8  ;;  %3734 = vmatpush.bf16.msrb.mxu0 %v6907_v15  ;;  %v6926_v8 = vld [vmem:[#allocation25 + $0x20] sm:$0xf]  ;;  %v8161_v15 = vld [vmem:[#allocation25 + $0x10] sm:$0xf0] }
 0x3db   : > { %3758 = vmatpush.bf16.msrb.mxu2 %v6935_v28  ;;  %v6927_v11 = vor.u32 %v8164_v9, %v6926_v8  ;;  %v8246_v28 = vld [vmem:[#allocation26 + $0x134] sm:$0xf0]  ;;  %v8237_v8 = vld [vmem:[#allocation26 + $0xf4] sm:$0xf]  ;;  %v7220_v9 = vld [vmem:[#allocation26 + $0x108] sm:$0xf0] }
 0x3dc   : > { %v7243_v44 = vor.u32 %v8246_v28, %v7242_v27  ;;  %v7578_v28 = vld [vmem:[#allocation26 + $0x3c0] sm:$0xf] }
 0x3dd   : > { %3770 = vmatpush.bf16.msrb.mxu3 %v7043_v6 }
 0x3de   : > { %3747 = vmatpush.bf16.msrb.mxu1 %v7003_v21  ;;  %3779 = vmatpush.bf16.msra.mxu0 %v6999_v22  ;;  %v3283_v21 = vld [vmem:[#allocation23] sm:$0x3] }
 0x3df   : > { %3759 = vmatpush.bf16.msrb.mxu2 %v6923_v40  ;;  %v3285_v22 = vperm.slane %v3283_v21, 0  ;;  %v8294_v40 = vld [vmem:[#allocation26 + $0x2b4] sm:$0xf0] }
 0x3e0   : > { %v7435_v42 = vor.u32 %v8294_v40, %v7434_v62  ;;  %v8297_v62 = vld [vmem:[#allocation26 + $0x2d4] sm:$0xf] }
 0x3e1   : > { %3771 = vmatpush.bf16.msrb.mxu3 %v7031_v31 }
 0x3e2   : > { %3792 = vmatpush.bf16.msra.mxu1 %v7095_v14  ;;  %3780 = vmatpush.bf16.msra.mxu0 %v6987_v36  ;;  %v7266_v14 = vld [vmem:[#allocation26 + $0x150] sm:$0xf] }
 0x3e3   : > { %v7267_v26 = vor.u32 %v8252_v25, %v7266_v14  ;;  %v7122_v14 = vld [vmem:[#allocation26 + $0x30] sm:$0xf]  ;;  %v8216_v25 = vld [vmem:[#allocation26 + $0x44] sm:$0xf0] }
 0x3e5   : > { %3772 = vmatpush.bf16.msrb.mxu3 %v7019_v34  ;;  %v8288_v34 = vld [vmem:[#allocation26 + $0x284] sm:$0xf0] }
 0x3e6   : > { %3793 = vmatpush.bf16.msra.mxu1 %v7083_v33  ;;  %3781 = vmatpush.bf16.msra.mxu0 %v6975_v45  ;;  %v7459_v33 = vor.u32 %v8300_v32, %v7458_v29  ;;  %v8249_v45 = vld [vmem:[#allocation26 + $0x154] sm:$0xf]  ;;  %v8330_v29 = vld [vmem:[#allocation26 + $0x3d4] sm:$0xf0] }
 0x3e7   : > { %v7271_v57 = vor.u32 %v8249_v45, %v7268_v46  ;;  %v8225_v32 = vld [vmem:[#allocation26 + $0x94] sm:$0xf]  ;;  %v7579_v38 = vor.u32 %v8330_v29, %v7578_v28  ;;  %v8258_v45 = vld [vmem:[#allocation26 + $0x194] sm:$0xf0]  ;;  %v7394_v29 = vld [vmem:[#allocation26 + $0x248] sm:$0xf] }
 0x3e9   : > { %3773 = vmatpush.bf16.msrb.mxu3 %v7007_v55 }
 0x3ea   : > { %3794 = vmatpush.bf16.msra.mxu1 %v7071_v48  ;;  %3782 = vmatpush.bf16.msra.mxu0 %v6963_v18  ;;  %v8234_v48 = vld [vmem:[#allocation26 + $0xd4] sm:$0xf0] }
 0x3eb   : > { %v7195_v61 = vor.u32 %v8234_v48, %v7194_v47  ;;  %v8345_v48 = vld [vmem:[#allocation26 + $0x454] sm:$0xf] }
 0x3ee   : > { %3795 = vmatpush.bf16.msra.mxu1 %v7059_v58  ;;  %3783 = vmatpush.bf16.msra.mxu0 %v6951_v0  ;;  %v8243_v58 = vld [vmem:[#allocation26 + $0x124] sm:$0xf]  ;;  %v7170_v0 = vld [vmem:[#allocation26 + $0x90] sm:$0xf] }
 0x44c   : > { %v3261_v63 = vpop.f32.mrf.mxu1 }
 0x44d   : > { %v3262_v24 = vadd.f32 %v8621_v49, %v3261_v63  ;;  %v8159_v49 = vld [vmem:[#allocation25 + $0x4] sm:$0xf]  ;;  %v7046_v63 = vld [vmem:[#allocation25 + $0x110] sm:$0xf] }
 0x44e   : > { %v6911_v52 = vor.u32 %v8159_v49, %v6908_v50  ;;  %v7047_v2 = vor.u32 %v8194_v1, %v7046_v63  ;;  %v7411_v49 = vor.u32 %v8288_v34, %v7410_v43  ;;  %v7650_v50 = vld [vmem:[#allocation26 + $0x450] sm:$0xf]  ;;  %v8228_v1 = vld [vmem:[#allocation26 + $0xa4] sm:$0xf0]  ;;  %v7290_v34 = vld [vmem:[#allocation26 + $0x180] sm:$0xf] }
 0x44f   : > { %8647 = vtanh.f32 %v3262_v24  ;;  %v8167_v24 = vld [vmem:[#allocation25 + $0x40] sm:$0xf0]  ;;  %v7171_v60 = vor.u32 %v8228_v1, %v7170_v0  ;;  %v8324_v43 = vld [vmem:[#allocation26 + $0x3a4] sm:$0xf0]  ;;  %v7628_v0 = vld [vmem:[#allocation26 + $0x438] sm:$0xf0] }
 0x450   : > { %3760 = vmatpush.bf16.msrb.mxu2 %v6911_v52  ;;  %3796 = vmatpush.bf16.msra.mxu1 %v7047_v2  ;;  %v6939_v6 = vor.u32 %v8167_v24, %v6938_v3  ;;  %v7651_v2 = vor.u32 %v8348_v39, %v7650_v50  ;;  %v7387_v3 = vor.u32 %v8282_v54, %v7386_v53  ;;  %v7626_v24 = vld [vmem:[#allocation26 + $0x420] sm:$0xf]  ;;  %v8219_v50 = vld [vmem:[#allocation26 + $0x64] sm:$0xf]  ;;  %v7436_v54 = vld [vmem:[#allocation26 + $0x2b8] sm:$0xf0] }
 0x451   : > { %v8291_v53 = vld [vmem:[#allocation26 + $0x2a4] sm:$0xf]  ;;  %v8213_v1 = vld [vmem:[#allocation26 + $0x34] sm:$0xf] }
 0x452   : > { %3784 = vmatpush.bf16.msra.mxu0 %v6939_v6  ;;  %v8276_v6 = vld [vmem:[#allocation26 + $0x224] sm:$0xf0] }
 0x454   : > { %v3263_v19 = vpop.f32.mrf.mxu1  ;;  %3797 = vmatpush.bf16.msra.mxu1 %v7035_v7  ;;  %v7247_v7 = vor.u32 %v8243_v58, %v7244_v59 }
 0x455   : > { %v8648_v20 = vpop.eup %8647  ;;  %v6915_v19 = vor.u32 %v8161_v15, %v6914_v13  ;;  %v7363_v13 = vor.u32 %v8276_v6, %v7362_v5  ;;  %v7602_v15 = vld [vmem:[#allocation26 + $0x3f0] sm:$0xf]  ;;  %v8312_v6 = vld [vmem:[#allocation26 + $0x344] sm:$0xf0] }
 0x456   : > { %v3266_v23 = vpack.c.bf16 %v8648_v20, %v8648_v20  ;;  %3785 = vmatpush.bf16.msra.mxu0 %v6927_v11  ;;  %v7011_v20 = vor.u32 %v8185_v17, %v7010_v16  ;;  %v8222_v11 = vld [vmem:[#allocation26 + $0x74] sm:$0xf0]  ;;  %v8336_v16 = vld [vmem:[#allocation26 + $0x404] sm:$0xf0]  ;;  %v7338_v17 = vld [vmem:[#allocation26 + $0x1e0] sm:$0xf] }
 0x457   : > { %v7506_v5 = vld [vmem:[#allocation26 + $0x330] sm:$0xf] }
 0x458   : > { %3377 = vmatmul.bf16.vlgmr.msra.gmra.mxu2 %v3266_v23  ;;  %3390 = vmatmul.bf16.vlgmr.msra.gmra.mxu3 %v3266_v23  ;;  %v3286_v23 = vperm.slane %v3283_v21, 1  ;;  %v8231_v21 = vld [vmem:[#allocation26 + $0xc4] sm:$0xf] }
 0x459   : > { %3798 = vmatpush.bf16.msra.mxu1 %v7023_v12  ;;  %4689 = vmatpush.bf16.msra.mxu2 %v7267_v26  ;;  %v7627_v12 = vor.u32 %v8342_v30, %v7626_v24  ;;  %v7603_v26 = vor.u32 %v8336_v16, %v7602_v15  ;;  %v8285_v30 = vld [vmem:[#allocation26 + $0x274] sm:$0xf]  ;;  %v8301_v15 = vld [vmem:[#allocation26 + $0x2ec] sm:$0xf0]  ;;  %v8279_v16 = vld [vmem:[#allocation26 + $0x244] sm:$0xf] }
 0x45a   : > { %3786 = vmatpush.bf16.msra.mxu0 %v6915_v19  ;;  %4702 = vmatpush.bf16.msra.mxu3 %v7459_v33  ;;  %v8270_v19 = vld [vmem:[#allocation26 + $0x1f4] sm:$0xf0]  ;;  %v7098_v33 = vld [vmem:[#allocation26] sm:$0xf] }
 0x45b   : > { %v7339_v27 = vor.u32 %v8270_v19, %v7338_v17  ;;  %v7099_v47 = vor.u32 %v8210_v37, %v7098_v33  ;;  %v7388_v17 = vld [vmem:[#allocation26 + $0x258] sm:$0xf0]  ;;  %v7364_v33 = vld [vmem:[#allocation26 + $0x228] sm:$0xf0]  ;;  %v7274_v37 = vld [vmem:[#allocation26 + $0x158] sm:$0xf] }
 0x45d   : > { %3799 = vmatpush.bf16.msra.mxu1 %v7011_v20  ;;  %4690 = vmatpush.bf16.msra.mxu2 %v7243_v44  ;;  %v7223_v20 = vor.u32 %v8237_v8, %v7220_v9  ;;  %v8333_v8 = vld [vmem:[#allocation26 + $0x3f4] sm:$0xf]  ;;  %v7604_v9 = vld [vmem:[#allocation26 + $0x408] sm:$0xf0] }
 0x45e   : > { %4703 = vmatpush.bf16.msra.mxu3 %v7435_v42  ;;  %v7460_v42 = vld [vmem:[#allocation26 + $0x2e8] sm:$0xf0]  ;;  %v7607_v19 = vor.u32 %v8333_v8, %v7604_v9  ;;  %v7202_v8 = vld [vmem:[#allocation26 + $0xc8] sm:$0xf] }
 0x461   : > { %4691 = vmatpush.bf16.msra.mxu2 %v7219_v4  ;;  %v7554_v4 = vld [vmem:[#allocation26 + $0x390] sm:$0xf] }
 0x462   : > { %4704 = vmatpush.bf16.msra.mxu3 %v7411_v49  ;;  %v7652_v49 = vld [vmem:[#allocation26 + $0x468] sm:$0xf0]  ;;  %v7555_v39 = vor.u32 %v8324_v43, %v7554_v4 }
 0x463   : > { %v7655_v58 = vor.u32 %v8345_v48, %v7652_v49  ;;  %v7340_v48 = vld [vmem:[#allocation26 + $0x1f8] sm:$0xf0]  ;;  %v7250_v49 = vld [vmem:[#allocation26 + $0x128] sm:$0xf] }
 0x465   : > { %4692 = vmatpush.bf16.msra.mxu2 %v7195_v61  ;;  %v8339_v61 = vld [vmem:[#allocation26 + $0x424] sm:$0xf] }
 0x466   : > { %4705 = vmatpush.bf16.msra.mxu3 %v7387_v3  ;;  %v7439_v3 = vor.u32 %v8291_v53, %v7436_v54 }
 0x469   : > { %4693 = vmatpush.bf16.msra.mxu2 %v7171_v60  ;;  %v8207_v60 = vld [vmem:[#allocation26 + $0x4] sm:$0xf] }
 0x46a   : > { %4706 = vmatpush.bf16.msra.mxu3 %v7363_v13  ;;  %v7507_v13 = vor.u32 %v8312_v6, %v7506_v5  ;;  %v7532_v5 = vld [vmem:[#allocation26 + $0x378] sm:$0xf0] }
 0x46e   : > { %4707 = vmatpush.bf16.msra.mxu3 %v7339_v27  ;;  %v8289_v27 = vld [vmem:[#allocation26 + $0x28c] sm:$0xf0] }
 0x4db   : > { %v3378_v41 = vpop.f32.mrf.mxu2  ;;  %v3391_v31 = vpop.f32.mrf.mxu3 }
 0x4dc   : > { %v3379_v35 = vadd.f32 %v3378_v41, %v3285_v22  ;;  %v3392_v36 = vadd.f32 %v3391_v31, %v3286_v23  ;;  %v7196_v22 = vld [vmem:[#allocation26 + $0xd8] sm:$0xf0]  ;;  %v7147_v23 = vor.u32 %v8222_v11, %v7146_v10  ;;  %v7314_v41 = vld [vmem:[#allocation26 + $0x1b0] sm:$0xf]  ;;  %v8264_v31 = vld [vmem:[#allocation26 + $0x1c4] sm:$0xf0] }
 0x4dd   : > { %v7199_v44 = vor.u32 %v8231_v21, %v7196_v22  ;;  %v7315_v40 = vor.u32 %v8264_v31, %v7314_v41  ;;  %v7100_v10 = vld [vmem:[#allocation26 + $0x18] sm:$0xf0]  ;;  %v7466_v11 = vld [vmem:[#allocation26 + $0x2d8] sm:$0xf]  ;;  %v7391_v22 = vor.u32 %v8279_v16, %v7388_v17  ;;  %v8283_v41 = vld [vmem:[#allocation26 + $0x25c] sm:$0xf0] }
 0x4de   : > { %8649 = vtanh.f32 %v3379_v35  ;;  %v7172_v35 = vld [vmem:[#allocation26 + $0xa8] sm:$0xf0]  ;;  %4694 = vmatpush.bf16.msra.mxu2 %v7147_v23  ;;  %v7467_v21 = vor.u32 %v8301_v15, %v7466_v11  ;;  %v7442_v23 = vld [vmem:[#allocation26 + $0x2a8] sm:$0xf]  ;;  %v7395_v31 = vor.u32 %v8283_v41, %v7394_v29  ;;  %v8259_v11 = vld [vmem:[#allocation26 + $0x19c] sm:$0xf0] }
 0x4df   : > { %8651 = vtanh.f32 %v3392_v36  ;;  %v7123_v36 = vor.u32 %v8216_v25, %v7122_v14  ;;  %v7175_v46 = vor.u32 %v8225_v32, %v7172_v35  ;;  %4708 = vmatpush.bf16.msra.mxu3 %v7315_v40  ;;  %v8295_v14 = vld [vmem:[#allocation26 + $0x2bc] sm:$0xf0]  ;;  %v8306_v32 = vld [vmem:[#allocation26 + $0x314] sm:$0xf0]  ;;  %v8309_v15 = vld [vmem:[#allocation26 + $0x334] sm:$0xf] }
 0x4e0   : > { %v7443_v25 = vor.u32 %v8295_v14, %v7442_v23  ;;  %v7370_v40 = vld [vmem:[#allocation26 + $0x218] sm:$0xf]  ;;  %v7508_v16 = vld [vmem:[#allocation26 + $0x348] sm:$0xf0]  ;;  %v7484_v23 = vld [vmem:[#allocation26 + $0x318] sm:$0xf0] }
 0x4e1   : > { %v7511_v17 = vor.u32 %v8309_v15, %v7508_v16  ;;  %v8217_v29 = vld [vmem:[#allocation26 + $0x4c] sm:$0xf0]  ;;  %v7586_v16 = vld [vmem:[#allocation26 + $0x3c8] sm:$0xf] }
 0x4e2   : > { %4695 = vmatpush.bf16.msra.mxu2 %v7123_v36  ;;  %v8273_v36 = vld [vmem:[#allocation26 + $0x214] sm:$0xf] }
 0x4e3   : > { %v3380_v51 = vpop.f32.mrf.mxu2  ;;  %v3393_v52 = vpop.f32.mrf.mxu3 }
 0x4e4   : > { %v8650_v55 = vpop.eup %8649  ;;  %v7148_v51 = vld [vmem:[#allocation26 + $0x78] sm:$0xf0]  ;;  %v7463_v52 = vor.u32 %v8297_v62, %v7460_v42  ;;  %v8253_v62 = vld [vmem:[#allocation26 + $0x16c] sm:$0xf0] }
 0x4e5   : > { %v8652_v18 = vpop.eup %8651  ;;  %v9779_v56 = vpack.c.bf16 %v8650_v55, %v8650_v55  ;;  %v7291_v55 = vor.u32 %v8258_v45, %v7290_v34  ;;  %v7151_v59 = vor.u32 %v8219_v50, %v7148_v51  ;;  %v8277_v42 = vld [vmem:[#allocation26 + $0x22c] sm:$0xf0]  ;;  %v7275_v4 = vor.u32 %v8253_v62, %v7274_v37  ;;  %v8327_v34 = vld [vmem:[#allocation26 + $0x3c4] sm:$0xf]  ;;  %v7580_v45 = vld [vmem:[#allocation26 + $0x3d8] sm:$0xf0] }
 0x4e6   : > { %v9781_v63 = vpack.c.bf16 %v8652_v18, %v8652_v18  ;;  %v7530_v18 = vld [vmem:[#allocation26 + $0x360] sm:$0xf]  ;;  %4696 = vmatpush.bf16.msra.mxu2 %v7099_v47  ;;  %v7371_v43 = vor.u32 %v8277_v42, %v7370_v40  ;;  %v8267_v47 = vld [vmem:[#allocation26 + $0x1e4] sm:$0xf] }
 0x4e7   : > { %3735 = vmatmul.bf16.vlgmr.msrb.gmra.mxu0 %v9779_v56  ;;  %3761 = vmatmul.bf16.vlgmr.msrb.gmra.mxu2 %v9779_v56  ;;  %v7343_v50 = vor.u32 %v8267_v47, %v7340_v48  ;;  %v8247_v51 = vld [vmem:[#allocation26 + $0x13c] sm:$0xf0]  ;;  %v8346_v47 = vld [vmem:[#allocation26 + $0x45c] sm:$0xf]  ;;  %v7660_v48 = vld [vmem:[#allocation26 + $0x470] sm:$0xf0] }
 0x4e8   : > { %3748 = vmatmul.bf16.vlgmr.msrb.gmra.mxu1 %v9781_v63  ;;  %3774 = vmatmul.bf16.vlgmr.msrb.gmra.mxu3 %v9781_v63  ;;  %v7251_v53 = vor.u32 %v8247_v51, %v7250_v49 }
 0x4e9   : > { %4728 = vmatpush.bf16.msrb.mxu1 %v7271_v57  ;;  %4715 = vmatpush.bf16.msrb.mxu0 %v7651_v2  ;;  %v8318_v57 = vld [vmem:[#allocation26 + $0x374] sm:$0xf0]  ;;  %v7124_v2 = vld [vmem:[#allocation26 + $0x48] sm:$0xf0] }
 0x4ea   : > { %4741 = vmatpush.bf16.msrb.mxu2 %v7463_v52  ;;  %v7531_v24 = vor.u32 %v8318_v57, %v7530_v18  ;;  %4709 = vmatpush.bf16.msra.mxu3 %v7291_v55  ;;  %v7346_v52 = vld [vmem:[#allocation26 + $0x1e8] sm:$0xf]  ;;  %v8321_v55 = vld [vmem:[#allocation26 + $0x394] sm:$0xf]  ;;  %v7556_v18 = vld [vmem:[#allocation26 + $0x3a8] sm:$0xf0] }
 0x4eb   : > { %v7559_v57 = vor.u32 %v8321_v55, %v7556_v18  ;;  %v8343_v55 = vld [vmem:[#allocation26 + $0x43c] sm:$0xf0]  ;;  %v8340_v18 = vld [vmem:[#allocation26 + $0x42c] sm:$0xf] }
 0x4ed   : > { %4729 = vmatpush.bf16.msrb.mxu1 %v7247_v7  ;;  %4716 = vmatpush.bf16.msrb.mxu0 %v7627_v12  ;;  %v7631_v7 = vor.u32 %v8339_v61, %v7628_v0  ;;  %v7226_v61 = vld [vmem:[#allocation26 + $0xf8] sm:$0xf] }
 0x4ee   : > { %4754 = vmatpush.bf16.msrb.mxu3 %v7655_v58  ;;  %4742 = vmatpush.bf16.msrb.mxu2 %v7439_v3  ;;  %v8261_v58 = vld [vmem:[#allocation26 + $0x1b4] sm:$0xf]  ;;  %v8265_v3 = vld [vmem:[#allocation26 + $0x1cc] sm:$0xf0] }
 0x4f1   : > { %4730 = vmatpush.bf16.msrb.mxu1 %v7223_v20  ;;  %4717 = vmatpush.bf16.msrb.mxu0 %v7603_v26  ;;  %v7103_v20 = vor.u32 %v8207_v60, %v7100_v10  ;;  %v7418_v26 = vld [vmem:[#allocation26 + $0x278] sm:$0xf]  ;;  %v8235_v60 = vld [vmem:[#allocation26 + $0xdc] sm:$0xf0]  ;;  %v7298_v10 = vld [vmem:[#allocation26 + $0x188] sm:$0xf] }
 0x4f2   : > { %4755 = vmatpush.bf16.msrb.mxu3 %v7631_v7  ;;  %v7419_v28 = vor.u32 %v8289_v27, %v7418_v26  ;;  %v8255_v7 = vld [vmem:[#allocation26 + $0x184] sm:$0xf]  ;;  %v8223_v26 = vld [vmem:[#allocation26 + $0x7c] sm:$0xf0] }
 0x4f5   : > { %4731 = vmatpush.bf16.msrb.mxu1 %v7199_v44  ;;  %4718 = vmatpush.bf16.msrb.mxu0 %v7579_v38  ;;  %v7482_v44 = vld [vmem:[#allocation26 + $0x300] sm:$0xf]  ;;  %v7367_v38 = vor.u32 %v8273_v36, %v7364_v33 }
 0x4f6   : > { %4756 = vmatpush.bf16.msrb.mxu3 %v7607_v19  ;;  %v7483_v35 = vor.u32 %v8306_v32, %v7482_v44  ;;  %v7178_v19 = vld [vmem:[#allocation26 + $0x98] sm:$0xf]  ;;  %v7106_v44 = vld [vmem:[#allocation26 + $0x8] sm:$0xf]  ;;  %v8211_v32 = vld [vmem:[#allocation26 + $0x1c] sm:$0xf0] }
 0x4f7   : > { %3787 = vmatmul.bf16.vlgmr.msra.gmra.mxu0 %v9779_v56  ;;  %v7412_v56 = vld [vmem:[#allocation26 + $0x288] sm:$0xf0] }
 0x4f8   : > { %3800 = vmatmul.bf16.vlgmr.msra.gmra.mxu1 %v9781_v63  ;;  %v7127_v63 = vor.u32 %v8213_v1, %v7124_v2  ;;  %v7415_v12 = vor.u32 %v8285_v30, %v7412_v56  ;;  %v8241_v1 = vld [vmem:[#allocation26 + $0x10c] sm:$0xf0]  ;;  %v7322_v2 = vld [vmem:[#allocation26 + $0x1b8] sm:$0xf]  ;;  %v8315_v56 = vld [vmem:[#allocation26 + $0x364] sm:$0xf] }
 0x4f9   : > { %4732 = vmatpush.bf16.msrb.mxu1 %v7175_v46  ;;  %4719 = vmatpush.bf16.msrb.mxu0 %v7555_v39  ;;  %v7583_v46 = vor.u32 %v8327_v34, %v7580_v45  ;;  %v8271_v39 = vld [vmem:[#allocation26 + $0x1fc] sm:$0xf0]  ;;  %v7323_v30 = vor.u32 %v8265_v3, %v7322_v2  ;;  %v7535_v6 = vor.u32 %v8315_v56, %v7532_v5  ;;  %v7658_v34 = vld [vmem:[#allocation26 + $0x458] sm:$0xf]  ;;  %v8337_v56 = vld [vmem:[#allocation26 + $0x40c] sm:$0xf0] }
 0x4fa   : > { %4743 = vmatpush.bf16.msrb.mxu2 %v7415_v12  ;;  %v7347_v54 = vor.u32 %v8271_v39, %v7346_v52  ;;  %v7203_v12 = vor.u32 %v8235_v60, %v7202_v8  ;;  %v7663_v39 = vor.u32 %v8346_v47, %v7660_v48  ;;  %v8334_v5 = vld [vmem:[#allocation26 + $0x3fc] sm:$0xf]  ;;  %v8316_v47 = vld [vmem:[#allocation26 + $0x36c] sm:$0xf]  ;;  %v7540_v48 = vld [vmem:[#allocation26 + $0x380] sm:$0xf0] }
 0x4fb   : > { %4757 = vmatpush.bf16.msrb.mxu3 %v7583_v46  ;;  %v8349_v46 = vld [vmem:[#allocation26 + $0x46c] sm:$0xf0] }
 0x4fc   : > { %v7659_v52 = vor.u32 %v8349_v46, %v7658_v34  ;;  %v8292_v34 = vld [vmem:[#allocation26 + $0x2ac] sm:$0xf]  ;;  %v7444_v46 = vld [vmem:[#allocation26 + $0x2c0] sm:$0xf0] }
 0x4fd   : > { %4733 = vmatpush.bf16.msrb.mxu1 %v7151_v59  ;;  %4720 = vmatpush.bf16.msrb.mxu0 %v7531_v24  ;;  %v7316_v59 = vld [vmem:[#allocation26 + $0x1c8] sm:$0xf0]  ;;  %v7227_v24 = vor.u32 %v8241_v1, %v7226_v61  ;;  %v8250_v61 = vld [vmem:[#allocation26 + $0x15c] sm:$0xf] }
 0x4fe   : > { %4744 = vmatpush.bf16.msrb.mxu2 %v7391_v22  ;;  %v7319_v0 = vor.u32 %v8261_v58, %v7316_v59  ;;  %v8303_v22 = vld [vmem:[#allocation26 + $0x304] sm:$0xf] }
 0x4ff   : > { %4758 = vmatpush.bf16.msrb.mxu3 %v7559_v57  ;;  %v7487_v14 = vor.u32 %v8303_v22, %v7484_v23  ;;  %v7636_v57 = vld [vmem:[#allocation26 + $0x440] sm:$0xf0]  ;;  %v8238_v22 = vld [vmem:[#allocation26 + $0xfc] sm:$0xf]  ;;  %v7228_v23 = vld [vmem:[#allocation26 + $0x110] sm:$0xf0] }
 0x500   : > { %v7639_v3 = vor.u32 %v8340_v18, %v7636_v57  ;;  %v8286_v18 = vld [vmem:[#allocation26 + $0x27c] sm:$0xf]  ;;  %v7420_v57 = vld [vmem:[#allocation26 + $0x290] sm:$0xf0] }
 0x501   : > { %4734 = vmatpush.bf16.msrb.mxu1 %v7127_v63  ;;  %4721 = vmatpush.bf16.msrb.mxu0 %v7507_v13  ;;  %v7292_v63 = vld [vmem:[#allocation26 + $0x198] sm:$0xf0]  ;;  %v7299_v13 = vor.u32 %v8259_v11, %v7298_v10  ;;  %v8244_v10 = vld [vmem:[#allocation26 + $0x12c] sm:$0xf]  ;;  %v7252_v11 = vld [vmem:[#allocation26 + $0x140] sm:$0xf0] }
 0x502   : > { %4745 = vmatpush.bf16.msrb.mxu2 %v7367_v38  ;;  %v7295_v9 = vor.u32 %v8255_v7, %v7292_v63 }
 0x503   : > { %4759 = vmatpush.bf16.msrb.mxu3 %v7535_v6  ;;  %v7612_v6 = vld [vmem:[#allocation26 + $0x410] sm:$0xf0] }
 0x504   : > { %v7615_v15 = vor.u32 %v8334_v5, %v7612_v6  ;;  %v8280_v5 = vld [vmem:[#allocation26 + $0x24c] sm:$0xf]  ;;  %v7396_v6 = vld [vmem:[#allocation26 + $0x260] sm:$0xf0] }
 0x505   : > { %4735 = vmatpush.bf16.msrb.mxu1 %v7103_v20  ;;  %4722 = vmatpush.bf16.msrb.mxu0 %v7483_v35  ;;  %v8229_v20 = vld [vmem:[#allocation26 + $0xac] sm:$0xf0]  ;;  %v7107_v35 = vor.u32 %v8211_v32, %v7106_v44  ;;  %v7468_v44 = vld [vmem:[#allocation26 + $0x2f0] sm:$0xf0]  ;;  %v8322_v32 = vld [vmem:[#allocation26 + $0x39c] sm:$0xf] }
 0x506   : > { %4746 = vmatpush.bf16.msrb.mxu2 %v7343_v50 }
 0x507   : > { %4760 = vmatpush.bf16.msrb.mxu3 %v7511_v17  ;;  %v8331_v17 = vld [vmem:[#allocation26 + $0x3dc] sm:$0xf0] }
 0x509   : > { %4780 = vmatpush.bf16.msra.mxu1 %v7467_v21  ;;  %4767 = vmatpush.bf16.msra.mxu0 %v7275_v4  ;;  %v7179_v21 = vor.u32 %v8229_v20, %v7178_v19  ;;  %v8328_v19 = vld [vmem:[#allocation26 + $0x3cc] sm:$0xf]  ;;  %v7588_v20 = vld [vmem:[#allocation26 + $0x3e0] sm:$0xf0] }
 0x50a   : > { %4747 = vmatpush.bf16.msrb.mxu2 %v7319_v0  ;;  %v7276_v0 = vld [vmem:[#allocation26 + $0x170] sm:$0xf0] }
 0x50b   : > { %4761 = vmatpush.bf16.msrb.mxu3 %v7487_v14  ;;  %v7587_v14 = vor.u32 %v8331_v17, %v7586_v16  ;;  %v7132_v16 = vld [vmem:[#allocation26 + $0x50] sm:$0xf0]  ;;  %v7399_v17 = vor.u32 %v8280_v5, %v7396_v6  ;;  %v8227_v6 = vld [vmem:[#allocation26 + $0xa4] sm:$0xf] }
 0x50d   : > { %4781 = vmatpush.bf16.msra.mxu1 %v7443_v25  ;;  %4768 = vmatpush.bf16.msra.mxu0 %v7251_v53  ;;  %v7154_v25 = vld [vmem:[#allocation26 + $0x68] sm:$0xf] }
 0x50e   : > { %4748 = vmatpush.bf16.msrb.mxu2 %v7295_v9  ;;  %v7155_v27 = vor.u32 %v8223_v26, %v7154_v25  ;;  %v7634_v53 = vld [vmem:[#allocation26 + $0x428] sm:$0xf]  ;;  %v7279_v9 = vor.u32 %v8250_v61, %v7276_v0  ;;  %v7591_v25 = vor.u32 %v8328_v19, %v7588_v20 }
 0x50f   : > { %v7635_v2 = vor.u32 %v8343_v55, %v7634_v53  ;;  %v7514_v53 = vld [vmem:[#allocation26 + $0x338] sm:$0xf]  ;;  %v8313_v55 = vld [vmem:[#allocation26 + $0x34c] sm:$0xf0] }
 0x510   : > { %v7515_v0 = vor.u32 %v8313_v55, %v7514_v53  ;;  %v8233_v53 = vld [vmem:[#allocation26 + $0xd4] sm:$0xf]  ;;  %v7212_v55 = vld [vmem:[#allocation26 + $0xe8] sm:$0xf0] }
 0x511   : > { %4782 = vmatpush.bf16.msra.mxu1 %v7419_v28  ;;  %4769 = vmatpush.bf16.msra.mxu0 %v7227_v24  ;;  %v7130_v28 = vld [vmem:[#allocation26 + $0x38] sm:$0xf] }
 0x512   : > { %v7131_v41 = vor.u32 %v8217_v29, %v7130_v28  ;;  %v7610_v24 = vld [vmem:[#allocation26 + $0x3f8] sm:$0xf]  ;;  %v8325_v28 = vld [vmem:[#allocation26 + $0x3ac] sm:$0xf0]  ;;  %v8298_v29 = vld [vmem:[#allocation26 + $0x2dc] sm:$0xf] }
 0x515   : > { %4783 = vmatpush.bf16.msra.mxu1 %v7395_v31  ;;  %4770 = vmatpush.bf16.msra.mxu0 %v7203_v12  ;;  %v3463_v31 = vld [vmem:[%s9968_s18] sm:$0x7]  ;;  %s5422_s18 = scalar_lea.sflag [#allocation4], %s9664_s24 }
 0x516   : > { %v3465_v36 = vperm.slane %v3463_v31, 0  ;;  %v3466_v40 = vperm.slane %v3463_v31, 1  ;;  %v3467_v58 = vperm.slane %v3463_v31, 2  ;;  %v7231_v31 = vor.u32 %v8238_v22, %v7228_v23  ;;  %v8274_v22 = vld [vmem:[#allocation26 + $0x21c] sm:$0xf] }
 0x517   : > { %v7372_v23 = vld [vmem:[#allocation26 + $0x230] sm:$0xf0] }
 0x519   : > { %4784 = vmatpush.bf16.msra.mxu1 %v7371_v43  ;;  %4771 = vmatpush.bf16.msra.mxu0 %v7179_v21  ;;  %v7255_v21 = vor.u32 %v8244_v10, %v7252_v11  ;;  %v8254_v10 = vld [vmem:[#allocation26 + $0x174] sm:$0xf0]  ;;  %v8251_v11 = vld [vmem:[#allocation26 + $0x164] sm:$0xf] }
 0x51d   : > { %4785 = vmatpush.bf16.msra.mxu1 %v7347_v54  ;;  %4772 = vmatpush.bf16.msra.mxu0 %v7155_v27  ;;  %v7562_v27 = vld [vmem:[#allocation26 + $0x398] sm:$0xf] }
 0x521   : > { %4786 = vmatpush.bf16.msra.mxu1 %v7323_v30  ;;  %4773 = vmatpush.bf16.msra.mxu0 %v7131_v41 }
 0x525   : > { %4787 = vmatpush.bf16.msra.mxu1 %v7299_v13  ;;  %4774 = vmatpush.bf16.msra.mxu0 %v7107_v35  ;;  %v7611_v13 = vor.u32 %v8337_v56, %v7610_v24  ;;  %v7564_v35 = vld [vmem:[#allocation26 + $0x3b0] sm:$0xf0]  ;;  %v7423_v24 = vor.u32 %v8286_v18, %v7420_v57  ;;  %v8307_v56 = vld [vmem:[#allocation26 + $0x31c] sm:$0xf0] }
 0x564   : > { %v3736_v33 = vpop.f32.mrf.mxu0 }
 0x565   : > { %v3737_v37 = vadd.f32 %v3736_v33, %v3465_v36  ;;  %v3749_v38 = vpop.f32.mrf.mxu1  ;;  %v8232_v36 = vld [vmem:[#allocation26 + $0xcc] sm:$0xf]  ;;  %v7204_v33 = vld [vmem:[#allocation26 + $0xe0] sm:$0xf0] }
 0x567   : > { %v3750_v62 = vadd.f32 %v3749_v38, %v3737_v37  ;;  %v7563_v38 = vor.u32 %v8325_v28, %v7562_v27  ;;  %v8245_v27 = vld [vmem:[#allocation26 + $0x134] sm:$0xf]  ;;  %v7260_v28 = vld [vmem:[#allocation26 + $0x148] sm:$0xf0] }
 0x569   : > { %8653 = vtanh.f32 %v3750_v62 }
 0x56a   : > { %v3762_v42 = vpop.f32.mrf.mxu2 }
 0x56b   : > { %v3763_v4 = vadd.f32 %v3762_v42, %v3466_v40  ;;  %v3775_v43 = vpop.f32.mrf.mxu3  ;;  %v7471_v40 = vor.u32 %v8298_v29, %v7468_v44  ;;  %v7567_v42 = vor.u32 %v8322_v32, %v7564_v35  ;;  %v8208_v29 = vld [vmem:[#allocation26 + $0xc] sm:$0xf]  ;;  %v7474_v44 = vld [vmem:[#allocation26 + $0x2e0] sm:$0xf]  ;;  %v8302_v32 = vld [vmem:[#allocation26 + $0x2f4] sm:$0xf0] }
 0x56c   : > { %v3738_v45 = vpop.f32.mrf.mxu0 }
 0x56d   : > { %v3776_v49 = vadd.f32 %v3775_v43, %v3763_v4  ;;  %v3751_v50 = vpop.f32.mrf.mxu1  ;;  %v7538_v4 = vld [vmem:[#allocation26 + $0x368] sm:$0xf]  ;;  %v8319_v43 = vld [vmem:[#allocation26 + $0x37c] sm:$0xf0]  ;;  %v7207_v45 = vor.u32 %v8232_v36, %v7204_v33  ;;  %v7263_v36 = vor.u32 %v8245_v27, %v7260_v28  ;;  %v8268_v33 = vld [vmem:[#allocation26 + $0x1ec] sm:$0xf] }
 0x56e   : > { %v8226_v50 = vld [vmem:[#allocation26 + $0x9c] sm:$0xf]  ;;  %v8218_v28 = vld [vmem:[#allocation26 + $0x54] sm:$0xf0] }
 0x56f   : > { %v8654_v51 = vpop.eup %8653  ;;  %8655 = vtanh.f32 %v3776_v49  ;;  %v7539_v49 = vor.u32 %v8319_v43, %v7538_v4  ;;  %v8239_v4 = vld [vmem:[#allocation26 + $0x104] sm:$0xf]  ;;  %v7236_v43 = vld [vmem:[#allocation26 + $0x118] sm:$0xf0] }
 0x570   : > { %v9792_v54 = vpack.c.bf16 %v8654_v51, %v8654_v51  ;;  %v7180_v51 = vld [vmem:[#allocation26 + $0xb0] sm:$0xf0] }
 0x571   : > { %v7183_v61 = vor.u32 %v8226_v50, %v7180_v51  ;;  %v8262_v50 = vld [vmem:[#allocation26 + $0x1bc] sm:$0xf]  ;;  %v7324_v51 = vld [vmem:[#allocation26 + $0x1d0] sm:$0xf0] }
 0x572   : > { %v3764_v59 = vpop.f32.mrf.mxu2  ;;  %4697 = vmatmul.bf16.vlgmr.msra.gmra.mxu2 %v9792_v54  ;;  %4736 = vmatmul.bf16.vlgmr.msrb.gmra.mxu1 %v9792_v54  ;;  %v7327_v57 = vor.u32 %v8262_v50, %v7324_v51  ;;  %v8266_v50 = vld [vmem:[#allocation26 + $0x1d4] sm:$0xf0] }
 0x573   : > { %v3777_v1 = vpop.f32.mrf.mxu3  ;;  %4793 = vmatpush.bf16.msra.mxu2 %v7659_v52  ;;  %4832 = vmatpush.bf16.msrb.mxu1 %v7663_v39  ;;  %v7447_v52 = vor.u32 %v8292_v34, %v7444_v46  ;;  %v7543_v39 = vor.u32 %v8316_v47, %v7540_v48  ;;  %v7516_v59 = vld [vmem:[#allocation26 + $0x350] sm:$0xf0]  ;;  %v7475_v34 = vor.u32 %v8302_v32, %v7474_v44  ;;  %v7450_v46 = vld [vmem:[#allocation26 + $0x2b0] sm:$0xf]  ;;  %v8296_v47 = vld [vmem:[#allocation26 + $0x2c4] sm:$0xf0] }
 0x574   : > { %v3788_v30 = vpop.f32.mrf.mxu0  ;;  %v8220_v1 = vld [vmem:[#allocation26 + $0x6c] sm:$0xf]  ;;  %v7451_v18 = vor.u32 %v8296_v47, %v7450_v46  ;;  %v8215_v44 = vld [vmem:[#allocation26 + $0x44] sm:$0xf]  ;;  %v7140_v32 = vld [vmem:[#allocation26 + $0x58] sm:$0xf0] }
 0x575   : > { %v8656_v7 = vpop.eup %8655  ;;  %v3789_v63 = vadd.f32 %v3788_v30, %v3467_v58  ;;  %v3801_v8 = vpop.f32.mrf.mxu1  ;;  %v8310_v58 = vld [vmem:[#allocation26 + $0x33c] sm:$0xf]  ;;  %v7116_v46 = vld [vmem:[#allocation26 + $0x28] sm:$0xf0]  ;;  %v8299_v47 = vld [vmem:[#allocation26 + $0x2e4] sm:$0xf] }
 0x576   : > { %v9796_v60 = vpack.c.bf16 %v8656_v7, %v8656_v7  ;;  %v7519_v30 = vor.u32 %v8310_v58, %v7516_v59  ;;  %v8304_v7 = vld [vmem:[#allocation26 + $0x30c] sm:$0xf]  ;;  %v7426_v58 = vld [vmem:[#allocation26 + $0x280] sm:$0xf]  ;;  %v8290_v59 = vld [vmem:[#allocation26 + $0x294] sm:$0xf0] }
 0x577   : > { %v3802_v12 = vadd.f32 %v3801_v8, %v3789_v63  ;;  %4794 = vmatpush.bf16.msra.mxu2 %v7635_v2  ;;  %4833 = vmatpush.bf16.msrb.mxu1 %v7639_v3  ;;  %v7156_v2 = vld [vmem:[#allocation26 + $0x80] sm:$0xf0]  ;;  %v7490_v3 = vld [vmem:[#allocation26 + $0x308] sm:$0xf]  ;;  %v7282_v8 = vld [vmem:[#allocation26 + $0x160] sm:$0xf]  ;;  %v7427_v5 = vor.u32 %v8290_v59, %v7426_v58 }
 0x578   : > { %4710 = vmatmul.bf16.vlgmr.msra.gmra.mxu3 %v9796_v60  ;;  %v7492_v63 = vld [vmem:[#allocation26 + $0x320] sm:$0xf0]  ;;  %v7283_v20 = vor.u32 %v8254_v10, %v7282_v8  ;;  %v7402_v8 = vld [vmem:[#allocation26 + $0x250] sm:$0xf]  ;;  %v8293_v58 = vld [vmem:[#allocation26 + $0x2b4] sm:$0xf] }
 0x579   : > { %8657 = vtanh.f32 %v3802_v12  ;;  %4806 = vmatpush.bf16.msra.mxu3 %v7279_v9  ;;  %v7159_v9 = vor.u32 %v8220_v1, %v7156_v2  ;;  %v7284_v12 = vld [vmem:[#allocation26 + $0x178] sm:$0xf0]  ;;  %v7495_v19 = vor.u32 %v8304_v7, %v7492_v63  ;;  %v8256_v1 = vld [vmem:[#allocation26 + $0x18c] sm:$0xf]  ;;  %v7300_v2 = vld [vmem:[#allocation26 + $0x1a0] sm:$0xf0] }
 0x57a   : > { %v7188_v7 = vld [vmem:[#allocation26 + $0xb8] sm:$0xf0]  ;;  %v7303_v63 = vor.u32 %v8256_v1, %v7300_v2  ;;  %v7452_v59 = vld [vmem:[#allocation26 + $0x2c8] sm:$0xf0]  ;;  %v8347_v2 = vld [vmem:[#allocation26 + $0x464] sm:$0xf] }
 0x57b   : > { %4795 = vmatpush.bf16.msra.mxu2 %v7611_v13  ;;  %4834 = vmatpush.bf16.msrb.mxu1 %v7615_v15  ;;  %v7491_v13 = vor.u32 %v8307_v56, %v7490_v3  ;;  %v8214_v15 = vld [vmem:[#allocation26 + $0x3c] sm:$0xf]  ;;  %v7186_v3 = vld [vmem:[#allocation26 + $0xa0] sm:$0xf]  ;;  %v8350_v56 = vld [vmem:[#allocation26 + $0x474] sm:$0xf0] }
 0x57c   : > { %v3790_v26 = vpop.f32.mrf.mxu0 }
 0x57d   : > { %v3803_v41 = vpop.f32.mrf.mxu1  ;;  %4807 = vmatpush.bf16.msra.mxu3 %v7255_v21  ;;  %v7287_v21 = vor.u32 %v8251_v11, %v7284_v12  ;;  %v8248_v26 = vld [vmem:[#allocation26 + $0x144] sm:$0xf0]  ;;  %v7162_v12 = vld [vmem:[#allocation26 + $0x70] sm:$0xf] }
 0x57e   : > { %v7108_v41 = vld [vmem:[#allocation26 + $0x20] sm:$0xf0] }
 0x57f   : > { %v8658_v37 = vpop.eup %8657  ;;  %4796 = vmatpush.bf16.msra.mxu2 %v7587_v14  ;;  %4835 = vmatpush.bf16.msrb.mxu1 %v7591_v25  ;;  %v7258_v14 = vld [vmem:[#allocation26 + $0x130] sm:$0xf]  ;;  %v7135_v25 = vor.u32 %v8214_v15, %v7132_v16  ;;  %v8224_v15 = vld [vmem:[#allocation26 + $0x84] sm:$0xf0] }
 0x580   : > { %v9799_v62 = vpack.c.bf16 %v8658_v37, %v8658_v37  ;;  %v7259_v35 = vor.u32 %v8248_v26, %v7258_v14  ;;  %v7348_v37 = vld [vmem:[#allocation26 + $0x200] sm:$0xf0]  ;;  %v7642_v16 = vld [vmem:[#allocation26 + $0x430] sm:$0xf]  ;;  %v7163_v14 = vor.u32 %v8224_v15, %v7162_v12  ;;  %v7138_v26 = vld [vmem:[#allocation26 + $0x40] sm:$0xf] }
 0x581   : > { %4808 = vmatpush.bf16.msra.mxu3 %v7231_v31  ;;  %v7375_v31 = vor.u32 %v8274_v22, %v7372_v23  ;;  %v7378_v22 = vld [vmem:[#allocation26 + $0x220] sm:$0xf]  ;;  %v8278_v23 = vld [vmem:[#allocation26 + $0x234] sm:$0xf0]  ;;  %v8281_v15 = vld [vmem:[#allocation26 + $0x254] sm:$0xf] }
 0x582   : > { %4723 = vmatmul.bf16.vlgmr.msrb.gmra.mxu0 %v9799_v62  ;;  %4749 = vmatmul.bf16.vlgmr.msrb.gmra.mxu2 %v9796_v60  ;;  %v7522_v12 = vld [vmem:[#allocation26 + $0x340] sm:$0xf] }
 0x583   : > { %4788 = vmatmul.bf16.vlgmr.msra.gmra.mxu1 %v9796_v60  ;;  %4797 = vmatpush.bf16.msra.mxu2 %v7563_v38  ;;  %v7234_v38 = vld [vmem:[#allocation26 + $0x100] sm:$0xf] }
 0x584   : > { %4819 = vmatpush.bf16.msrb.mxu0 %v7471_v40  ;;  %4836 = vmatpush.bf16.msrb.mxu1 %v7567_v42  ;;  %v7111_v40 = vor.u32 %v8208_v29, %v7108_v41  ;;  %v8242_v42 = vld [vmem:[#allocation26 + $0x114] sm:$0xf0]  ;;  %v7618_v29 = vld [vmem:[#allocation26 + $0x400] sm:$0xf] }
 0x585   : > { %4809 = vmatpush.bf16.msra.mxu3 %v7207_v45  ;;  %v7351_v45 = vor.u32 %v8268_v33, %v7348_v37  ;;  %v7235_v48 = vor.u32 %v8242_v42, %v7234_v38  ;;  %v8338_v41 = vld [vmem:[#allocation26 + $0x414] sm:$0xf0]  ;;  %v7139_v33 = vor.u32 %v8218_v28, %v7138_v26  ;;  %v7114_v38 = vld [vmem:[#allocation26 + $0x10] sm:$0xf]  ;;  %v7143_v42 = vor.u32 %v8215_v44, %v7140_v32  ;;  %v8329_v28 = vld [vmem:[#allocation26 + $0x3d4] sm:$0xf] }
 0x586   : > { %v7619_v37 = vor.u32 %v8338_v41, %v7618_v29  ;;  %v7596_v29 = vld [vmem:[#allocation26 + $0x3e8] sm:$0xf0]  ;;  %v8269_v44 = vld [vmem:[#allocation26 + $0x1f4] sm:$0xf] }
 0x587   : > { %4798 = vmatpush.bf16.msra.mxu2 %v7539_v49  ;;  %v7239_v49 = vor.u32 %v8239_v4, %v7236_v43  ;;  %v7594_v4 = vld [vmem:[#allocation26 + $0x3d0] sm:$0xf]  ;;  %v8332_v43 = vld [vmem:[#allocation26 + $0x3e4] sm:$0xf0]  ;;  %v7356_v32 = vld [vmem:[#allocation26 + $0x208] sm:$0xf0] }
 0x588   : > { %4820 = vmatpush.bf16.msrb.mxu0 %v7447_v52  ;;  %4837 = vmatpush.bf16.msrb.mxu1 %v7543_v39  ;;  %v7210_v52 = vld [vmem:[#allocation26 + $0xd0] sm:$0xf]  ;;  %v8236_v39 = vld [vmem:[#allocation26 + $0xe4] sm:$0xf0] }
 0x589   : > { %4762 = vmatmul.bf16.vlgmr.msrb.gmra.mxu3 %v9799_v62 }
 0x58a   : > { %4810 = vmatpush.bf16.msra.mxu3 %v7183_v61  ;;  %v7211_v61 = vor.u32 %v8236_v39, %v7210_v52  ;;  %v7595_v52 = vor.u32 %v8332_v43, %v7594_v4  ;;  %v8317_v4 = vld [vmem:[#allocation26 + $0x374] sm:$0xf]  ;;  %v7548_v43 = vld [vmem:[#allocation26 + $0x388] sm:$0xf0] }
 0x58b   : > { %4799 = vmatpush.bf16.msra.mxu2 %v7515_v0  ;;  %v7215_v0 = vor.u32 %v8233_v53, %v7212_v55  ;;  %v7570_v55 = vld [vmem:[#allocation26 + $0x3a0] sm:$0xf] }
 0x58c   : > { %4821 = vmatpush.bf16.msrb.mxu0 %v7423_v24  ;;  %4838 = vmatpush.bf16.msrb.mxu1 %v7519_v30  ;;  %v8230_v24 = vld [vmem:[#allocation26 + $0xb4] sm:$0xf0]  ;;  %v7666_v30 = vld [vmem:[#allocation26 + $0x460] sm:$0xf] }
 0x58d   : > { %v7187_v10 = vor.u32 %v8230_v24, %v7186_v3  ;;  %v7667_v11 = vor.u32 %v8350_v56, %v7666_v30  ;;  %v7668_v3 = vld [vmem:[#allocation26 + $0x478] sm:$0xf0]  ;;  %v7455_v24 = vor.u32 %v8293_v58, %v7452_v59  ;;  %v7546_v30 = vld [vmem:[#allocation26 + $0x370] sm:$0xf]  ;;  %v8320_v56 = vld [vmem:[#allocation26 + $0x384] sm:$0xf0] }
 0x58e   : > { %4811 = vmatpush.bf16.msra.mxu3 %v7159_v9  ;;  %v8284_v9 = vld [vmem:[#allocation26 + $0x264] sm:$0xf0]  ;;  %v8366_v58 = vld [vmem:[#allocation28 + $0x78] sm:$0xff] }
 0x58f   : > { %4800 = vmatpush.bf16.msra.mxu2 %v7491_v13  ;;  %v7191_v13 = vor.u32 %v8227_v6, %v7188_v7  ;;  %v8287_v6 = vld [vmem:[#allocation26 + $0x284] sm:$0xf]  ;;  %v7428_v7 = vld [vmem:[#allocation26 + $0x298] sm:$0xf0] }
 0x590   : > { %4822 = vmatpush.bf16.msrb.mxu0 %v7399_v17  ;;  %4839 = vmatpush.bf16.msrb.mxu1 %v7495_v19  ;;  %v8344_v17 = vld [vmem:[#allocation26 + $0x444] sm:$0xf0]  ;;  %v7403_v19 = vor.u32 %v8284_v9, %v7402_v8  ;;  %v7547_v8 = vor.u32 %v8320_v56, %v7546_v30  ;;  %v8341_v9 = vld [vmem:[#allocation26 + $0x434] sm:$0xf]  ;;  %v8354_v59 = vld [vmem:[#allocation28 + $0x18] sm:$0xff] }
 0x591   : > { %v8362_v30 = vld [vmem:[#allocation28 + $0x58] sm:$0xff]  ;;  %v8372_v56 = vld [vmem:[#allocation28 + $0xa8] sm:$0xff] }
 0x592   : > { %4812 = vmatpush.bf16.msra.mxu3 %v7135_v25  ;;  %4775 = vmatmul.bf16.vlgmr.msra.gmra.mxu0 %v9792_v54  ;;  %v7643_v25 = vor.u32 %v8344_v17, %v7642_v16  ;;  %v7404_v16 = vld [vmem:[#allocation26 + $0x268] sm:$0xf0] }
 0x593   : > { %4845 = vmatpush.bf16.msrb.mxu2 %v7283_v20  ;;  %4840 = vmatmul.bf16.vlgmr.msrb.gmra.mxu1 %v9799_v62  ;;  %v8221_v20 = vld [vmem:[#allocation26 + $0x74] sm:$0xf] }
 0x594   : > { %4884 = vmatpush.bf16.msra.mxu1 %v7287_v21  ;;  %4801 = vmatmul.bf16.vlgmr.msra.gmra.mxu2 %v9799_v62  ;;  %v7164_v21 = vld [vmem:[#allocation26 + $0x88] sm:$0xf0] }
 0x595   : > { %4823 = vmatpush.bf16.msrb.mxu0 %v7375_v31  ;;  %v7167_v27 = vor.u32 %v8221_v20, %v7164_v21  ;;  %v7379_v31 = vor.u32 %v8278_v23, %v7378_v22  ;;  %v8335_v20 = vld [vmem:[#allocation26 + $0x404] sm:$0xf]  ;;  %v7620_v21 = vld [vmem:[#allocation26 + $0x418] sm:$0xf0]  ;;  %v7498_v22 = vld [vmem:[#allocation26 + $0x310] sm:$0xf] }
 0x596   : > { %4813 = vmatpush.bf16.msra.mxu3 %v7111_v40  ;;  %v8212_v40 = vld [vmem:[#allocation26 + $0x24] sm:$0xf0]  ;;  %v7623_v26 = vor.u32 %v8335_v20, %v7620_v21 }
 0x597   : > { %4846 = vmatpush.bf16.msrb.mxu2 %v7259_v35  ;;  %v7354_v35 = vld [vmem:[#allocation26 + $0x1f0] sm:$0xf]  ;;  %v7115_v51 = vor.u32 %v8212_v40, %v7114_v38  ;;  %v8308_v23 = vld [vmem:[#allocation26 + $0x324] sm:$0xf0]  ;;  %v8263_v38 = vld [vmem:[#allocation26 + $0x1c4] sm:$0xf] }
 0x598   : > { %4885 = vmatpush.bf16.msra.mxu1 %v7263_v36  ;;  %v8272_v36 = vld [vmem:[#allocation26 + $0x204] sm:$0xf0]  ;;  %v7332_v40 = vld [vmem:[#allocation26 + $0x1d8] sm:$0xf0] }
 0x599   : > { %4824 = vmatpush.bf16.msrb.mxu0 %v7351_v45  ;;  %4814 = vmatmul.bf16.vlgmr.msra.gmra.mxu3 %v9792_v54  ;;  %v7355_v45 = vor.u32 %v8272_v36, %v7354_v35  ;;  %v7599_v35 = vor.u32 %v8329_v28, %v7596_v29  ;;  %v8323_v36 = vld [vmem:[#allocation26 + $0x3a4] sm:$0xf]  ;;  %v8368_v21 = vld [vmem:[#allocation28 + $0x88] sm:$0xff] }
 0x59a   : > { %4858 = vmatpush.bf16.msrb.mxu3 %v7475_v34  ;;  %v8209_v34 = vld [vmem:[#allocation26 + $0x14] sm:$0xf] }
 0x59b   : > { %4847 = vmatpush.bf16.msrb.mxu2 %v7235_v48  ;;  %v7476_v48 = vld [vmem:[#allocation26 + $0x2f8] sm:$0xf0]  ;;  %v7119_v39 = vor.u32 %v8209_v34, %v7116_v46  ;;  %v7335_v34 = vor.u32 %v8263_v38, %v7332_v40  ;;  %v7308_v46 = vld [vmem:[#allocation26 + $0x1a8] sm:$0xf0] }
 0x59c   : > { %4886 = vmatpush.bf16.msra.mxu1 %v7239_v49  ;;  %v7330_v49 = vld [vmem:[#allocation26 + $0x1c0] sm:$0xf]  ;;  %v7479_v53 = vor.u32 %v8299_v47, %v7476_v48  ;;  %v7551_v47 = vor.u32 %v8317_v4, %v7548_v43  ;;  %v8311_v48 = vld [vmem:[#allocation26 + $0x344] sm:$0xf] }
 0x59d   : > { %4825 = vmatpush.bf16.msrb.mxu0 %v7327_v57  ;;  %v7331_v57 = vor.u32 %v8266_v50, %v7330_v49  ;;  %v7524_v49 = vld [vmem:[#allocation26 + $0x358] sm:$0xf0]  ;;  %v8375_v43 = vld [vmem:[#allocation28 + $0xc0] sm:$0xff] }
 0x59e   : > { %4859 = vmatpush.bf16.msrb.mxu3 %v7451_v18  ;;  %v8326_v18 = vld [vmem:[#allocation26 + $0x3b4] sm:$0xf0] }
 0x59f   : > { %4848 = vmatpush.bf16.msrb.mxu2 %v7211_v61  ;;  %v7306_v61 = vld [vmem:[#allocation26 + $0x190] sm:$0xf]  ;;  %v7571_v1 = vor.u32 %v8326_v18, %v7570_v55  ;;  %v8356_v18 = vld [vmem:[#allocation28 + $0x28] sm:$0xff] }
 0x5a0   : > { %4887 = vmatpush.bf16.msra.mxu1 %v7215_v0  ;;  %v8260_v0 = vld [vmem:[#allocation26 + $0x1a4] sm:$0xf0]  ;;  %v8357_v55 = vld [vmem:[#allocation28 + $0x30] sm:$0xff] }
 0x5a1   : > { %4826 = vmatpush.bf16.msrb.mxu0 %v7303_v63  ;;  %v7671_v63 = vor.u32 %v8347_v2, %v7668_v3  ;;  %v8352_v2 = vld [vmem:[#allocation28 + $0x8] sm:$0xff]  ;;  %v8363_v3 = vld [vmem:[#allocation28 + $0x60] sm:$0xff] }
 0x5a2   : > { %4860 = vmatpush.bf16.msrb.mxu3 %v7427_v5  ;;  %v7307_v5 = vor.u32 %v8260_v0, %v7306_v61  ;;  %v8365_v61 = vld [vmem:[#allocation28 + $0x70] sm:$0xff] }
 0x5a3   : > { %4849 = vmatpush.bf16.msrb.mxu2 %v7187_v10  ;;  %v7644_v10 = vld [vmem:[#allocation26 + $0x448] sm:$0xf0]  ;;  %v8353_v0 = vld [vmem:[#allocation28 + $0x10] sm:$0xff] }
 0x5a4   : > { %4888 = vmatpush.bf16.msra.mxu1 %v7191_v13  ;;  %4827 = vmatmul.bf16.vlgmr.msrb.gmra.mxu0 %v9796_v60  ;;  %v8314_v13 = vld [vmem:[#allocation26 + $0x354] sm:$0xf0]  ;;  %v7647_v17 = vor.u32 %v8341_v9, %v7644_v10  ;;  %v8381_v10 = vld [vmem:[#allocation28 + $0xf0] sm:$0xff] }
 0x5a5   : > { %4871 = vmatpush.bf16.msra.mxu0 %v7667_v11  ;;  %v7431_v11 = vor.u32 %v8287_v6, %v7428_v7  ;;  %v8371_v7 = vld [vmem:[#allocation28 + $0xa0] sm:$0xff]  ;;  %v8370_v9 = vld [vmem:[#allocation28 + $0x98] sm:$0xff] }
 0x5a6   : > { %4861 = vmatpush.bf16.msrb.mxu3 %v7403_v19  ;;  %v7523_v19 = vor.u32 %v8314_v13, %v7522_v12  ;;  %v8359_v12 = vld [vmem:[#allocation28 + $0x40] sm:$0xff]  ;;  %v9819_v13 = vld [vmem:[%s9969_s21] sm:$0x3f] }
 0x5a7   : > { %4850 = vmatpush.bf16.msrb.mxu2 %v7163_v14  ;;  %v8275_v14 = vld [vmem:[#allocation26 + $0x224] sm:$0xf] }
 0x5a8   : > { %4889 = vmatpush.bf16.msra.mxu1 %v7167_v27  ;;  %v7499_v27 = vor.u32 %v8308_v23, %v7498_v22 }
 0x5a9   : > { %4872 = vmatpush.bf16.msra.mxu0 %v7643_v25  ;;  %v7380_v25 = vld [vmem:[#allocation26 + $0x238] sm:$0xf0] }
 0x5aa   : > { %4862 = vmatpush.bf16.msrb.mxu3 %v7379_v31  ;;  %v7383_v41 = vor.u32 %v8275_v14, %v7380_v25  ;;  %v8358_v31 = vld [vmem:[#allocation28 + $0x38] sm:$0xff] }
 0x5ab   : > { %4851 = vmatpush.bf16.msrb.mxu2 %v7139_v33  ;;  %v7572_v33 = vld [vmem:[#allocation26 + $0x3b8] sm:$0xf0] }
 0x5ac   : > { %4890 = vmatpush.bf16.msra.mxu1 %v7143_v42  ;;  %v7575_v42 = vor.u32 %v8323_v36, %v7572_v33  ;;  %v8376_v36 = vld [vmem:[#allocation28 + $0xc8] sm:$0xff] }
 0x5ad   : > { %4873 = vmatpush.bf16.msra.mxu0 %v7619_v37  ;;  %v7359_v37 = vor.u32 %v8269_v44, %v7356_v32  ;;  %v3958_v44 = vperm.slane %v9819_v13, 1 }
 0x5ae   : > { %4863 = vmatpush.bf16.msrb.mxu3 %v7355_v45  ;;  %v8257_v45 = vld [vmem:[#allocation26 + $0x194] sm:$0xf] }
 0x5af   : > { %4852 = vmatpush.bf16.msrb.mxu2 %v7115_v51  ;;  %v7311_v50 = vor.u32 %v8257_v45, %v7308_v46  ;;  %v7527_v51 = vor.u32 %v8311_v48, %v7524_v49  ;;  %v8389_v48 = vld [vmem:[#allocation28 + $0x130] sm:$0xff] }
 0x5b0   : > { %4891 = vmatpush.bf16.msra.mxu1 %v7119_v39  ;;  %v7500_v39 = vld [vmem:[#allocation26 + $0x328] sm:$0xf0] }
 0x5b1   : > { %4874 = vmatpush.bf16.msra.mxu0 %v7595_v52  ;;  %v8305_v52 = vld [vmem:[#allocation26 + $0x314] sm:$0xf] }
 0x5b2   : > { %4864 = vmatpush.bf16.msrb.mxu3 %v7331_v57  ;;  %4853 = vmatmul.bf16.vlgmr.msrb.gmra.mxu2 %v9792_v54  ;;  %v8355_v57 = vld [vmem:[#allocation28 + $0x20] sm:$0xff] }
 0x5b3   : > { %4897 = vmatpush.bf16.msra.mxu2 %v7479_v53  ;;  %4892 = vmatmul.bf16.vlgmr.msra.gmra.mxu1 %v9792_v54  ;;  %v7407_v54 = vor.u32 %v8281_v15, %v7404_v16  ;;  %v7503_v53 = vor.u32 %v8305_v52, %v7500_v39  ;;  %v8369_v16 = vld [vmem:[#allocation28 + $0x90] sm:$0xff] }
 0x5b4   : > { %5336 = vmatpush.bf16.msrb.mxu1 %v8366_v58 }
 0x5b5   : > { %4875 = vmatpush.bf16.msra.mxu0 %v7571_v1  ;;  %v8364_v1 = vld [vmem:[#allocation28 + $0x68] sm:$0xff] }
 0x5b6   : > { %4865 = vmatpush.bf16.msrb.mxu3 %v7307_v5  ;;  %v8361_v5 = vld [vmem:[#allocation28 + $0x50] sm:$0xff] }
 0x5b7   : > { %4898 = vmatpush.bf16.msra.mxu2 %v7455_v24  ;;  %v8351_v24 = vld [vmem:[#allocation28] sm:$0xff] }
 0x5b8   : > { %5337 = vmatpush.bf16.msrb.mxu1 %v8365_v61 }
 0x5b9   : > { %4876 = vmatpush.bf16.msra.mxu0 %v7547_v8  ;;  %4866 = vmatmul.bf16.vlgmr.msrb.gmra.mxu3 %v9796_v60  ;;  %v8360_v8 = vld [vmem:[#allocation28 + $0x48] sm:$0xff] }
 0x5ba   : > { %4910 = vmatpush.bf16.msra.mxu3 %v7671_v63  ;;  %v8382_v63 = vld [vmem:[#allocation28 + $0xf8] sm:$0xff] }
 0x5bb   : > { %4899 = vmatpush.bf16.msra.mxu2 %v7431_v11 }
 0x5bc   : > { %5338 = vmatpush.bf16.msrb.mxu1 %v8364_v1  ;;  %v8386_v1 = vld [vmem:[#allocation28 + $0x118] sm:$0xff] }
 0x5bd   : > { %4877 = vmatpush.bf16.msra.mxu0 %v7523_v19  ;;  %v3957_v19 = vperm.slane %v9819_v13, 0 }
 0x5be   : > { %4911 = vmatpush.bf16.msra.mxu3 %v7647_v17  ;;  %v8380_v17 = vld [vmem:[#allocation28 + $0xe8] sm:$0xff] }
 0x5bf   : > { %4900 = vmatpush.bf16.msra.mxu2 %v7407_v54  ;;  %v8379_v54 = vld [vmem:[#allocation28 + $0xe0] sm:$0xff] }
 0x5c0   : > { %5339 = vmatpush.bf16.msrb.mxu1 %v8363_v3  ;;  %v8385_v3 = vld [vmem:[#allocation28 + $0x110] sm:$0xff] }
 0x5c1   : > { %4878 = vmatpush.bf16.msra.mxu0 %v7499_v27  ;;  %v8378_v27 = vld [vmem:[#allocation28 + $0xd8] sm:$0xff] }
 0x5c2   : > { %4912 = vmatpush.bf16.msra.mxu3 %v7623_v26  ;;  %v8367_v26 = vld [vmem:[#allocation28 + $0x80] sm:$0xff] }
 0x5c3   : > { %4901 = vmatpush.bf16.msra.mxu2 %v7383_v41 }
 0x5c4   : > { %4879 = vmatmul.bf16.vlgmr.msra.gmra.mxu0 %v9799_v62  ;;  %5340 = vmatpush.bf16.msrb.mxu1 %v8362_v30 }
 0x5c5   : > { %5323 = vmatpush.bf16.msrb.mxu0 %v8358_v31  ;;  %v8377_v31 = vld [vmem:[#allocation28 + $0xd0] sm:$0xff] }
 0x5c6   : > { %4913 = vmatpush.bf16.msra.mxu3 %v7599_v35 }
 0x5c7   : > { %4902 = vmatpush.bf16.msra.mxu2 %v7359_v37 }
 0x5c8   : > { %5341 = vmatpush.bf16.msrb.mxu1 %v8361_v5 }
 0x5c9   : > { %5324 = vmatpush.bf16.msrb.mxu0 %v8357_v55 }
 0x5ca   : > { %4914 = vmatpush.bf16.msra.mxu3 %v7575_v42  ;;  %v8390_v42 = vld [vmem:[#allocation28 + $0x138] sm:$0xff] }
 0x5cb   : > { %4903 = vmatpush.bf16.msra.mxu2 %v7335_v34 }
 0x5cc   : > { %5342 = vmatpush.bf16.msrb.mxu1 %v8360_v8 }
 0x5cd   : > { %5325 = vmatpush.bf16.msrb.mxu0 %v8356_v18  ;;  %v8387_v18 = vld [vmem:[#allocation28 + $0x120] sm:$0xff] }
 0x5ce   : > { %4915 = vmatpush.bf16.msra.mxu3 %v7551_v47  ;;  %v3959_v47 = vperm.slane %v9819_v13, 2 }
 0x5cf   : > { %4904 = vmatpush.bf16.msra.mxu2 %v7311_v50 }
 0x5d0   : > { %5343 = vmatpush.bf16.msrb.mxu1 %v8359_v12 }
 0x5d1   : > { %5326 = vmatpush.bf16.msrb.mxu0 %v8355_v57 }
 0x5d2   : > { %4916 = vmatpush.bf16.msra.mxu3 %v7527_v51  ;;  %4905 = vmatmul.bf16.vlgmr.msra.gmra.mxu2 %v9796_v60  ;;  %v8374_v60 = vld [vmem:[#allocation28 + $0xb8] sm:$0xff]  ;;  %v8388_v51 = vld [vmem:[#allocation28 + $0x128] sm:$0xff] }
 0x5d3   : > { %5349 = vmatpush.bf16.msrb.mxu2 %v8374_v60  ;;  %v3960_v60 = vperm.slane %v9819_v13, 3 }
 0x5d5   : > { %5327 = vmatpush.bf16.msrb.mxu0 %v8354_v59 }
 0x5d6   : > { %4917 = vmatpush.bf16.msra.mxu3 %v7503_v53 }
 0x5d9   : > { %4918 = vmatmul.bf16.vlgmr.msra.gmra.mxu3 %v9799_v62  ;;  %5328 = vmatpush.bf16.msrb.mxu0 %v8353_v0  ;;  %v8373_v62 = vld [vmem:[#allocation28 + $0xb0] sm:$0xff] }
 0x5da   : > { %5350 = vmatpush.bf16.msrb.mxu2 %v8373_v62  ;;  %5362 = vmatpush.bf16.msrb.mxu3 %v8382_v63  ;;  %v8398_v63 = vld [vmem:[#allocation28 + $0x178] sm:$0xff] }
 0x5db   : > { %5388 = vmatpush.bf16.msra.mxu1 %v8398_v63 }
 0x5dd   : > { %5329 = vmatpush.bf16.msrb.mxu0 %v8352_v2 }
 0x5de   : > { %5351 = vmatpush.bf16.msrb.mxu2 %v8372_v56  ;;  %5363 = vmatpush.bf16.msrb.mxu3 %v8381_v10  ;;  %v8383_v10 = vld [vmem:[#allocation28 + $0x100] sm:$0xff] }
 0x5e1   : > { %5330 = vmatpush.bf16.msrb.mxu0 %v8351_v24 }
 0x5e2   : > { %5352 = vmatpush.bf16.msrb.mxu2 %v8371_v7  ;;  %5364 = vmatpush.bf16.msrb.mxu3 %v8380_v17  ;;  %v8384_v7 = vld [vmem:[#allocation28 + $0x108] sm:$0xff] }
 0x5e5   : > { %5375 = vmatpush.bf16.msra.mxu0 %v8390_v42 }
 0x5e6   : > { %5353 = vmatpush.bf16.msrb.mxu2 %v8370_v9  ;;  %5365 = vmatpush.bf16.msrb.mxu3 %v8379_v54 }
 0x5e9   : > { %5376 = vmatpush.bf16.msra.mxu0 %v8389_v48 }
 0x5ea   : > { %5354 = vmatpush.bf16.msrb.mxu2 %v8369_v16  ;;  %5366 = vmatpush.bf16.msrb.mxu3 %v8378_v27  ;;  %v8392_v27 = vld [vmem:[#allocation28 + $0x148] sm:$0xff] }
 0x5ed   : > { %5377 = vmatpush.bf16.msra.mxu0 %v8388_v51 }
 0x5ee   : > { %5355 = vmatpush.bf16.msrb.mxu2 %v8368_v21  ;;  %5367 = vmatpush.bf16.msrb.mxu3 %v8377_v31  ;;  %v8394_v21 = vld [vmem:[#allocation28 + $0x158] sm:$0xff] }
 0x5ef   : > { %v4737_v6 = vpop.f32.mrf.mxu1 }
 0x5f0   : > { %v4738_v38 = vadd.f32 %v4737_v6, %v3958_v44  ;;  %v8391_v44 = vld [vmem:[#allocation28 + $0x140] sm:$0xff] }
 0x5f1   : > { %5378 = vmatpush.bf16.msra.mxu0 %v8387_v18 }
 0x5f2   : > { %5356 = vmatpush.bf16.msrb.mxu2 %v8367_v26  ;;  %5368 = vmatpush.bf16.msrb.mxu3 %v8376_v36 }
 0x5f5   : > { %v4698_v11 = vpop.f32.mrf.mxu2  ;;  %5379 = vmatpush.bf16.msra.mxu0 %v8386_v1 }
 0x5f6   : > { %v4699_v22 = vadd.f32 %v4698_v11, %v3957_v19  ;;  %5369 = vmatpush.bf16.msrb.mxu3 %v8375_v43  ;;  %v8397_v11 = vld [vmem:[#allocation28 + $0x170] sm:$0xff]  ;;  %v8395_v19 = vld [vmem:[#allocation28 + $0x160] sm:$0xff] }
 0x5f7   : > { %v4739_v15 = vpop.f32.mrf.mxu1  ;;  %5389 = vmatpush.bf16.msra.mxu1 %v8397_v11 }
 0x5f8   : > { %v8396_v15 = vld [vmem:[#allocation28 + $0x168] sm:$0xff] }
 0x5f9   : > { %5380 = vmatpush.bf16.msra.mxu0 %v8385_v3 }
 0x5fb   : > { %v4711_v20 = vpop.f32.mrf.mxu3  ;;  %5390 = vmatpush.bf16.msra.mxu1 %v8396_v15 }
 0x5fc   : > { %v4712_v14 = vadd.f32 %v4711_v20, %v4699_v22  ;;  %v3961_v22 = vperm.slane %v9819_v13, 4 }
 0x5fd   : > { %v4700_v23 = vpop.f32.mrf.mxu2  ;;  %5381 = vmatpush.bf16.msra.mxu0 %v8384_v7 }
 0x5ff   : > { %v4724_v25 = vpop.f32.mrf.mxu0  ;;  %5391 = vmatpush.bf16.msra.mxu1 %v8395_v19 }
 0x600   : > { %v4725_v28 = vadd.f32 %v4724_v25, %v4712_v14  ;;  %v4789_v29 = vpop.f32.mrf.mxu1  ;;  %v8393_v14 = vld [vmem:[#allocation28 + $0x150] sm:$0xff] }
 0x601   : > { %5382 = vmatpush.bf16.msra.mxu0 %v8383_v10 }
 0x602   : > { %8659 = vtanh.f32 %v4725_v28 }
 0x603   : > { %v4713_v41 = vpop.f32.mrf.mxu3  ;;  %5392 = vmatpush.bf16.msra.mxu1 %v8394_v21 }
 0x605   : > { %v4750_v32 = vpop.f32.mrf.mxu2 }
 0x606   : > { %v4751_v4 = vadd.f32 %v4750_v32, %v4738_v38 }
 0x607   : > { %v4726_v35 = vpop.f32.mrf.mxu0  ;;  %5393 = vmatpush.bf16.msra.mxu1 %v8393_v14 }
 0x608   : > { %v8660_v33 = vpop.eup %8659  ;;  %v4791_v37 = vpop.f32.mrf.mxu1 }
 0x609   : > { %v4929_v40 = vpack.c.bf16 %v8660_v33, %v8660_v33  ;;  %v3962_v37 = vperm.slane %v9819_v13, 5 }
 0x60b   : > { %5331 = vmatmul.bf16.vlgmr.msrb.gmra.mxu0 %v4929_v40  ;;  %5394 = vmatpush.bf16.msra.mxu1 %v8392_v27 }
 0x60c   : > { %v4763_v34 = vpop.f32.mrf.mxu3 }
 0x60d   : > { %v4764_v45 = vadd.f32 %v4763_v34, %v4751_v4  ;;  %v4752_v46 = vpop.f32.mrf.mxu2 }
 0x60f   : > { %8661 = vtanh.f32 %v4764_v45  ;;  %v4776_v49 = vpop.f32.mrf.mxu0  ;;  %5395 = vmatpush.bf16.msra.mxu1 %v8391_v44 }
 0x610   : > { %v4841_v50 = vpop.f32.mrf.mxu1  ;;  %v4777_v52 = vadd.f32 %v4776_v49, %v3959_v47 }
 0x612   : > { %v4790_v55 = vadd.f32 %v4789_v29, %v4777_v52 }
 0x614   : > { %v4765_v39 = vpop.f32.mrf.mxu3 }
 0x615   : > { %v8662_v53 = vpop.eup %8661 }
 0x616   : > { %v4930_v57 = vpack.c.bf16 %v8662_v53, %v8662_v53 }
 0x617   : > { %v4802_v58 = vpop.f32.mrf.mxu2  ;;  %v4778_v61 = vpop.f32.mrf.mxu0 }
 0x618   : > { %v4803_v59 = vadd.f32 %v4802_v58, %v4790_v55  ;;  %v4843_v0 = vpop.f32.mrf.mxu1  ;;  %5344 = vmatmul.bf16.vlgmr.msrb.gmra.mxu1 %v4930_v57 }
 0x61a   : > { %8663 = vtanh.f32 %v4803_v59 }
 0x61c   : > { %v4815_v2 = vpop.f32.mrf.mxu3 }
 0x61d   : > { %v4816_v30 = vadd.f32 %v4815_v2, %v3960_v60 }
 0x61f   : > { %v4804_v62 = vpop.f32.mrf.mxu2 }
 0x620   : > { %v8664_v24 = vpop.eup %8663 }
 0x621   : > { %v4931_v56 = vpack.c.bf16 %v8664_v24, %v8664_v24  ;;  %v4828_v5 = vpop.f32.mrf.mxu0 }
 0x622   : > { %v4829_v6 = vadd.f32 %v4828_v5, %v4816_v30 }
 0x623   : > { %5357 = vmatmul.bf16.vlgmr.msrb.gmra.mxu2 %v4931_v56 }
 0x624   : > { %v4842_v8 = vadd.f32 %v4841_v50, %v4829_v6  ;;  %v4817_v9 = vpop.f32.mrf.mxu3 }
 0x626   : > { %8665 = vtanh.f32 %v4842_v8 }
 0x629   : > { %v4830_v12 = vpop.f32.mrf.mxu0 }
 0x62c   : > { %v8666_v16 = vpop.eup %8665 }
 0x62d   : > { %v4932_v17 = vpack.c.bf16 %v8666_v16, %v8666_v16 }
 0x62f   : > { %5370 = vmatmul.bf16.vlgmr.msrb.gmra.mxu3 %v4932_v17 }
 0x630   : > { %v4893_v20 = vpop.f32.mrf.mxu1 }
 0x631   : > { %v4894_v40 = vadd.f32 %v4893_v20, %v3962_v37 }
 0x635   : > { %v4854_v54 = vpop.f32.mrf.mxu2 }
 0x636   : > { %v4855_v26 = vadd.f32 %v4854_v54, %v3961_v22 }
 0x638   : > { %v4895_v23 = vpop.f32.mrf.mxu1 }
 0x63c   : > { %v4867_v25 = vpop.f32.mrf.mxu3 }
 0x63d   : > { %v4856_v28 = vpop.f32.mrf.mxu2  ;;  %v4868_v29 = vadd.f32 %v4867_v25, %v4855_v26 }
 0x641   : > { %v4880_v41 = vpop.f32.mrf.mxu0 }
 0x642   : > { %v4881_v31 = vadd.f32 %v4880_v41, %v4868_v29 }
 0x644   : > { %8667 = vtanh.f32 %v4881_v31  ;;  %v4869_v32 = vpop.f32.mrf.mxu3 }
 0x649   : > { %v4882_v35 = vpop.f32.mrf.mxu0 }
 0x64a   : > { %v8668_v36 = vpop.eup %8667 }
 0x64b   : > { %v4933_v33 = vpack.c.bf16 %v8668_v36, %v8668_v36 }
 0x64d   : > { %5383 = vmatmul.bf16.vlgmr.msra.gmra.mxu0 %v4933_v33 }
 0x655   : > { %v4906_v38 = vpop.f32.mrf.mxu2 }
 0x656   : > { %v4907_v42 = vadd.f32 %v4906_v38, %v4894_v40 }
 0x65c   : > { %v4919_v4 = vpop.f32.mrf.mxu3 }
 0x65d   : > { %v4920_v43 = vadd.f32 %v4919_v4, %v4907_v42  ;;  %v4908_v34 = vpop.f32.mrf.mxu2 }
 0x65f   : > { %8669 = vtanh.f32 %v4920_v43 }
 0x664   : > { %v4921_v45 = vpop.f32.mrf.mxu3 }
 0x665   : > { %v8670_v46 = vpop.eup %8669 }
 0x666   : > { %v4934_v47 = vpack.c.bf16 %v8670_v46, %v8670_v46 }
 0x668   : > { %5396 = vmatmul.bf16.vlgmr.msra.gmra.mxu1 %v4934_v47 }
 0x669   : > { %9212 = shalt.err (!%p9209_p9)
}
 0x66a   : > { %8465 = dma.vmem_to_hbm [thread:$0]  (%p9633_p4), %s5440_s23, 128, %s5442_s6, %s5422_s18  }
 0x66b   : > { %s9971_s7 = sld [smem:[#allocation61_spill]]  ;;  %s9973_s25 = sshll.u32 %s9664_s24, 3 }
 0x66c   : > { %s9972_s12 = sld [smem:[#allocation63_spill]]  ;;  %s963_s23 = scalar_lea.vmem [#allocation30], %s9973_s25 }
 0x66d   : > { %s5453_s6 = sshll.u32 %s963_s23, 4  ;;  %s5427_s8 = scalar_lea.sflag [#allocation31], %s9664_s24  ;;  %s5454_s6 = int_to_ptr.vmem [resolvable:$true] %s5453_s6 }
 0x671   : > { %v8622_v48 = vld [vmem:[%s9971_s7] ss:$0 sm:$0xff] }
 0x672   : > { %s5451_s22 = scalar_lea.hbm %s9972_s12, %s7867_s2  ;;  %s9233_s20 = scalar_lea.hbm %s9972_s12, 16 }
 0x673   : > { %s5455_s18 = sshll.u32 %s5451_s22, 4  ;;  %s5456_s18 = int_to_ptr.hbm [resolvable:$true] %s5455_s18 }
 0x674   : > { %s9227_s2 = sshra.s32 %s5456_s18, 4  ;;  %s9228_s2 = int_to_ptr.hbm [resolvable:$true] %s9227_s2 }
 0x675   : > { %s9229_s0 = scalar_lea.hbm %s9228_s2, 8  ;;  %p9234_p0 = scmp.lt.s32.totalorder %s9228_s2, %s9972_s12 }
 0x676   : > { %p9230_p10 = scmp.ne.s32.totalorder %s9228_s2, %s9229_s0  ;;  %p9235_p2 = scmp.lt.s32.totalorder %s9233_s20, %s9229_s0 }
 0x678   : > { %p9231_p13 = pnand %p9230_p10, %p9633_p4  ;;  %p9236_p1 = por %p9235_p2, %p9234_p0 }
 0x67a   : > { %p9232_p11 = pneg %p9231_p13 }
 0x67c   : > { %p9237_p3 = pnand %p9236_p1, %p9232_p11 }
 0x688   : > { %v5332_v13 = vpop.f32.mrf.mxu0 }
 0x689   : > { %v5333_v50 = vadd.f32 %v8622_v48, %v5332_v13 }
 0x690   : > { %v5334_v49 = vpop.f32.mrf.mxu0 }
 0x695   : > { %v5345_v51 = vpop.f32.mrf.mxu1 }
 0x696   : > { %v5346_v52 = vadd.f32 %v5345_v51, %v5333_v50 }
 0x69d   : > { %v5347_v39 = vpop.f32.mrf.mxu1 }
 0x6a6   : > { %v5358_v53 = vpop.f32.mrf.mxu2 }
 0x6a7   : > { %v5359_v61 = vadd.f32 %v5358_v53, %v5346_v52 }
 0x6ae   : > { %v5360_v55 = vpop.f32.mrf.mxu2 }
 0x6b2   : > { %v5371_v18 = vpop.f32.mrf.mxu3 }
 0x6b3   : > { %v5372_v0 = vadd.f32 %v5371_v18, %v5359_v61 }
 0x6ba   : > { %v5373_v57 = vpop.f32.mrf.mxu3 }
 0x6ca   : > { %v5384_v58 = vpop.f32.mrf.mxu0 }
 0x6cb   : > { %v5385_v1 = vadd.f32 %v5384_v58, %v5372_v0 }
 0x6d2   : > { %v5386_v59 = vpop.f32.mrf.mxu0 }
 0x6e5   : > { %v5397_v60 = vpop.f32.mrf.mxu1 }
 0x6e6   : > { %v5398_v2 = vadd.f32 %v5397_v60, %v5385_v1 }
 0x6e8   : > { %v7864_v3 = vmul.f32 -1.442695, %v5398_v2 }
 0x6ea   : > { %8671 = vpow2.f32 %v7864_v3 }
 0x6ed   : > { %v5399_v62 = vpop.f32.mrf.mxu1 }
 0x6f0   : > { %v8672_v24 = vpop.eup %8671 }
 0x6f1   : > { %v5404_v30 = vadd.f32 1.0, %v8672_v24 }
 0x6f3   : > { %8673 = vrcp.f32 %v5404_v30  ;;  %v5416_v7 = vand.u32 2147483648, %v5404_v30  ;;  %v5414_v8 = vand.u32 2147483647, %v5404_v30  ;;  %vm5410_vm1 = vweird.f32 %v5404_v30 }
 0x6f5   : > { %v5417_v10 = vor.u32 1.1754944e-38, %v5416_v7  ;;  %vm5415_vm3 = vcmp.eq.f32.partialorder %v5414_v8, 8.507059e+37 }
 0x6f9   : > { %v8674_v56 = vpop.eup %8673 }
 0x6fa   : > { %v5406_v5 = vmul.f32 %v8674_v56, %v5404_v30  ;;  %vm5411_vm0 = vweird.f32 %v8674_v56 }
 0x6fb   : > { %vm5412_vm2 = vmor %vm5410_vm1, %vm5411_vm0 }
 0x6fc   : > { %v5407_v6 = vsub.f32 1.0, %v5406_v5 }
 0x6fe   : > { %v5408_v63 = vmul.f32 %v8674_v56, %v5407_v6 }
 0x700   : > { %v5409_v9 = vadd.f32 %v8674_v56, %v5408_v63 }
 0x702   : > { %v5413_v11 = vsel %vm5412_vm2, %v8674_v56, %v5409_v9 }
 0x703   : > { %v5418_v12 = vsel %vm5415_vm3, %v5417_v10, %v5413_v11 }
 0x704   : > { %5420 = vst [vmem:[%s963_s23] sm:$0xff] %v5418_v12 }
 0x705   : > { %9240 = shalt.err (!%p9237_p3)
}
 0x706   : > { %8466 = dma.vmem_to_hbm [thread:$0]  (%p9633_p4), %s5454_s6, 128, %s5456_s18, %s5427_s8  }
 0x707 PF: > { %s9974_s24 = sld [smem:[#allocation43_spill]]  ;;  %p9975_p5 = scmp.ge.s32.totalorder %s9315_s30, 2 }
 0x709   : > { %p8523_p12 = pnand %p9975_p5, %p9637_p6 }
 0x70b   : > { %p8524_p7 = pneg %p8523_p12 }
 0x70d   : > { %s5467_s10 = sand.u32 1, %s9974_s24  }
 0x70e   : > { %s5468_s11 = scalar_lea.sflag [#allocation4], %s5467_s10 }
 0x70f   : > { %9294 = dma.done.wait (%p8524_p7), %s5468_s11, 128  }
 0x710   : > { %9296 = vsyncadd (%p8524_p7), %s5468_s11, 4294967168  ;;  %s5478_s22 = scalar_lea.sflag [#allocation31], %s5467_s10 }
 0x711   : > { %9298 = dma.done.wait (%p8524_p7), %s5478_s22, 128  }
 0x712   : > { %9300 = vsyncadd (%p8524_p7), %s5478_s22, 4294967168  ;;  %p47_p4 = scmp.ge.s32.totalorder %s9607_s26, 4   ;;  %s9976_s3 = smov %s9307_s28 }
 0x713   : > { %s9977_s28 = smov %s9311_s29  ;;  %s9978_s29 = smov %s9618_s1 }
 0x714   : > { %s9979_s30 = smov %s9607_s26  ;;  %49 = sbr.rel (!%p47_p4) target bundleno = 34 (0x22), region = 230 }
 0x719   :  { %5484 = vsyncpa [#allocation3], 1 }
 0x71a   :  { %5486 = vsyncpa [#allocation3 + $0x1], 1 }
 0x71b   :  { %5487 = vsyncpa [#allocation6], 1 }
 0x71c   :  { %5488 = vsyncpa [#allocation9], 1 }
 0x71d   :  { %5489 = vsyncpa [#allocation12], 1 }
 0x71e   :  { %5490 = vsyncpa [#allocation15], 1 }
 0x71f   :  { %5491 = vsyncpa [#allocation18], 1 }
 0x720   :  { %5492 = vsyncpa [#allocation21], 1 }
 0x721   :  { %5493 = vsyncpa [#allocation24], 1 }
 0x722   :  { %5494 = vsyncpa [#allocation27], 1 }
 0x723   :  { %5495 = vsyncpa [#allocation4], 1 }
 0x724   :  { %5497 = vsyncpa [#allocation4 + $0x1], 1 }
 0x725   :  { %5498 = vsyncpa [#allocation31], 1 }
 0x726   :  { %5500 = vsyncpa [#allocation31 + $0x1], 1 }

</bundles_post_ra>
